<compile_context>
chip_gen: v7x
topology: tpu7x:2x2x1
jax: 0.10.0
libtpu: 0.0.40
codegen_flags: <defaults>
</compile_context>

<pallas_src>
import functools

import jax
import jax.numpy as jnp
from jax.experimental import pallas as pl
from jax.experimental.pallas import tpu as pltpu


def _round_up(x, m):
    return (x + m - 1) // m * m


def _cdiv(a, b):
    return -(-a // b)


# ----------------------------------------------------------------------------
# Conv front-end: im2col (glue, plain JAX, bf16) + fused matmul/bias/ReLU/BN
# kernel gridded over the im2col row dimension.
# ----------------------------------------------------------------------------
def _im2col(x_nhwc, k=3, stride=2, pad=1):
    x = jnp.pad(x_nhwc, ((0, 0), (pad, pad), (pad, pad), (0, 0)))
    n, hp, wp, c = x.shape
    ho = (hp - k) // stride + 1
    wo = (wp - k) // stride + 1
    cols = []
    for di in range(k):
        for dj in range(k):
            cols.append(x[:, di:di + stride * ho:stride, dj:dj + stride * wo:stride, :])
    # patch element order = (di, dj, channel), matching the weight reshape below
    return jnp.concatenate(cols, axis=-1), ho, wo  # (N, Ho, Wo, k*k*C)


def _conv_bn_relu_kernel(p_ref, w_ref, b_ref, scale_ref, shift_ref, o_ref):
    # bf16 operands on the MXU, f32 accumulation + epilogue (kept f32 per review).
    y = jnp.dot(p_ref[...], w_ref[...], preferred_element_type=jnp.float32)
    y = jnp.maximum(y + b_ref[...], 0.0)            # torch order: conv -> ReLU -> BN
    o_ref[...] = (y * scale_ref[...] + shift_ref[...]).astype(o_ref.dtype)


def conv_bn_relu(x_nhwc, w_oihw, bias, gamma, beta, rmean, rvar,
                 eps=1e-5, tile_m=1024):
    # TODO(synk): im2col is still materialized at the JAX level and the four
    # conv layers are separate pallas_calls; fusing im2col + the conv stack
    # (inter-layer activations resident in VMEM) would remove the remaining
    # ~4-9x HBM traffic of this (memory-bound) stage.
    patches, ho, wo = _im2col(x_nhwc.astype(jnp.bfloat16))
    n = x_nhwc.shape[0]
    k = patches.shape[-1]
    cout = w_oihw.shape[0]
    m = n * ho * wo
    pm = patches.reshape(m, k)

    # Row tile: <= tile_m, multiple of 8, and capped at ceil(m/2) so the grid
    # has >= 2 steps whenever m allows (v7x: both TensorCores busy).
    if m > 8:
        tm = min(tile_m, _round_up(_cdiv(m, 2), 8))
    else:
        tm = 8
    m_pad = _round_up(m, tm)
    if m_pad != m:
        pm = jnp.pad(pm, ((0, m_pad - m), (0, 0)))

    wm = jnp.transpose(w_oihw, (2, 3, 1, 0)).reshape(k, cout).astype(jnp.bfloat16)
    scale = (gamma / jnp.sqrt(rvar + eps)).astype(jnp.float32)
    shift = (beta - rmean * scale).astype(jnp.float32)

    out = pl.pallas_call(
        _conv_bn_relu_kernel,
        out_shape=jax.ShapeDtypeStruct((m_pad, cout), jnp.bfloat16),
        grid=(m_pad // tm,),
        in_specs=[
            pl.BlockSpec((tm, k), lambda i: (i, 0)),
            pl.BlockSpec((k, cout), lambda i: (0, 0)),
            pl.BlockSpec((1, cout), lambda i: (0, 0)),
            pl.BlockSpec((1, cout), lambda i: (0, 0)),
            pl.BlockSpec((1, cout), lambda i: (0, 0)),
        ],
        out_specs=pl.BlockSpec((tm, cout), lambda i: (i, 0)),
        compiler_params=pltpu.CompilerParams(dimension_semantics=("parallel",)),
    )(pm, wm,
      bias.reshape(1, cout).astype(jnp.float32),
      scale.reshape(1, cout),
      shift.reshape(1, cout))
    return out[:m].reshape(n, ho, wo, cout)


# ----------------------------------------------------------------------------
# Relational head: split first g-layer (no feats concat), g_pre MLP (3x
# Linear+ReLU), masked XLU reduction over the 32-padded component axis,
# f_fc1, fcout.fc2, fcout.fc3, log_softmax — fused, TB batch items per step.
# ----------------------------------------------------------------------------
def _relation_kernel(x_ref, qst_ref, coord_ref, mask_ref,
                     w1a, w1q, b1, w2, b2, w3, b3,
                     wf, bfc, wo2, bo2, wo3, bo3,
                     o_ref):
    tb = qst_ref.shape[0]
    ncp = coord_ref.shape[0]          # padded component count (32)
    hid = coord_ref.shape[1]          # 256

    # First g-layer, split so the (.., 37) feats concat never exists:
    #   h1 = x @ W1[:24] + coords @ W1[24:26] + qst @ W1[26:] + b1
    h = jnp.dot(x_ref[...], w1a[...], preferred_element_type=jnp.float32)       # (tb*ncp, hid)
    qproj = jnp.dot(qst_ref[...], w1q[...], preferred_element_type=jnp.float32)  # (tb, hid)
    h = h.reshape(tb, ncp, hid) + coord_ref[...] + qproj[:, None, :] + b1[...]
    h = jnp.maximum(h, 0.0).reshape(tb * ncp, hid).astype(jnp.bfloat16)

    h = jnp.dot(h, w2[...], preferred_element_type=jnp.float32) + b2[...]
    h = jnp.maximum(h, 0.0).astype(jnp.bfloat16)
    h = jnp.dot(h, w3[...], preferred_element_type=jnp.float32) + b3[...]
    h = jnp.maximum(h, 0.0)                                                      # f32 (tb*ncp, hid)

    # Per-item sum over the 25 real components: ncp=32 is a sublane multiple so
    # the reshape is a layout no-op; the reduction runs on the XLU.  Padded
    # component rows (ReLU(b) != 0 through the g-MLP) are masked to zero.
    xg = jnp.sum(h.reshape(tb, ncp, hid) * mask_ref[...], axis=1)                # (tb, hid) f32

    xf = jnp.dot(xg.astype(jnp.bfloat16), wf[...],
                 preferred_element_type=jnp.float32) + bfc[...]
    xf = jnp.maximum(xf, 0.0).astype(jnp.bfloat16)
    xf = jnp.dot(xf, wo2[...], preferred_element_type=jnp.float32) + bo2[...]
    xf = jnp.maximum(xf, 0.0).astype(jnp.bfloat16)
    # TODO(synk): F.dropout(p=0.5) skipped — deterministic eval-mode kernel.
    logits = jnp.dot(xf, wo3[...], preferred_element_type=jnp.float32) + bo3[...]  # (tb, 128)
    # Padded classes carry bias -1e30 -> exp()==0 in f32, so the real-class
    # log_softmax is unaffected; padded columns are sliced off in the wrapper.
    mx = jnp.max(logits, axis=-1, keepdims=True)
    lse = mx + jnp.log(jnp.sum(jnp.exp(logits - mx), axis=-1, keepdims=True))
    o_ref[...] = logits - lse                                                    # log_softmax


def relation_head(x_comp, qst, params, num_out):
    """x_comp: (mb, ncomp, nc) bf16 conv features, comp index = h*W + w, channels last."""
    mb, ncomp, nc = x_comp.shape
    hid = params["g2_w"].shape[0]                  # 256
    ncp = _round_up(ncomp, 8)                      # 25 -> 32 (sublane aligned)

    # Batch tile: big (MXU fill, fewer grid steps) but <= ceil(mb/2) rounded to
    # 8 so the grid has >= 2 steps whenever mb allows (v7x megacore).
    tb = max(8, min(128, _round_up(_cdiv(mb, 2), 8)))
    mb_pad = _round_up(mb, tb)

    x_comp = jnp.pad(x_comp.astype(jnp.bfloat16),
                     ((0, mb_pad - mb), (0, ncp - ncomp), (0, 0)))
    x2d = x_comp.reshape(mb_pad * ncp, nc)
    qst_p = jnp.pad(qst.astype(jnp.bfloat16), ((0, mb_pad - mb), (0, 0)))

    # Constant per-component coord contribution: cvt_coord (Python-3 true
    # division i/5, as in the reference) projected through g1_w's coord rows.
    coords = jnp.array([[(i / 5 - 2) / 2.0, (i % 5 - 2) / 2.0] for i in range(ncomp)],
                       dtype=jnp.float32)
    coord_tab = coords @ params["g1_w"][nc:nc + 2].astype(jnp.float32)   # (25, 256)
    coord_tab = jnp.pad(coord_tab, ((0, ncp - ncomp), (0, 0)))           # (32, 256) f32
    comp_mask = (jnp.arange(ncp)[:, None] < ncomp).astype(jnp.float32) \
        * jnp.ones((1, hid), jnp.float32)                                # (32, 256) f32

    def bf16(a):
        return a.astype(jnp.bfloat16)

    def b2d(b):
        return b.reshape(1, -1).astype(jnp.float32)

    nout_pad = _round_up(num_out, 128)             # lane-dense output block
    wo3_pad = jnp.zeros((params["fc3_w"].shape[0], nout_pad), jnp.bfloat16)
    wo3_pad = wo3_pad.at[:, :num_out].set(bf16(params["fc3_w"]))
    bo3_pad = jnp.full((1, nout_pad), -1e30, jnp.float32)
    bo3_pad = bo3_pad.at[0, :num_out].set(params["fc3_b"].astype(jnp.float32))

    weights = [
        bf16(params["g1_w"][:nc]),                 # W1a  (24, 256)
        bf16(params["g1_w"][nc + 2:]),             # W1q  (11, 256)
        b2d(params["g1_b"]),
        bf16(params["g2_w"]), b2d(params["g2_b"]),
        bf16(params["g3_w"]), b2d(params["g3_b"]),
        bf16(params["f1_w"]), b2d(params["f1_b"]),
        bf16(params["fc2_w"]), b2d(params["fc2_b"]),
        wo3_pad, bo3_pad,
    ]

    def full2d(a):
        return pl.BlockSpec(a.shape, lambda b: (0, 0))

    in_specs = [pl.BlockSpec((tb * ncp, nc), lambda b: (b, 0)),
                pl.BlockSpec((tb, qst_p.shape[1]), lambda b: (b, 0)),
                full2d(coord_tab), full2d(comp_mask)]
    in_specs += [full2d(w) for w in weights]

    out = pl.pallas_call(
        _relation_kernel,
        out_shape=jax.ShapeDtypeStruct((mb_pad, nout_pad), jnp.float32),
        grid=(mb_pad // tb,),
        in_specs=in_specs,
        out_specs=pl.BlockSpec((tb, nout_pad), lambda b: (b, 0)),
        compiler_params=pltpu.CompilerParams(
            dimension_semantics=("parallel",),
            vmem_limit_bytes=48 * 1024 * 1024),
    )(x2d, qst_p, coord_tab, comp_mask, *weights)
    return out[:mb, :num_out]


# ----------------------------------------------------------------------------
# Full Pool forward.
# ----------------------------------------------------------------------------
def pool_forward(params, img_nchw, qst):
    x = jnp.transpose(img_nchw, (0, 2, 3, 1)).astype(jnp.bfloat16)   # NCHW -> NHWC
    for c in params["conv"]:
        x = conv_bn_relu(x, c["w"], c["b"], c["gamma"], c["beta"], c["mean"], c["var"])
    mb, h, w, nc = x.shape
    ncomp = h * w                                                    # 25 (5x5)
    # component index = h*W + w, channels last == torch .view(...).permute(0,2,1)
    x_comp = x.reshape(mb, ncomp, nc)
    num_out = params["fc3_w"].shape[1]
    return relation_head(x_comp, qst, params, num_out)


# ----------------------------------------------------------------------------
# Deterministic parameter init (shapes from the module's __init__).
# ----------------------------------------------------------------------------
def init_params(key, num_outputs=10):
    def lin(k, fi, fo):
        kw, kb = jax.random.split(k)
        w = jax.random.normal(kw, (fi, fo), jnp.float32) / jnp.sqrt(fi)
        b = 0.01 * jax.random.normal(kb, (fo,), jnp.float32)
        return w, b

    keys = jax.random.split(key, 12)
    convs = []
    cin = 3
    for i in range(4):
        kw, kb, kg, kbe = jax.random.split(keys[i], 4)
        convs.append(dict(
            w=jax.random.normal(kw, (24, cin, 3, 3), jnp.float32) / jnp.sqrt(cin * 9),
            b=0.01 * jax.random.normal(kb, (24,), jnp.float32),
            gamma=1.0 + 0.1 * jax.random.normal(kg, (24,), jnp.float32),
            beta=0.1 * jax.random.normal(kbe, (24,), jnp.float32),
            mean=jnp.zeros((24,), jnp.float32),
            var=jnp.ones((24,), jnp.float32),
        ))
        cin = 24

    p = dict(conv=convs)
    p["g1_w"], p["g1_b"] = lin(keys[4], 24 + 2 + 11, 256)
    p["g2_w"], p["g2_b"] = lin(keys[5], 256, 256)
    p["g3_w"], p["g3_b"] = lin(keys[6], 256, 256)
    p["f1_w"], p["f1_b"] = lin(keys[7], 256, 256)
    p["fc2_w"], p["fc2_b"] = lin(keys[8], 256, 256)
    p["fc3_w"], p["fc3_b"] = lin(keys[9], 256, num_outputs)
    return p


if __name__ == "__main__":
    key = jax.random.PRNGKey(0)
    k_img, k_qst, k_par = jax.random.split(key, 3)

    mb = 2
    img = jax.random.normal(k_img, (mb, 3, 75, 75), jnp.float32)   # NCHW, 75x75 -> 5x5
    qst = jax.random.normal(k_qst, (mb, 11), jnp.float32)
    params = init_params(k_par, num_outputs=10)

    fwd = jax.jit(functools.partial(pool_forward, params))
    out = fwd(img, qst)
    jax.block_until_ready(out)
    assert out.shape == (mb, 10)
    print("KERNEL_OK")
</pallas_src>

<mosaic_0001>
module attributes {stable_mosaic.version = 11 : i64} {
  func.func @_conv_bn_relu_kernel(%arg0: i32, %arg1: memref<1024x27xbf16, #tpu.memory_space<vmem>>, %arg2: memref<27x24xbf16, #tpu.memory_space<vmem>>, %arg3: memref<1x24xf32, #tpu.memory_space<vmem>>, %arg4: memref<1x24xf32, #tpu.memory_space<vmem>>, %arg5: memref<1x24xf32, #tpu.memory_space<vmem>>, %arg6: memref<1024x24xbf16, #tpu.memory_space<vmem>>) attributes {dimension_semantics = [#tpu.dimension_semantics<parallel>], iteration_bounds = array<i64: 3>, scalar_prefetch = 0 : i64, scratch_operands = 0 : i64, tpu.core_type = #tpu.core_type<tc>, window_params = [{transform_indices = @transform_0, window_bounds = array<i64: 1024, 27>}, {pipeline_mode = #tpu.pipeline_mode<synchronous>, transform_indices = @transform_1, window_bounds = array<i64: 27, 24>}, {pipeline_mode = #tpu.pipeline_mode<synchronous>, transform_indices = @transform_2, window_bounds = array<i64: 1, 24>}, {pipeline_mode = #tpu.pipeline_mode<synchronous>, transform_indices = @transform_3, window_bounds = array<i64: 1, 24>}, {pipeline_mode = #tpu.pipeline_mode<synchronous>, transform_indices = @transform_4, window_bounds = array<i64: 1, 24>}, {transform_indices = @transform_5, window_bounds = array<i64: 1024, 24>}]} {
    %c0 = arith.constant 0 : index
    %c0_0 = arith.constant 0 : index
    %0 = vector.load %arg1[%c0, %c0_0] : memref<1024x27xbf16, #tpu.memory_space<vmem>>, vector<1024x27xbf16>
    %c0_1 = arith.constant 0 : index
    %c0_2 = arith.constant 0 : index
    %1 = vector.load %arg2[%c0_1, %c0_2] : memref<27x24xbf16, #tpu.memory_space<vmem>>, vector<27x24xbf16>
    %cst = arith.constant dense<0.000000e+00> : vector<1024x24xf32>
    %2 = tpu.matmul %0, %1, %cst {dimension_numbers = #tpu.dot_dimension_numbers<[1], [0], [0], [1], [0, 0, 1, 1], [], []>} : vector<1024x27xbf16>, vector<27x24xbf16>, vector<1024x24xf32> -> vector<1024x24xf32>
    %c0_3 = arith.constant 0 : index
    %c0_4 = arith.constant 0 : index
    %3 = vector.load %arg3[%c0_3, %c0_4] : memref<1x24xf32, #tpu.memory_space<vmem>>, vector<1x24xf32>
    %4 = vector.broadcast %3 : vector<1x24xf32> to vector<1024x24xf32>
    %5 = arith.addf %2, %4 : vector<1024x24xf32>
    %cst_5 = arith.constant 0.000000e+00 : f32
    %6 = vector.broadcast %cst_5 : f32 to vector<1024x24xf32>
    %7 = arith.maximumf %5, %6 : vector<1024x24xf32>
    %c0_6 = arith.constant 0 : index
    %c0_7 = arith.constant 0 : index
    %8 = vector.load %arg4[%c0_6, %c0_7] : memref<1x24xf32, #tpu.memory_space<vmem>>, vector<1x24xf32>
    %9 = vector.broadcast %8 : vector<1x24xf32> to vector<1024x24xf32>
    %10 = arith.mulf %7, %9 : vector<1024x24xf32>
    %c0_8 = arith.constant 0 : index
    %c0_9 = arith.constant 0 : index
    %11 = vector.load %arg5[%c0_8, %c0_9] : memref<1x24xf32, #tpu.memory_space<vmem>>, vector<1x24xf32>
    %12 = vector.broadcast %11 : vector<1x24xf32> to vector<1024x24xf32>
    %13 = arith.addf %10, %12 : vector<1024x24xf32>
    %14 = arith.truncf %13 : vector<1024x24xf32> to vector<1024x24xbf16>
    %c0_10 = arith.constant 0 : index
    %c0_11 = arith.constant 0 : index
    %15 = vector.load %arg6[%c0_10, %c0_11] : memref<1024x24xbf16, #tpu.memory_space<vmem>>, vector<1024x24xbf16>
    tpu.vector_store %arg6[%c0_10, %c0_11], %14 {strides = array<i32>} : memref<1024x24xbf16, #tpu.memory_space<vmem>>, vector<1024x24xbf16>,
    return
  }
  func.func @transform_0(%arg0: i32) -> (i32, i32) {
    %c0_i32 = arith.constant 0 : i32
    %c0_i32_0 = arith.constant 0 : i32
    return %arg0, %c0_i32 : i32, i32
  }
  func.func @transform_1(%arg0: i32) -> (i32, i32) {
    %c0_i32 = arith.constant 0 : i32
    %c0_i32_0 = arith.constant 0 : i32
    %c0_i32_1 = arith.constant 0 : i32
    return %c0_i32, %c0_i32_0 : i32, i32
  }
  func.func @transform_2(%arg0: i32) -> (i32, i32) {
    %c0_i32 = arith.constant 0 : i32
    %c0_i32_0 = arith.constant 0 : i32
    %c0_i32_1 = arith.constant 0 : i32
    return %c0_i32, %c0_i32_0 : i32, i32
  }
  func.func @transform_3(%arg0: i32) -> (i32, i32) {
    %c0_i32 = arith.constant 0 : i32
    %c0_i32_0 = arith.constant 0 : i32
    %c0_i32_1 = arith.constant 0 : i32
    return %c0_i32, %c0_i32_0 : i32, i32
  }
  func.func @transform_4(%arg0: i32) -> (i32, i32) {
    %c0_i32 = arith.constant 0 : i32
    %c0_i32_0 = arith.constant 0 : i32
    %c0_i32_1 = arith.constant 0 : i32
    return %c0_i32, %c0_i32_0 : i32, i32
  }
  func.func @transform_5(%arg0: i32) -> (i32, i32) {
    %c0_i32 = arith.constant 0 : i32
    %c0_i32_0 = arith.constant 0 : i32
    return %arg0, %c0_i32 : i32, i32
  }
}

module attributes {stable_mosaic.version = 11 : i64} {
  func.func @_conv_bn_relu_kernel(%arg0: i32, %arg1: memref<368x216xbf16, #tpu.memory_space<vmem>>, %arg2: memref<216x24xbf16, #tpu.memory_space<vmem>>, %arg3: memref<1x24xf32, #tpu.memory_space<vmem>>, %arg4: memref<1x24xf32, #tpu.memory_space<vmem>>, %arg5: memref<1x24xf32, #tpu.memory_space<vmem>>, %arg6: memref<368x24xbf16, #tpu.memory_space<vmem>>) attributes {dimension_semantics = [#tpu.dimension_semantics<parallel>], iteration_bounds = array<i64: 2>, scalar_prefetch = 0 : i64, scratch_operands = 0 : i64, tpu.core_type = #tpu.core_type<tc>, window_params = [{transform_indices = @transform_0, window_bounds = array<i64: 368, 216>}, {pipeline_mode = #tpu.pipeline_mode<synchronous>, transform_indices = @transform_1, window_bounds = array<i64: 216, 24>}, {pipeline_mode = #tpu.pipeline_mode<synchronous>, transform_indices = @transform_2, window_bounds = array<i64: 1, 24>}, {pipeline_mode = #tpu.pipeline_mode<synchronous>, transform_indices = @transform_3, window_bounds = array<i64: 1, 24>}, {pipeline_mode = #tpu.pipeline_mode<synchronous>, transform_indices = @transform_4, window_bounds = array<i64: 1, 24>}, {transform_indices = @transform_5, window_bounds = array<i64: 368, 24>}]} {
    %c0 = arith.constant 0 : index
    %c0_0 = arith.constant 0 : index
    %0 = vector.load %arg1[%c0, %c0_0] : memref<368x216xbf16, #tpu.memory_space<vmem>>, vector<368x216xbf16>
    %c0_1 = arith.constant 0 : index
    %c0_2 = arith.constant 0 : index
    %1 = vector.load %arg2[%c0_1, %c0_2] : memref<216x24xbf16, #tpu.memory_space<vmem>>, vector<216x24xbf16>
    %cst = arith.constant dense<0.000000e+00> : vector<368x24xf32>
    %2 = tpu.matmul %0, %1, %cst {dimension_numbers = #tpu.dot_dimension_numbers<[1], [0], [0], [1], [0, 0, 1, 1], [], []>} : vector<368x216xbf16>, vector<216x24xbf16>, vector<368x24xf32> -> vector<368x24xf32>
    %c0_3 = arith.constant 0 : index
    %c0_4 = arith.constant 0 : index
    %3 = vector.load %arg3[%c0_3, %c0_4] : memref<1x24xf32, #tpu.memory_space<vmem>>, vector<1x24xf32>
    %4 = vector.broadcast %3 : vector<1x24xf32> to vector<368x24xf32>
    %5 = arith.addf %2, %4 : vector<368x24xf32>
    %cst_5 = arith.constant 0.000000e+00 : f32
    %6 = vector.broadcast %cst_5 : f32 to vector<368x24xf32>
    %7 = arith.maximumf %5, %6 : vector<368x24xf32>
    %c0_6 = arith.constant 0 : index
    %c0_7 = arith.constant 0 : index
    %8 = vector.load %arg4[%c0_6, %c0_7] : memref<1x24xf32, #tpu.memory_space<vmem>>, vector<1x24xf32>
    %9 = vector.broadcast %8 : vector<1x24xf32> to vector<368x24xf32>
    %10 = arith.mulf %7, %9 : vector<368x24xf32>
    %c0_8 = arith.constant 0 : index
    %c0_9 = arith.constant 0 : index
    %11 = vector.load %arg5[%c0_8, %c0_9] : memref<1x24xf32, #tpu.memory_space<vmem>>, vector<1x24xf32>
    %12 = vector.broadcast %11 : vector<1x24xf32> to vector<368x24xf32>
    %13 = arith.addf %10, %12 : vector<368x24xf32>
    %14 = arith.truncf %13 : vector<368x24xf32> to vector<368x24xbf16>
    %c0_10 = arith.constant 0 : index
    %c0_11 = arith.constant 0 : index
    %15 = vector.load %arg6[%c0_10, %c0_11] : memref<368x24xbf16, #tpu.memory_space<vmem>>, vector<368x24xbf16>
    tpu.vector_store %arg6[%c0_10, %c0_11], %14 {strides = array<i32>} : memref<368x24xbf16, #tpu.memory_space<vmem>>, vector<368x24xbf16>,
    return
  }
  func.func @transform_0(%arg0: i32) -> (i32, i32) {
    %c0_i32 = arith.constant 0 : i32
    %c0_i32_0 = arith.constant 0 : i32
    return %arg0, %c0_i32 : i32, i32
  }
  func.func @transform_1(%arg0: i32) -> (i32, i32) {
    %c0_i32 = arith.constant 0 : i32
    %c0_i32_0 = arith.constant 0 : i32
    %c0_i32_1 = arith.constant 0 : i32
    return %c0_i32, %c0_i32_0 : i32, i32
  }
  func.func @transform_2(%arg0: i32) -> (i32, i32) {
    %c0_i32 = arith.constant 0 : i32
    %c0_i32_0 = arith.constant 0 : i32
    %c0_i32_1 = arith.constant 0 : i32
    return %c0_i32, %c0_i32_0 : i32, i32
  }
  func.func @transform_3(%arg0: i32) -> (i32, i32) {
    %c0_i32 = arith.constant 0 : i32
    %c0_i32_0 = arith.constant 0 : i32
    %c0_i32_1 = arith.constant 0 : i32
    return %c0_i32, %c0_i32_0 : i32, i32
  }
  func.func @transform_4(%arg0: i32) -> (i32, i32) {
    %c0_i32 = arith.constant 0 : i32
    %c0_i32_0 = arith.constant 0 : i32
    %c0_i32_1 = arith.constant 0 : i32
    return %c0_i32, %c0_i32_0 : i32, i32
  }
  func.func @transform_5(%arg0: i32) -> (i32, i32) {
    %c0_i32 = arith.constant 0 : i32
    %c0_i32_0 = arith.constant 0 : i32
    return %arg0, %c0_i32 : i32, i32
  }
}

module attributes {stable_mosaic.version = 11 : i64} {
  func.func @_conv_bn_relu_kernel(%arg0: i32, %arg1: memref<104x216xbf16, #tpu.memory_space<vmem>>, %arg2: memref<216x24xbf16, #tpu.memory_space<vmem>>, %arg3: memref<1x24xf32, #tpu.memory_space<vmem>>, %arg4: memref<1x24xf32, #tpu.memory_space<vmem>>, %arg5: memref<1x24xf32, #tpu.memory_space<vmem>>, %arg6: memref<104x24xbf16, #tpu.memory_space<vmem>>) attributes {dimension_semantics = [#tpu.dimension_semantics<parallel>], iteration_bounds = array<i64: 2>, scalar_prefetch = 0 : i64, scratch_operands = 0 : i64, tpu.core_type = #tpu.core_type<tc>, window_params = [{transform_indices = @transform_0, window_bounds = array<i64: 104, 216>}, {pipeline_mode = #tpu.pipeline_mode<synchronous>, transform_indices = @transform_1, window_bounds = array<i64: 216, 24>}, {pipeline_mode = #tpu.pipeline_mode<synchronous>, transform_indices = @transform_2, window_bounds = array<i64: 1, 24>}, {pipeline_mode = #tpu.pipeline_mode<synchronous>, transform_indices = @transform_3, window_bounds = array<i64: 1, 24>}, {pipeline_mode = #tpu.pipeline_mode<synchronous>, transform_indices = @transform_4, window_bounds = array<i64: 1, 24>}, {transform_indices = @transform_5, window_bounds = array<i64: 104, 24>}]} {
    %c0 = arith.constant 0 : index
    %c0_0 = arith.constant 0 : index
    %0 = vector.load %arg1[%c0, %c0_0] : memref<104x216xbf16, #tpu.memory_space<vmem>>, vector<104x216xbf16>
    %c0_1 = arith.constant 0 : index
    %c0_2 = arith.constant 0 : index
    %1 = vector.load %arg2[%c0_1, %c0_2] : memref<216x24xbf16, #tpu.memory_space<vmem>>, vector<216x24xbf16>
    %cst = arith.constant dense<0.000000e+00> : vector<104x24xf32>
    %2 = tpu.matmul %0, %1, %cst {dimension_numbers = #tpu.dot_dimension_numbers<[1], [0], [0], [1], [0, 0, 1, 1], [], []>} : vector<104x216xbf16>, vector<216x24xbf16>, vector<104x24xf32> -> vector<104x24xf32>
    %c0_3 = arith.constant 0 : index
    %c0_4 = arith.constant 0 : index
    %3 = vector.load %arg3[%c0_3, %c0_4] : memref<1x24xf32, #tpu.memory_space<vmem>>, vector<1x24xf32>
    %4 = vector.broadcast %3 : vector<1x24xf32> to vector<104x24xf32>
    %5 = arith.addf %2, %4 : vector<104x24xf32>
    %cst_5 = arith.constant 0.000000e+00 : f32
    %6 = vector.broadcast %cst_5 : f32 to vector<104x24xf32>
    %7 = arith.maximumf %5, %6 : vector<104x24xf32>
    %c0_6 = arith.constant 0 : index
    %c0_7 = arith.constant 0 : index
    %8 = vector.load %arg4[%c0_6, %c0_7] : memref<1x24xf32, #tpu.memory_space<vmem>>, vector<1x24xf32>
    %9 = vector.broadcast %8 : vector<1x24xf32> to vector<104x24xf32>
    %10 = arith.mulf %7, %9 : vector<104x24xf32>
    %c0_8 = arith.constant 0 : index
    %c0_9 = arith.constant 0 : index
    %11 = vector.load %arg5[%c0_8, %c0_9] : memref<1x24xf32, #tpu.memory_space<vmem>>, vector<1x24xf32>
    %12 = vector.broadcast %11 : vector<1x24xf32> to vector<104x24xf32>
    %13 = arith.addf %10, %12 : vector<104x24xf32>
    %14 = arith.truncf %13 : vector<104x24xf32> to vector<104x24xbf16>
    %c0_10 = arith.constant 0 : index
    %c0_11 = arith.constant 0 : index
    %15 = vector.load %arg6[%c0_10, %c0_11] : memref<104x24xbf16, #tpu.memory_space<vmem>>, vector<104x24xbf16>
    tpu.vector_store %arg6[%c0_10, %c0_11], %14 {strides = array<i32>} : memref<104x24xbf16, #tpu.memory_space<vmem>>, vector<104x24xbf16>,
    return
  }
  func.func @transform_0(%arg0: i32) -> (i32, i32) {
    %c0_i32 = arith.constant 0 : i32
    %c0_i32_0 = arith.constant 0 : i32
    return %arg0, %c0_i32 : i32, i32
  }
  func.func @transform_1(%arg0: i32) -> (i32, i32) {
    %c0_i32 = arith.constant 0 : i32
    %c0_i32_0 = arith.constant 0 : i32
    %c0_i32_1 = arith.constant 0 : i32
    return %c0_i32, %c0_i32_0 : i32, i32
  }
  func.func @transform_2(%arg0: i32) -> (i32, i32) {
    %c0_i32 = arith.constant 0 : i32
    %c0_i32_0 = arith.constant 0 : i32
    %c0_i32_1 = arith.constant 0 : i32
    return %c0_i32, %c0_i32_0 : i32, i32
  }
  func.func @transform_3(%arg0: i32) -> (i32, i32) {
    %c0_i32 = arith.constant 0 : i32
    %c0_i32_0 = arith.constant 0 : i32
    %c0_i32_1 = arith.constant 0 : i32
    return %c0_i32, %c0_i32_0 : i32, i32
  }
  func.func @transform_4(%arg0: i32) -> (i32, i32) {
    %c0_i32 = arith.constant 0 : i32
    %c0_i32_0 = arith.constant 0 : i32
    %c0_i32_1 = arith.constant 0 : i32
    return %c0_i32, %c0_i32_0 : i32, i32
  }
  func.func @transform_5(%arg0: i32) -> (i32, i32) {
    %c0_i32 = arith.constant 0 : i32
    %c0_i32_0 = arith.constant 0 : i32
    return %arg0, %c0_i32 : i32, i32
  }
}

module attributes {stable_mosaic.version = 11 : i64} {
  func.func @_conv_bn_relu_kernel(%arg0: i32, %arg1: memref<32x216xbf16, #tpu.memory_space<vmem>>, %arg2: memref<216x24xbf16, #tpu.memory_space<vmem>>, %arg3: memref<1x24xf32, #tpu.memory_space<vmem>>, %arg4: memref<1x24xf32, #tpu.memory_space<vmem>>, %arg5: memref<1x24xf32, #tpu.memory_space<vmem>>, %arg6: memref<32x24xbf16, #tpu.memory_space<vmem>>) attributes {dimension_semantics = [#tpu.dimension_semantics<parallel>], iteration_bounds = array<i64: 2>, scalar_prefetch = 0 : i64, scratch_operands = 0 : i64, tpu.core_type = #tpu.core_type<tc>, window_params = [{transform_indices = @transform_0, window_bounds = array<i64: 32, 216>}, {pipeline_mode = #tpu.pipeline_mode<synchronous>, transform_indices = @transform_1, window_bounds = array<i64: 216, 24>}, {pipeline_mode = #tpu.pipeline_mode<synchronous>, transform_indices = @transform_2, window_bounds = array<i64: 1, 24>}, {pipeline_mode = #tpu.pipeline_mode<synchronous>, transform_indices = @transform_3, window_bounds = array<i64: 1, 24>}, {pipeline_mode = #tpu.pipeline_mode<synchronous>, transform_indices = @transform_4, window_bounds = array<i64: 1, 24>}, {transform_indices = @transform_5, window_bounds = array<i64: 32, 24>}]} {
    %c0 = arith.constant 0 : index
    %c0_0 = arith.constant 0 : index
    %0 = vector.load %arg1[%c0, %c0_0] : memref<32x216xbf16, #tpu.memory_space<vmem>>, vector<32x216xbf16>
    %c0_1 = arith.constant 0 : index
    %c0_2 = arith.constant 0 : index
    %1 = vector.load %arg2[%c0_1, %c0_2] : memref<216x24xbf16, #tpu.memory_space<vmem>>, vector<216x24xbf16>
    %cst = arith.constant dense<0.000000e+00> : vector<32x24xf32>
    %2 = tpu.matmul %0, %1, %cst {dimension_numbers = #tpu.dot_dimension_numbers<[1], [0], [0], [1], [0, 0, 1, 1], [], []>} : vector<32x216xbf16>, vector<216x24xbf16>, vector<32x24xf32> -> vector<32x24xf32>
    %c0_3 = arith.constant 0 : index
    %c0_4 = arith.constant 0 : index
    %3 = vector.load %arg3[%c0_3, %c0_4] : memref<1x24xf32, #tpu.memory_space<vmem>>, vector<1x24xf32>
    %4 = vector.broadcast %3 : vector<1x24xf32> to vector<32x24xf32>
    %5 = arith.addf %2, %4 : vector<32x24xf32>
    %cst_5 = arith.constant 0.000000e+00 : f32
    %6 = vector.broadcast %cst_5 : f32 to vector<32x24xf32>
    %7 = arith.maximumf %5, %6 : vector<32x24xf32>
    %c0_6 = arith.constant 0 : index
    %c0_7 = arith.constant 0 : index
    %8 = vector.load %arg4[%c0_6, %c0_7] : memref<1x24xf32, #tpu.memory_space<vmem>>, vector<1x24xf32>
    %9 = vector.broadcast %8 : vector<1x24xf32> to vector<32x24xf32>
    %10 = arith.mulf %7, %9 : vector<32x24xf32>
    %c0_8 = arith.constant 0 : index
    %c0_9 = arith.constant 0 : index
    %11 = vector.load %arg5[%c0_8, %c0_9] : memref<1x24xf32, #tpu.memory_space<vmem>>, vector<1x24xf32>
    %12 = vector.broadcast %11 : vector<1x24xf32> to vector<32x24xf32>
    %13 = arith.addf %10, %12 : vector<32x24xf32>
    %14 = arith.truncf %13 : vector<32x24xf32> to vector<32x24xbf16>
    %c0_10 = arith.constant 0 : index
    %c0_11 = arith.constant 0 : index
    %15 = vector.load %arg6[%c0_10, %c0_11] : memref<32x24xbf16, #tpu.memory_space<vmem>>, vector<32x24xbf16>
    tpu.vector_store %arg6[%c0_10, %c0_11], %14 {strides = array<i32>} : memref<32x24xbf16, #tpu.memory_space<vmem>>, vector<32x24xbf16>,
    return
  }
  func.func @transform_0(%arg0: i32) -> (i32, i32) {
    %c0_i32 = arith.constant 0 : i32
    %c0_i32_0 = arith.constant 0 : i32
    return %arg0, %c0_i32 : i32, i32
  }
  func.func @transform_1(%arg0: i32) -> (i32, i32) {
    %c0_i32 = arith.constant 0 : i32
    %c0_i32_0 = arith.constant 0 : i32
    %c0_i32_1 = arith.constant 0 : i32
    return %c0_i32, %c0_i32_0 : i32, i32
  }
  func.func @transform_2(%arg0: i32) -> (i32, i32) {
    %c0_i32 = arith.constant 0 : i32
    %c0_i32_0 = arith.constant 0 : i32
    %c0_i32_1 = arith.constant 0 : i32
    return %c0_i32, %c0_i32_0 : i32, i32
  }
  func.func @transform_3(%arg0: i32) -> (i32, i32) {
    %c0_i32 = arith.constant 0 : i32
    %c0_i32_0 = arith.constant 0 : i32
    %c0_i32_1 = arith.constant 0 : i32
    return %c0_i32, %c0_i32_0 : i32, i32
  }
  func.func @transform_4(%arg0: i32) -> (i32, i32) {
    %c0_i32 = arith.constant 0 : i32
    %c0_i32_0 = arith.constant 0 : i32
    %c0_i32_1 = arith.constant 0 : i32
    return %c0_i32, %c0_i32_0 : i32, i32
  }
  func.func @transform_5(%arg0: i32) -> (i32, i32) {
    %c0_i32 = arith.constant 0 : i32
    %c0_i32_0 = arith.constant 0 : i32
    return %arg0, %c0_i32 : i32, i32
  }
}

module attributes {stable_mosaic.version = 11 : i64} {
  func.func @_relation_kernel(%arg0: i32, %arg1: memref<256x24xbf16, #tpu.memory_space<vmem>>, %arg2: memref<8x11xbf16, #tpu.memory_space<vmem>>, %arg3: memref<32x256xf32, #tpu.memory_space<vmem>>, %arg4: memref<32x256xf32, #tpu.memory_space<vmem>>, %arg5: memref<24x256xbf16, #tpu.memory_space<vmem>>, %arg6: memref<11x256xbf16, #tpu.memory_space<vmem>>, %arg7: memref<1x256xf32, #tpu.memory_space<vmem>>, %arg8: memref<256x256xbf16, #tpu.memory_space<vmem>>, %arg9: memref<1x256xf32, #tpu.memory_space<vmem>>, %arg10: memref<256x256xbf16, #tpu.memory_space<vmem>>, %arg11: memref<1x256xf32, #tpu.memory_space<vmem>>, %arg12: memref<256x256xbf16, #tpu.memory_space<vmem>>, %arg13: memref<1x256xf32, #tpu.memory_space<vmem>>, %arg14: memref<256x256xbf16, #tpu.memory_space<vmem>>, %arg15: memref<1x256xf32, #tpu.memory_space<vmem>>, %arg16: memref<256x128xbf16, #tpu.memory_space<vmem>>, %arg17: memref<1x128xf32, #tpu.memory_space<vmem>>, %arg18: memref<8x128xf32, #tpu.memory_space<vmem>>) attributes {dimension_semantics = [#tpu.dimension_semantics<parallel>], iteration_bounds = array<i64: 1>, scalar_prefetch = 0 : i64, scratch_operands = 0 : i64, tpu.core_type = #tpu.core_type<tc>, window_params = [{transform_indices = @transform_0, window_bounds = array<i64: 256, 24>}, {transform_indices = @transform_1, window_bounds = array<i64: 8, 11>}, {pipeline_mode = #tpu.pipeline_mode<synchronous>, transform_indices = @transform_2, window_bounds = array<i64: 32, 256>}, {pipeline_mode = #tpu.pipeline_mode<synchronous>, transform_indices = @transform_3, window_bounds = array<i64: 32, 256>}, {pipeline_mode = #tpu.pipeline_mode<synchronous>, transform_indices = @transform_4, window_bounds = array<i64: 24, 256>}, {pipeline_mode = #tpu.pipeline_mode<synchronous>, transform_indices = @transform_5, window_bounds = array<i64: 11, 256>}, {pipeline_mode = #tpu.pipeline_mode<synchronous>, transform_indices = @transform_6, window_bounds = array<i64: 1, 256>}, {pipeline_mode = #tpu.pipeline_mode<synchronous>, transform_indices = @transform_7, window_bounds = array<i64: 256, 256>}, {pipeline_mode = #tpu.pipeline_mode<synchronous>, transform_indices = @transform_8, window_bounds = array<i64: 1, 256>}, {pipeline_mode = #tpu.pipeline_mode<synchronous>, transform_indices = @transform_9, window_bounds = array<i64: 256, 256>}, {pipeline_mode = #tpu.pipeline_mode<synchronous>, transform_indices = @transform_10, window_bounds = array<i64: 1, 256>}, {pipeline_mode = #tpu.pipeline_mode<synchronous>, transform_indices = @transform_11, window_bounds = array<i64: 256, 256>}, {pipeline_mode = #tpu.pipeline_mode<synchronous>, transform_indices = @transform_12, window_bounds = array<i64: 1, 256>}, {pipeline_mode = #tpu.pipeline_mode<synchronous>, transform_indices = @transform_13, window_bounds = array<i64: 256, 256>}, {pipeline_mode = #tpu.pipeline_mode<synchronous>, transform_indices = @transform_14, window_bounds = array<i64: 1, 256>}, {pipeline_mode = #tpu.pipeline_mode<synchronous>, transform_indices = @transform_15, window_bounds = array<i64: 256, 128>}, {pipeline_mode = #tpu.pipeline_mode<synchronous>, transform_indices = @transform_16, window_bounds = array<i64: 1, 128>}, {transform_indices = @transform_17, window_bounds = array<i64: 8, 128>}]} {
    %c0 = arith.constant 0 : index
    %c0_0 = arith.constant 0 : index
    %0 = vector.load %arg1[%c0, %c0_0] : memref<256x24xbf16, #tpu.memory_space<vmem>>, vector<256x24xbf16>
    %c0_1 = arith.constant 0 : index
    %c0_2 = arith.constant 0 : index
    %1 = vector.load %arg5[%c0_1, %c0_2] : memref<24x256xbf16, #tpu.memory_space<vmem>>, vector<24x256xbf16>
    %cst = arith.constant dense<0.000000e+00> : vector<256x256xf32>
    %2 = tpu.matmul %0, %1, %cst {dimension_numbers = #tpu.dot_dimension_numbers<[1], [0], [0], [1], [0, 0, 1, 1], [], []>} : vector<256x24xbf16>, vector<24x256xbf16>, vector<256x256xf32> -> vector<256x256xf32>
    %c0_3 = arith.constant 0 : index
    %c0_4 = arith.constant 0 : index
    %3 = vector.load %arg2[%c0_3, %c0_4] : memref<8x11xbf16, #tpu.memory_space<vmem>>, vector<8x11xbf16>
    %c0_5 = arith.constant 0 : index
    %c0_6 = arith.constant 0 : index
    %4 = vector.load %arg6[%c0_5, %c0_6] : memref<11x256xbf16, #tpu.memory_space<vmem>>, vector<11x256xbf16>
    %cst_7 = arith.constant dense<0.000000e+00> : vector<8x256xf32>
    %5 = tpu.matmul %3, %4, %cst_7 {dimension_numbers = #tpu.dot_dimension_numbers<[1], [0], [0], [1], [0, 0, 1, 1], [], []>} : vector<8x11xbf16>, vector<11x256xbf16>, vector<8x256xf32> -> vector<8x256xf32>
    %6 = vector.shape_cast %2 : vector<256x256xf32> to vector<8x32x256xf32>
    %c0_8 = arith.constant 0 : index
    %c0_9 = arith.constant 0 : index
    %7 = vector.load %arg3[%c0_8, %c0_9] : memref<32x256xf32, #tpu.memory_space<vmem>>, vector<32x256xf32>
    %8 = vector.shape_cast %7 : vector<32x256xf32> to vector<1x32x256xf32>
    %9 = vector.broadcast %8 : vector<1x32x256xf32> to vector<8x32x256xf32>
    %10 = arith.addf %6, %9 : vector<8x32x256xf32>
    %11 = vector.shape_cast %5 : vector<8x256xf32> to vector<8x1x256xf32>
    %12 = vector.broadcast %11 : vector<8x1x256xf32> to vector<8x32x256xf32>
    %13 = arith.addf %10, %12 : vector<8x32x256xf32>
    %c0_10 = arith.constant 0 : index
    %c0_11 = arith.constant 0 : index
    %14 = vector.load %arg7[%c0_10, %c0_11] : memref<1x256xf32, #tpu.memory_space<vmem>>, vector<1x256xf32>
    %15 = vector.shape_cast %14 : vector<1x256xf32> to vector<1x1x256xf32>
    %16 = vector.broadcast %15 : vector<1x1x256xf32> to vector<8x32x256xf32>
    %17 = arith.addf %13, %16 : vector<8x32x256xf32>
    %cst_12 = arith.constant 0.000000e+00 : f32
    %18 = vector.broadcast %cst_12 : f32 to vector<8x32x256xf32>
    %19 = arith.maximumf %17, %18 : vector<8x32x256xf32>
    %20 = vector.shape_cast %19 : vector<8x32x256xf32> to vector<256x256xf32>
    %21 = arith.truncf %20 : vector<256x256xf32> to vector<256x256xbf16>
    %c0_13 = arith.constant 0 : index
    %c0_14 = arith.constant 0 : index
    %22 = vector.load %arg8[%c0_13, %c0_14] : memref<256x256xbf16, #tpu.memory_space<vmem>>, vector<256x256xbf16>
    %cst_15 = arith.constant dense<0.000000e+00> : vector<256x256xf32>
    %23 = tpu.matmul %21, %22, %cst_15 {dimension_numbers = #tpu.dot_dimension_numbers<[1], [0], [0], [1], [0, 0, 1, 1], [], []>} : vector<256x256xbf16>, vector<256x256xbf16>, vector<256x256xf32> -> vector<256x256xf32>
    %c0_16 = arith.constant 0 : index
    %c0_17 = arith.constant 0 : index
    %24 = vector.load %arg9[%c0_16, %c0_17] : memref<1x256xf32, #tpu.memory_space<vmem>>, vector<1x256xf32>
    %25 = vector.broadcast %24 : vector<1x256xf32> to vector<256x256xf32>
    %26 = arith.addf %23, %25 : vector<256x256xf32>
    %cst_18 = arith.constant 0.000000e+00 : f32
    %27 = vector.broadcast %cst_18 : f32 to vector<256x256xf32>
    %28 = arith.maximumf %26, %27 : vector<256x256xf32>
    %29 = arith.truncf %28 : vector<256x256xf32> to vector<256x256xbf16>
    %c0_19 = arith.constant 0 : index
    %c0_20 = arith.constant 0 : index
    %30 = vector.load %arg10[%c0_19, %c0_20] : memref<256x256xbf16, #tpu.memory_space<vmem>>, vector<256x256xbf16>
    %cst_21 = arith.constant dense<0.000000e+00> : vector<256x256xf32>
    %31 = tpu.matmul %29, %30, %cst_21 {dimension_numbers = #tpu.dot_dimension_numbers<[1], [0], [0], [1], [0, 0, 1, 1], [], []>} : vector<256x256xbf16>, vector<256x256xbf16>, vector<256x256xf32> -> vector<256x256xf32>
    %c0_22 = arith.constant 0 : index
    %c0_23 = arith.constant 0 : index
    %32 = vector.load %arg11[%c0_22, %c0_23] : memref<1x256xf32, #tpu.memory_space<vmem>>, vector<1x256xf32>
    %33 = vector.broadcast %32 : vector<1x256xf32> to vector<256x256xf32>
    %34 = arith.addf %31, %33 : vector<256x256xf32>
    %cst_24 = arith.constant 0.000000e+00 : f32
    %35 = vector.broadcast %cst_24 : f32 to vector<256x256xf32>
    %36 = arith.maximumf %34, %35 : vector<256x256xf32>
    %37 = vector.shape_cast %36 : vector<256x256xf32> to vector<8x32x256xf32>
    %c0_25 = arith.constant 0 : index
    %c0_26 = arith.constant 0 : index
    %38 = vector.load %arg4[%c0_25, %c0_26] : memref<32x256xf32, #tpu.memory_space<vmem>>, vector<32x256xf32>
    %39 = vector.shape_cast %38 : vector<32x256xf32> to vector<1x32x256xf32>
    %40 = vector.broadcast %39 : vector<1x32x256xf32> to vector<8x32x256xf32>
    %41 = arith.mulf %37, %40 : vector<8x32x256xf32>
    %cst_27 = arith.constant dense<0.000000e+00> : vector<8x256xf32>
    %42 = vector.multi_reduction <add>, %41, %cst_27 [1] : vector<8x32x256xf32> to vector<8x256xf32>
    %43 = arith.truncf %42 : vector<8x256xf32> to vector<8x256xbf16>
    %c0_28 = arith.constant 0 : index
    %c0_29 = arith.constant 0 : index
    %44 = vector.load %arg12[%c0_28, %c0_29] : memref<256x256xbf16, #tpu.memory_space<vmem>>, vector<256x256xbf16>
    %cst_30 = arith.constant dense<0.000000e+00> : vector<8x256xf32>
    %45 = tpu.matmul %43, %44, %cst_30 {dimension_numbers = #tpu.dot_dimension_numbers<[1], [0], [0], [1], [0, 0, 1, 1], [], []>} : vector<8x256xbf16>, vector<256x256xbf16>, vector<8x256xf32> -> vector<8x256xf32>
    %c0_31 = arith.constant 0 : index
    %c0_32 = arith.constant 0 : index
    %46 = vector.load %arg13[%c0_31, %c0_32] : memref<1x256xf32, #tpu.memory_space<vmem>>, vector<1x256xf32>
    %47 = vector.broadcast %46 : vector<1x256xf32> to vector<8x256xf32>
    %48 = arith.addf %45, %47 : vector<8x256xf32>
    %cst_33 = arith.constant 0.000000e+00 : f32
    %49 = vector.broadcast %cst_33 : f32 to vector<8x256xf32>
    %50 = arith.maximumf %48, %49 : vector<8x256xf32>
    %51 = arith.truncf %50 : vector<8x256xf32> to vector<8x256xbf16>
    %c0_34 = arith.constant 0 : index
    %c0_35 = arith.constant 0 : index
    %52 = vector.load %arg14[%c0_34, %c0_35] : memref<256x256xbf16, #tpu.memory_space<vmem>>, vector<256x256xbf16>
    %cst_36 = arith.constant dense<0.000000e+00> : vector<8x256xf32>
    %53 = tpu.matmul %51, %52, %cst_36 {dimension_numbers = #tpu.dot_dimension_numbers<[1], [0], [0], [1], [0, 0, 1, 1], [], []>} : vector<8x256xbf16>, vector<256x256xbf16>, vector<8x256xf32> -> vector<8x256xf32>
    %c0_37 = arith.constant 0 : index
    %c0_38 = arith.constant 0 : index
    %54 = vector.load %arg15[%c0_37, %c0_38] : memref<1x256xf32, #tpu.memory_space<vmem>>, vector<1x256xf32>
    %55 = vector.broadcast %54 : vector<1x256xf32> to vector<8x256xf32>
    %56 = arith.addf %53, %55 : vector<8x256xf32>
    %cst_39 = arith.constant 0.000000e+00 : f32
    %57 = vector.broadcast %cst_39 : f32 to vector<8x256xf32>
    %58 = arith.maximumf %56, %57 : vector<8x256xf32>
    %59 = arith.truncf %58 : vector<8x256xf32> to vector<8x256xbf16>
    %c0_40 = arith.constant 0 : index
    %c0_41 = arith.constant 0 : index
    %60 = vector.load %arg16[%c0_40, %c0_41] : memref<256x128xbf16, #tpu.memory_space<vmem>>, vector<256x128xbf16>
    %cst_42 = arith.constant dense<0.000000e+00> : vector<8x128xf32>
    %61 = tpu.matmul %59, %60, %cst_42 {dimension_numbers = #tpu.dot_dimension_numbers<[1], [0], [0], [1], [0, 0, 1, 1], [], []>} : vector<8x256xbf16>, vector<256x128xbf16>, vector<8x128xf32> -> vector<8x128xf32>
    %c0_43 = arith.constant 0 : index
    %c0_44 = arith.constant 0 : index
    %62 = vector.load %arg17[%c0_43, %c0_44] : memref<1x128xf32, #tpu.memory_space<vmem>>, vector<1x128xf32>
    %63 = vector.broadcast %62 : vector<1x128xf32> to vector<8x128xf32>
    %64 = arith.addf %61, %63 : vector<8x128xf32>
    %cst_45 = arith.constant dense<0xFF800000> : vector<8xf32>
    %65 = vector.multi_reduction <maximumf>, %64, %cst_45 [1] : vector<8x128xf32> to vector<8xf32>
    %66 = vector.shape_cast %65 : vector<8xf32> to vector<8x1xf32>
    %67 = vector.broadcast %66 : vector<8x1xf32> to vector<8x128xf32>
    %68 = arith.subf %64, %67 : vector<8x128xf32>
    %69 = math.exp %68 : vector<8x128xf32>
    %cst_46 = arith.constant dense<0.000000e+00> : vector<8xf32>
    %70 = vector.multi_reduction <add>, %69, %cst_46 [1] : vector<8x128xf32> to vector<8xf32>
    %71 = vector.shape_cast %70 : vector<8xf32> to vector<8x1xf32>
    %72 = math.log %71 : vector<8x1xf32>
    %73 = arith.addf %66, %72 : vector<8x1xf32>
    %74 = vector.broadcast %73 : vector<8x1xf32> to vector<8x128xf32>
    %75 = arith.subf %64, %74 : vector<8x128xf32>
    %c0_47 = arith.constant 0 : index
    %c0_48 = arith.constant 0 : index
    %76 = vector.load %arg18[%c0_47, %c0_48] : memref<8x128xf32, #tpu.memory_space<vmem>>, vector<8x128xf32>
    tpu.vector_store %arg18[%c0_47, %c0_48], %75 {strides = array<i32>} : memref<8x128xf32, #tpu.memory_space<vmem>>, vector<8x128xf32>,
    return
  }
  func.func @transform_0(%arg0: i32) -> (i32, i32) {
    %c0_i32 = arith.constant 0 : i32
    %c0_i32_0 = arith.constant 0 : i32
    return %arg0, %c0_i32 : i32, i32
  }
  func.func @transform_1(%arg0: i32) -> (i32, i32) {
    %c0_i32 = arith.constant 0 : i32
    %c0_i32_0 = arith.constant 0 : i32
    return %arg0, %c0_i32 : i32, i32
  }
  func.func @transform_2(%arg0: i32) -> (i32, i32) {
    %c0_i32 = arith.constant 0 : i32
    %c0_i32_0 = arith.constant 0 : i32
    %c0_i32_1 = arith.constant 0 : i32
    return %c0_i32, %c0_i32_0 : i32, i32
  }
  func.func @transform_3(%arg0: i32) -> (i32, i32) {
    %c0_i32 = arith.constant 0 : i32
    %c0_i32_0 = arith.constant 0 : i32
    %c0_i32_1 = arith.constant 0 : i32
    return %c0_i32, %c0_i32_0 : i32, i32
  }
  func.func @transform_4(%arg0: i32) -> (i32, i32) {
    %c0_i32 = arith.constant 0 : i32
    %c0_i32_0 = arith.constant 0 : i32
    %c0_i32_1 = arith.constant 0 : i32
    return %c0_i32, %c0_i32_0 : i32, i32
  }
  func.func @transform_5(%arg0: i32) -> (i32, i32) {
    %c0_i32 = arith.constant 0 : i32
    %c0_i32_0 = arith.constant 0 : i32
    %c0_i32_1 = arith.constant 0 : i32
    return %c0_i32, %c0_i32_0 : i32, i32
  }
  func.func @transform_6(%arg0: i32) -> (i32, i32) {
    %c0_i32 = arith.constant 0 : i32
    %c0_i32_0 = arith.constant 0 : i32
    %c0_i32_1 = arith.constant 0 : i32
    return %c0_i32, %c0_i32_0 : i32, i32
  }
  func.func @transform_7(%arg0: i32) -> (i32, i32) {
    %c0_i32 = arith.constant 0 : i32
    %c0_i32_0 = arith.constant 0 : i32
    %c0_i32_1 = arith.constant 0 : i32
    return %c0_i32, %c0_i32_0 : i32, i32
  }
  func.func @transform_8(%arg0: i32) -> (i32, i32) {
    %c0_i32 = arith.constant 0 : i32
    %c0_i32_0 = arith.constant 0 : i32
    %c0_i32_1 = arith.constant 0 : i32
    return %c0_i32, %c0_i32_0 : i32, i32
  }
  func.func @transform_9(%arg0: i32) -> (i32, i32) {
    %c0_i32 = arith.constant 0 : i32
    %c0_i32_0 = arith.constant 0 : i32
    %c0_i32_1 = arith.constant 0 : i32
    return %c0_i32, %c0_i32_0 : i32, i32
  }
  func.func @transform_10(%arg0: i32) -> (i32, i32) {
    %c0_i32 = arith.constant 0 : i32
    %c0_i32_0 = arith.constant 0 : i32
    %c0_i32_1 = arith.constant 0 : i32
    return %c0_i32, %c0_i32_0 : i32, i32
  }
  func.func @transform_11(%arg0: i32) -> (i32, i32) {
    %c0_i32 = arith.constant 0 : i32
    %c0_i32_0 = arith.constant 0 : i32
    %c0_i32_1 = arith.constant 0 : i32
    return %c0_i32, %c0_i32_0 : i32, i32
  }
  func.func @transform_12(%arg0: i32) -> (i32, i32) {
    %c0_i32 = arith.constant 0 : i32
    %c0_i32_0 = arith.constant 0 : i32
    %c0_i32_1 = arith.constant 0 : i32
    return %c0_i32, %c0_i32_0 : i32, i32
  }
  func.func @transform_13(%arg0: i32) -> (i32, i32) {
    %c0_i32 = arith.constant 0 : i32
    %c0_i32_0 = arith.constant 0 : i32
    %c0_i32_1 = arith.constant 0 : i32
    return %c0_i32, %c0_i32_0 : i32, i32
  }
  func.func @transform_14(%arg0: i32) -> (i32, i32) {
    %c0_i32 = arith.constant 0 : i32
    %c0_i32_0 = arith.constant 0 : i32
    %c0_i32_1 = arith.constant 0 : i32
    return %c0_i32, %c0_i32_0 : i32, i32
  }
  func.func @transform_15(%arg0: i32) -> (i32, i32) {
    %c0_i32 = arith.constant 0 : i32
    %c0_i32_0 = arith.constant 0 : i32
    %c0_i32_1 = arith.constant 0 : i32
    return %c0_i32, %c0_i32_0 : i32, i32
  }
  func.func @transform_16(%arg0: i32) -> (i32, i32) {
    %c0_i32 = arith.constant 0 : i32
    %c0_i32_0 = arith.constant 0 : i32
    %c0_i32_1 = arith.constant 0 : i32
    return %c0_i32, %c0_i32_0 : i32, i32
  }
  func.func @transform_17(%arg0: i32) -> (i32, i32) {
    %c0_i32 = arith.constant 0 : i32
    %c0_i32_0 = arith.constant 0 : i32
    return %arg0, %c0_i32 : i32, i32
  }
}

</mosaic_0001>

<bundles_post_ra>
// kernel: pool_forward.5
= control target key start
LH: loop header
LB: loop body
LE: loop exit
PB: predicated region body
PF: predicated region fallthrough
CT: control target
= control target key end

     0   :  { %s3258_s18 = smov 0   ;;  %s4351_s0 = inlined_call_operand.vmem [shape: bf16[3072,27], index: 0, kind: input, shape index: {}]   ;;  %s4352_s1 = inlined_call_operand.vmem [shape: bf16[27,24], index: 1, kind: input, shape index: {}]   ;;  %s4353_s2 = inlined_call_operand.vmem [shape: f32[1,24], index: 2, kind: input, shape index: {}]   ;;  %s4354_s3 = inlined_call_operand.vmem [shape: f32[1,24], index: 3, kind: input, shape index: {}]   ;;  %s4355_s4 = inlined_call_operand.vmem [shape: f32[1,24], index: 4, kind: input, shape index: {}]   ;;  %s4356_s5 = inlined_call_operand.vmem [shape: bf16[3072,24], index: 5, kind: output, shape index: {}]  }
   0x1 LB: > { %s2539_s19 = sadd.s32 4294967295, %s3225_s18   ;;  %p2543_p0 = scmp.ge.s32.totalorder %s3225_s18, 1  ;;  %s3225_s18 = sphi %s3258_s18, %s15_s18  }
   0x2   : > { %p188_p1 = scmp.lt.s32.totalorder %s3225_s18, 4 }
   0x4   : > { %p189_p2 = pnand %p2543_p0, %p188_p1 }
   0x5   : > { %v3150_v0 = vld [vmem:[%s4352_s1] sm:$0xff] (!%p189_p2)   ;;  %vm892_vm0 = vcmask (!%p189_p2), 1044480   ;;  %v3151_v1 = vld [vmem:[%s4352_s1 + $0x8] sm:$0x3f] (!%p189_p2)   ;;  %vm893_vm1 = vcmask (!%p189_p2), 1045504   ;;  %s2544_s24 = sshll.u32 (!%p189_p2), %s2539_s19, 7 }
   0x6   : > { %192 = sbr.rel (%p189_p2) target bundleno = 396 (0x18c), region = 40  ;;  %3005 = vmatprep.subr.bf16.mxu0 (!%p189_p2), %v3150_v0  ;;  %3137 = vmatprep.subr.bf16.mxu1 (!%p189_p2), %v3150_v0  ;;  %v3227_v2 = vmov (!%p189_p2), 65535   ;;  %p217_p3 = scmp.lt.s32.totalorder (!%p189_p2), %s2544_s24, 383  ;;  %vm699_vm2 = vcmask (!%p189_p2), 220160   ;;  %vm2354_vm3 = vcmask (!%p189_p2), 191488  }
   0x7   : > { %3006 = vmatpush3.bf16.msra.mxu0 (!%p189_p2), %v3150_v0  ;;  %3139 = vmatpush3.bf16.msra.mxu1 (!%p189_p2), %v3150_v0  ;;  %v894_v3 = vsel (!%p189_p2), %vm892_vm0, 4294967295, %v3227_v2 }
   0x8   : > { %v895_v4 = vsel (!%p189_p2), %vm893_vm1, %v894_v3, 0 }
   0x9   : > { %v897_v5 = vand.u32 (!%p189_p2), %v3151_v1, %v895_v4 }
   0xb   : > { %3007 = vmatprep.subr.bf16.mxu0 (!%p189_p2), %v897_v5  ;;  %3138 = vmatprep.subr.bf16.mxu1 (!%p189_p2), %v897_v5 }
   0xc   : > { %3008 = vmatpush3.bf16.msra.mxu0 (!%p189_p2), %v897_v5  ;;  %3140 = vmatpush3.bf16.msra.mxu1 (!%p189_p2), %v897_v5 }
   0xd   : > { %s4358_s24 = smov (!%p217_p3, %s2544_s24), 383 }
   0xe   : > { %s2545_s25 = sshll.u32 %s4358_s24, 2 }
   0xf   : > { %s3280_s28 = scalar_lea.vmem %s4351_s0, %s2545_s25  ;;  %s3444_s12 = scalar_lea.vmem %s4356_s5, %s2545_s25 }
  0x10   : > { %v3152_v6 = vld [vmem:[%s3280_s28] sm:$0xff]   ;;  %v3154_v8 = vld [vmem:[%s3280_s28 + $0x8] sm:$0xff]   ;;  %v3156_v10 = vld [vmem:[%s3280_s28 + $0x10] sm:$0xff]  }
  0x11   : > { %v3153_v7 = vld [vmem:[%s3280_s28 + $0x100] sm:$0xff]   ;;  %3009 = vmatprep.mubr.msk.bf16.mxu0 %vm699_vm2, %v3152_v6  ;;  %v3155_v9 = vld [vmem:[%s3280_s28 + $0x108] sm:$0xff]   ;;  %v3157_v11 = vld [vmem:[%s3280_s28 + $0x110] sm:$0xff]  }
  0x12   : > { %3073 = vmatprep.mubr.msk.bf16.mxu1 %vm699_vm2, %v3153_v7  ;;  %3010 = vmatmul.mubr.msk.bf16.vlgmr.msra.gmra.mrb[0].mxu0 %vm699_vm2, %v3154_v8  ;;  %v3158_v12 = vld [vmem:[%s3280_s28 + $0x18] sm:$0xff]   ;;  %v3160_v14 = vld [vmem:[%s3280_s28 + $0x20] sm:$0xff]   ;;  %v3162_v16 = vld [vmem:[%s3280_s28 + $0x28] sm:$0xff]  }
  0x13   : > { %3074 = vmatmul.mubr.msk.bf16.vlgmr.msra.gmra.mrb[0].mxu1 %vm699_vm2, %v3155_v9  ;;  %3013 = vmatprep.mubr.msk.bf16.mxu0 %vm699_vm2, %v3156_v10  ;;  %v3159_v13 = vld [vmem:[%s3280_s28 + $0x118] sm:$0xff]   ;;  %v3161_v15 = vld [vmem:[%s3280_s28 + $0x120] sm:$0xff]   ;;  %v3163_v17 = vld [vmem:[%s3280_s28 + $0x128] sm:$0xff]  }
  0x14   : > { %3077 = vmatprep.mubr.msk.bf16.mxu1 %vm699_vm2, %v3157_v11  ;;  %v3164_v18 = vld [vmem:[%s3280_s28 + $0x30] sm:$0xff]   ;;  %v3166_v20 = vld [vmem:[%s3280_s28 + $0x38] sm:$0xff]   ;;  %v3168_v22 = vld [vmem:[%s3280_s28 + $0x40] sm:$0xff]  }
  0x15   : > { %v3165_v19 = vld [vmem:[%s3280_s28 + $0x130] sm:$0xff]   ;;  %v3167_v21 = vld [vmem:[%s3280_s28 + $0x138] sm:$0xff]   ;;  %v3169_v23 = vld [vmem:[%s3280_s28 + $0x140] sm:$0xff]  }
  0x16   : > { %v3170_v24 = vld [vmem:[%s3280_s28 + $0x48] sm:$0xff]   ;;  %v3172_v26 = vld [vmem:[%s3280_s28 + $0x50] sm:$0xff]   ;;  %v3174_v28 = vld [vmem:[%s3280_s28 + $0x58] sm:$0xff]  }
  0x17   : > { %v3171_v25 = vld [vmem:[%s3280_s28 + $0x148] sm:$0xff]   ;;  %v3173_v27 = vld [vmem:[%s3280_s28 + $0x150] sm:$0xff]   ;;  %v3175_v29 = vld [vmem:[%s3280_s28 + $0x158] sm:$0xff]  }
  0x18   : > { %v3176_v30 = vld [vmem:[%s3280_s28 + $0x60] sm:$0xff]   ;;  %v3178_v32 = vld [vmem:[%s3280_s28 + $0x68] sm:$0xff]   ;;  %v3180_v34 = vld [vmem:[%s3280_s28 + $0x70] sm:$0xff]  }
  0x19   : > { %v3177_v31 = vld [vmem:[%s3280_s28 + $0x160] sm:$0xff]   ;;  %v3179_v33 = vld [vmem:[%s3280_s28 + $0x168] sm:$0xff]   ;;  %v3181_v35 = vld [vmem:[%s3280_s28 + $0x170] sm:$0xff]  }
  0x1a   : > { %3014 = vmatmul.mubr.msk.bf16.gmra.mrb[4].mxu0 %vm699_vm2, %v3158_v12  ;;  %v3182_v36 = vld [vmem:[%s3280_s28 + $0x78] sm:$0xff]   ;;  %v3184_v38 = vld [vmem:[%s3280_s28 + $0x80] sm:$0xff]   ;;  %v3186_v40 = vld [vmem:[%s3280_s28 + $0x88] sm:$0xff]  }
  0x1b   : > { %3078 = vmatmul.mubr.msk.bf16.gmra.mrb[4].mxu1 %vm699_vm2, %v3159_v13  ;;  %3017 = vmatprep.mubr.msk.bf16.mxu0 %vm699_vm2, %v3160_v14  ;;  %v3183_v37 = vld [vmem:[%s3280_s28 + $0x178] sm:$0xff]   ;;  %v3185_v39 = vld [vmem:[%s3280_s28 + $0x180] sm:$0xff]   ;;  %v3187_v41 = vld [vmem:[%s3280_s28 + $0x188] sm:$0xff]  }
  0x1c   : > { %3081 = vmatprep.mubr.msk.bf16.mxu1 %vm699_vm2, %v3161_v15  ;;  %v3188_v42 = vld [vmem:[%s3280_s28 + $0x90] sm:$0xff]   ;;  %v3190_v44 = vld [vmem:[%s3280_s28 + $0x98] sm:$0xff]   ;;  %v3192_v46 = vld [vmem:[%s3280_s28 + $0xa0] sm:$0xff]  }
  0x1d   : > { %v3189_v43 = vld [vmem:[%s3280_s28 + $0x190] sm:$0xff]   ;;  %v3191_v45 = vld [vmem:[%s3280_s28 + $0x198] sm:$0xff]   ;;  %v3193_v47 = vld [vmem:[%s3280_s28 + $0x1a0] sm:$0xff]  }
  0x1e   : > { %v3194_v48 = vld [vmem:[%s3280_s28 + $0xa8] sm:$0xff]   ;;  %v3196_v50 = vld [vmem:[%s3280_s28 + $0xb0] sm:$0xff]   ;;  %v3198_v52 = vld [vmem:[%s3280_s28 + $0xb8] sm:$0xff]  }
  0x1f   : > { %v3195_v49 = vld [vmem:[%s3280_s28 + $0x1a8] sm:$0xff]   ;;  %v3197_v51 = vld [vmem:[%s3280_s28 + $0x1b0] sm:$0xff]   ;;  %v3199_v53 = vld [vmem:[%s3280_s28 + $0x1b8] sm:$0xff]  }
  0x20   : > { %v3200_v54 = vld [vmem:[%s3280_s28 + $0xc0] sm:$0xff]   ;;  %v3202_v56 = vld [vmem:[%s3280_s28 + $0xc8] sm:$0xff]   ;;  %v3204_v58 = vld [vmem:[%s3280_s28 + $0xd0] sm:$0xff]  }
  0x21   : > { %v3201_v55 = vld [vmem:[%s3280_s28 + $0x1c0] sm:$0xff]   ;;  %v3203_v57 = vld [vmem:[%s3280_s28 + $0x1c8] sm:$0xff]   ;;  %v3205_v59 = vld [vmem:[%s3280_s28 + $0x1d0] sm:$0xff]  }
  0x22   : > { %3018 = vmatmul.mubr.msk.bf16.gmra.mrb[8].mxu0 %vm699_vm2, %v3162_v16  ;;  %v3206_v60 = vld [vmem:[%s3280_s28 + $0xd8] sm:$0xff]   ;;  %v3208_v62 = vld [vmem:[%s3280_s28 + $0xe0] sm:$0xff]   ;;  %v3210_v0 = vld [vmem:[%s3280_s28 + $0xe8] sm:$0xff]  }
  0x23   : > { %3082 = vmatmul.mubr.msk.bf16.gmra.mrb[8].mxu1 %vm699_vm2, %v3163_v17  ;;  %3021 = vmatprep.mubr.msk.bf16.mxu0 %vm699_vm2, %v3164_v18  ;;  %v3207_v61 = vld [vmem:[%s3280_s28 + $0x1d8] sm:$0xff]   ;;  %v3209_v63 = vld [vmem:[%s3280_s28 + $0x1e0] sm:$0xff]   ;;  %v3211_v1 = vld [vmem:[%s3280_s28 + $0x1e8] sm:$0xff]  }
  0x24   : > { %3085 = vmatprep.mubr.msk.bf16.mxu1 %vm699_vm2, %v3165_v19  ;;  %v3212_v2 = vld [vmem:[%s3280_s28 + $0xf0] sm:$0xff]   ;;  %v3214_v4 = vld [vmem:[%s3280_s28 + $0xf8] sm:$0xff]   ;;  %v3413_v6 = vld [vmem:[%s4353_s2] ss:$0 sm:$0xff] }
  0x25   : > { %v3213_v3 = vld [vmem:[%s3280_s28 + $0x1f0] sm:$0xff]   ;;  %v3215_v5 = vld [vmem:[%s3280_s28 + $0x1f8] sm:$0xff]   ;;  %v3419_v11 = vld [vmem:[%s4354_s3] ss:$0 sm:$0xff] }
  0x2a   : > { %3022 = vmatmul.mubr.msk.bf16.gmra.mrb[12].mxu0 %vm699_vm2, %v3166_v20 }
  0x2b   : > { %3086 = vmatmul.mubr.msk.bf16.gmra.mrb[12].mxu1 %vm699_vm2, %v3167_v21  ;;  %3025 = vmatprep.mubr.msk.bf16.mxu0 %vm699_vm2, %v3168_v22  ;;  %v3428_v21 = vld [vmem:[%s4355_s4] ss:$0 sm:$0xff] }
  0x2c   : > { %3089 = vmatprep.mubr.msk.bf16.mxu1 %vm699_vm2, %v3169_v23 }
  0x32   : > { %3026 = vmatmul.mubr.msk.bf16.gmra.mrb[16].mxu0 %vm699_vm2, %v3170_v24 }
  0x33   : > { %3090 = vmatmul.mubr.msk.bf16.gmra.mrb[16].mxu1 %vm699_vm2, %v3171_v25  ;;  %3029 = vmatprep.mubr.msk.bf16.mxu0 %vm699_vm2, %v3172_v26 }
  0x34   : > { %3093 = vmatprep.mubr.msk.bf16.mxu1 %vm699_vm2, %v3173_v27 }
  0x3a   : > { %3030 = vmatmul.mubr.msk.bf16.gmra.mrb[20].mxu0 %vm699_vm2, %v3174_v28 }
  0x3b   : > { %3094 = vmatmul.mubr.msk.bf16.gmra.mrb[20].mxu1 %vm699_vm2, %v3175_v29  ;;  %3033 = vmatprep.mubr.msk.bf16.mxu0 %vm699_vm2, %v3176_v30 }
  0x3c   : > { %3097 = vmatprep.mubr.msk.bf16.mxu1 %vm699_vm2, %v3177_v31 }
  0x42   : > { %3034 = vmatmul.mubr.msk.bf16.gmra.mrb[24].mxu0 %vm699_vm2, %v3178_v32 }
  0x43   : > { %3098 = vmatmul.mubr.msk.bf16.gmra.mrb[24].mxu1 %vm699_vm2, %v3179_v33  ;;  %3037 = vmatprep.mubr.msk.bf16.mxu0 %vm699_vm2, %v3180_v34 }
  0x44   : > { %3101 = vmatprep.mubr.msk.bf16.mxu1 %vm699_vm2, %v3181_v35 }
  0x4a   : > { %3038 = vmatmul.mubr.msk.bf16.gmra.mrb[28].mxu0 %vm699_vm2, %v3182_v36 }
  0x4b   : > { %3102 = vmatmul.mubr.msk.bf16.gmra.mrb[28].mxu1 %vm699_vm2, %v3183_v37  ;;  %3041 = vmatprep.mubr.msk.bf16.mxu0 %vm699_vm2, %v3184_v38 }
  0x4c   : > { %3105 = vmatprep.mubr.msk.bf16.mxu1 %vm699_vm2, %v3185_v39 }
  0x52   : > { %3042 = vmatmul.mubr.msk.bf16.gmra.mrb[32].mxu0 %vm699_vm2, %v3186_v40 }
  0x53   : > { %3106 = vmatmul.mubr.msk.bf16.gmra.mrb[32].mxu1 %vm699_vm2, %v3187_v41  ;;  %3045 = vmatprep.mubr.msk.bf16.mxu0 %vm699_vm2, %v3188_v42 }
  0x54   : > { %3109 = vmatprep.mubr.msk.bf16.mxu1 %vm699_vm2, %v3189_v43 }
  0x5a   : > { %3046 = vmatmul.mubr.msk.bf16.gmra.mrb[36].mxu0 %vm699_vm2, %v3190_v44 }
  0x5b   : > { %3110 = vmatmul.mubr.msk.bf16.gmra.mrb[36].mxu1 %vm699_vm2, %v3191_v45  ;;  %3049 = vmatprep.mubr.msk.bf16.mxu0 %vm699_vm2, %v3192_v46 }
  0x5c   : > { %3113 = vmatprep.mubr.msk.bf16.mxu1 %vm699_vm2, %v3193_v47 }
  0x62   : > { %3050 = vmatmul.mubr.msk.bf16.gmra.mrb[40].mxu0 %vm699_vm2, %v3194_v48 }
  0x63   : > { %3114 = vmatmul.mubr.msk.bf16.gmra.mrb[40].mxu1 %vm699_vm2, %v3195_v49  ;;  %3053 = vmatprep.mubr.msk.bf16.mxu0 %vm699_vm2, %v3196_v50 }
  0x64   : > { %3117 = vmatprep.mubr.msk.bf16.mxu1 %vm699_vm2, %v3197_v51 }
  0x6a   : > { %3054 = vmatmul.mubr.msk.bf16.gmra.mrb[44].mxu0 %vm699_vm2, %v3198_v52 }
  0x6b   : > { %3118 = vmatmul.mubr.msk.bf16.gmra.mrb[44].mxu1 %vm699_vm2, %v3199_v53  ;;  %3057 = vmatprep.mubr.msk.bf16.mxu0 %vm699_vm2, %v3200_v54 }
  0x6c   : > { %3121 = vmatprep.mubr.msk.bf16.mxu1 %vm699_vm2, %v3201_v55 }
  0x72   : > { %3058 = vmatmul.mubr.msk.bf16.gmra.mrb[48].mxu0 %vm699_vm2, %v3202_v56 }
  0x73   : > { %3122 = vmatmul.mubr.msk.bf16.gmra.mrb[48].mxu1 %vm699_vm2, %v3203_v57  ;;  %3061 = vmatprep.mubr.msk.bf16.mxu0 %vm699_vm2, %v3204_v58 }
  0x74   : > { %3125 = vmatprep.mubr.msk.bf16.mxu1 %vm699_vm2, %v3205_v59 }
  0x7a   : > { %3062 = vmatmul.mubr.msk.bf16.gmra.mrb[52].mxu0 %vm699_vm2, %v3206_v60 }
  0x7b   : > { %3126 = vmatmul.mubr.msk.bf16.gmra.mrb[52].mxu1 %vm699_vm2, %v3207_v61  ;;  %3065 = vmatprep.mubr.msk.bf16.mxu0 %vm699_vm2, %v3208_v62 }
  0x7c   : > { %3129 = vmatprep.mubr.msk.bf16.mxu1 %vm699_vm2, %v3209_v63 }
  0x82   : > { %3066 = vmatmul.mubr.msk.bf16.gmra.mrb[56].mxu0 %vm699_vm2, %v3210_v0 }
  0x83   : > { %3130 = vmatmul.mubr.msk.bf16.gmra.mrb[56].mxu1 %vm699_vm2, %v3211_v1  ;;  %3069 = vmatprep.mubr.msk.bf16.mxu0 %vm699_vm2, %v3212_v2 }
  0x84   : > { %3133 = vmatprep.mubr.msk.bf16.mxu1 %vm699_vm2, %v3213_v3 }
  0x8a   : > { %3070 = vmatmul.mubr.msk.bf16.gmra.mrb[60].mxu0 %vm699_vm2, %v3214_v4 }
  0x8b   : > { %3134 = vmatmul.mubr.msk.bf16.gmra.mrb[60].mxu1 %vm699_vm2, %v3215_v5 }
  0xe5   : > { %v3011_v7 = vpop.f32.mrb[0].mxu0 }
  0xe6   : > { %v942_v8 = vadd.f32 %v3011_v7, %v3413_v6  ;;  %v3075_v9 = vpop.f32.mrb[0].mxu1  ;;  %v933_v10 = vpop.f32.mrb[1].mxu0 }
  0xe7   : > { %v1198_v12 = vadd.f32 %v3075_v9, %v3413_v6  ;;  %v934_v13 = vadd.f32 %v3413_v6, %v933_v10  ;;  %v1189_v14 = vpop.f32.mrb[1].mxu1  ;;  %v3012_v15 = vpop.f32.mrb[2].mxu0 }
  0xe8   : > { %v1446_v16 = vmax.f32 %v942_v8, 0.0  ;;  %v1190_v17 = vadd.f32 %v3413_v6, %v1189_v14  ;;  %v945_v18 = vadd.f32 %v3012_v15, %v3413_v6  ;;  %v3076_v19 = vpop.f32.mrb[2].mxu1  ;;  %v936_v20 = vpop.f32.mrb[3].mxu0 }
  0xe9   : > { %v1510_v22 = vmax.f32 %v1198_v12, 0.0  ;;  %v1444_v23 = vmax.f32 %v934_v13, 0.0  ;;  %v1201_v24 = vadd.f32 %v3076_v19, %v3413_v6  ;;  %v937_v25 = vadd.f32 %v3413_v6, %v936_v20  ;;  %v1192_v26 = vpop.f32.mrb[3].mxu1 }
  0xea   : > { %v1581_v27 = vmul.f32 %v3419_v11, %v1446_v16  ;;  %v1508_v28 = vmax.f32 %v1190_v17, 0.0  ;;  %v1447_v29 = vmax.f32 %v945_v18, 0.0  ;;  %v1193_v30 = vadd.f32 %v3413_v6, %v1192_v26 }
  0xeb   : > { %v1645_v31 = vmul.f32 %v3419_v11, %v1510_v22  ;;  %v1579_v32 = vmul.f32 %v3419_v11, %v1444_v23  ;;  %v1511_v33 = vmax.f32 %v1201_v24, 0.0  ;;  %v1445_v34 = vmax.f32 %v937_v25, 0.0 }
  0xec   : > { %v1716_v35 = vadd.f32 %v3428_v21, %v1581_v27  ;;  %v1643_v36 = vmul.f32 %v3419_v11, %v1508_v28  ;;  %v1582_v37 = vmul.f32 %v3419_v11, %v1447_v29  ;;  %v1509_v38 = vmax.f32 %v1193_v30, 0.0 }
  0xed   : > { %v1780_v39 = vadd.f32 %v3428_v21, %v1645_v31  ;;  %v1714_v40 = vadd.f32 %v3428_v21, %v1579_v32  ;;  %v1646_v41 = vmul.f32 %v3419_v11, %v1511_v33  ;;  %v1580_v42 = vmul.f32 %v3419_v11, %v1445_v34  ;;  %v3015_v43 = vpop.f32.mrb[4].mxu0 }
  0xee   : > { %v2813_v44 = vpack.c.bf16 %v1716_v35, %v1716_v35  ;;  %v1778_v45 = vadd.f32 %v3428_v21, %v1643_v36  ;;  %v1717_v46 = vadd.f32 %v3428_v21, %v1582_v37  ;;  %v1644_v47 = vmul.f32 %v3419_v11, %v1509_v38  ;;  %v3079_v48 = vpop.f32.mrb[4].mxu1  ;;  %v949_v49 = vpop.f32.mrb[5].mxu0 }
  0xef   : > { %v2877_v50 = vpack.c.bf16 %v1780_v39, %v1780_v39  ;;  %v2811_v51 = vpack.c.bf16 %v1714_v40, %v1714_v40  ;;  %v1781_v52 = vadd.f32 %v3428_v21, %v1646_v41  ;;  %v1715_v53 = vadd.f32 %v3428_v21, %v1580_v42  ;;  %v1205_v54 = vpop.f32.mrb[5].mxu1  ;;  %v3016_v55 = vpop.f32.mrb[6].mxu0 }
  0xf0   : > { %2357 = vst.msk [vmem:[%s3444_s12 + $0x8] sm:$0xf] %vm2354_vm3, %v2813_v44  ;;  %v2875_v56 = vpack.c.bf16 %v1778_v45, %v1778_v45  ;;  %v2814_v57 = vpack.c.bf16 %v1717_v46, %v1717_v46  ;;  %v1779_v58 = vadd.f32 %v3428_v21, %v1644_v47  ;;  %v958_v59 = vadd.f32 %v3015_v43, %v3413_v6  ;;  %v3080_v60 = vpop.f32.mrb[6].mxu1  ;;  %v952_v61 = vpop.f32.mrb[7].mxu0 }
  0xf1   : > { %2421 = vst.msk [vmem:[%s3444_s12 + $0x108] sm:$0xf] %vm2354_vm3, %v2877_v50  ;;  %2355 = vst.msk [vmem:[%s3444_s12] sm:$0xf] %vm2354_vm3, %v2811_v51  ;;  %v2878_v62 = vpack.c.bf16 %v1781_v52, %v1781_v52  ;;  %v2812_v63 = vpack.c.bf16 %v1715_v53, %v1715_v53  ;;  %v1214_v0 = vadd.f32 %v3079_v48, %v3413_v6  ;;  %v1208_v2 = vpop.f32.mrb[7].mxu1 }
  0xf2   : > { %v950_v1 = vadd.f32 %v3413_v6, %v949_v49  ;;  %2419 = vst.msk [vmem:[%s3444_s12 + $0x100] sm:$0xf] %vm2354_vm3, %v2875_v56  ;;  %2358 = vst.msk [vmem:[%s3444_s12 + $0xc] sm:$0xf] %vm2354_vm3, %v2814_v57  ;;  %v2876_v3 = vpack.c.bf16 %v1779_v58, %v1779_v58  ;;  %v1450_v4 = vmax.f32 %v958_v59, 0.0  ;;  %v1206_v5 = vadd.f32 %v3413_v6, %v1205_v54 }
  0xf3   : > { %v961_v7 = vadd.f32 %v3016_v55, %v3413_v6  ;;  %2422 = vst.msk [vmem:[%s3444_s12 + $0x10c] sm:$0xf] %vm2354_vm3, %v2878_v62  ;;  %2356 = vst.msk [vmem:[%s3444_s12 + $0x4] sm:$0xf] %vm2354_vm3, %v2812_v63  ;;  %v1514_v8 = vmax.f32 %v1214_v0, 0.0  ;;  %v1217_v10 = vadd.f32 %v3080_v60, %v3413_v6  ;;  %v953_v12 = vadd.f32 %v3413_v6, %v952_v61 }
  0xf4   : > { %v1448_v9 = vmax.f32 %v950_v1, 0.0  ;;  %2420 = vst.msk [vmem:[%s3444_s12 + $0x104] sm:$0xf] %vm2354_vm3, %v2876_v3  ;;  %v1585_v13 = vmul.f32 %v3419_v11, %v1450_v4  ;;  %v1512_v14 = vmax.f32 %v1206_v5, 0.0  ;;  %v1209_v16 = vadd.f32 %v3413_v6, %v1208_v2 }
  0xf5   : > { %v1451_v15 = vmax.f32 %v961_v7, 0.0  ;;  %v1649_v17 = vmul.f32 %v3419_v11, %v1514_v8  ;;  %v1515_v19 = vmax.f32 %v1217_v10, 0.0  ;;  %v1449_v20 = vmax.f32 %v953_v12, 0.0  ;;  %v3019_v22 = vpop.f32.mrb[8].mxu0 }
  0xf6   : > { %v1583_v18 = vmul.f32 %v3419_v11, %v1448_v9  ;;  %v1720_v23 = vadd.f32 %v3428_v21, %v1585_v13  ;;  %v1647_v24 = vmul.f32 %v3419_v11, %v1512_v14  ;;  %v1513_v26 = vmax.f32 %v1209_v16, 0.0  ;;  %v3083_v27 = vpop.f32.mrb[8].mxu1  ;;  %v965_v28 = vpop.f32.mrb[9].mxu0 }
  0xf7   : > { %v1586_v25 = vmul.f32 %v3419_v11, %v1451_v15  ;;  %v1784_v29 = vadd.f32 %v3428_v21, %v1649_v17  ;;  %v1650_v31 = vmul.f32 %v3419_v11, %v1515_v19  ;;  %v1584_v32 = vmul.f32 %v3419_v11, %v1449_v20  ;;  %v1221_v33 = vpop.f32.mrb[9].mxu1  ;;  %v3020_v34 = vpop.f32.mrb[10].mxu0 }
  0xf8   : > { %v1718_v30 = vadd.f32 %v3428_v21, %v1583_v18  ;;  %v2817_v35 = vpack.c.bf16 %v1720_v23, %v1720_v23  ;;  %v1782_v36 = vadd.f32 %v3428_v21, %v1647_v24  ;;  %v1648_v38 = vmul.f32 %v3419_v11, %v1513_v26  ;;  %v3084_v39 = vpop.f32.mrb[10].mxu1  ;;  %v968_v40 = vpop.f32.mrb[11].mxu0 }
  0xf9   : > { %v1721_v37 = vadd.f32 %v3428_v21, %v1586_v25  ;;  %v2881_v41 = vpack.c.bf16 %v1784_v29, %v1784_v29  ;;  %v1785_v43 = vadd.f32 %v3428_v21, %v1650_v31  ;;  %v1719_v44 = vadd.f32 %v3428_v21, %v1584_v32  ;;  %v1224_v45 = vpop.f32.mrb[11].mxu1 }
  0xfa   : > { %v2815_v42 = vpack.c.bf16 %v1718_v30, %v1718_v30  ;;  %2361 = vst.msk [vmem:[%s3444_s12 + $0x18] sm:$0xf] %vm2354_vm3, %v2817_v35  ;;  %v2879_v46 = vpack.c.bf16 %v1782_v36, %v1782_v36  ;;  %v1783_v48 = vadd.f32 %v3428_v21, %v1648_v38  ;;  %v974_v49 = vadd.f32 %v3019_v22, %v3413_v6 }
  0xfb   : > { %v2818_v47 = vpack.c.bf16 %v1721_v37, %v1721_v37  ;;  %2425 = vst.msk [vmem:[%s3444_s12 + $0x118] sm:$0xf] %vm2354_vm3, %v2881_v41  ;;  %v2882_v50 = vpack.c.bf16 %v1785_v43, %v1785_v43  ;;  %v2816_v51 = vpack.c.bf16 %v1719_v44, %v1719_v44  ;;  %v1230_v52 = vadd.f32 %v3083_v27, %v3413_v6 }
  0xfc   : > { %2359 = vst.msk [vmem:[%s3444_s12 + $0x10] sm:$0xf] %vm2354_vm3, %v2815_v42  ;;  %v966_v53 = vadd.f32 %v3413_v6, %v965_v28  ;;  %2423 = vst.msk [vmem:[%s3444_s12 + $0x110] sm:$0xf] %vm2354_vm3, %v2879_v46  ;;  %v2880_v54 = vpack.c.bf16 %v1783_v48, %v1783_v48  ;;  %v1454_v55 = vmax.f32 %v974_v49, 0.0  ;;  %v1222_v56 = vadd.f32 %v3413_v6, %v1221_v33 }
  0xfd   : > { %2362 = vst.msk [vmem:[%s3444_s12 + $0x1c] sm:$0xf] %vm2354_vm3, %v2818_v47  ;;  %v977_v57 = vadd.f32 %v3020_v34, %v3413_v6  ;;  %2426 = vst.msk [vmem:[%s3444_s12 + $0x11c] sm:$0xf] %vm2354_vm3, %v2882_v50  ;;  %v1518_v58 = vmax.f32 %v1230_v52, 0.0  ;;  %v1233_v60 = vadd.f32 %v3084_v39, %v3413_v6  ;;  %v969_v61 = vadd.f32 %v3413_v6, %v968_v40  ;;  %v3023_v62 = vpop.f32.mrb[12].mxu0 }
  0xfe   : > { %2360 = vst.msk [vmem:[%s3444_s12 + $0x14] sm:$0xf] %vm2354_vm3, %v2816_v51  ;;  %v1452_v59 = vmax.f32 %v966_v53, 0.0  ;;  %2424 = vst.msk [vmem:[%s3444_s12 + $0x114] sm:$0xf] %vm2354_vm3, %v2880_v54  ;;  %v1589_v63 = vmul.f32 %v3419_v11, %v1454_v55  ;;  %v1516_v0 = vmax.f32 %v1222_v56, 0.0  ;;  %v1225_v2 = vadd.f32 %v3413_v6, %v1224_v45 }
  0xff   : > { %v1455_v1 = vmax.f32 %v977_v57, 0.0  ;;  %v3087_v3 = vpop.f32.mrb[12].mxu1  ;;  %v981_v4 = vpop.f32.mrb[13].mxu0  ;;  %v1653_v5 = vmul.f32 %v3419_v11, %v1518_v58  ;;  %v1519_v8 = vmax.f32 %v1233_v60, 0.0  ;;  %v1453_v9 = vmax.f32 %v969_v61, 0.0 }
 0x100   : > { %v1587_v7 = vmul.f32 %v3419_v11, %v1452_v59  ;;  %v1237_v10 = vpop.f32.mrb[13].mxu1  ;;  %v3024_v12 = vpop.f32.mrb[14].mxu0  ;;  %v1724_v13 = vadd.f32 %v3428_v21, %v1589_v63  ;;  %v1651_v14 = vmul.f32 %v3419_v11, %v1516_v0  ;;  %v1517_v16 = vmax.f32 %v1225_v2, 0.0 }
 0x101   : > { %v1590_v15 = vmul.f32 %v3419_v11, %v1455_v1  ;;  %v3088_v17 = vpop.f32.mrb[14].mxu1  ;;  %v984_v18 = vpop.f32.mrb[15].mxu0  ;;  %v1788_v19 = vadd.f32 %v3428_v21, %v1653_v5  ;;  %v1654_v22 = vmul.f32 %v3419_v11, %v1519_v8  ;;  %v1588_v23 = vmul.f32 %v3419_v11, %v1453_v9 }
 0x102   : > { %v1722_v20 = vadd.f32 %v3428_v21, %v1587_v7  ;;  %v1240_v24 = vpop.f32.mrb[15].mxu1  ;;  %v2821_v25 = vpack.c.bf16 %v1724_v13, %v1724_v13  ;;  %v1786_v26 = vadd.f32 %v3428_v21, %v1651_v14  ;;  %v1652_v28 = vmul.f32 %v3419_v11, %v1517_v16 }
 0x103   : > { %v1725_v27 = vadd.f32 %v3428_v21, %v1590_v15  ;;  %v2885_v29 = vpack.c.bf16 %v1788_v19, %v1788_v19  ;;  %v1789_v31 = vadd.f32 %v3428_v21, %v1654_v22  ;;  %v1723_v32 = vadd.f32 %v3428_v21, %v1588_v23 }
 0x104   : > { %v2819_v30 = vpack.c.bf16 %v1722_v20, %v1722_v20  ;;  %2365 = vst.msk [vmem:[%s3444_s12 + $0x28] sm:$0xf] %vm2354_vm3, %v2821_v25  ;;  %v2883_v33 = vpack.c.bf16 %v1786_v26, %v1786_v26  ;;  %v1787_v35 = vadd.f32 %v3428_v21, %v1652_v28  ;;  %v990_v36 = vadd.f32 %v3023_v62, %v3413_v6 }
 0x105   : > { %v2822_v34 = vpack.c.bf16 %v1725_v27, %v1725_v27  ;;  %2429 = vst.msk [vmem:[%s3444_s12 + $0x128] sm:$0xf] %vm2354_vm3, %v2885_v29  ;;  %v2886_v37 = vpack.c.bf16 %v1789_v31, %v1789_v31  ;;  %v2820_v38 = vpack.c.bf16 %v1723_v32, %v1723_v32  ;;  %v1246_v39 = vadd.f32 %v3087_v3, %v3413_v6  ;;  %v3027_v41 = vpop.f32.mrb[16].mxu0 }
 0x106   : > { %2363 = vst.msk [vmem:[%s3444_s12 + $0x20] sm:$0xf] %vm2354_vm3, %v2819_v30  ;;  %v982_v40 = vadd.f32 %v3413_v6, %v981_v4  ;;  %2427 = vst.msk [vmem:[%s3444_s12 + $0x120] sm:$0xf] %vm2354_vm3, %v2883_v33  ;;  %v2884_v42 = vpack.c.bf16 %v1787_v35, %v1787_v35  ;;  %v1458_v43 = vmax.f32 %v990_v36, 0.0  ;;  %v1238_v44 = vadd.f32 %v3413_v6, %v1237_v10  ;;  %v3091_v46 = vpop.f32.mrb[16].mxu1 }
 0x107   : > { %2366 = vst.msk [vmem:[%s3444_s12 + $0x2c] sm:$0xf] %vm2354_vm3, %v2822_v34  ;;  %v993_v45 = vadd.f32 %v3024_v12, %v3413_v6  ;;  %v997_v47 = vpop.f32.mrb[17].mxu0  ;;  %2430 = vst.msk [vmem:[%s3444_s12 + $0x12c] sm:$0xf] %vm2354_vm3, %v2886_v37  ;;  %v1522_v48 = vmax.f32 %v1246_v39, 0.0  ;;  %v1249_v50 = vadd.f32 %v3088_v17, %v3413_v6  ;;  %v985_v51 = vadd.f32 %v3413_v6, %v984_v18 }
 0x108   : > { %2364 = vst.msk [vmem:[%s3444_s12 + $0x24] sm:$0xf] %vm2354_vm3, %v2820_v38  ;;  %v1456_v49 = vmax.f32 %v982_v40, 0.0  ;;  %v1253_v52 = vpop.f32.mrb[17].mxu1  ;;  %v3028_v53 = vpop.f32.mrb[18].mxu0  ;;  %v1593_v54 = vmul.f32 %v3419_v11, %v1458_v43  ;;  %v1520_v55 = vmax.f32 %v1238_v44, 0.0  ;;  %v1241_v57 = vadd.f32 %v3413_v6, %v1240_v24 }
 0x109   : > { %2428 = vst.msk [vmem:[%s3444_s12 + $0x124] sm:$0xf] %vm2354_vm3, %v2884_v42  ;;  %v1459_v56 = vmax.f32 %v993_v45, 0.0  ;;  %v3092_v58 = vpop.f32.mrb[18].mxu1  ;;  %v1000_v59 = vpop.f32.mrb[19].mxu0  ;;  %v1657_v60 = vmul.f32 %v3419_v11, %v1522_v48  ;;  %v1523_v62 = vmax.f32 %v1249_v50, 0.0  ;;  %v1006_v24 = vadd.f32 %v3027_v41, %v3413_v6 }
 0x10a   : > { %v1591_v61 = vmul.f32 %v3419_v11, %v1456_v49  ;;  %v1457_v63 = vmax.f32 %v985_v51, 0.0  ;;  %v1256_v0 = vpop.f32.mrb[19].mxu1  ;;  %v1728_v1 = vadd.f32 %v3428_v21, %v1593_v54  ;;  %v1655_v2 = vmul.f32 %v3419_v11, %v1520_v55 }
 0x10b   : > { %v1594_v3 = vmul.f32 %v3419_v11, %v1459_v56  ;;  %v1521_v4 = vmax.f32 %v1241_v57, 0.0  ;;  %v1792_v5 = vadd.f32 %v3428_v21, %v1657_v60  ;;  %v1658_v8 = vmul.f32 %v3419_v11, %v1523_v62 }
 0x10c   : > { %v1726_v7 = vadd.f32 %v3428_v21, %v1591_v61  ;;  %v1592_v9 = vmul.f32 %v3419_v11, %v1457_v63  ;;  %v2825_v10 = vpack.c.bf16 %v1728_v1, %v1728_v1  ;;  %v1790_v12 = vadd.f32 %v3428_v21, %v1655_v2 }
 0x10d   : > { %v1729_v13 = vadd.f32 %v3428_v21, %v1594_v3  ;;  %v1656_v14 = vmul.f32 %v3419_v11, %v1521_v4  ;;  %v2889_v15 = vpack.c.bf16 %v1792_v5, %v1792_v5  ;;  %v1793_v17 = vadd.f32 %v3428_v21, %v1658_v8  ;;  %v3575_v19 = vpop.f32.mrb[20].mxu0 }
 0x10e   : > { %v2823_v16 = vpack.c.bf16 %v1726_v7, %v1726_v7  ;;  %v1727_v18 = vadd.f32 %v3428_v21, %v1592_v9  ;;  %2369 = vst.msk [vmem:[%s3444_s12 + $0x38] sm:$0xf] %vm2354_vm3, %v2825_v10  ;;  %v2887_v20 = vpack.c.bf16 %v1790_v12, %v1790_v12  ;;  %v3581_v25 = vpop.f32.mrb[20].mxu1  ;;  %v3583_v26 = vpop.f32.mrb[21].mxu0  ;;  %v1262_v29 = vadd.f32 %v3091_v46, %v3413_v6 }
 0x10f   : > { %v2826_v22 = vpack.c.bf16 %v1729_v13, %v1729_v13  ;;  %v1791_v23 = vadd.f32 %v3428_v21, %v1656_v14  ;;  %2433 = vst.msk [vmem:[%s3444_s12 + $0x138] sm:$0xf] %vm2354_vm3, %v2889_v15  ;;  %v2890_v27 = vpack.c.bf16 %v1793_v17, %v1793_v17  ;;  %v998_v30 = vadd.f32 %v3413_v6, %v997_v47  ;;  %v3591_v31 = vpop.f32.mrb[21].mxu1  ;;  %v3593_v32 = vpop.f32.mrb[22].mxu0 }
 0x110   : > { %2367 = vst.msk [vmem:[%s3444_s12 + $0x30] sm:$0xf] %vm2354_vm3, %v2823_v16  ;;  %v2824_v28 = vpack.c.bf16 %v1727_v18, %v1727_v18  ;;  %2431 = vst.msk [vmem:[%s3444_s12 + $0x130] sm:$0xf] %vm2354_vm3, %v2887_v20  ;;  %v1462_v34 = vmax.f32 %v1006_v24, 0.0  ;;  %v1254_v35 = vadd.f32 %v3413_v6, %v1253_v52  ;;  %v1009_v36 = vadd.f32 %v3028_v53, %v3413_v6  ;;  %v3601_v37 = vpop.f32.mrb[22].mxu1 }
 0x111   : > { %2370 = vst.msk [vmem:[%s3444_s12 + $0x3c] sm:$0xf] %vm2354_vm3, %v2826_v22  ;;  %v2888_v33 = vpack.c.bf16 %v1791_v23, %v1791_v23  ;;  %v3603_v38 = vpop.f32.mrb[23].mxu0  ;;  %2434 = vst.msk [vmem:[%s3444_s12 + $0x13c] sm:$0xf] %vm2354_vm3, %v2890_v27  ;;  %v1526_v39 = vmax.f32 %v1262_v29, 0.0  ;;  %v1265_v41 = vadd.f32 %v3092_v58, %v3413_v6  ;;  %v1001_v42 = vadd.f32 %v3413_v6, %v1000_v59 }
 0x112   : > { %2368 = vst.msk [vmem:[%s3444_s12 + $0x34] sm:$0xf] %vm2354_vm3, %v2824_v28  ;;  %v1460_v40 = vmax.f32 %v998_v30, 0.0  ;;  %v1272_v43 = vpop.f32.mrb[23].mxu1  ;;  %v1597_v44 = vmul.f32 %v3419_v11, %v1462_v34  ;;  %v1524_v45 = vmax.f32 %v1254_v35, 0.0  ;;  %v1463_v46 = vmax.f32 %v1009_v36, 0.0 }
 0x113   : > { %2432 = vst.msk [vmem:[%s3444_s12 + $0x134] sm:$0xf] %vm2354_vm3, %v2888_v33  ;;  %v1257_v47 = vadd.f32 %v3413_v6, %v1256_v0  ;;  %v1661_v48 = vmul.f32 %v3419_v11, %v1526_v39  ;;  %v1527_v50 = vmax.f32 %v1265_v41, 0.0  ;;  %v1461_v51 = vmax.f32 %v1001_v42, 0.0 }
 0x114   : > { %v1595_v49 = vmul.f32 %v3419_v11, %v1460_v40  ;;  %v1732_v52 = vadd.f32 %v3428_v21, %v1597_v44  ;;  %v1659_v53 = vmul.f32 %v3419_v11, %v1524_v45  ;;  %v1598_v54 = vmul.f32 %v3419_v11, %v1463_v46 }
 0x115   : > { %v1525_v55 = vmax.f32 %v1257_v47, 0.0  ;;  %v1796_v56 = vadd.f32 %v3428_v21, %v1661_v48  ;;  %v1662_v58 = vmul.f32 %v3419_v11, %v1527_v50  ;;  %v1596_v59 = vmul.f32 %v3419_v11, %v1461_v51  ;;  %v3624_v60 = vpop.f32.mrb[24].mxu0 }
 0x116   : > { %v1730_v57 = vadd.f32 %v3428_v21, %v1595_v49  ;;  %v2829_v61 = vpack.c.bf16 %v1732_v52, %v1732_v52  ;;  %v1794_v62 = vadd.f32 %v3428_v21, %v1659_v53  ;;  %v1733_v63 = vadd.f32 %v3428_v21, %v1598_v54  ;;  %v3629_v1 = vpop.f32.mrb[24].mxu1  ;;  %v3631_v2 = vpop.f32.mrb[25].mxu0 }
 0x117   : > { %v1660_v0 = vmul.f32 %v3419_v11, %v1525_v55  ;;  %v2893_v3 = vpack.c.bf16 %v1796_v56, %v1796_v56  ;;  %v1797_v5 = vadd.f32 %v3428_v21, %v1662_v58  ;;  %v1731_v7 = vadd.f32 %v3428_v21, %v1596_v59  ;;  %v3635_v8 = vpop.f32.mrb[25].mxu1  ;;  %v3637_v9 = vpop.f32.mrb[26].mxu0 }
 0x118   : > { %v2827_v4 = vpack.c.bf16 %v1730_v57, %v1730_v57  ;;  %2373 = vst.msk [vmem:[%s3444_s12 + $0x48] sm:$0xf] %vm2354_vm3, %v2829_v61  ;;  %v2891_v10 = vpack.c.bf16 %v1794_v62, %v1794_v62  ;;  %v2830_v12 = vpack.c.bf16 %v1733_v63, %v1733_v63  ;;  %v1022_v14 = vadd.f32 %v3575_v19, %v3413_v6  ;;  %v3644_v15 = vpop.f32.mrb[26].mxu1  ;;  %v3646_v16 = vpop.f32.mrb[27].mxu0 }
 0x119   : > { %v1795_v13 = vadd.f32 %v3428_v21, %v1660_v0  ;;  %2437 = vst.msk [vmem:[%s3444_s12 + $0x148] sm:$0xf] %vm2354_vm3, %v2893_v3  ;;  %v2894_v17 = vpack.c.bf16 %v1797_v5, %v1797_v5  ;;  %v2828_v18 = vpack.c.bf16 %v1731_v7, %v1731_v7  ;;  %v1278_v20 = vadd.f32 %v3581_v25, %v3413_v6  ;;  %v3656_v19 = vpop.f32.mrb[27].mxu1 }
 0x11a   : > { %2371 = vst.msk [vmem:[%s3444_s12 + $0x40] sm:$0xf] %vm2354_vm3, %v2827_v4  ;;  %v1014_v22 = vadd.f32 %v3413_v6, %v3583_v26  ;;  %2435 = vst.msk [vmem:[%s3444_s12 + $0x140] sm:$0xf] %vm2354_vm3, %v2891_v10  ;;  %v1466_v24 = vmax.f32 %v1022_v14, 0.0  ;;  %v1270_v27 = vadd.f32 %v3413_v6, %v3591_v31  ;;  %v1025_v28 = vadd.f32 %v3593_v32, %v3413_v6 }
 0x11b   : > { %2374 = vst.msk [vmem:[%s3444_s12 + $0x4c] sm:$0xf] %vm2354_vm3, %v2830_v12  ;;  %v2892_v23 = vpack.c.bf16 %v1795_v13, %v1795_v13  ;;  %2438 = vst.msk [vmem:[%s3444_s12 + $0x14c] sm:$0xf] %vm2354_vm3, %v2894_v17  ;;  %v1530_v25 = vmax.f32 %v1278_v20, 0.0  ;;  %v1281_v29 = vadd.f32 %v3601_v37, %v3413_v6  ;;  %v1017_v30 = vadd.f32 %v3413_v6, %v3603_v38 }
 0x11c   : > { %2372 = vst.msk [vmem:[%s3444_s12 + $0x44] sm:$0xf] %vm2354_vm3, %v2828_v18  ;;  %v1464_v26 = vmax.f32 %v1014_v22, 0.0  ;;  %v1601_v33 = vmul.f32 %v3419_v11, %v1466_v24  ;;  %v1528_v31 = vmax.f32 %v1270_v27, 0.0  ;;  %v1467_v34 = vmax.f32 %v1025_v28, 0.0 }
 0x11d   : > { %2436 = vst.msk [vmem:[%s3444_s12 + $0x144] sm:$0xf] %vm2354_vm3, %v2892_v23  ;;  %v1273_v32 = vadd.f32 %v3413_v6, %v1272_v43  ;;  %v1665_v35 = vmul.f32 %v3419_v11, %v1530_v25  ;;  %v1531_v39 = vmax.f32 %v1281_v29, 0.0  ;;  %v1465_v40 = vmax.f32 %v1017_v30, 0.0  ;;  %v3680_v41 = vpop.f32.mrb[28].mxu0 }
 0x11e   : > { %v1599_v36 = vmul.f32 %v3419_v11, %v1464_v26  ;;  %v1736_v37 = vadd.f32 %v3428_v21, %v1601_v33  ;;  %v1663_v38 = vmul.f32 %v3419_v11, %v1528_v31  ;;  %v1602_v42 = vmul.f32 %v3419_v11, %v1467_v34  ;;  %v3685_v45 = vpop.f32.mrb[28].mxu1  ;;  %v3687_v46 = vpop.f32.mrb[29].mxu0 }
 0x11f   : > { %v1529_v44 = vmax.f32 %v1273_v32, 0.0  ;;  %v1800_v43 = vadd.f32 %v3428_v21, %v1665_v35  ;;  %v1666_v48 = vmul.f32 %v3419_v11, %v1531_v39  ;;  %v1600_v49 = vmul.f32 %v3419_v11, %v1465_v40  ;;  %v3693_v50 = vpop.f32.mrb[29].mxu1  ;;  %v3695_v51 = vpop.f32.mrb[30].mxu0 }
 0x120   : > { %v1734_v47 = vadd.f32 %v3428_v21, %v1599_v36  ;;  %v2833_v52 = vpack.c.bf16 %v1736_v37, %v1736_v37  ;;  %v1798_v53 = vadd.f32 %v3428_v21, %v1663_v38  ;;  %v1737_v54 = vadd.f32 %v3428_v21, %v1602_v42  ;;  %v3700_v56 = vpop.f32.mrb[30].mxu1  ;;  %v3702_v57 = vpop.f32.mrb[31].mxu0 }
 0x121   : > { %v1664_v55 = vmul.f32 %v3419_v11, %v1529_v44  ;;  %v2897_v58 = vpack.c.bf16 %v1800_v43, %v1800_v43  ;;  %v1801_v61 = vadd.f32 %v3428_v21, %v1666_v48  ;;  %v1735_v62 = vadd.f32 %v3428_v21, %v1600_v49  ;;  %v3706_v63 = vpop.f32.mrb[31].mxu1 }
 0x122   : > { %v2831_v59 = vpack.c.bf16 %v1734_v47, %v1734_v47  ;;  %2377 = vst.msk [vmem:[%s3444_s12 + $0x58] sm:$0xf] %vm2354_vm3, %v2833_v52  ;;  %v2895_v0 = vpack.c.bf16 %v1798_v53, %v1798_v53  ;;  %v2834_v3 = vpack.c.bf16 %v1737_v54, %v1737_v54  ;;  %v1038_v5 = vadd.f32 %v3624_v60, %v3413_v6 }
 0x123   : > { %v1799_v4 = vadd.f32 %v3428_v21, %v1664_v55  ;;  %2441 = vst.msk [vmem:[%s3444_s12 + $0x158] sm:$0xf] %vm2354_vm3, %v2897_v58  ;;  %v2898_v7 = vpack.c.bf16 %v1801_v61, %v1801_v61  ;;  %v2832_v10 = vpack.c.bf16 %v1735_v62, %v1735_v62  ;;  %v1294_v12 = vadd.f32 %v3629_v1, %v3413_v6 }
 0x124   : > { %2375 = vst.msk [vmem:[%s3444_s12 + $0x50] sm:$0xf] %vm2354_vm3, %v2831_v59  ;;  %v1030_v13 = vadd.f32 %v3413_v6, %v3631_v2  ;;  %2439 = vst.msk [vmem:[%s3444_s12 + $0x150] sm:$0xf] %vm2354_vm3, %v2895_v0  ;;  %v1470_v17 = vmax.f32 %v1038_v5, 0.0  ;;  %v1286_v60 = vadd.f32 %v3413_v6, %v3635_v8  ;;  %v1041_v18 = vadd.f32 %v3637_v9, %v3413_v6 }
 0x125   : > { %2378 = vst.msk [vmem:[%s3444_s12 + $0x5c] sm:$0xf] %vm2354_vm3, %v2834_v3  ;;  %v2896_v14 = vpack.c.bf16 %v1799_v4, %v1799_v4  ;;  %2442 = vst.msk [vmem:[%s3444_s12 + $0x15c] sm:$0xf] %vm2354_vm3, %v2898_v7  ;;  %v1534_v1 = vmax.f32 %v1294_v12, 0.0  ;;  %v1297_v2 = vadd.f32 %v3644_v15, %v3413_v6  ;;  %v1033_v22 = vadd.f32 %v3413_v6, %v3646_v16  ;;  %v3737_v23 = vpop.f32.mrb[32].mxu0 }
 0x126   : > { %2376 = vst.msk [vmem:[%s3444_s12 + $0x54] sm:$0xf] %vm2354_vm3, %v2832_v10  ;;  %v1468_v20 = vmax.f32 %v1030_v13, 0.0  ;;  %v1605_v8 = vmul.f32 %v3419_v11, %v1470_v17  ;;  %v1532_v24 = vmax.f32 %v1286_v60, 0.0  ;;  %v1471_v9 = vmax.f32 %v1041_v18, 0.0  ;;  %v3744_v28 = vpop.f32.mrb[32].mxu1 }
 0x127   : > { %2440 = vst.msk [vmem:[%s3444_s12 + $0x154] sm:$0xf] %vm2354_vm3, %v2896_v14  ;;  %v1289_v27 = vadd.f32 %v3413_v6, %v3656_v19  ;;  %v3746_v25 = vpop.f32.mrb[33].mxu0  ;;  %v1669_v15 = vmul.f32 %v3419_v11, %v1534_v1  ;;  %v1535_v16 = vmax.f32 %v1297_v2, 0.0  ;;  %v1469_v29 = vmax.f32 %v1033_v22, 0.0  ;;  %v3750_v30 = vpop.f32.mrb[33].mxu1 }
 0x128   : > { %v1603_v26 = vmul.f32 %v3419_v11, %v1468_v20  ;;  %v3752_v33 = vpop.f32.mrb[34].mxu0  ;;  %v1740_v31 = vadd.f32 %v3428_v21, %v1605_v8  ;;  %v1667_v34 = vmul.f32 %v3419_v11, %v1532_v24  ;;  %v1606_v19 = vmul.f32 %v3419_v11, %v1471_v9  ;;  %v3757_v35 = vpop.f32.mrb[34].mxu1 }
 0x129   : > { %v1533_v32 = vmax.f32 %v1289_v27, 0.0  ;;  %v3759_v36 = vpop.f32.mrb[35].mxu0  ;;  %v1804_v39 = vadd.f32 %v3428_v21, %v1669_v15  ;;  %v1670_v37 = vmul.f32 %v3419_v11, %v1535_v16  ;;  %v1604_v38 = vmul.f32 %v3419_v11, %v1469_v29  ;;  %v3765_v42 = vpop.f32.mrb[35].mxu1 }
 0x12a   : > { %v1738_v40 = vadd.f32 %v3428_v21, %v1603_v26  ;;  %v2837_v44 = vpack.c.bf16 %v1740_v31, %v1740_v31  ;;  %v1802_v43 = vadd.f32 %v3428_v21, %v1667_v34  ;;  %v1741_v47 = vadd.f32 %v3428_v21, %v1606_v19 }
 0x12b   : > { %v1668_v48 = vmul.f32 %v3419_v11, %v1533_v32  ;;  %v2901_v49 = vpack.c.bf16 %v1804_v39, %v1804_v39  ;;  %v1805_v53 = vadd.f32 %v3428_v21, %v1670_v37  ;;  %v1739_v54 = vadd.f32 %v3428_v21, %v1604_v38 }
 0x12c   : > { %v2835_v52 = vpack.c.bf16 %v1738_v40, %v1738_v40  ;;  %2381 = vst.msk [vmem:[%s3444_s12 + $0x68] sm:$0xf] %vm2354_vm3, %v2837_v44  ;;  %v2899_v55 = vpack.c.bf16 %v1802_v43, %v1802_v43  ;;  %v2838_v58 = vpack.c.bf16 %v1741_v47, %v1741_v47  ;;  %v1054_v61 = vadd.f32 %v3680_v41, %v3413_v6 }
 0x12d   : > { %v1803_v59 = vadd.f32 %v3428_v21, %v1668_v48  ;;  %2445 = vst.msk [vmem:[%s3444_s12 + $0x168] sm:$0xf] %vm2354_vm3, %v2901_v49  ;;  %v2902_v62 = vpack.c.bf16 %v1805_v53, %v1805_v53  ;;  %v2836_v0 = vpack.c.bf16 %v1739_v54, %v1739_v54  ;;  %v1310_v3 = vadd.f32 %v3685_v45, %v3413_v6  ;;  %v3785_v5 = vpop.f32.mrb[36].mxu0 }
 0x12e   : > { %2379 = vst.msk [vmem:[%s3444_s12 + $0x60] sm:$0xf] %vm2354_vm3, %v2835_v52  ;;  %v1046_v4 = vadd.f32 %v3413_v6, %v3687_v46  ;;  %2443 = vst.msk [vmem:[%s3444_s12 + $0x160] sm:$0xf] %vm2354_vm3, %v2899_v55  ;;  %v1474_v7 = vmax.f32 %v1054_v61, 0.0  ;;  %v1302_v10 = vadd.f32 %v3413_v6, %v3693_v50  ;;  %v1057_v12 = vadd.f32 %v3695_v51, %v3413_v6  ;;  %v3795_v13 = vpop.f32.mrb[36].mxu1 }
 0x12f   : > { %2382 = vst.msk [vmem:[%s3444_s12 + $0x6c] sm:$0xf] %vm2354_vm3, %v2838_v58  ;;  %v2900_v41 = vpack.c.bf16 %v1803_v59, %v1803_v59  ;;  %v3797_v45 = vpop.f32.mrb[37].mxu0  ;;  %2446 = vst.msk [vmem:[%s3444_s12 + $0x16c] sm:$0xf] %vm2354_vm3, %v2902_v62  ;;  %v1538_v46 = vmax.f32 %v1310_v3, 0.0  ;;  %v1313_v17 = vadd.f32 %v3700_v56, %v3413_v6  ;;  %v1049_v60 = vadd.f32 %v3413_v6, %v3702_v57 }
 0x130   : > { %2380 = vst.msk [vmem:[%s3444_s12 + $0x64] sm:$0xf] %vm2354_vm3, %v2836_v0  ;;  %v1472_v14 = vmax.f32 %v1046_v4, 0.0  ;;  %v3807_v50 = vpop.f32.mrb[37].mxu1  ;;  %v3809_v18 = vpop.f32.mrb[38].mxu0  ;;  %v1609_v51 = vmul.f32 %v3419_v11, %v1474_v7  ;;  %v1536_v1 = vmax.f32 %v1302_v10, 0.0  ;;  %v1305_v2 = vadd.f32 %v3413_v6, %v3706_v63 }
 0x131   : > { %2444 = vst.msk [vmem:[%s3444_s12 + $0x164] sm:$0xf] %vm2354_vm3, %v2900_v41  ;;  %v1475_v20 = vmax.f32 %v1057_v12, 0.0  ;;  %v3816_v22 = vpop.f32.mrb[38].mxu1  ;;  %v3818_v8 = vpop.f32.mrb[39].mxu0  ;;  %v1673_v56 = vmul.f32 %v3419_v11, %v1538_v46  ;;  %v1539_v24 = vmax.f32 %v1313_v17, 0.0  ;;  %v1070_v54 = vadd.f32 %v3737_v23, %v3413_v6 }
 0x132   : > { %v1607_v57 = vmul.f32 %v3419_v11, %v1472_v14  ;;  %v1473_v9 = vmax.f32 %v1049_v60, 0.0  ;;  %v3822_v27 = vpop.f32.mrb[39].mxu1  ;;  %v1744_v15 = vadd.f32 %v3428_v21, %v1609_v51  ;;  %v1671_v26 = vmul.f32 %v3419_v11, %v1536_v1 }
 0x133   : > { %v1610_v16 = vmul.f32 %v3419_v11, %v1475_v20  ;;  %v1537_v63 = vmax.f32 %v1305_v2, 0.0  ;;  %v1808_v29 = vadd.f32 %v3428_v21, %v1673_v56  ;;  %v1674_v34 = vmul.f32 %v3419_v11, %v1539_v24 }
 0x134   : > { %v1742_v31 = vadd.f32 %v3428_v21, %v1607_v57  ;;  %v1608_v19 = vmul.f32 %v3419_v11, %v1473_v9  ;;  %v2841_v32 = vpack.c.bf16 %v1744_v15, %v1744_v15  ;;  %v1806_v39 = vadd.f32 %v3428_v21, %v1671_v26 }
 0x135   : > { %v1745_v40 = vadd.f32 %v3428_v21, %v1610_v16  ;;  %v1672_v37 = vmul.f32 %v3419_v11, %v1537_v63  ;;  %v2905_v38 = vpack.c.bf16 %v1808_v29, %v1808_v29  ;;  %v1809_v43 = vadd.f32 %v3428_v21, %v1674_v34  ;;  %v3836_v48 = vpop.f32.mrb[40].mxu0 }
 0x136   : > { %v2839_v44 = vpack.c.bf16 %v1742_v31, %v1742_v31  ;;  %v1743_v47 = vadd.f32 %v3428_v21, %v1608_v19  ;;  %2385 = vst.msk [vmem:[%s3444_s12 + $0x78] sm:$0xf] %vm2354_vm3, %v2841_v32  ;;  %v2903_v49 = vpack.c.bf16 %v1806_v39, %v1806_v39  ;;  %v3843_v55 = vpop.f32.mrb[40].mxu1  ;;  %v3845_v58 = vpop.f32.mrb[41].mxu0  ;;  %v1326_v62 = vadd.f32 %v3744_v28, %v3413_v6 }
 0x137   : > { %v2842_v52 = vpack.c.bf16 %v1745_v40, %v1745_v40  ;;  %v1807_v53 = vadd.f32 %v3428_v21, %v1672_v37  ;;  %2449 = vst.msk [vmem:[%s3444_s12 + $0x178] sm:$0xf] %vm2354_vm3, %v2905_v38  ;;  %v2906_v59 = vpack.c.bf16 %v1809_v43, %v1809_v43  ;;  %v1062_v0 = vadd.f32 %v3413_v6, %v3746_v25  ;;  %v3855_v3 = vpop.f32.mrb[41].mxu1  ;;  %v3857_v23 = vpop.f32.mrb[42].mxu0 }
 0x138   : > { %2383 = vst.msk [vmem:[%s3444_s12 + $0x70] sm:$0xf] %vm2354_vm3, %v2839_v44  ;;  %v2840_v61 = vpack.c.bf16 %v1743_v47, %v1743_v47  ;;  %2447 = vst.msk [vmem:[%s3444_s12 + $0x170] sm:$0xf] %vm2354_vm3, %v2903_v49  ;;  %v1478_v41 = vmax.f32 %v1070_v54, 0.0  ;;  %v1318_v7 = vadd.f32 %v3413_v6, %v3750_v30  ;;  %v1073_v28 = vadd.f32 %v3752_v33, %v3413_v6  ;;  %v3867_v10 = vpop.f32.mrb[42].mxu1 }
 0x139   : > { %2386 = vst.msk [vmem:[%s3444_s12 + $0x7c] sm:$0xf] %vm2354_vm3, %v2842_v52  ;;  %v2904_v4 = vpack.c.bf16 %v1807_v53, %v1807_v53  ;;  %v3869_v25 = vpop.f32.mrb[43].mxu0  ;;  %2450 = vst.msk [vmem:[%s3444_s12 + $0x17c] sm:$0xf] %vm2354_vm3, %v2906_v59  ;;  %v1542_v12 = vmax.f32 %v1326_v62, 0.0  ;;  %v1329_v14 = vadd.f32 %v3757_v35, %v3413_v6  ;;  %v1065_v17 = vadd.f32 %v3413_v6, %v3759_v36 }
 0x13a   : > { %2384 = vst.msk [vmem:[%s3444_s12 + $0x74] sm:$0xf] %vm2354_vm3, %v2840_v61  ;;  %v1476_v46 = vmax.f32 %v1062_v0, 0.0  ;;  %v3879_v30 = vpop.f32.mrb[43].mxu1  ;;  %v1613_v33 = vmul.f32 %v3419_v11, %v1478_v41  ;;  %v1540_v60 = vmax.f32 %v1318_v7, 0.0  ;;  %v1479_v51 = vmax.f32 %v1073_v28, 0.0 }
 0x13b   : > { %2448 = vst.msk [vmem:[%s3444_s12 + $0x174] sm:$0xf] %vm2354_vm3, %v2904_v4  ;;  %v1321_v1 = vadd.f32 %v3413_v6, %v3765_v42  ;;  %v1677_v20 = vmul.f32 %v3419_v11, %v1542_v12  ;;  %v1543_v56 = vmax.f32 %v1329_v14, 0.0  ;;  %v1477_v35 = vmax.f32 %v1065_v17, 0.0  ;;  %v3916_v52 = vld [vmem:[%s4353_s2] ss:$0 sm:$0xff] }
 0x13c   : > { %v1611_v2 = vmul.f32 %v3419_v11, %v1476_v46  ;;  %v1748_v57 = vadd.f32 %v3428_v21, %v1613_v33  ;;  %v1675_v36 = vmul.f32 %v3419_v11, %v1540_v60  ;;  %v1614_v24 = vmul.f32 %v3419_v11, %v1479_v51 }
 0x13d   : > { %v1541_v9 = vmax.f32 %v1321_v1, 0.0  ;;  %v1812_v15 = vadd.f32 %v3428_v21, %v1677_v20  ;;  %v1678_v6 = vmul.f32 %v3419_v11, %v1543_v56  ;;  %v1612_v42 = vmul.f32 %v3419_v11, %v1477_v35  ;;  %v3895_v16 = vpop.f32.mrb[44].mxu0  ;;  %v3967_v20 = vld [vmem:[%s4355_s4] ss:$0 sm:$0xff] }
 0x13e   : > { %v1746_v26 = vadd.f32 %v3428_v21, %v1611_v2  ;;  %v2845_v63 = vpack.c.bf16 %v1748_v57, %v1748_v57  ;;  %v1810_v29 = vadd.f32 %v3428_v21, %v1675_v36  ;;  %v1749_v31 = vadd.f32 %v3428_v21, %v1614_v24  ;;  %v3900_v19 = vpop.f32.mrb[44].mxu1  ;;  %v3902_v32 = vpop.f32.mrb[45].mxu0 }
 0x13f   : > { %v1676_v34 = vmul.f32 %v3419_v11, %v1541_v9  ;;  %v2909_v39 = vpack.c.bf16 %v1812_v15, %v1812_v15  ;;  %v1813_v37 = vadd.f32 %v3428_v21, %v1678_v6  ;;  %v1747_v38 = vadd.f32 %v3428_v21, %v1612_v42  ;;  %v3906_v44 = vpop.f32.mrb[45].mxu1  ;;  %v3908_v43 = vpop.f32.mrb[46].mxu0 }
 0x140   : > { %v2843_v40 = vpack.c.bf16 %v1746_v26, %v1746_v26  ;;  %2389 = vst.msk [vmem:[%s3444_s12 + $0x88] sm:$0xf] %vm2354_vm3, %v2845_v63  ;;  %v2907_v11 = vpack.c.bf16 %v1810_v29, %v1810_v29  ;;  %v2846_v47 = vpack.c.bf16 %v1749_v31, %v1749_v31  ;;  %v1086_v53 = vadd.f32 %v3916_v52, %v3785_v5  ;;  %v3920_v54 = vpop.f32.mrb[46].mxu1  ;;  %v3922_v59 = vpop.f32.mrb[47].mxu0 }
 0x141   : > { %v1811_v49 = vadd.f32 %v3428_v21, %v1676_v34  ;;  %2453 = vst.msk [vmem:[%s3444_s12 + $0x188] sm:$0xf] %vm2354_vm3, %v2909_v39  ;;  %v2910_v61 = vpack.c.bf16 %v1813_v37, %v1813_v37  ;;  %v2844_v21 = vpack.c.bf16 %v1747_v38, %v1747_v38  ;;  %v1342_v62 = vadd.f32 %v3916_v52, %v3795_v13  ;;  %v3932_v5 = vpop.f32.mrb[47].mxu1 }
 0x142   : > { %2387 = vst.msk [vmem:[%s3444_s12 + $0x80] sm:$0xf] %vm2354_vm3, %v2843_v40  ;;  %v1078_v0 = vadd.f32 %v3916_v52, %v3797_v45  ;;  %2451 = vst.msk [vmem:[%s3444_s12 + $0x180] sm:$0xf] %vm2354_vm3, %v2907_v11  ;;  %v1482_v41 = vmax.f32 %v1086_v53, 0.0  ;;  %v1334_v7 = vadd.f32 %v3916_v52, %v3807_v50  ;;  %v1089_v28 = vadd.f32 %v3916_v52, %v3809_v18 }
 0x143   : > { %2390 = vst.msk [vmem:[%s3444_s12 + $0x8c] sm:$0xf] %vm2354_vm3, %v2846_v47  ;;  %v2908_v4 = vpack.c.bf16 %v1811_v49, %v1811_v49  ;;  %2454 = vst.msk [vmem:[%s3444_s12 + $0x18c] sm:$0xf] %vm2354_vm3, %v2910_v61  ;;  %v1546_v13 = vmax.f32 %v1342_v62, 0.0  ;;  %v1345_v12 = vadd.f32 %v3916_v52, %v3816_v22  ;;  %v1081_v46 = vadd.f32 %v3916_v52, %v3818_v8 }
 0x144   : > { %2388 = vst.msk [vmem:[%s3444_s12 + $0x84] sm:$0xf] %vm2354_vm3, %v2844_v21  ;;  %v1480_v45 = vmax.f32 %v1078_v0, 0.0  ;;  %v3955_v50 = vld [vmem:[%s4354_s3] ss:$0 sm:$0xff]  ;;  %v1544_v14 = vmax.f32 %v1334_v7, 0.0  ;;  %v1337_v33 = vadd.f32 %v3916_v52, %v3822_v27  ;;  %v1102_v62 = vadd.f32 %v3916_v52, %v3836_v48 }
 0x145   : > { %2452 = vst.msk [vmem:[%s3444_s12 + $0x184] sm:$0xf] %vm2354_vm3, %v2908_v4  ;;  %v1617_v18 = vmul.f32 %v3955_v50, %v1482_v41  ;;  %v1483_v17 = vmax.f32 %v1089_v28, 0.0  ;;  %v1681_v60 = vmul.f32 %v3955_v50, %v1546_v13  ;;  %v1547_v51 = vmax.f32 %v1345_v12, 0.0  ;;  %v3962_v1 = vpop.f32.mrb[48].mxu0 }
 0x146   : > { %v1615_v22 = vmul.f32 %v3955_v50, %v1480_v45  ;;  %v1481_v8 = vmax.f32 %v1081_v46, 0.0  ;;  %v1679_v56 = vmul.f32 %v3955_v50, %v1544_v14  ;;  %v1545_v27 = vmax.f32 %v1337_v33, 0.0  ;;  %v3972_v57 = vpop.f32.mrb[48].mxu1  ;;  %v3974_v36 = vpop.f32.mrb[49].mxu0 }
 0x147   : > { %v1752_v2 = vadd.f32 %v3967_v20, %v1617_v18  ;;  %v1618_v35 = vmul.f32 %v3955_v50, %v1483_v17  ;;  %v1816_v24 = vadd.f32 %v3967_v20, %v1681_v60  ;;  %v1682_v15 = vmul.f32 %v3955_v50, %v1547_v51  ;;  %v3980_v6 = vpop.f32.mrb[49].mxu1  ;;  %v3982_v42 = vpop.f32.mrb[50].mxu0 }
 0x148   : > { %v1750_v9 = vadd.f32 %v3967_v20, %v1615_v22  ;;  %v1616_v26 = vmul.f32 %v3955_v50, %v1481_v8  ;;  %v1814_v29 = vadd.f32 %v3967_v20, %v1679_v56  ;;  %v1680_v34 = vmul.f32 %v3955_v50, %v1545_v27  ;;  %v3987_v39 = vpop.f32.mrb[50].mxu1  ;;  %v3989_v40 = vpop.f32.mrb[51].mxu0 }
 0x149   : > { %v2849_v63 = vpack.c.bf16 %v1752_v2, %v1752_v2  ;;  %v1753_v31 = vadd.f32 %v3967_v20, %v1618_v35  ;;  %v2913_v37 = vpack.c.bf16 %v1816_v24, %v1816_v24  ;;  %v1817_v11 = vadd.f32 %v3967_v20, %v1682_v15  ;;  %v3993_v49 = vpop.f32.mrb[51].mxu1 }
 0x14a   : > { %v2847_v38 = vpack.c.bf16 %v1750_v9, %v1750_v9  ;;  %v1751_v47 = vadd.f32 %v3967_v20, %v1616_v26  ;;  %v2911_v53 = vpack.c.bf16 %v1814_v29, %v1814_v29  ;;  %v1815_v21 = vadd.f32 %v3967_v20, %v1680_v34 }
 0x14b   : > { %2393 = vst.msk [vmem:[%s3444_s12 + $0x98] sm:$0xf] %vm2354_vm3, %v2849_v63  ;;  %v2850_v61 = vpack.c.bf16 %v1753_v31, %v1753_v31  ;;  %2457 = vst.msk [vmem:[%s3444_s12 + $0x198] sm:$0xf] %vm2354_vm3, %v2913_v37  ;;  %v2914_v0 = vpack.c.bf16 %v1817_v11, %v1817_v11  ;;  %v1358_v41 = vadd.f32 %v3916_v52, %v3843_v55  ;;  %v1486_v13 = vmax.f32 %v1102_v62, 0.0 }
 0x14c   : > { %2391 = vst.msk [vmem:[%s3444_s12 + $0x90] sm:$0xf] %vm2354_vm3, %v2847_v38  ;;  %v2848_v4 = vpack.c.bf16 %v1751_v47, %v1751_v47  ;;  %v1094_v7 = vadd.f32 %v3916_v52, %v3845_v58  ;;  %2455 = vst.msk [vmem:[%s3444_s12 + $0x190] sm:$0xf] %vm2354_vm3, %v2911_v53  ;;  %v2912_v28 = vpack.c.bf16 %v1815_v21, %v1815_v21 }
 0x14d   : > { %2394 = vst.msk [vmem:[%s3444_s12 + $0x9c] sm:$0xf] %vm2354_vm3, %v2850_v61  ;;  %v1350_v48 = vadd.f32 %v3916_v52, %v3855_v3  ;;  %v1105_v45 = vadd.f32 %v3916_v52, %v3857_v23  ;;  %2458 = vst.msk [vmem:[%s3444_s12 + $0x19c] sm:$0xf] %vm2354_vm3, %v2914_v0  ;;  %v1550_v55 = vmax.f32 %v1358_v41, 0.0  ;;  %v1361_v58 = vadd.f32 %v3916_v52, %v3867_v10  ;;  %v4024_v18 = vpop.f32.mrb[52].mxu0 }
 0x14e   : > { %2392 = vst.msk [vmem:[%s3444_s12 + $0x94] sm:$0xf] %vm2354_vm3, %v2848_v4  ;;  %v1484_v12 = vmax.f32 %v1094_v7, 0.0  ;;  %v1097_v46 = vadd.f32 %v3916_v52, %v3869_v25  ;;  %2456 = vst.msk [vmem:[%s3444_s12 + $0x194] sm:$0xf] %vm2354_vm3, %v2912_v28  ;;  %v1621_v3 = vmul.f32 %v3955_v50, %v1486_v13  ;;  %v1353_v17 = vadd.f32 %v3916_v52, %v3879_v30  ;;  %v4031_v33 = vpop.f32.mrb[52].mxu1 }
 0x14f   : > { %v1548_v14 = vmax.f32 %v1350_v48, 0.0  ;;  %v1487_v23 = vmax.f32 %v1105_v45, 0.0  ;;  %v4033_v60 = vpop.f32.mrb[53].mxu0  ;;  %v1685_v10 = vmul.f32 %v3955_v50, %v1550_v55  ;;  %v1551_v25 = vmax.f32 %v1361_v58, 0.0  ;;  %v4037_v8 = vpop.f32.mrb[53].mxu1 }
 0x150   : > { %v1619_v22 = vmul.f32 %v3955_v50, %v1484_v12  ;;  %v1485_v51 = vmax.f32 %v1097_v46, 0.0  ;;  %v4039_v2 = vpop.f32.mrb[54].mxu0  ;;  %v1756_v56 = vadd.f32 %v3967_v20, %v1621_v3  ;;  %v1549_v27 = vmax.f32 %v1353_v17, 0.0  ;;  %v4044_v24 = vpop.f32.mrb[54].mxu1 }
 0x151   : > { %v1683_v35 = vmul.f32 %v3955_v50, %v1548_v14  ;;  %v1622_v30 = vmul.f32 %v3955_v50, %v1487_v23  ;;  %v4046_v9 = vpop.f32.mrb[55].mxu0  ;;  %v1820_v15 = vadd.f32 %v3967_v20, %v1685_v10  ;;  %v1686_v63 = vmul.f32 %v3955_v50, %v1551_v25  ;;  %v4052_v31 = vpop.f32.mrb[55].mxu1 }
 0x152   : > { %v1754_v26 = vadd.f32 %v3967_v20, %v1619_v22  ;;  %v1620_v29 = vmul.f32 %v3955_v50, %v1485_v51  ;;  %v2853_v34 = vpack.c.bf16 %v1756_v56, %v1756_v56  ;;  %v1684_v11 = vmul.f32 %v3955_v50, %v1549_v27 }
 0x153   : > { %v1818_v37 = vadd.f32 %v3967_v20, %v1683_v35  ;;  %v1757_v38 = vadd.f32 %v3967_v20, %v1622_v30  ;;  %v2917_v47 = vpack.c.bf16 %v1820_v15, %v1820_v15  ;;  %v1821_v61 = vadd.f32 %v3967_v20, %v1686_v63 }
 0x154   : > { %v2851_v53 = vpack.c.bf16 %v1754_v26, %v1754_v26  ;;  %v1755_v21 = vadd.f32 %v3967_v20, %v1620_v29  ;;  %2397 = vst.msk [vmem:[%s3444_s12 + $0xa8] sm:$0xf] %vm2354_vm3, %v2853_v34  ;;  %v1819_v4 = vadd.f32 %v3967_v20, %v1684_v11  ;;  %v1118_v41 = vadd.f32 %v3916_v52, %v3895_v16 }
 0x155   : > { %v2915_v62 = vpack.c.bf16 %v1818_v37, %v1818_v37  ;;  %v2854_v0 = vpack.c.bf16 %v1757_v38, %v1757_v38  ;;  %2461 = vst.msk [vmem:[%s3444_s12 + $0x1a8] sm:$0xf] %vm2354_vm3, %v2917_v47  ;;  %v2918_v7 = vpack.c.bf16 %v1821_v61, %v1821_v61  ;;  %v1374_v13 = vadd.f32 %v3916_v52, %v3900_v19  ;;  %v4072_v45 = vpop.f32.mrb[56].mxu0 }
 0x156   : > { %2395 = vst.msk [vmem:[%s3444_s12 + $0xa0] sm:$0xf] %vm2354_vm3, %v2851_v53  ;;  %v2852_v28 = vpack.c.bf16 %v1755_v21, %v1755_v21  ;;  %v1110_v48 = vadd.f32 %v3916_v52, %v3902_v32  ;;  %v2916_v16 = vpack.c.bf16 %v1819_v4, %v1819_v4  ;;  %v1490_v55 = vmax.f32 %v1118_v41, 0.0  ;;  %v4082_v46 = vpop.f32.mrb[56].mxu1  ;;  %v4084_v19 = vpop.f32.mrb[57].mxu0 }
 0x157   : > { %2459 = vst.msk [vmem:[%s3444_s12 + $0x1a0] sm:$0xf] %vm2354_vm3, %v2915_v62  ;;  %2398 = vst.msk [vmem:[%s3444_s12 + $0xac] sm:$0xf] %vm2354_vm3, %v2854_v0  ;;  %v1366_v12 = vadd.f32 %v3916_v52, %v3906_v44  ;;  %v1121_v58 = vadd.f32 %v3916_v52, %v3908_v43  ;;  %v1554_v32 = vmax.f32 %v1374_v13, 0.0  ;;  %v1377_v14 = vadd.f32 %v3916_v52, %v3920_v54  ;;  %v4094_v44 = vpop.f32.mrb[57].mxu1 }
 0x158   : > { %2462 = vst.msk [vmem:[%s3444_s12 + $0x1ac] sm:$0xf] %vm2354_vm3, %v2918_v7  ;;  %2396 = vst.msk [vmem:[%s3444_s12 + $0xa4] sm:$0xf] %vm2354_vm3, %v2852_v28  ;;  %v1488_v3 = vmax.f32 %v1110_v48, 0.0  ;;  %v1113_v23 = vadd.f32 %v3916_v52, %v3922_v59  ;;  %v4096_v17 = vpop.f32.mrb[58].mxu0  ;;  %v1625_v43 = vmul.f32 %v3955_v50, %v1490_v55  ;;  %v1369_v25 = vadd.f32 %v3916_v52, %v3932_v5 }
 0x159   : > { %2460 = vst.msk [vmem:[%s3444_s12 + $0x1a4] sm:$0xf] %vm2354_vm3, %v2916_v16  ;;  %v1552_v10 = vmax.f32 %v1366_v12, 0.0  ;;  %v1491_v22 = vmax.f32 %v1121_v58, 0.0  ;;  %v4103_v51 = vpop.f32.mrb[58].mxu1  ;;  %v4105_v56 = vpop.f32.mrb[59].mxu0  ;;  %v1689_v54 = vmul.f32 %v3955_v50, %v1554_v32  ;;  %v1134_v48 = vadd.f32 %v3916_v52, %v3962_v1 }
 0x15a   : > { %v1623_v59 = vmul.f32 %v3955_v50, %v1488_v3  ;;  %v1555_v35 = vmax.f32 %v1377_v14, 0.0  ;;  %v1489_v30 = vmax.f32 %v1113_v23, 0.0  ;;  %v4109_v27 = vpop.f32.mrb[59].mxu1  ;;  %v1760_v15 = vadd.f32 %v3967_v20, %v1625_v43 }
 0x15b   : > { %v1687_v26 = vmul.f32 %v3955_v50, %v1552_v10  ;;  %v1626_v63 = vmul.f32 %v3955_v50, %v1491_v22  ;;  %v1553_v5 = vmax.f32 %v1369_v25, 0.0  ;;  %v1824_v29 = vadd.f32 %v3967_v20, %v1689_v54 }
 0x15c   : > { %v1758_v34 = vadd.f32 %v3967_v20, %v1623_v59  ;;  %v1690_v37 = vmul.f32 %v3955_v50, %v1555_v35  ;;  %v1624_v38 = vmul.f32 %v3955_v50, %v1489_v30  ;;  %v2857_v11 = vpack.c.bf16 %v1760_v15, %v1760_v15 }
 0x15d   : > { %v1822_v47 = vadd.f32 %v3967_v20, %v1687_v26  ;;  %v1761_v53 = vadd.f32 %v3967_v20, %v1626_v63  ;;  %v1688_v61 = vmul.f32 %v3955_v50, %v1553_v5  ;;  %v2921_v21 = vpack.c.bf16 %v1824_v29, %v1824_v29  ;;  %v4123_v41 = vpop.f32.mrb[60].mxu0 }
 0x15e   : > { %v2855_v62 = vpack.c.bf16 %v1758_v34, %v1758_v34  ;;  %v1825_v0 = vadd.f32 %v3967_v20, %v1690_v37  ;;  %v1759_v4 = vadd.f32 %v3967_v20, %v1624_v38  ;;  %2401 = vst.msk [vmem:[%s3444_s12 + $0xb8] sm:$0xf] %vm2354_vm3, %v2857_v11  ;;  %v4130_v16 = vpop.f32.mrb[60].mxu1  ;;  %v4132_v55 = vpop.f32.mrb[61].mxu0  ;;  %v1390_v32 = vadd.f32 %v3916_v52, %v3972_v57 }
 0x15f   : > { %v2919_v7 = vpack.c.bf16 %v1822_v47, %v1822_v47  ;;  %v2858_v28 = vpack.c.bf16 %v1761_v53, %v1761_v53  ;;  %v1823_v13 = vadd.f32 %v3967_v20, %v1688_v61  ;;  %2465 = vst.msk [vmem:[%s3444_s12 + $0x1b8] sm:$0xf] %vm2354_vm3, %v2921_v21  ;;  %v1126_v3 = vadd.f32 %v3916_v52, %v3974_v36  ;;  %v4142_v14 = vpop.f32.mrb[61].mxu1  ;;  %v4144_v1 = vpop.f32.mrb[62].mxu0 }
 0x160   : > { %2399 = vst.msk [vmem:[%s3444_s12 + $0xb0] sm:$0xf] %vm2354_vm3, %v2855_v62  ;;  %v2922_v12 = vpack.c.bf16 %v1825_v0, %v1825_v0  ;;  %v2856_v58 = vpack.c.bf16 %v1759_v4, %v1759_v4  ;;  %v1494_v43 = vmax.f32 %v1134_v48, 0.0  ;;  %v1382_v10 = vadd.f32 %v3916_v52, %v3980_v6  ;;  %v4154_v22 = vpop.f32.mrb[62].mxu1  ;;  %v4156_v36 = vpop.f32.mrb[63].mxu0 }
 0x161   : > { %2463 = vst.msk [vmem:[%s3444_s12 + $0x1b0] sm:$0xf] %vm2354_vm3, %v2919_v7  ;;  %2402 = vst.msk [vmem:[%s3444_s12 + $0xbc] sm:$0xf] %vm2354_vm3, %v2858_v28  ;;  %v2920_v23 = vpack.c.bf16 %v1823_v13, %v1823_v13  ;;  %v1137_v57 = vadd.f32 %v3916_v52, %v3982_v42  ;;  %v1558_v25 = vmax.f32 %v1390_v32, 0.0  ;;  %v1492_v54 = vmax.f32 %v1126_v3, 0.0 }
 0x162   : > { %2466 = vst.msk [vmem:[%s3444_s12 + $0x1bc] sm:$0xf] %vm2354_vm3, %v2922_v12  ;;  %2400 = vst.msk [vmem:[%s3444_s12 + $0xb4] sm:$0xf] %vm2354_vm3, %v2856_v58  ;;  %v1393_v59 = vadd.f32 %v3916_v52, %v3987_v39  ;;  %v1129_v35 = vadd.f32 %v3916_v52, %v3989_v40  ;;  %v4166_v6 = vpop.f32.mrb[63].mxu1  ;;  %v1629_v42 = vmul.f32 %v3955_v50, %v1494_v43  ;;  %v1556_v30 = vmax.f32 %v1382_v10, 0.0 }
 0x163   : > { %2464 = vst.msk [vmem:[%s3444_s12 + $0x1b4] sm:$0xf] %vm2354_vm3, %v2920_v23  ;;  %v1495_v15 = vmax.f32 %v1137_v57, 0.0  ;;  %v1385_v26 = vadd.f32 %v3916_v52, %v3993_v49  ;;  %v1693_v63 = vmul.f32 %v3955_v50, %v1558_v25  ;;  %v1627_v5 = vmul.f32 %v3955_v50, %v1492_v54 }
 0x164   : > { %v1559_v29 = vmax.f32 %v1393_v59, 0.0  ;;  %v1493_v39 = vmax.f32 %v1129_v35, 0.0  ;;  %v1764_v34 = vadd.f32 %v3967_v20, %v1629_v42  ;;  %v1691_v40 = vmul.f32 %v3955_v50, %v1556_v30 }
 0x165   : > { %v1630_v37 = vmul.f32 %v3955_v50, %v1495_v15  ;;  %v1557_v38 = vmax.f32 %v1385_v26, 0.0  ;;  %v1828_v11 = vadd.f32 %v3967_v20, %v1693_v63  ;;  %v1762_v47 = vadd.f32 %v3967_v20, %v1627_v5 }
 0x166   : > { %v1694_v49 = vmul.f32 %v3955_v50, %v1559_v29  ;;  %v1628_v53 = vmul.f32 %v3955_v50, %v1493_v39  ;;  %v2861_v61 = vpack.c.bf16 %v1764_v34, %v1764_v34  ;;  %v1826_v21 = vadd.f32 %v3967_v20, %v1691_v40 }
 0x167   : > { %v1765_v62 = vadd.f32 %v3967_v20, %v1630_v37  ;;  %v1692_v0 = vmul.f32 %v3955_v50, %v1557_v38  ;;  %v2925_v4 = vpack.c.bf16 %v1828_v11, %v1828_v11  ;;  %v2859_v7 = vpack.c.bf16 %v1762_v47, %v1762_v47 }
 0x168   : > { %v1829_v28 = vadd.f32 %v3967_v20, %v1694_v49  ;;  %v1763_v13 = vadd.f32 %v3967_v20, %v1628_v53  ;;  %2405 = vst.msk [vmem:[%s3444_s12 + $0xc8] sm:$0xf] %vm2354_vm3, %v2861_v61  ;;  %v2923_v48 = vpack.c.bf16 %v1826_v21, %v1826_v21  ;;  %v1150_v32 = vadd.f32 %v3916_v52, %v4024_v18 }
 0x169   : > { %v2862_v12 = vpack.c.bf16 %v1765_v62, %v1765_v62  ;;  %v1827_v58 = vadd.f32 %v3967_v20, %v1692_v0  ;;  %2469 = vst.msk [vmem:[%s3444_s12 + $0x1c8] sm:$0xf] %vm2354_vm3, %v2925_v4  ;;  %2403 = vst.msk [vmem:[%s3444_s12 + $0xc0] sm:$0xf] %vm2354_vm3, %v2859_v7  ;;  %v1406_v43 = vadd.f32 %v3916_v52, %v4031_v33 }
 0x16a   : > { %v2926_v3 = vpack.c.bf16 %v1829_v28, %v1829_v28  ;;  %v2860_v23 = vpack.c.bf16 %v1763_v13, %v1763_v13  ;;  %v1142_v10 = vadd.f32 %v3916_v52, %v4033_v60  ;;  %2467 = vst.msk [vmem:[%s3444_s12 + $0x1c0] sm:$0xf] %vm2354_vm3, %v2923_v48  ;;  %v1498_v25 = vmax.f32 %v1150_v32, 0.0 }
 0x16b   : > { %2406 = vst.msk [vmem:[%s3444_s12 + $0xcc] sm:$0xf] %vm2354_vm3, %v2862_v12  ;;  %v2924_v57 = vpack.c.bf16 %v1827_v58, %v1827_v58  ;;  %v1398_v18 = vadd.f32 %v3916_v52, %v4037_v8  ;;  %v1153_v54 = vadd.f32 %v3916_v52, %v4039_v2  ;;  %v1562_v33 = vmax.f32 %v1406_v43, 0.0 }
 0x16c   : > { %2470 = vst.msk [vmem:[%s3444_s12 + $0x1cc] sm:$0xf] %vm2354_vm3, %v2926_v3  ;;  %2404 = vst.msk [vmem:[%s3444_s12 + $0xc4] sm:$0xf] %vm2354_vm3, %v2860_v23  ;;  %v1496_v59 = vmax.f32 %v1142_v10, 0.0  ;;  %v1409_v60 = vadd.f32 %v3916_v52, %v4044_v24  ;;  %v1145_v35 = vadd.f32 %v3916_v52, %v4046_v9  ;;  %v1633_v42 = vmul.f32 %v3955_v50, %v1498_v25 }
 0x16d   : > { %2468 = vst.msk [vmem:[%s3444_s12 + $0x1c4] sm:$0xf] %vm2354_vm3, %v2924_v57  ;;  %v1560_v8 = vmax.f32 %v1398_v18, 0.0  ;;  %v1499_v30 = vmax.f32 %v1153_v54, 0.0  ;;  %v1401_v2 = vadd.f32 %v3916_v52, %v4052_v31  ;;  %v1697_v15 = vmul.f32 %v3955_v50, %v1562_v33 }
 0x16e   : > { %v1631_v26 = vmul.f32 %v3955_v50, %v1496_v59  ;;  %v1563_v63 = vmax.f32 %v1409_v60, 0.0  ;;  %v1497_v5 = vmax.f32 %v1145_v35, 0.0  ;;  %v1768_v24 = vadd.f32 %v3967_v20, %v1633_v42 }
 0x16f   : > { %v1695_v9 = vmul.f32 %v3955_v50, %v1560_v8  ;;  %v1634_v29 = vmul.f32 %v3955_v50, %v1499_v30  ;;  %v1561_v39 = vmax.f32 %v1401_v2, 0.0  ;;  %v1832_v34 = vadd.f32 %v3967_v20, %v1697_v15 }
 0x170   : > { %v1766_v40 = vadd.f32 %v3967_v20, %v1631_v26  ;;  %v1698_v31 = vmul.f32 %v3955_v50, %v1563_v63  ;;  %v1632_v37 = vmul.f32 %v3955_v50, %v1497_v5  ;;  %v2865_v38 = vpack.c.bf16 %v1768_v24, %v1768_v24 }
 0x171   : > { %v1830_v11 = vadd.f32 %v3967_v20, %v1695_v9  ;;  %v1769_v47 = vadd.f32 %v3967_v20, %v1634_v29  ;;  %v1696_v49 = vmul.f32 %v3955_v50, %v1561_v39  ;;  %v2929_v53 = vpack.c.bf16 %v1832_v34, %v1832_v34 }
 0x172   : > { %v2863_v61 = vpack.c.bf16 %v1766_v40, %v1766_v40  ;;  %v1833_v21 = vadd.f32 %v3967_v20, %v1698_v31  ;;  %v1767_v62 = vadd.f32 %v3967_v20, %v1632_v37  ;;  %2409 = vst.msk [vmem:[%s3444_s12 + $0xd8] sm:$0xf] %vm2354_vm3, %v2865_v38  ;;  %v1166_v28 = vadd.f32 %v3916_v52, %v4072_v45 }
 0x173   : > { %v2927_v0 = vpack.c.bf16 %v1830_v11, %v1830_v11  ;;  %v2866_v4 = vpack.c.bf16 %v1769_v47, %v1769_v47  ;;  %v1831_v7 = vadd.f32 %v3967_v20, %v1696_v49  ;;  %2473 = vst.msk [vmem:[%s3444_s12 + $0x1d8] sm:$0xf] %vm2354_vm3, %v2929_v53  ;;  %v1422_v12 = vadd.f32 %v3916_v52, %v4082_v46 }
 0x174   : > { %2407 = vst.msk [vmem:[%s3444_s12 + $0xd0] sm:$0xf] %vm2354_vm3, %v2863_v61  ;;  %v2930_v13 = vpack.c.bf16 %v1833_v21, %v1833_v21  ;;  %v2864_v48 = vpack.c.bf16 %v1767_v62, %v1767_v62  ;;  %v1158_v58 = vadd.f32 %v3916_v52, %v4084_v19  ;;  %v1502_v3 = vmax.f32 %v1166_v28, 0.0 }
 0x175   : > { %2471 = vst.msk [vmem:[%s3444_s12 + $0x1d0] sm:$0xf] %vm2354_vm3, %v2927_v0  ;;  %2410 = vst.msk [vmem:[%s3444_s12 + $0xdc] sm:$0xf] %vm2354_vm3, %v2866_v4  ;;  %v2928_v32 = vpack.c.bf16 %v1831_v7, %v1831_v7  ;;  %v1414_v45 = vadd.f32 %v3916_v52, %v4094_v44  ;;  %v1169_v23 = vadd.f32 %v3916_v52, %v4096_v17  ;;  %v1566_v46 = vmax.f32 %v1422_v12, 0.0 }
 0x176   : > { %2474 = vst.msk [vmem:[%s3444_s12 + $0x1dc] sm:$0xf] %vm2354_vm3, %v2930_v13  ;;  %2408 = vst.msk [vmem:[%s3444_s12 + $0xd4] sm:$0xf] %vm2354_vm3, %v2864_v48  ;;  %v1500_v43 = vmax.f32 %v1158_v58, 0.0  ;;  %v1425_v19 = vadd.f32 %v3916_v52, %v4103_v51  ;;  %v1161_v10 = vadd.f32 %v3916_v52, %v4105_v56  ;;  %v1637_v57 = vmul.f32 %v3955_v50, %v1502_v3 }
 0x177   : > { %2472 = vst.msk [vmem:[%s3444_s12 + $0x1d4] sm:$0xf] %vm2354_vm3, %v2928_v32  ;;  %v1564_v44 = vmax.f32 %v1414_v45, 0.0  ;;  %v1503_v25 = vmax.f32 %v1169_v23, 0.0  ;;  %v1417_v17 = vadd.f32 %v3916_v52, %v4109_v27  ;;  %v1701_v18 = vmul.f32 %v3955_v50, %v1566_v46 }
 0x178   : > { %v1635_v54 = vmul.f32 %v3955_v50, %v1500_v43  ;;  %v1567_v33 = vmax.f32 %v1425_v19, 0.0  ;;  %v1501_v59 = vmax.f32 %v1161_v10, 0.0  ;;  %v1772_v51 = vadd.f32 %v3967_v20, %v1637_v57 }
 0x179   : > { %v1699_v56 = vmul.f32 %v3955_v50, %v1564_v44  ;;  %v1638_v60 = vmul.f32 %v3955_v50, %v1503_v25  ;;  %v1565_v35 = vmax.f32 %v1417_v17, 0.0  ;;  %v1836_v42 = vadd.f32 %v3967_v20, %v1701_v18 }
 0x17a   : > { %v1770_v8 = vadd.f32 %v3967_v20, %v1635_v54  ;;  %v1702_v27 = vmul.f32 %v3955_v50, %v1567_v33  ;;  %v1636_v30 = vmul.f32 %v3955_v50, %v1501_v59  ;;  %v2869_v2 = vpack.c.bf16 %v1772_v51, %v1772_v51 }
 0x17b   : > { %v1834_v15 = vadd.f32 %v3967_v20, %v1699_v56  ;;  %v1773_v26 = vadd.f32 %v3967_v20, %v1638_v60  ;;  %v1700_v63 = vmul.f32 %v3955_v50, %v1565_v35  ;;  %v2933_v5 = vpack.c.bf16 %v1836_v42, %v1836_v42 }
 0x17c   : > { %v2867_v24 = vpack.c.bf16 %v1770_v8, %v1770_v8  ;;  %v1837_v9 = vadd.f32 %v3967_v20, %v1702_v27  ;;  %v1771_v29 = vadd.f32 %v3967_v20, %v1636_v30  ;;  %2413 = vst.msk [vmem:[%s3444_s12 + $0xe8] sm:$0xf] %vm2354_vm3, %v2869_v2  ;;  %v1182_v31 = vadd.f32 %v3916_v52, %v4123_v41 }
 0x17d   : > { %v2931_v39 = vpack.c.bf16 %v1834_v15, %v1834_v15  ;;  %v2870_v34 = vpack.c.bf16 %v1773_v26, %v1773_v26  ;;  %v1835_v40 = vadd.f32 %v3967_v20, %v1700_v63  ;;  %2477 = vst.msk [vmem:[%s3444_s12 + $0x1e8] sm:$0xf] %vm2354_vm3, %v2933_v5  ;;  %v1438_v11 = vadd.f32 %v3916_v52, %v4130_v16 }
 0x17e   : > { %2411 = vst.msk [vmem:[%s3444_s12 + $0xe0] sm:$0xf] %vm2354_vm3, %v2867_v24  ;;  %v2934_v37 = vpack.c.bf16 %v1837_v9, %v1837_v9  ;;  %v2868_v38 = vpack.c.bf16 %v1771_v29, %v1771_v29  ;;  %v1174_v47 = vadd.f32 %v3916_v52, %v4132_v55  ;;  %v1506_v53 = vmax.f32 %v1182_v31, 0.0 }
 0x17f   : > { %2475 = vst.msk [vmem:[%s3444_s12 + $0x1e0] sm:$0xf] %vm2354_vm3, %v2931_v39  ;;  %2414 = vst.msk [vmem:[%s3444_s12 + $0xec] sm:$0xf] %vm2354_vm3, %v2870_v34  ;;  %v2932_v49 = vpack.c.bf16 %v1835_v40, %v1835_v40  ;;  %v1430_v41 = vadd.f32 %v3916_v52, %v4142_v14  ;;  %v1185_v61 = vadd.f32 %v3916_v52, %v4144_v1  ;;  %v1570_v16 = vmax.f32 %v1438_v11, 0.0 }
 0x180   : > { %2478 = vst.msk [vmem:[%s3444_s12 + $0x1ec] sm:$0xf] %vm2354_vm3, %v2934_v37  ;;  %2412 = vst.msk [vmem:[%s3444_s12 + $0xe4] sm:$0xf] %vm2354_vm3, %v2868_v38  ;;  %v1504_v21 = vmax.f32 %v1174_v47, 0.0  ;;  %v1441_v55 = vadd.f32 %v3916_v52, %v4154_v22  ;;  %v1177_v62 = vadd.f32 %v3916_v52, %v4156_v36  ;;  %v1641_v0 = vmul.f32 %v3955_v50, %v1506_v53 }
 0x181   : > { %2476 = vst.msk [vmem:[%s3444_s12 + $0x1e4] sm:$0xf] %vm2354_vm3, %v2932_v49  ;;  %v1568_v14 = vmax.f32 %v1430_v41, 0.0  ;;  %v1507_v4 = vmax.f32 %v1185_v61, 0.0  ;;  %v1433_v1 = vadd.f32 %v3916_v52, %v4166_v6  ;;  %v1705_v7 = vmul.f32 %v3955_v50, %v1570_v16 }
 0x182   : > { %v1639_v28 = vmul.f32 %v3955_v50, %v1504_v21  ;;  %v1571_v13 = vmax.f32 %v1441_v55, 0.0  ;;  %v1505_v48 = vmax.f32 %v1177_v62, 0.0  ;;  %v1776_v22 = vadd.f32 %v3967_v20, %v1641_v0 }
 0x183   : > { %v1703_v36 = vmul.f32 %v3955_v50, %v1568_v14  ;;  %v1642_v12 = vmul.f32 %v3955_v50, %v1507_v4  ;;  %v1569_v58 = vmax.f32 %v1433_v1, 0.0  ;;  %v1840_v32 = vadd.f32 %v3967_v20, %v1705_v7 }
 0x184   : > { %v1774_v3 = vadd.f32 %v3967_v20, %v1639_v28  ;;  %v1706_v52 = vmul.f32 %v3955_v50, %v1571_v13  ;;  %v1640_v6 = vmul.f32 %v3955_v50, %v1505_v48  ;;  %v2873_v45 = vpack.c.bf16 %v1776_v22, %v1776_v22 }
 0x185   : > { %v1838_v23 = vadd.f32 %v3967_v20, %v1703_v36  ;;  %v1777_v46 = vadd.f32 %v3967_v20, %v1642_v12  ;;  %v1704_v43 = vmul.f32 %v3955_v50, %v1569_v58  ;;  %v2937_v19 = vpack.c.bf16 %v1840_v32, %v1840_v32 }
 0x186   : > { %v2871_v10 = vpack.c.bf16 %v1774_v3, %v1774_v3  ;;  %v1841_v57 = vadd.f32 %v3967_v20, %v1706_v52  ;;  %v1775_v44 = vadd.f32 %v3967_v20, %v1640_v6  ;;  %2417 = vst.msk [vmem:[%s3444_s12 + $0xf8] sm:$0xf] %vm2354_vm3, %v2873_v45 }
 0x187   : > { %v2935_v25 = vpack.c.bf16 %v1838_v23, %v1838_v23  ;;  %v2874_v17 = vpack.c.bf16 %v1777_v46, %v1777_v46  ;;  %v1839_v18 = vadd.f32 %v3967_v20, %v1704_v43  ;;  %2481 = vst.msk [vmem:[%s3444_s12 + $0x1f8] sm:$0xf] %vm2354_vm3, %v2937_v19 }
 0x188   : > { %2415 = vst.msk [vmem:[%s3444_s12 + $0xf0] sm:$0xf] %vm2354_vm3, %v2871_v10  ;;  %v2938_v50 = vpack.c.bf16 %v1841_v57, %v1841_v57  ;;  %v2872_v54 = vpack.c.bf16 %v1775_v44, %v1775_v44 }
 0x189   : > { %2479 = vst.msk [vmem:[%s3444_s12 + $0x1f0] sm:$0xf] %vm2354_vm3, %v2935_v25  ;;  %2418 = vst.msk [vmem:[%s3444_s12 + $0xfc] sm:$0xf] %vm2354_vm3, %v2874_v17  ;;  %v2936_v33 = vpack.c.bf16 %v1839_v18, %v1839_v18 }
 0x18a   : > { %2482 = vst.msk [vmem:[%s3444_s12 + $0x1fc] sm:$0xf] %vm2354_vm3, %v2938_v50  ;;  %2416 = vst.msk [vmem:[%s3444_s12 + $0xf4] sm:$0xf] %vm2354_vm3, %v2872_v54 }
 0x18b   : > { %2480 = vst.msk [vmem:[%s3444_s12 + $0x1f4] sm:$0xf] %vm2354_vm3, %v2936_v33 }
 0x18c PF: > { %s15_s18 = sadd.s32 1, %s3225_s18  }
 0x18d   : > { %p12_p4 = scmp.ge.s32.totalorder %s15_s18, 5  }
 0x18f   :  { %14 = sbr.rel (!%p12_p4) target bundleno = 1 (0x1), region = 70 }

// kernel: pool_forward.6
= control target key start
LH: loop header
LB: loop body
LE: loop exit
PB: predicated region body
PF: predicated region fallthrough
CT: control target
= control target key end

     0   :  { %s1678_s18 = smov 0   ;;  %s2087_s0 = inlined_call_operand.vmem [shape: bf16[736,216], index: 0, kind: input, shape index: {}]   ;;  %s2088_s1 = inlined_call_operand.vmem [shape: bf16[216,24], index: 1, kind: input, shape index: {}]   ;;  %s2089_s2 = inlined_call_operand.vmem [shape: f32[1,24], index: 2, kind: input, shape index: {}]   ;;  %s2090_s3 = inlined_call_operand.vmem [shape: f32[1,24], index: 3, kind: input, shape index: {}]   ;;  %s2091_s4 = inlined_call_operand.vmem [shape: f32[1,24], index: 4, kind: input, shape index: {}]   ;;  %s2092_s5 = inlined_call_operand.vmem [shape: bf16[736,24], index: 5, kind: output, shape index: {}]  }
   0x1 LB: > { %s1330_s19 = sadd.s32 4294967295, %s1645_s18   ;;  %p1334_p0 = scmp.ge.s32.totalorder %s1645_s18, 1  ;;  %s1645_s18 = sphi %s1678_s18, %s15_s18  }
   0x2   : > { %p189_p1 = scmp.lt.s32.totalorder %s1645_s18, 3 }
   0x4   : > { %p190_p2 = pnand %p1334_p0, %p189_p1 }
   0x5   : > { %v1556_v0 = vld [vmem:[%s2088_s1] sm:$0xff] (!%p190_p2)   ;;  %v1647_v1 = vmov (!%p190_p2), 0   ;;  %v1557_v2 = vld [vmem:[%s2088_s1 + $0x8] sm:$0xff] (!%p190_p2)   ;;  %s218_s24 = smul.u32 (!%p190_p2), 46, %s1330_s19  ;;  %v1558_v3 = vld [vmem:[%s2088_s1 + $0x10] sm:$0xff] (!%p190_p2)   ;;  %vm600_vm0 = vcmask (!%p190_p2), 719872  }
   0x6   : > { %193 = sbr.rel (%p190_p2) target bundleno = 375 (0x177), region = 40  ;;  %674 = vmatprep.subr.bf16.mxu0 (!%p190_p2), %v1647_v1  ;;  %1519 = vmatprep.subr.bf16.mxu1 (!%p190_p2), %v1647_v1  ;;  %v1559_v4 = vld [vmem:[%s2088_s1 + $0x18] sm:$0xff] (!%p190_p2)   ;;  %v1560_v5 = vld [vmem:[%s2088_s1 + $0x20] sm:$0xff] (!%p190_p2)   ;;  %v1561_v8 = vld [vmem:[%s2088_s1 + $0x28] sm:$0xff] (!%p190_p2)   ;;  %vm670_vm1 = vcmask (!%p190_p2), 1043456   ;;  %vm1227_vm2 = vcmask (!%p190_p2), 191488  }
   0x7   : > { %675 = vmatpush1.bf16.msra.mxu0 (!%p190_p2), %v1556_v0  ;;  %1533 = vmatpush1.bf16.msra.mxu1 (!%p190_p2), %v1556_v0  ;;  %p219_p3 = scmp.lt.s32.totalorder (!%p190_p2), %s218_s24, 91  ;;  %v1562_v9 = vld [vmem:[%s2088_s1 + $0x30] sm:$0xff] (!%p190_p2)   ;;  %v1563_v10 = vld [vmem:[%s2088_s1 + $0x38] sm:$0xff] (!%p190_p2)   ;;  %v1564_v11 = vld [vmem:[%s2088_s1 + $0x40] sm:$0xff] (!%p190_p2)  }
   0x8   : > { %676 = vmatprep.subr.bf16.mxu0 (!%p190_p2), %v1647_v1  ;;  %1520 = vmatprep.subr.bf16.mxu1 (!%p190_p2), %v1647_v1  ;;  %v1565_v12 = vld [vmem:[%s2088_s1 + $0x48] sm:$0xff] (!%p190_p2)   ;;  %v1566_v13 = vld [vmem:[%s2088_s1 + $0x50] sm:$0xff] (!%p190_p2)   ;;  %v1567_v14 = vld [vmem:[%s2088_s1 + $0x58] sm:$0xff] (!%p190_p2)  }
   0x9   : > { %v1568_v15 = vld [vmem:[%s2088_s1 + $0x60] sm:$0xff] (!%p190_p2)   ;;  %v1569_v16 = vld [vmem:[%s2088_s1 + $0x68] ss:$0 sps:$4 sm:$0xff] (!%p190_p2)  }
   0xa   : > { %v672_v17 = vsel (!%p190_p2), %vm670_vm1, %v1569_v16, 0  ;;  %v1836_v62 = vld [vmem:[%s2089_s2] ss:$0 sm:$0xff] (!%p190_p2) }
   0xb   : > { %677 = vmatpush1.bf16.msra.mxu0 (!%p190_p2), %v1557_v2  ;;  %1534 = vmatpush1.bf16.msra.mxu1 (!%p190_p2), %v1557_v2 }
   0xc   : > { %678 = vmatprep.subr.bf16.mxu0 (!%p190_p2), %v1647_v1  ;;  %1521 = vmatprep.subr.bf16.mxu1 (!%p190_p2), %v1647_v1 }
   0xd   : > { %s2094_s24 = smov (!%p219_p3, %s218_s24), 91 }
   0xe   : > { %s1472_s27 = sshll.u32 %s2094_s24, 3  ;;  %s1337_s11 = sshll.u32 %s2094_s24, 2 }
   0xf   : > { %679 = vmatpush1.bf16.msra.mxu0 %v1558_v3  ;;  %1535 = vmatpush1.bf16.msra.mxu1 %v1558_v3  ;;  %s1712_s7 = scalar_lea.vmem %s2087_s0, %s1472_s27  ;;  %s1862_s14 = scalar_lea.vmem %s2092_s5, %s1337_s11 }
  0x10   : > { %680 = vmatprep.subr.bf16.mxu0 %v1647_v1  ;;  %1522 = vmatprep.subr.bf16.mxu1 %v1647_v1  ;;  %v1572_v6 = vld [vmem:[%s1712_s7 + $0x4] ss:$8 sps:$4 sm:$0xff]   ;;  %v1570_v18 = vld [vmem:[%s1712_s7] ss:$8 sps:$4 sm:$0xff]   ;;  %v1576_v20 = vld [vmem:[%s1712_s7 + $0x14] ss:$8 sps:$4 sm:$0xff]  }
  0x11   : > { %1399 = vmatprep.mubr.msk.bf16.mxu0 %vm600_vm0, %v1572_v6  ;;  %v1575_v7 = vld [vmem:[%s1712_s7 + $0xc4] ss:$8 sps:$4 sm:$0xff]   ;;  %v1573_v19 = vld [vmem:[%s1712_s7 + $0xc0] ss:$8 sps:$4 sm:$0xff]   ;;  %v1579_v21 = vld [vmem:[%s1712_s7 + $0xd4] ss:$8 sps:$4 sm:$0xff]  }
  0x12   : > { %1411 = vmatprep.mubr.msk.bf16.mxu1 %vm600_vm0, %v1575_v7  ;;  %v1578_v22 = vld [vmem:[%s1712_s7 + $0x10] ss:$8 sps:$4 sm:$0xff]   ;;  %v1582_v24 = vld [vmem:[%s1712_s7 + $0x24] ss:$8 sps:$4 sm:$0xff]   ;;  %v1584_v26 = vld [vmem:[%s1712_s7 + $0x20] ss:$8 sps:$4 sm:$0xff]  }
  0x13   : > { %681 = vmatpush1.bf16.msra.mxu0 %v1559_v4  ;;  %1536 = vmatpush1.bf16.msra.mxu1 %v1559_v4  ;;  %v1581_v23 = vld [vmem:[%s1712_s7 + $0xd0] ss:$8 sps:$4 sm:$0xff]   ;;  %v1585_v25 = vld [vmem:[%s1712_s7 + $0xe4] ss:$8 sps:$4 sm:$0xff]   ;;  %v1587_v27 = vld [vmem:[%s1712_s7 + $0xe0] ss:$8 sps:$4 sm:$0xff]  }
  0x14   : > { %682 = vmatprep.subr.bf16.mxu0 %v1647_v1  ;;  %1523 = vmatprep.subr.bf16.mxu1 %v1647_v1  ;;  %v1588_v28 = vld [vmem:[%s1712_s7 + $0x34] ss:$8 sps:$4 sm:$0xff]   ;;  %v1590_v30 = vld [vmem:[%s1712_s7 + $0x30] ss:$8 sps:$4 sm:$0xff]   ;;  %v1594_v32 = vld [vmem:[%s1712_s7 + $0x44] ss:$8 sps:$4 sm:$0xff]  }
  0x15   : > { %v1591_v29 = vld [vmem:[%s1712_s7 + $0xf4] ss:$8 sps:$4 sm:$0xff]   ;;  %v1593_v31 = vld [vmem:[%s1712_s7 + $0xf0] ss:$8 sps:$4 sm:$0xff]   ;;  %v1597_v33 = vld [vmem:[%s1712_s7 + $0x104] ss:$8 sps:$4 sm:$0xff]  }
  0x16   : > { %v1596_v34 = vld [vmem:[%s1712_s7 + $0x40] ss:$8 sps:$4 sm:$0xff]   ;;  %v1600_v36 = vld [vmem:[%s1712_s7 + $0x54] ss:$8 sps:$4 sm:$0xff]   ;;  %v1602_v38 = vld [vmem:[%s1712_s7 + $0x50] ss:$8 sps:$4 sm:$0xff]  }
  0x17   : > { %683 = vmatpush1.bf16.msra.mxu0 %v1560_v5  ;;  %1537 = vmatpush1.bf16.msra.mxu1 %v1560_v5  ;;  %v1599_v35 = vld [vmem:[%s1712_s7 + $0x100] ss:$8 sps:$4 sm:$0xff]   ;;  %v1603_v37 = vld [vmem:[%s1712_s7 + $0x114] ss:$8 sps:$4 sm:$0xff]   ;;  %v1605_v39 = vld [vmem:[%s1712_s7 + $0x110] ss:$8 sps:$4 sm:$0xff]  }
  0x18   : > { %684 = vmatprep.subr.bf16.mxu0 %v1647_v1  ;;  %1524 = vmatprep.subr.bf16.mxu1 %v1647_v1  ;;  %v1606_v40 = vld [vmem:[%s1712_s7 + $0x64] ss:$8 sps:$4 sm:$0xff]   ;;  %v1608_v42 = vld [vmem:[%s1712_s7 + $0x60] ss:$8 sps:$4 sm:$0xff]   ;;  %v1612_v44 = vld [vmem:[%s1712_s7 + $0x74] ss:$8 sps:$4 sm:$0xff]  }
  0x19   : > { %v1609_v41 = vld [vmem:[%s1712_s7 + $0x124] ss:$8 sps:$4 sm:$0xff]   ;;  %v1611_v43 = vld [vmem:[%s1712_s7 + $0x120] ss:$8 sps:$4 sm:$0xff]   ;;  %v1615_v45 = vld [vmem:[%s1712_s7 + $0x134] ss:$8 sps:$4 sm:$0xff]  }
  0x1a   : > { %v1614_v46 = vld [vmem:[%s1712_s7 + $0x70] ss:$8 sps:$4 sm:$0xff]   ;;  %v1618_v48 = vld [vmem:[%s1712_s7 + $0x84] ss:$8 sps:$4 sm:$0xff]   ;;  %v1620_v50 = vld [vmem:[%s1712_s7 + $0x80] ss:$8 sps:$4 sm:$0xff]  }
  0x1b   : > { %685 = vmatpush1.bf16.msra.mxu0 %v1561_v8  ;;  %1538 = vmatpush1.bf16.msra.mxu1 %v1561_v8  ;;  %v1617_v47 = vld [vmem:[%s1712_s7 + $0x130] ss:$8 sps:$4 sm:$0xff]   ;;  %v1621_v49 = vld [vmem:[%s1712_s7 + $0x144] ss:$8 sps:$4 sm:$0xff]   ;;  %v1623_v51 = vld [vmem:[%s1712_s7 + $0x140] ss:$8 sps:$4 sm:$0xff]  }
  0x1c   : > { %686 = vmatprep.subr.bf16.mxu0 %v1647_v1  ;;  %1525 = vmatprep.subr.bf16.mxu1 %v1647_v1  ;;  %v1624_v52 = vld [vmem:[%s1712_s7 + $0x94] ss:$8 sps:$4 sm:$0xff]   ;;  %v1626_v54 = vld [vmem:[%s1712_s7 + $0x90] ss:$8 sps:$4 sm:$0xff]   ;;  %v1630_v56 = vld [vmem:[%s1712_s7 + $0xa4] ss:$8 sps:$4 sm:$0xff]  }
  0x1d   : > { %v1627_v53 = vld [vmem:[%s1712_s7 + $0x154] ss:$8 sps:$4 sm:$0xff]   ;;  %v1629_v55 = vld [vmem:[%s1712_s7 + $0x150] ss:$8 sps:$4 sm:$0xff]   ;;  %v1633_v57 = vld [vmem:[%s1712_s7 + $0x164] ss:$8 sps:$4 sm:$0xff]  }
  0x1e   : > { %v1632_v58 = vld [vmem:[%s1712_s7 + $0xa0] ss:$8 sps:$4 sm:$0xff]   ;;  %v1636_v60 = vld [vmem:[%s1712_s7 + $0xb4] ss:$8 sps:$4 sm:$0xff]   ;;  %v1638_v61 = vld [vmem:[%s1712_s7 + $0xb0] ss:$8 sps:$4 sm:$0xff]  }
  0x1f   : > { %687 = vmatpush1.bf16.msra.mxu0 %v1562_v9  ;;  %1539 = vmatpush1.bf16.msra.mxu1 %v1562_v9  ;;  %v1635_v59 = vld [vmem:[%s1712_s7 + $0x160] ss:$8 sps:$4 sm:$0xff]  }
  0x20   : > { %688 = vmatprep.subr.bf16.mxu0 %v1647_v1  ;;  %1526 = vmatprep.subr.bf16.mxu1 %v1647_v1  ;;  %v1843_v5 = vld [vmem:[%s2090_s3] ss:$0 sm:$0xff] }
  0x23   : > { %689 = vmatpush1.bf16.msra.mxu0 %v1563_v10  ;;  %1540 = vmatpush1.bf16.msra.mxu1 %v1563_v10 }
  0x24   : > { %690 = vmatprep.subr.bf16.mxu0 %v1647_v1  ;;  %1527 = vmatprep.subr.bf16.mxu1 %v1647_v1 }
  0x27   : > { %691 = vmatpush1.bf16.msra.mxu0 %v1564_v11  ;;  %1541 = vmatpush1.bf16.msra.mxu1 %v1564_v11 }
  0x28   : > { %692 = vmatprep.subr.bf16.mxu0 %v1647_v1  ;;  %1528 = vmatprep.subr.bf16.mxu1 %v1647_v1 }
  0x2b   : > { %693 = vmatpush1.bf16.msra.mxu0 %v1565_v12  ;;  %1542 = vmatpush1.bf16.msra.mxu1 %v1565_v12 }
  0x2c   : > { %694 = vmatprep.subr.bf16.mxu0 %v1647_v1  ;;  %1529 = vmatprep.subr.bf16.mxu1 %v1647_v1 }
  0x2f   : > { %695 = vmatpush1.bf16.msra.mxu0 %v1566_v13  ;;  %1543 = vmatpush1.bf16.msra.mxu1 %v1566_v13 }
  0x30   : > { %696 = vmatprep.subr.bf16.mxu0 %v1647_v1  ;;  %1530 = vmatprep.subr.bf16.mxu1 %v1647_v1 }
  0x33   : > { %697 = vmatpush1.bf16.msra.mxu0 %v1567_v14  ;;  %1544 = vmatpush1.bf16.msra.mxu1 %v1567_v14  ;;  %v1850_v14 = vld [vmem:[%s2091_s4] ss:$0 sm:$0xff] }
  0x34   : > { %698 = vmatprep.subr.bf16.mxu0 %v1647_v1  ;;  %1531 = vmatprep.subr.bf16.mxu1 %v1647_v1 }
  0x37   : > { %699 = vmatpush1.bf16.msra.mxu0 %v1568_v15  ;;  %1545 = vmatpush1.bf16.msra.mxu1 %v1568_v15 }
  0x38   : > { %700 = vmatprep.subr.bf16.mxu0 %v1647_v1  ;;  %1532 = vmatprep.subr.bf16.mxu1 %v1647_v1 }
  0x3b   : > { %701 = vmatpush1.bf16.msra.mxu0 %v672_v17  ;;  %1546 = vmatpush1.bf16.msra.mxu1 %v672_v17 }
  0x3e   : > { %707 = vmatmul.mubr.bf16.vlgmr.msra.gmra.mrb[0].mxu0 %v1570_v18  ;;  %803 = vmatmul.mubr.bf16.vlgmr.msra.gmra.mrb[0].mxu1 %v1573_v19 }
  0x3f   : > { %1400 = vmatprep.mubr.msk.bf16.mxu0 %vm600_vm0, %v1576_v20  ;;  %1412 = vmatprep.mubr.msk.bf16.mxu1 %vm600_vm0, %v1579_v21 }
  0x46   : > { %715 = vmatmul.mubr.bf16.gmra.mrb[4].mxu0 %v1578_v22  ;;  %811 = vmatmul.mubr.bf16.gmra.mrb[4].mxu1 %v1581_v23 }
  0x47   : > { %1401 = vmatprep.mubr.msk.bf16.mxu0 %vm600_vm0, %v1582_v24  ;;  %1413 = vmatprep.mubr.msk.bf16.mxu1 %vm600_vm0, %v1585_v25 }
  0x4e   : > { %723 = vmatmul.mubr.bf16.gmra.mrb[8].mxu0 %v1584_v26  ;;  %819 = vmatmul.mubr.bf16.gmra.mrb[8].mxu1 %v1587_v27 }
  0x4f   : > { %1402 = vmatprep.mubr.msk.bf16.mxu0 %vm600_vm0, %v1588_v28  ;;  %1414 = vmatprep.mubr.msk.bf16.mxu1 %vm600_vm0, %v1591_v29 }
  0x56   : > { %731 = vmatmul.mubr.bf16.gmra.mrb[12].mxu0 %v1590_v30  ;;  %827 = vmatmul.mubr.bf16.gmra.mrb[12].mxu1 %v1593_v31 }
  0x57   : > { %1403 = vmatprep.mubr.msk.bf16.mxu0 %vm600_vm0, %v1594_v32  ;;  %1415 = vmatprep.mubr.msk.bf16.mxu1 %vm600_vm0, %v1597_v33 }
  0x5e   : > { %739 = vmatmul.mubr.bf16.gmra.mrb[16].mxu0 %v1596_v34  ;;  %835 = vmatmul.mubr.bf16.gmra.mrb[16].mxu1 %v1599_v35 }
  0x5f   : > { %1404 = vmatprep.mubr.msk.bf16.mxu0 %vm600_vm0, %v1600_v36  ;;  %1416 = vmatprep.mubr.msk.bf16.mxu1 %vm600_vm0, %v1603_v37 }
  0x66   : > { %747 = vmatmul.mubr.bf16.gmra.mrb[20].mxu0 %v1602_v38  ;;  %843 = vmatmul.mubr.bf16.gmra.mrb[20].mxu1 %v1605_v39 }
  0x67   : > { %1405 = vmatprep.mubr.msk.bf16.mxu0 %vm600_vm0, %v1606_v40  ;;  %1417 = vmatprep.mubr.msk.bf16.mxu1 %vm600_vm0, %v1609_v41 }
  0x6e   : > { %755 = vmatmul.mubr.bf16.gmra.mrb[24].mxu0 %v1608_v42  ;;  %851 = vmatmul.mubr.bf16.gmra.mrb[24].mxu1 %v1611_v43 }
  0x6f   : > { %1406 = vmatprep.mubr.msk.bf16.mxu0 %vm600_vm0, %v1612_v44  ;;  %1418 = vmatprep.mubr.msk.bf16.mxu1 %vm600_vm0, %v1615_v45 }
  0x76   : > { %763 = vmatmul.mubr.bf16.gmra.mrb[28].mxu0 %v1614_v46  ;;  %859 = vmatmul.mubr.bf16.gmra.mrb[28].mxu1 %v1617_v47 }
  0x77   : > { %1407 = vmatprep.mubr.msk.bf16.mxu0 %vm600_vm0, %v1618_v48  ;;  %1419 = vmatprep.mubr.msk.bf16.mxu1 %vm600_vm0, %v1621_v49 }
  0x7e   : > { %771 = vmatmul.mubr.bf16.gmra.mrb[32].mxu0 %v1620_v50  ;;  %867 = vmatmul.mubr.bf16.gmra.mrb[32].mxu1 %v1623_v51 }
  0x7f   : > { %1408 = vmatprep.mubr.msk.bf16.mxu0 %vm600_vm0, %v1624_v52  ;;  %1420 = vmatprep.mubr.msk.bf16.mxu1 %vm600_vm0, %v1627_v53 }
  0x86   : > { %779 = vmatmul.mubr.bf16.gmra.mrb[36].mxu0 %v1626_v54  ;;  %875 = vmatmul.mubr.bf16.gmra.mrb[36].mxu1 %v1629_v55 }
  0x87   : > { %1409 = vmatprep.mubr.msk.bf16.mxu0 %vm600_vm0, %v1630_v56  ;;  %1421 = vmatprep.mubr.msk.bf16.mxu1 %vm600_vm0, %v1633_v57 }
  0x8e   : > { %787 = vmatmul.mubr.bf16.gmra.mrb[40].mxu0 %v1632_v58  ;;  %883 = vmatmul.mubr.bf16.gmra.mrb[40].mxu1 %v1635_v59 }
  0x8f   : > { %1410 = vmatprep.mubr.msk.bf16.mxu0 %vm600_vm0, %v1636_v60 }
  0x96   : > { %795 = vmatmul.mubr.bf16.gmra.mrb[44].mxu0 %v1638_v61 }
 0x111   : > { %v708_v63 = vpop.f32.mrb[0].mxu0  ;;  %v804_v0 = vpop.f32.mrb[0].mxu1 }
 0x112   : > { %v709_v1 = vadd.f32 %v1836_v62, %v708_v63  ;;  %v710_v2 = vpop.f32.mrb[1].mxu0  ;;  %v805_v3 = vadd.f32 %v1836_v62, %v804_v0  ;;  %v806_v4 = vpop.f32.mrb[1].mxu1 }
 0x113   : > { %v711_v6 = vpop.f32.mrb[2].mxu0  ;;  %v807_v7 = vpop.f32.mrb[2].mxu1 }
 0x114   : > { %v891_v8 = vmax.f32 %v709_v1, 0.0  ;;  %v712_v9 = vadd.f32 %v1836_v62, %v711_v6  ;;  %v713_v10 = vpop.f32.mrb[3].mxu0  ;;  %v915_v11 = vmax.f32 %v805_v3, 0.0  ;;  %v808_v12 = vadd.f32 %v1836_v62, %v807_v7  ;;  %v809_v13 = vpop.f32.mrb[3].mxu1 }
 0x116   : > { %v944_v15 = vmul.f32 %v1843_v5, %v891_v8  ;;  %v892_v16 = vmax.f32 %v712_v9, 0.0  ;;  %v968_v17 = vmul.f32 %v1843_v5, %v915_v11  ;;  %v916_v18 = vmax.f32 %v808_v12, 0.0 }
 0x118   : > { %v997_v19 = vadd.f32 %v1850_v14, %v944_v15  ;;  %v945_v20 = vmul.f32 %v1843_v5, %v892_v16  ;;  %v1021_v21 = vadd.f32 %v1850_v14, %v968_v17  ;;  %v969_v22 = vmul.f32 %v1843_v5, %v916_v18 }
 0x119   : > { %v716_v23 = vpop.f32.mrb[4].mxu0  ;;  %v812_v24 = vpop.f32.mrb[4].mxu1 }
 0x11a   : > { %v1473_v25 = vpack.c.bf16 %v997_v19, %v997_v19  ;;  %v998_v26 = vadd.f32 %v1850_v14, %v945_v20  ;;  %v1497_v27 = vpack.c.bf16 %v1021_v21, %v1021_v21  ;;  %v1022_v28 = vadd.f32 %v1850_v14, %v969_v22  ;;  %v718_v29 = vpop.f32.mrb[5].mxu0  ;;  %v814_v30 = vpop.f32.mrb[5].mxu1 }
 0x11b   : > { %v717_v31 = vadd.f32 %v1836_v62, %v716_v23  ;;  %v719_v32 = vpop.f32.mrb[6].mxu0  ;;  %v813_v33 = vadd.f32 %v1836_v62, %v812_v24  ;;  %v815_v34 = vpop.f32.mrb[6].mxu1 }
 0x11c   : > { %1228 = vst.msk [vmem:[%s1862_s14] sm:$0xf] %vm1227_vm2, %v1473_v25  ;;  %v1474_v35 = vpack.c.bf16 %v998_v26, %v998_v26  ;;  %1252 = vst.msk [vmem:[%s1862_s14 + $0x60] sm:$0xf] %vm1227_vm2, %v1497_v27  ;;  %v1498_v36 = vpack.c.bf16 %v1022_v28, %v1022_v28  ;;  %v720_v37 = vadd.f32 %v1836_v62, %v719_v32  ;;  %v721_v38 = vpop.f32.mrb[7].mxu0  ;;  %v817_v40 = vpop.f32.mrb[7].mxu1 }
 0x11d   : > { %v816_v39 = vadd.f32 %v1836_v62, %v815_v34  ;;  %v893_v41 = vmax.f32 %v717_v31, 0.0  ;;  %v917_v42 = vmax.f32 %v813_v33, 0.0 }
 0x11e   : > { %1229 = vst.msk [vmem:[%s1862_s14 + $0x4] sm:$0xf] %vm1227_vm2, %v1474_v35  ;;  %1253 = vst.msk [vmem:[%s1862_s14 + $0x64] sm:$0xf] %vm1227_vm2, %v1498_v36  ;;  %v894_v43 = vmax.f32 %v720_v37, 0.0 }
 0x11f   : > { %v918_v44 = vmax.f32 %v816_v39, 0.0  ;;  %v946_v45 = vmul.f32 %v1843_v5, %v893_v41  ;;  %v970_v46 = vmul.f32 %v1843_v5, %v917_v42 }
 0x120   : > { %v947_v47 = vmul.f32 %v1843_v5, %v894_v43 }
 0x121   : > { %v971_v48 = vmul.f32 %v1843_v5, %v918_v44  ;;  %v999_v49 = vadd.f32 %v1850_v14, %v946_v45  ;;  %v1023_v50 = vadd.f32 %v1850_v14, %v970_v46  ;;  %v724_v51 = vpop.f32.mrb[8].mxu0  ;;  %v820_v52 = vpop.f32.mrb[8].mxu1 }
 0x122   : > { %v1000_v53 = vadd.f32 %v1850_v14, %v947_v47  ;;  %v725_v55 = vadd.f32 %v1836_v62, %v724_v51  ;;  %v726_v56 = vpop.f32.mrb[9].mxu0  ;;  %v821_v57 = vadd.f32 %v1836_v62, %v820_v52  ;;  %v822_v58 = vpop.f32.mrb[9].mxu1 }
 0x123   : > { %v1024_v54 = vadd.f32 %v1850_v14, %v971_v48  ;;  %v1475_v59 = vpack.c.bf16 %v999_v49, %v999_v49  ;;  %v1499_v60 = vpack.c.bf16 %v1023_v50, %v1023_v50  ;;  %v727_v61 = vpop.f32.mrb[10].mxu0  ;;  %v823_v63 = vpop.f32.mrb[10].mxu1 }
 0x124   : > { %v1476_v0 = vpack.c.bf16 %v1000_v53, %v1000_v53  ;;  %v895_v2 = vmax.f32 %v725_v55, 0.0  ;;  %v728_v3 = vadd.f32 %v1836_v62, %v727_v61  ;;  %v729_v4 = vpop.f32.mrb[11].mxu0  ;;  %v825_v6 = vpop.f32.mrb[11].mxu1  ;;  %v919_v7 = vmax.f32 %v821_v57, 0.0 }
 0x125   : > { %v1500_v1 = vpack.c.bf16 %v1024_v54, %v1024_v54  ;;  %1230 = vst.msk [vmem:[%s1862_s14 + $0x8] sm:$0xf] %vm1227_vm2, %v1475_v59  ;;  %1254 = vst.msk [vmem:[%s1862_s14 + $0x68] sm:$0xf] %vm1227_vm2, %v1499_v60  ;;  %v824_v8 = vadd.f32 %v1836_v62, %v823_v63 }
 0x126   : > { %1231 = vst.msk [vmem:[%s1862_s14 + $0xc] sm:$0xf] %vm1227_vm2, %v1476_v0  ;;  %v948_v9 = vmul.f32 %v1843_v5, %v895_v2  ;;  %v896_v10 = vmax.f32 %v728_v3, 0.0  ;;  %v972_v11 = vmul.f32 %v1843_v5, %v919_v7 }
 0x127   : > { %1255 = vst.msk [vmem:[%s1862_s14 + $0x6c] sm:$0xf] %vm1227_vm2, %v1500_v1  ;;  %v920_v12 = vmax.f32 %v824_v8, 0.0 }
 0x128   : > { %v1001_v13 = vadd.f32 %v1850_v14, %v948_v9  ;;  %v949_v15 = vmul.f32 %v1843_v5, %v896_v10  ;;  %v1025_v16 = vadd.f32 %v1850_v14, %v972_v11 }
 0x129   : > { %v973_v17 = vmul.f32 %v1843_v5, %v920_v12  ;;  %v732_v18 = vpop.f32.mrb[12].mxu0  ;;  %v828_v19 = vpop.f32.mrb[12].mxu1 }
 0x12a   : > { %v1477_v20 = vpack.c.bf16 %v1001_v13, %v1001_v13  ;;  %v1002_v21 = vadd.f32 %v1850_v14, %v949_v15  ;;  %v733_v22 = vadd.f32 %v1836_v62, %v732_v18  ;;  %v734_v23 = vpop.f32.mrb[13].mxu0  ;;  %v829_v24 = vadd.f32 %v1836_v62, %v828_v19  ;;  %v830_v25 = vpop.f32.mrb[13].mxu1 }
 0x12b   : > { %v1501_v26 = vpack.c.bf16 %v1025_v16, %v1025_v16  ;;  %v1026_v27 = vadd.f32 %v1850_v14, %v973_v17  ;;  %v735_v28 = vpop.f32.mrb[14].mxu0  ;;  %v831_v29 = vpop.f32.mrb[14].mxu1 }
 0x12c   : > { %1232 = vst.msk [vmem:[%s1862_s14 + $0x10] sm:$0xf] %vm1227_vm2, %v1477_v20  ;;  %v1478_v30 = vpack.c.bf16 %v1002_v21, %v1002_v21  ;;  %v897_v31 = vmax.f32 %v733_v22, 0.0  ;;  %v736_v32 = vadd.f32 %v1836_v62, %v735_v28  ;;  %v737_v33 = vpop.f32.mrb[15].mxu0  ;;  %v921_v34 = vmax.f32 %v829_v24, 0.0  ;;  %v833_v35 = vpop.f32.mrb[15].mxu1 }
 0x12d   : > { %1256 = vst.msk [vmem:[%s1862_s14 + $0x70] sm:$0xf] %vm1227_vm2, %v1501_v26  ;;  %v1502_v36 = vpack.c.bf16 %v1026_v27, %v1026_v27  ;;  %v832_v37 = vadd.f32 %v1836_v62, %v831_v29 }
 0x12e   : > { %1233 = vst.msk [vmem:[%s1862_s14 + $0x14] sm:$0xf] %vm1227_vm2, %v1478_v30  ;;  %v950_v38 = vmul.f32 %v1843_v5, %v897_v31  ;;  %v898_v39 = vmax.f32 %v736_v32, 0.0  ;;  %v974_v40 = vmul.f32 %v1843_v5, %v921_v34 }
 0x12f   : > { %1257 = vst.msk [vmem:[%s1862_s14 + $0x74] sm:$0xf] %vm1227_vm2, %v1502_v36  ;;  %v922_v41 = vmax.f32 %v832_v37, 0.0 }
 0x130   : > { %v1003_v42 = vadd.f32 %v1850_v14, %v950_v38  ;;  %v951_v43 = vmul.f32 %v1843_v5, %v898_v39  ;;  %v1027_v44 = vadd.f32 %v1850_v14, %v974_v40 }
 0x131   : > { %v975_v45 = vmul.f32 %v1843_v5, %v922_v41  ;;  %v740_v46 = vpop.f32.mrb[16].mxu0  ;;  %v836_v47 = vpop.f32.mrb[16].mxu1 }
 0x132   : > { %v1479_v48 = vpack.c.bf16 %v1003_v42, %v1003_v42  ;;  %v1004_v49 = vadd.f32 %v1850_v14, %v951_v43  ;;  %v1503_v50 = vpack.c.bf16 %v1027_v44, %v1027_v44  ;;  %v741_v51 = vadd.f32 %v1836_v62, %v740_v46  ;;  %v742_v52 = vpop.f32.mrb[17].mxu0  ;;  %v838_v53 = vpop.f32.mrb[17].mxu1 }
 0x133   : > { %v1028_v54 = vadd.f32 %v1850_v14, %v975_v45  ;;  %v743_v55 = vpop.f32.mrb[18].mxu0  ;;  %v837_v56 = vadd.f32 %v1836_v62, %v836_v47  ;;  %v839_v57 = vpop.f32.mrb[18].mxu1 }
 0x134   : > { %1234 = vst.msk [vmem:[%s1862_s14 + $0x18] sm:$0xf] %vm1227_vm2, %v1479_v48  ;;  %v1480_v58 = vpack.c.bf16 %v1004_v49, %v1004_v49  ;;  %1258 = vst.msk [vmem:[%s1862_s14 + $0x78] sm:$0xf] %vm1227_vm2, %v1503_v50  ;;  %v899_v59 = vmax.f32 %v741_v51, 0.0  ;;  %v744_v60 = vadd.f32 %v1836_v62, %v743_v55  ;;  %v745_v61 = vpop.f32.mrb[19].mxu0  ;;  %v840_v63 = vadd.f32 %v1836_v62, %v839_v57 }
 0x135   : > { %v841_v0 = vpop.f32.mrb[19].mxu1  ;;  %v1504_v1 = vpack.c.bf16 %v1028_v54, %v1028_v54  ;;  %v923_v2 = vmax.f32 %v837_v56, 0.0 }
 0x136   : > { %1235 = vst.msk [vmem:[%s1862_s14 + $0x1c] sm:$0xf] %vm1227_vm2, %v1480_v58  ;;  %v952_v3 = vmul.f32 %v1843_v5, %v899_v59  ;;  %v900_v4 = vmax.f32 %v744_v60, 0.0  ;;  %v924_v6 = vmax.f32 %v840_v63, 0.0 }
 0x137   : > { %1259 = vst.msk [vmem:[%s1862_s14 + $0x7c] sm:$0xf] %vm1227_vm2, %v1504_v1  ;;  %v976_v7 = vmul.f32 %v1843_v5, %v923_v2 }
 0x138   : > { %v1005_v8 = vadd.f32 %v1850_v14, %v952_v3  ;;  %v953_v9 = vmul.f32 %v1843_v5, %v900_v4  ;;  %v977_v10 = vmul.f32 %v1843_v5, %v924_v6 }
 0x139   : > { %v1029_v11 = vadd.f32 %v1850_v14, %v976_v7  ;;  %v748_v12 = vpop.f32.mrb[20].mxu0  ;;  %v844_v13 = vpop.f32.mrb[20].mxu1 }
 0x13a   : > { %v1481_v15 = vpack.c.bf16 %v1005_v8, %v1005_v8  ;;  %v1006_v16 = vadd.f32 %v1850_v14, %v953_v9  ;;  %v1030_v17 = vadd.f32 %v1850_v14, %v977_v10  ;;  %v749_v18 = vadd.f32 %v1836_v62, %v748_v12  ;;  %v750_v19 = vpop.f32.mrb[21].mxu0  ;;  %v846_v20 = vpop.f32.mrb[21].mxu1 }
 0x13b   : > { %v1505_v21 = vpack.c.bf16 %v1029_v11, %v1029_v11  ;;  %v751_v22 = vpop.f32.mrb[22].mxu0  ;;  %v845_v23 = vadd.f32 %v1836_v62, %v844_v13  ;;  %v847_v24 = vpop.f32.mrb[22].mxu1 }
 0x13c   : > { %1236 = vst.msk [vmem:[%s1862_s14 + $0x20] sm:$0xf] %vm1227_vm2, %v1481_v15  ;;  %v1482_v25 = vpack.c.bf16 %v1006_v16, %v1006_v16  ;;  %v1506_v26 = vpack.c.bf16 %v1030_v17, %v1030_v17  ;;  %v901_v27 = vmax.f32 %v749_v18, 0.0  ;;  %v752_v28 = vadd.f32 %v1836_v62, %v751_v22  ;;  %v753_v29 = vpop.f32.mrb[23].mxu0  ;;  %v849_v30 = vpop.f32.mrb[23].mxu1 }
 0x13d   : > { %1260 = vst.msk [vmem:[%s1862_s14 + $0x80] sm:$0xf] %vm1227_vm2, %v1505_v21  ;;  %v925_v31 = vmax.f32 %v845_v23, 0.0  ;;  %v848_v32 = vadd.f32 %v1836_v62, %v847_v24 }
 0x13e   : > { %1237 = vst.msk [vmem:[%s1862_s14 + $0x24] sm:$0xf] %vm1227_vm2, %v1482_v25  ;;  %1261 = vst.msk [vmem:[%s1862_s14 + $0x84] sm:$0xf] %vm1227_vm2, %v1506_v26  ;;  %v954_v33 = vmul.f32 %v1843_v5, %v901_v27  ;;  %v902_v34 = vmax.f32 %v752_v28, 0.0 }
 0x13f   : > { %v978_v35 = vmul.f32 %v1843_v5, %v925_v31  ;;  %v926_v36 = vmax.f32 %v848_v32, 0.0 }
 0x140   : > { %v1007_v37 = vadd.f32 %v1850_v14, %v954_v33  ;;  %v955_v38 = vmul.f32 %v1843_v5, %v902_v34 }
 0x141   : > { %v1031_v39 = vadd.f32 %v1850_v14, %v978_v35  ;;  %v979_v40 = vmul.f32 %v1843_v5, %v926_v36  ;;  %v756_v41 = vpop.f32.mrb[24].mxu0  ;;  %v852_v42 = vpop.f32.mrb[24].mxu1 }
 0x142   : > { %v1483_v43 = vpack.c.bf16 %v1007_v37, %v1007_v37  ;;  %v1008_v44 = vadd.f32 %v1850_v14, %v955_v38  ;;  %v757_v45 = vadd.f32 %v1836_v62, %v756_v41  ;;  %v758_v46 = vpop.f32.mrb[25].mxu0  ;;  %v853_v47 = vadd.f32 %v1836_v62, %v852_v42  ;;  %v854_v48 = vpop.f32.mrb[25].mxu1 }
 0x143   : > { %v1507_v49 = vpack.c.bf16 %v1031_v39, %v1031_v39  ;;  %v1032_v50 = vadd.f32 %v1850_v14, %v979_v40  ;;  %v759_v51 = vpop.f32.mrb[26].mxu0  ;;  %v855_v52 = vpop.f32.mrb[26].mxu1 }
 0x144   : > { %1238 = vst.msk [vmem:[%s1862_s14 + $0x28] sm:$0xf] %vm1227_vm2, %v1483_v43  ;;  %v1484_v53 = vpack.c.bf16 %v1008_v44, %v1008_v44  ;;  %v903_v54 = vmax.f32 %v757_v45, 0.0  ;;  %v760_v55 = vadd.f32 %v1836_v62, %v759_v51  ;;  %v761_v56 = vpop.f32.mrb[27].mxu0  ;;  %v927_v57 = vmax.f32 %v853_v47, 0.0  ;;  %v857_v58 = vpop.f32.mrb[27].mxu1 }
 0x145   : > { %1262 = vst.msk [vmem:[%s1862_s14 + $0x88] sm:$0xf] %vm1227_vm2, %v1507_v49  ;;  %v1508_v59 = vpack.c.bf16 %v1032_v50, %v1032_v50  ;;  %v856_v60 = vadd.f32 %v1836_v62, %v855_v52 }
 0x146   : > { %1239 = vst.msk [vmem:[%s1862_s14 + $0x2c] sm:$0xf] %vm1227_vm2, %v1484_v53  ;;  %v956_v61 = vmul.f32 %v1843_v5, %v903_v54  ;;  %v904_v63 = vmax.f32 %v760_v55, 0.0  ;;  %v980_v0 = vmul.f32 %v1843_v5, %v927_v57 }
 0x147   : > { %1263 = vst.msk [vmem:[%s1862_s14 + $0x8c] sm:$0xf] %vm1227_vm2, %v1508_v59  ;;  %v928_v1 = vmax.f32 %v856_v60, 0.0 }
 0x148   : > { %v1009_v2 = vadd.f32 %v1850_v14, %v956_v61  ;;  %v957_v3 = vmul.f32 %v1843_v5, %v904_v63  ;;  %v1033_v4 = vadd.f32 %v1850_v14, %v980_v0 }
 0x149   : > { %v981_v6 = vmul.f32 %v1843_v5, %v928_v1  ;;  %v764_v7 = vpop.f32.mrb[28].mxu0  ;;  %v860_v8 = vpop.f32.mrb[28].mxu1 }
 0x14a   : > { %v1485_v9 = vpack.c.bf16 %v1009_v2, %v1009_v2  ;;  %v1010_v10 = vadd.f32 %v1850_v14, %v957_v3  ;;  %v1509_v11 = vpack.c.bf16 %v1033_v4, %v1033_v4  ;;  %v765_v12 = vadd.f32 %v1836_v62, %v764_v7  ;;  %v766_v13 = vpop.f32.mrb[29].mxu0  ;;  %v862_v15 = vpop.f32.mrb[29].mxu1 }
 0x14b   : > { %v1034_v16 = vadd.f32 %v1850_v14, %v981_v6  ;;  %v767_v17 = vpop.f32.mrb[30].mxu0  ;;  %v861_v18 = vadd.f32 %v1836_v62, %v860_v8  ;;  %v863_v19 = vpop.f32.mrb[30].mxu1 }
 0x14c   : > { %1240 = vst.msk [vmem:[%s1862_s14 + $0x30] sm:$0xf] %vm1227_vm2, %v1485_v9  ;;  %v1486_v20 = vpack.c.bf16 %v1010_v10, %v1010_v10  ;;  %1264 = vst.msk [vmem:[%s1862_s14 + $0x90] sm:$0xf] %vm1227_vm2, %v1509_v11  ;;  %v905_v21 = vmax.f32 %v765_v12, 0.0  ;;  %v768_v22 = vadd.f32 %v1836_v62, %v767_v17  ;;  %v769_v23 = vpop.f32.mrb[31].mxu0  ;;  %v864_v24 = vadd.f32 %v1836_v62, %v863_v19 }
 0x14d   : > { %v865_v25 = vpop.f32.mrb[31].mxu1  ;;  %v1510_v26 = vpack.c.bf16 %v1034_v16, %v1034_v16  ;;  %v929_v27 = vmax.f32 %v861_v18, 0.0 }
 0x14e   : > { %1241 = vst.msk [vmem:[%s1862_s14 + $0x34] sm:$0xf] %vm1227_vm2, %v1486_v20  ;;  %v958_v28 = vmul.f32 %v1843_v5, %v905_v21  ;;  %v906_v29 = vmax.f32 %v768_v22, 0.0  ;;  %v930_v30 = vmax.f32 %v864_v24, 0.0 }
 0x14f   : > { %1265 = vst.msk [vmem:[%s1862_s14 + $0x94] sm:$0xf] %vm1227_vm2, %v1510_v26  ;;  %v982_v31 = vmul.f32 %v1843_v5, %v929_v27 }
 0x150   : > { %v1011_v32 = vadd.f32 %v1850_v14, %v958_v28  ;;  %v959_v33 = vmul.f32 %v1843_v5, %v906_v29  ;;  %v983_v34 = vmul.f32 %v1843_v5, %v930_v30 }
 0x151   : > { %v1035_v35 = vadd.f32 %v1850_v14, %v982_v31  ;;  %v772_v36 = vpop.f32.mrb[32].mxu0  ;;  %v868_v37 = vpop.f32.mrb[32].mxu1 }
 0x152   : > { %v1487_v38 = vpack.c.bf16 %v1011_v32, %v1011_v32  ;;  %v1012_v39 = vadd.f32 %v1850_v14, %v959_v33  ;;  %v1036_v40 = vadd.f32 %v1850_v14, %v983_v34  ;;  %v773_v41 = vadd.f32 %v1836_v62, %v772_v36  ;;  %v774_v42 = vpop.f32.mrb[33].mxu0  ;;  %v870_v43 = vpop.f32.mrb[33].mxu1 }
 0x153   : > { %v1511_v44 = vpack.c.bf16 %v1035_v35, %v1035_v35  ;;  %v775_v45 = vpop.f32.mrb[34].mxu0  ;;  %v869_v46 = vadd.f32 %v1836_v62, %v868_v37  ;;  %v871_v47 = vpop.f32.mrb[34].mxu1 }
 0x154   : > { %1242 = vst.msk [vmem:[%s1862_s14 + $0x38] sm:$0xf] %vm1227_vm2, %v1487_v38  ;;  %v1488_v48 = vpack.c.bf16 %v1012_v39, %v1012_v39  ;;  %v1512_v49 = vpack.c.bf16 %v1036_v40, %v1036_v40  ;;  %v907_v50 = vmax.f32 %v773_v41, 0.0  ;;  %v776_v51 = vadd.f32 %v1836_v62, %v775_v45  ;;  %v777_v52 = vpop.f32.mrb[35].mxu0  ;;  %v873_v53 = vpop.f32.mrb[35].mxu1 }
 0x155   : > { %1266 = vst.msk [vmem:[%s1862_s14 + $0x98] sm:$0xf] %vm1227_vm2, %v1511_v44  ;;  %v931_v54 = vmax.f32 %v869_v46, 0.0  ;;  %v872_v55 = vadd.f32 %v1836_v62, %v871_v47 }
 0x156   : > { %1243 = vst.msk [vmem:[%s1862_s14 + $0x3c] sm:$0xf] %vm1227_vm2, %v1488_v48  ;;  %1267 = vst.msk [vmem:[%s1862_s14 + $0x9c] sm:$0xf] %vm1227_vm2, %v1512_v49  ;;  %v960_v56 = vmul.f32 %v1843_v5, %v907_v50  ;;  %v908_v57 = vmax.f32 %v776_v51, 0.0 }
 0x157   : > { %v984_v58 = vmul.f32 %v1843_v5, %v931_v54  ;;  %v932_v59 = vmax.f32 %v872_v55, 0.0 }
 0x158   : > { %v1013_v60 = vadd.f32 %v1850_v14, %v960_v56  ;;  %v961_v61 = vmul.f32 %v1843_v5, %v908_v57 }
 0x159   : > { %v1037_v63 = vadd.f32 %v1850_v14, %v984_v58  ;;  %v985_v0 = vmul.f32 %v1843_v5, %v932_v59  ;;  %v780_v1 = vpop.f32.mrb[36].mxu0  ;;  %v876_v2 = vpop.f32.mrb[36].mxu1 }
 0x15a   : > { %v1489_v3 = vpack.c.bf16 %v1013_v60, %v1013_v60  ;;  %v1014_v4 = vadd.f32 %v1850_v14, %v961_v61  ;;  %v781_v6 = vadd.f32 %v1836_v62, %v780_v1  ;;  %v782_v7 = vpop.f32.mrb[37].mxu0  ;;  %v877_v8 = vadd.f32 %v1836_v62, %v876_v2  ;;  %v878_v9 = vpop.f32.mrb[37].mxu1 }
 0x15b   : > { %v1513_v10 = vpack.c.bf16 %v1037_v63, %v1037_v63  ;;  %v1038_v11 = vadd.f32 %v1850_v14, %v985_v0  ;;  %v783_v12 = vpop.f32.mrb[38].mxu0  ;;  %v879_v13 = vpop.f32.mrb[38].mxu1 }
 0x15c   : > { %1244 = vst.msk [vmem:[%s1862_s14 + $0x40] sm:$0xf] %vm1227_vm2, %v1489_v3  ;;  %v1490_v15 = vpack.c.bf16 %v1014_v4, %v1014_v4  ;;  %v909_v16 = vmax.f32 %v781_v6, 0.0  ;;  %v784_v17 = vadd.f32 %v1836_v62, %v783_v12  ;;  %v785_v18 = vpop.f32.mrb[39].mxu0  ;;  %v933_v19 = vmax.f32 %v877_v8, 0.0  ;;  %v881_v20 = vpop.f32.mrb[39].mxu1 }
 0x15d   : > { %1268 = vst.msk [vmem:[%s1862_s14 + $0xa0] sm:$0xf] %vm1227_vm2, %v1513_v10  ;;  %v1514_v21 = vpack.c.bf16 %v1038_v11, %v1038_v11  ;;  %v880_v22 = vadd.f32 %v1836_v62, %v879_v13 }
 0x15e   : > { %1245 = vst.msk [vmem:[%s1862_s14 + $0x44] sm:$0xf] %vm1227_vm2, %v1490_v15  ;;  %v962_v23 = vmul.f32 %v1843_v5, %v909_v16  ;;  %v910_v24 = vmax.f32 %v784_v17, 0.0  ;;  %v986_v25 = vmul.f32 %v1843_v5, %v933_v19 }
 0x15f   : > { %1269 = vst.msk [vmem:[%s1862_s14 + $0xa4] sm:$0xf] %vm1227_vm2, %v1514_v21  ;;  %v934_v26 = vmax.f32 %v880_v22, 0.0 }
 0x160   : > { %v1015_v27 = vadd.f32 %v1850_v14, %v962_v23  ;;  %v963_v28 = vmul.f32 %v1843_v5, %v910_v24  ;;  %v1039_v29 = vadd.f32 %v1850_v14, %v986_v25 }
 0x161   : > { %v987_v30 = vmul.f32 %v1843_v5, %v934_v26  ;;  %v788_v31 = vpop.f32.mrb[40].mxu0  ;;  %v884_v32 = vpop.f32.mrb[40].mxu1 }
 0x162   : > { %v1491_v33 = vpack.c.bf16 %v1015_v27, %v1015_v27  ;;  %v1016_v34 = vadd.f32 %v1850_v14, %v963_v28  ;;  %v1515_v35 = vpack.c.bf16 %v1039_v29, %v1039_v29  ;;  %v789_v36 = vadd.f32 %v1836_v62, %v788_v31  ;;  %v790_v37 = vpop.f32.mrb[41].mxu0  ;;  %v886_v38 = vpop.f32.mrb[41].mxu1 }
 0x163   : > { %v1040_v39 = vadd.f32 %v1850_v14, %v987_v30  ;;  %v791_v40 = vpop.f32.mrb[42].mxu0  ;;  %v885_v41 = vadd.f32 %v1836_v62, %v884_v32  ;;  %v887_v42 = vpop.f32.mrb[42].mxu1 }
 0x164   : > { %1246 = vst.msk [vmem:[%s1862_s14 + $0x48] sm:$0xf] %vm1227_vm2, %v1491_v33  ;;  %v1492_v43 = vpack.c.bf16 %v1016_v34, %v1016_v34  ;;  %1270 = vst.msk [vmem:[%s1862_s14 + $0xa8] sm:$0xf] %vm1227_vm2, %v1515_v35  ;;  %v911_v44 = vmax.f32 %v789_v36, 0.0  ;;  %v792_v45 = vadd.f32 %v1836_v62, %v791_v40  ;;  %v793_v46 = vpop.f32.mrb[43].mxu0  ;;  %v888_v47 = vadd.f32 %v1836_v62, %v887_v42 }
 0x165   : > { %v889_v48 = vpop.f32.mrb[43].mxu1  ;;  %v1516_v49 = vpack.c.bf16 %v1040_v39, %v1040_v39  ;;  %v935_v50 = vmax.f32 %v885_v41, 0.0 }
 0x166   : > { %1247 = vst.msk [vmem:[%s1862_s14 + $0x4c] sm:$0xf] %vm1227_vm2, %v1492_v43  ;;  %v964_v51 = vmul.f32 %v1843_v5, %v911_v44  ;;  %v912_v52 = vmax.f32 %v792_v45, 0.0  ;;  %v936_v53 = vmax.f32 %v888_v47, 0.0 }
 0x167   : > { %1271 = vst.msk [vmem:[%s1862_s14 + $0xac] sm:$0xf] %vm1227_vm2, %v1516_v49  ;;  %v988_v54 = vmul.f32 %v1843_v5, %v935_v50 }
 0x168   : > { %v1017_v55 = vadd.f32 %v1850_v14, %v964_v51  ;;  %v965_v56 = vmul.f32 %v1843_v5, %v912_v52  ;;  %v989_v57 = vmul.f32 %v1843_v5, %v936_v53 }
 0x169   : > { %v1041_v58 = vadd.f32 %v1850_v14, %v988_v54  ;;  %v796_v59 = vpop.f32.mrb[44].mxu0 }
 0x16a   : > { %v1493_v60 = vpack.c.bf16 %v1017_v55, %v1017_v55  ;;  %v1018_v61 = vadd.f32 %v1850_v14, %v965_v56  ;;  %v1042_v63 = vadd.f32 %v1850_v14, %v989_v57  ;;  %v797_v0 = vadd.f32 %v1836_v62, %v796_v59  ;;  %v798_v1 = vpop.f32.mrb[45].mxu0 }
 0x16b   : > { %v1517_v2 = vpack.c.bf16 %v1041_v58, %v1041_v58  ;;  %v799_v3 = vpop.f32.mrb[46].mxu0 }
 0x16c   : > { %1248 = vst.msk [vmem:[%s1862_s14 + $0x50] sm:$0xf] %vm1227_vm2, %v1493_v60  ;;  %v1494_v4 = vpack.c.bf16 %v1018_v61, %v1018_v61  ;;  %v1518_v6 = vpack.c.bf16 %v1042_v63, %v1042_v63  ;;  %v913_v7 = vmax.f32 %v797_v0, 0.0  ;;  %v800_v8 = vadd.f32 %v1836_v62, %v799_v3  ;;  %v801_v9 = vpop.f32.mrb[47].mxu0 }
 0x16d   : > { %1272 = vst.msk [vmem:[%s1862_s14 + $0xb0] sm:$0xf] %vm1227_vm2, %v1517_v2 }
 0x16e   : > { %1249 = vst.msk [vmem:[%s1862_s14 + $0x54] sm:$0xf] %vm1227_vm2, %v1494_v4  ;;  %1273 = vst.msk [vmem:[%s1862_s14 + $0xb4] sm:$0xf] %vm1227_vm2, %v1518_v6  ;;  %v966_v10 = vmul.f32 %v1843_v5, %v913_v7  ;;  %v914_v11 = vmax.f32 %v800_v8, 0.0 }
 0x170   : > { %v1019_v12 = vadd.f32 %v1850_v14, %v966_v10  ;;  %v967_v13 = vmul.f32 %v1843_v5, %v914_v11 }
 0x172   : > { %v1495_v15 = vpack.c.bf16 %v1019_v12, %v1019_v12  ;;  %v1020_v16 = vadd.f32 %v1850_v14, %v967_v13 }
 0x174   : > { %1250 = vst.msk [vmem:[%s1862_s14 + $0x58] sm:$0xf] %vm1227_vm2, %v1495_v15  ;;  %v1496_v62 = vpack.c.bf16 %v1020_v16, %v1020_v16 }
 0x176   : > { %1251 = vst.msk [vmem:[%s1862_s14 + $0x5c] sm:$0xf] %vm1227_vm2, %v1496_v62 }
 0x177 PF: > { %s15_s18 = sadd.s32 1, %s1645_s18  }
 0x178   : > { %p12_p4 = scmp.ge.s32.totalorder %s15_s18, 4  }
 0x17a   :  { %14 = sbr.rel (!%p12_p4) target bundleno = 1 (0x1), region = 70 }

// kernel: pool_forward.7
= control target key start
LH: loop header
LB: loop body
LE: loop exit
PB: predicated region body
PF: predicated region fallthrough
CT: control target
= control target key end

     0   :  { %s895_s18 = smov 0   ;;  %s1090_s0 = inlined_call_operand.vmem [shape: bf16[208,216], index: 0, kind: input, shape index: {}]   ;;  %s1091_s1 = inlined_call_operand.vmem [shape: bf16[216,24], index: 1, kind: input, shape index: {}]   ;;  %s1092_s2 = inlined_call_operand.vmem [shape: f32[1,24], index: 2, kind: input, shape index: {}]   ;;  %s1093_s3 = inlined_call_operand.vmem [shape: f32[1,24], index: 3, kind: input, shape index: {}]   ;;  %s1094_s4 = inlined_call_operand.vmem [shape: f32[1,24], index: 4, kind: input, shape index: {}]   ;;  %s1095_s5 = inlined_call_operand.vmem [shape: bf16[208,24], index: 5, kind: output, shape index: {}]  }
   0x1 LB: > { %s710_s19 = sadd.s32 4294967295, %s862_s18   ;;  %p714_p0 = scmp.ge.s32.totalorder %s862_s18, 1  ;;  %s862_s18 = sphi %s895_s18, %s15_s18  }
   0x2   : > { %p189_p1 = scmp.lt.s32.totalorder %s862_s18, 3 }
   0x4   : > { %p190_p2 = pnand %p714_p0, %p189_p1 }
   0x5   : > { %v822_v0 = vld [vmem:[%s1091_s1] sm:$0xff] (!%p190_p2)   ;;  %v864_v1 = vmov (!%p190_p2), 0   ;;  %v823_v2 = vld [vmem:[%s1091_s1 + $0x8] sm:$0xff] (!%p190_p2)   ;;  %s218_s24 = smul.u32 (!%p190_p2), 13, %s710_s19  ;;  %v824_v3 = vld [vmem:[%s1091_s1 + $0x10] sm:$0xff] (!%p190_p2)   ;;  %vm420_vm0 = vcmask (!%p190_p2), 719872  }
   0x6   : > { %193 = sbr.rel (%p190_p2) target bundleno = 311 (0x137), region = 40  ;;  %446 = vmatprep.subr.bf16.mxu0 (!%p190_p2), %v864_v1  ;;  %785 = vmatprep.subr.bf16.mxu1 (!%p190_p2), %v864_v1  ;;  %v825_v4 = vld [vmem:[%s1091_s1 + $0x18] sm:$0xff] (!%p190_p2)   ;;  %v826_v5 = vld [vmem:[%s1091_s1 + $0x20] sm:$0xff] (!%p190_p2)   ;;  %v827_v8 = vld [vmem:[%s1091_s1 + $0x28] sm:$0xff] (!%p190_p2)   ;;  %vm442_vm1 = vcmask (!%p190_p2), 1043456   ;;  %vm640_vm2 = vcmask (!%p190_p2), 191488  }
   0x7   : > { %447 = vmatpush1.bf16.msra.mxu0 (!%p190_p2), %v822_v0  ;;  %799 = vmatpush1.bf16.msra.mxu1 (!%p190_p2), %v822_v0  ;;  %p219_p3 = scmp.lt.s32.totalorder (!%p190_p2), %s218_s24, 25  ;;  %v828_v9 = vld [vmem:[%s1091_s1 + $0x30] sm:$0xff] (!%p190_p2)   ;;  %v829_v10 = vld [vmem:[%s1091_s1 + $0x38] sm:$0xff] (!%p190_p2)   ;;  %v830_v11 = vld [vmem:[%s1091_s1 + $0x40] sm:$0xff] (!%p190_p2)  }
   0x8   : > { %448 = vmatprep.subr.bf16.mxu0 (!%p190_p2), %v864_v1  ;;  %786 = vmatprep.subr.bf16.mxu1 (!%p190_p2), %v864_v1  ;;  %v831_v12 = vld [vmem:[%s1091_s1 + $0x48] sm:$0xff] (!%p190_p2)   ;;  %v832_v13 = vld [vmem:[%s1091_s1 + $0x50] sm:$0xff] (!%p190_p2)   ;;  %v833_v14 = vld [vmem:[%s1091_s1 + $0x58] sm:$0xff] (!%p190_p2)  }
   0x9   : > { %v834_v15 = vld [vmem:[%s1091_s1 + $0x60] sm:$0xff] (!%p190_p2)   ;;  %v835_v16 = vld [vmem:[%s1091_s1 + $0x68] ss:$0 sps:$4 sm:$0xff] (!%p190_p2)  }
   0xa   : > { %v444_v17 = vsel (!%p190_p2), %vm442_vm1, %v835_v16, 0  ;;  %v1004_v31 = vld [vmem:[%s1092_s2] ss:$0 sm:$0xff] (!%p190_p2) }
   0xb   : > { %449 = vmatpush1.bf16.msra.mxu0 (!%p190_p2), %v823_v2  ;;  %800 = vmatpush1.bf16.msra.mxu1 (!%p190_p2), %v823_v2  ;;  %v1011_v38 = vld [vmem:[%s1093_s3] ss:$0 sm:$0xff] (!%p190_p2) }
   0xc   : > { %450 = vmatprep.subr.bf16.mxu0 (!%p190_p2), %v864_v1  ;;  %787 = vmatprep.subr.bf16.mxu1 (!%p190_p2), %v864_v1  ;;  %v1018_v47 = vld [vmem:[%s1094_s4] ss:$0 sm:$0xff] (!%p190_p2) }
   0xd   : > { %s1097_s24 = smov (!%p219_p3, %s218_s24), 25 }
   0xe   : > { %s771_s27 = sshll.u32 %s1097_s24, 3  ;;  %s717_s11 = sshll.u32 %s1097_s24, 2 }
   0xf   : > { %451 = vmatpush1.bf16.msra.mxu0 %v824_v3  ;;  %801 = vmatpush1.bf16.msra.mxu1 %v824_v3  ;;  %s929_s7 = scalar_lea.vmem %s1090_s0, %s771_s27  ;;  %s1030_s14 = scalar_lea.vmem %s1095_s5, %s717_s11 }
  0x10   : > { %452 = vmatprep.subr.bf16.mxu0 %v864_v1  ;;  %788 = vmatprep.subr.bf16.mxu1 %v864_v1  ;;  %v838_v6 = vld [vmem:[%s929_s7 + $0x4] ss:$8 sps:$4 sm:$0xff]   ;;  %v836_v18 = vld [vmem:[%s929_s7] ss:$8 sps:$4 sm:$0xff]   ;;  %v842_v20 = vld [vmem:[%s929_s7 + $0x14] ss:$8 sps:$4 sm:$0xff]  }
  0x11   : > { %747 = vmatprep.mubr.msk.bf16.mxu0 %vm420_vm0, %v838_v6  ;;  %v841_v7 = vld [vmem:[%s929_s7 + $0x44] ss:$8 sps:$4 sm:$0xff]   ;;  %v839_v19 = vld [vmem:[%s929_s7 + $0x40] ss:$8 sps:$4 sm:$0xff]   ;;  %v845_v21 = vld [vmem:[%s929_s7 + $0x54] ss:$8 sps:$4 sm:$0xff]  }
  0x12   : > { %751 = vmatprep.mubr.msk.bf16.mxu1 %vm420_vm0, %v841_v7  ;;  %v244_v22 = vld [vmem:[%s929_s7 + $0x60] sm:$0xff]  ;;  %v844_v23 = vld [vmem:[%s929_s7 + $0x10] ss:$8 sps:$4 sm:$0xff]   ;;  %v852_v29 = vld [vmem:[%s929_s7 + $0x34] ss:$8 sps:$4 sm:$0xff]  }
  0x13   : > { %453 = vmatpush1.bf16.msra.mxu0 %v825_v4  ;;  %802 = vmatpush1.bf16.msra.mxu1 %v825_v4  ;;  %v849_v24 = vld [vmem:[%s929_s7 + $0x50] ss:$8 sps:$4 sm:$0xff]   ;;  %v847_v25 = vld [vmem:[%s929_s7 + $0x24] ss:$8 sps:$4 sm:$0xff]   ;;  %v732_v26 = vcombine.high %v244_v22, %v244_v22  ;;  %v850_v27 = vld [vmem:[%s929_s7 + $0x20] ss:$8 sps:$4 sm:$0xff]   ;;  %v731_v28 = vcombine.low %v244_v22, %v244_v22 }
  0x14   : > { %454 = vmatprep.subr.bf16.mxu0 %v864_v1  ;;  %789 = vmatprep.subr.bf16.mxu1 %v864_v1  ;;  %v855_v30 = vld [vmem:[%s929_s7 + $0x30] ss:$8 sps:$4 sm:$0xff]  }
  0x17   : > { %455 = vmatpush1.bf16.msra.mxu0 %v826_v5  ;;  %803 = vmatpush1.bf16.msra.mxu1 %v826_v5 }
  0x18   : > { %456 = vmatprep.subr.bf16.mxu0 %v864_v1  ;;  %790 = vmatprep.subr.bf16.mxu1 %v864_v1 }
  0x1b   : > { %457 = vmatpush1.bf16.msra.mxu0 %v827_v8  ;;  %804 = vmatpush1.bf16.msra.mxu1 %v827_v8 }
  0x1c   : > { %458 = vmatprep.subr.bf16.mxu0 %v864_v1  ;;  %791 = vmatprep.subr.bf16.mxu1 %v864_v1 }
  0x1f   : > { %459 = vmatpush1.bf16.msra.mxu0 %v828_v9  ;;  %805 = vmatpush1.bf16.msra.mxu1 %v828_v9 }
  0x20   : > { %460 = vmatprep.subr.bf16.mxu0 %v864_v1  ;;  %792 = vmatprep.subr.bf16.mxu1 %v864_v1 }
  0x23   : > { %461 = vmatpush1.bf16.msra.mxu0 %v829_v10  ;;  %806 = vmatpush1.bf16.msra.mxu1 %v829_v10 }
  0x24   : > { %462 = vmatprep.subr.bf16.mxu0 %v864_v1  ;;  %793 = vmatprep.subr.bf16.mxu1 %v864_v1 }
  0x27   : > { %463 = vmatpush1.bf16.msra.mxu0 %v830_v11  ;;  %807 = vmatpush1.bf16.msra.mxu1 %v830_v11 }
  0x28   : > { %464 = vmatprep.subr.bf16.mxu0 %v864_v1  ;;  %794 = vmatprep.subr.bf16.mxu1 %v864_v1 }
  0x2b   : > { %465 = vmatpush1.bf16.msra.mxu0 %v831_v12  ;;  %808 = vmatpush1.bf16.msra.mxu1 %v831_v12 }
  0x2c   : > { %466 = vmatprep.subr.bf16.mxu0 %v864_v1  ;;  %795 = vmatprep.subr.bf16.mxu1 %v864_v1 }
  0x2f   : > { %467 = vmatpush1.bf16.msra.mxu0 %v832_v13  ;;  %809 = vmatpush1.bf16.msra.mxu1 %v832_v13 }
  0x30   : > { %468 = vmatprep.subr.bf16.mxu0 %v864_v1  ;;  %796 = vmatprep.subr.bf16.mxu1 %v864_v1 }
  0x33   : > { %469 = vmatpush1.bf16.msra.mxu0 %v833_v14  ;;  %810 = vmatpush1.bf16.msra.mxu1 %v833_v14 }
  0x34   : > { %470 = vmatprep.subr.bf16.mxu0 %v864_v1  ;;  %797 = vmatprep.subr.bf16.mxu1 %v864_v1 }
  0x37   : > { %471 = vmatpush1.bf16.msra.mxu0 %v834_v15  ;;  %811 = vmatpush1.bf16.msra.mxu1 %v834_v15 }
  0x38   : > { %472 = vmatprep.subr.bf16.mxu0 %v864_v1  ;;  %798 = vmatprep.subr.bf16.mxu1 %v864_v1 }
  0x3b   : > { %473 = vmatpush1.bf16.msra.mxu0 %v444_v17  ;;  %812 = vmatpush1.bf16.msra.mxu1 %v444_v17 }
  0x3e   : > { %479 = vmatmul.mubr.bf16.vlgmr.msra.gmra.mrb[0].mxu0 %v836_v18  ;;  %511 = vmatmul.mubr.bf16.vlgmr.msra.gmra.mrb[0].mxu1 %v839_v19 }
  0x3f   : > { %748 = vmatprep.mubr.msk.bf16.mxu0 %vm420_vm0, %v842_v20  ;;  %752 = vmatprep.mubr.msk.bf16.mxu1 %vm420_vm0, %v845_v21 }
  0x46   : > { %487 = vmatmul.mubr.bf16.gmra.mrb[4].mxu0 %v844_v23  ;;  %519 = vmatmul.mubr.bf16.gmra.mrb[4].mxu1 %v849_v24 }
  0x47   : > { %749 = vmatprep.mubr.msk.bf16.mxu0 %vm420_vm0, %v847_v25  ;;  %753 = vmatprep.mubr.msk.bf16.mxu1 %vm420_vm0, %v732_v26 }
  0x4e   : > { %495 = vmatmul.mubr.bf16.gmra.mrb[8].mxu0 %v850_v27  ;;  %527 = vmatmul.mubr.bf16.gmra.mrb[8].mxu1 %v731_v28 }
  0x4f   : > { %750 = vmatprep.mubr.msk.bf16.mxu0 %vm420_vm0, %v852_v29 }
  0x56   : > { %503 = vmatmul.mubr.bf16.gmra.mrb[12].mxu0 %v855_v30 }
 0x111   : > { %v480_v32 = vpop.f32.mrb[0].mxu0  ;;  %v512_v33 = vpop.f32.mrb[0].mxu1 }
 0x112   : > { %v481_v34 = vadd.f32 %v1004_v31, %v480_v32  ;;  %v482_v35 = vpop.f32.mrb[1].mxu0  ;;  %v513_v36 = vadd.f32 %v1004_v31, %v512_v33  ;;  %v514_v37 = vpop.f32.mrb[1].mxu1 }
 0x113   : > { %v483_v39 = vpop.f32.mrb[2].mxu0  ;;  %v515_v40 = vpop.f32.mrb[2].mxu1 }
 0x114   : > { %v534_v41 = vmax.f32 %v481_v34, 0.0  ;;  %v484_v42 = vadd.f32 %v1004_v31, %v483_v39  ;;  %v485_v43 = vpop.f32.mrb[3].mxu0  ;;  %v542_v44 = vmax.f32 %v513_v36, 0.0  ;;  %v516_v45 = vadd.f32 %v1004_v31, %v515_v40  ;;  %v517_v46 = vpop.f32.mrb[3].mxu1 }
 0x116   : > { %v554_v48 = vmul.f32 %v1011_v38, %v534_v41  ;;  %v535_v49 = vmax.f32 %v484_v42, 0.0  ;;  %v562_v50 = vmul.f32 %v1011_v38, %v542_v44  ;;  %v543_v51 = vmax.f32 %v516_v45, 0.0 }
 0x118   : > { %v574_v52 = vadd.f32 %v1018_v47, %v554_v48  ;;  %v555_v53 = vmul.f32 %v1011_v38, %v535_v49  ;;  %v582_v54 = vadd.f32 %v1018_v47, %v562_v50  ;;  %v563_v55 = vmul.f32 %v1011_v38, %v543_v51 }
 0x119   : > { %v488_v56 = vpop.f32.mrb[4].mxu0  ;;  %v520_v57 = vpop.f32.mrb[4].mxu1 }
 0x11a   : > { %v772_v58 = vpack.c.bf16 %v574_v52, %v574_v52  ;;  %v575_v59 = vadd.f32 %v1018_v47, %v555_v53  ;;  %v780_v60 = vpack.c.bf16 %v582_v54, %v582_v54  ;;  %v489_v61 = vadd.f32 %v1004_v31, %v488_v56  ;;  %v490_v62 = vpop.f32.mrb[5].mxu0  ;;  %v522_v63 = vpop.f32.mrb[5].mxu1 }
 0x11b   : > { %v583_v0 = vadd.f32 %v1018_v47, %v563_v55  ;;  %v491_v1 = vpop.f32.mrb[6].mxu0  ;;  %v521_v2 = vadd.f32 %v1004_v31, %v520_v57  ;;  %v523_v3 = vpop.f32.mrb[6].mxu1 }
 0x11c   : > { %641 = vst.msk [vmem:[%s1030_s14] sm:$0xf] %vm640_vm2, %v772_v58  ;;  %v773_v4 = vpack.c.bf16 %v575_v59, %v575_v59  ;;  %649 = vst.msk [vmem:[%s1030_s14 + $0x20] sm:$0xf] %vm640_vm2, %v780_v60  ;;  %v536_v5 = vmax.f32 %v489_v61, 0.0  ;;  %v492_v6 = vadd.f32 %v1004_v31, %v491_v1  ;;  %v493_v7 = vpop.f32.mrb[7].mxu0  ;;  %v524_v8 = vadd.f32 %v1004_v31, %v523_v3 }
 0x11d   : > { %v525_v9 = vpop.f32.mrb[7].mxu1  ;;  %v781_v10 = vpack.c.bf16 %v583_v0, %v583_v0  ;;  %v544_v11 = vmax.f32 %v521_v2, 0.0 }
 0x11e   : > { %642 = vst.msk [vmem:[%s1030_s14 + $0x4] sm:$0xf] %vm640_vm2, %v773_v4  ;;  %v556_v12 = vmul.f32 %v1011_v38, %v536_v5  ;;  %v537_v13 = vmax.f32 %v492_v6, 0.0  ;;  %v545_v14 = vmax.f32 %v524_v8, 0.0 }
 0x11f   : > { %650 = vst.msk [vmem:[%s1030_s14 + $0x24] sm:$0xf] %vm640_vm2, %v781_v10  ;;  %v564_v15 = vmul.f32 %v1011_v38, %v544_v11 }
 0x120   : > { %v576_v16 = vadd.f32 %v1018_v47, %v556_v12  ;;  %v557_v17 = vmul.f32 %v1011_v38, %v537_v13  ;;  %v565_v18 = vmul.f32 %v1011_v38, %v545_v14 }
 0x121   : > { %v584_v19 = vadd.f32 %v1018_v47, %v564_v15  ;;  %v496_v20 = vpop.f32.mrb[8].mxu0  ;;  %v528_v21 = vpop.f32.mrb[8].mxu1 }
 0x122   : > { %v774_v22 = vpack.c.bf16 %v576_v16, %v576_v16  ;;  %v577_v23 = vadd.f32 %v1018_v47, %v557_v17  ;;  %v497_v24 = vadd.f32 %v1004_v31, %v496_v20  ;;  %v498_v25 = vpop.f32.mrb[9].mxu0  ;;  %v585_v26 = vadd.f32 %v1018_v47, %v565_v18  ;;  %v530_v27 = vpop.f32.mrb[9].mxu1 }
 0x123   : > { %v782_v28 = vpack.c.bf16 %v584_v19, %v584_v19  ;;  %v499_v29 = vpop.f32.mrb[10].mxu0  ;;  %v529_v30 = vadd.f32 %v1004_v31, %v528_v21  ;;  %v531_v32 = vpop.f32.mrb[10].mxu1 }
 0x124   : > { %643 = vst.msk [vmem:[%s1030_s14 + $0x8] sm:$0xf] %vm640_vm2, %v774_v22  ;;  %v775_v33 = vpack.c.bf16 %v577_v23, %v577_v23  ;;  %v538_v34 = vmax.f32 %v497_v24, 0.0  ;;  %v783_v35 = vpack.c.bf16 %v585_v26, %v585_v26  ;;  %v500_v36 = vadd.f32 %v1004_v31, %v499_v29  ;;  %v501_v37 = vpop.f32.mrb[11].mxu0  ;;  %v532_v39 = vpop.f32.mrb[11].mxu1 }
 0x125   : > { %651 = vst.msk [vmem:[%s1030_s14 + $0x28] sm:$0xf] %vm640_vm2, %v782_v28  ;;  %v546_v40 = vmax.f32 %v529_v30, 0.0 }
 0x126   : > { %644 = vst.msk [vmem:[%s1030_s14 + $0xc] sm:$0xf] %vm640_vm2, %v775_v33  ;;  %v558_v41 = vmul.f32 %v1011_v38, %v538_v34  ;;  %652 = vst.msk [vmem:[%s1030_s14 + $0x2c] sm:$0xf] %vm640_vm2, %v783_v35  ;;  %v539_v42 = vmax.f32 %v500_v36, 0.0 }
 0x127   : > { %v566_v43 = vmul.f32 %v1011_v38, %v546_v40 }
 0x128   : > { %v578_v44 = vadd.f32 %v1018_v47, %v558_v41  ;;  %v559_v45 = vmul.f32 %v1011_v38, %v539_v42 }
 0x129   : > { %v586_v46 = vadd.f32 %v1018_v47, %v566_v43  ;;  %v504_v48 = vpop.f32.mrb[12].mxu0 }
 0x12a   : > { %v776_v49 = vpack.c.bf16 %v578_v44, %v578_v44  ;;  %v579_v50 = vadd.f32 %v1018_v47, %v559_v45  ;;  %v505_v51 = vadd.f32 %v1004_v31, %v504_v48  ;;  %v506_v52 = vpop.f32.mrb[13].mxu0 }
 0x12b   : > { %v784_v53 = vpack.c.bf16 %v586_v46, %v586_v46  ;;  %v507_v54 = vpop.f32.mrb[14].mxu0 }
 0x12c   : > { %645 = vst.msk [vmem:[%s1030_s14 + $0x10] sm:$0xf] %vm640_vm2, %v776_v49  ;;  %v777_v55 = vpack.c.bf16 %v579_v50, %v579_v50  ;;  %v540_v56 = vmax.f32 %v505_v51, 0.0  ;;  %v508_v57 = vadd.f32 %v1004_v31, %v507_v54  ;;  %v509_v58 = vpop.f32.mrb[15].mxu0 }
 0x12d   : > { %653 = vst.msk [vmem:[%s1030_s14 + $0x30] sm:$0xf] %vm640_vm2, %v784_v53 }
 0x12e   : > { %646 = vst.msk [vmem:[%s1030_s14 + $0x14] sm:$0xf] %vm640_vm2, %v777_v55  ;;  %v560_v59 = vmul.f32 %v1011_v38, %v540_v56  ;;  %v541_v60 = vmax.f32 %v508_v57, 0.0 }
 0x130   : > { %v580_v61 = vadd.f32 %v1018_v47, %v560_v59  ;;  %v561_v62 = vmul.f32 %v1011_v38, %v541_v60 }
 0x132   : > { %v778_v63 = vpack.c.bf16 %v580_v61, %v580_v61  ;;  %v581_v0 = vadd.f32 %v1018_v47, %v561_v62 }
 0x134   : > { %647 = vst.msk [vmem:[%s1030_s14 + $0x18] sm:$0xf] %vm640_vm2, %v778_v63  ;;  %v779_v1 = vpack.c.bf16 %v581_v0, %v581_v0 }
 0x136   : > { %648 = vst.msk [vmem:[%s1030_s14 + $0x1c] sm:$0xf] %vm640_vm2, %v779_v1 }
 0x137 PF: > { %s15_s18 = sadd.s32 1, %s862_s18  }
 0x138   : > { %p12_p4 = scmp.ge.s32.totalorder %s15_s18, 4  }
 0x13a   :  { %14 = sbr.rel (!%p12_p4) target bundleno = 1 (0x1), region = 70 }

// kernel: pool_forward.8
= control target key start
LH: loop header
LB: loop body
LE: loop exit
PB: predicated region body
PF: predicated region fallthrough
CT: control target
= control target key end

     0   :  { %s672_s18 = smov 0   ;;  %s778_s0 = inlined_call_operand.vmem [shape: bf16[64,216], index: 0, kind: input, shape index: {}]   ;;  %s779_s1 = inlined_call_operand.vmem [shape: bf16[216,24], index: 1, kind: input, shape index: {}]   ;;  %s780_s2 = inlined_call_operand.vmem [shape: f32[1,24], index: 2, kind: input, shape index: {}]   ;;  %s781_s3 = inlined_call_operand.vmem [shape: f32[1,24], index: 3, kind: input, shape index: {}]   ;;  %s782_s4 = inlined_call_operand.vmem [shape: f32[1,24], index: 4, kind: input, shape index: {}]   ;;  %s783_s5 = inlined_call_operand.vmem [shape: bf16[64,24], index: 5, kind: output, shape index: {}]  }
   0x1 LB: > { %s532_s19 = sadd.s32 4294967295, %s639_s18   ;;  %p536_p0 = scmp.ge.s32.totalorder %s639_s18, 1  ;;  %s639_s18 = sphi %s672_s18, %s15_s18  }
   0x2   : > { %p189_p1 = scmp.lt.s32.totalorder %s639_s18, 3 }
   0x4   : > { %p190_p2 = pnand %p536_p0, %p189_p1 }
   0x5   : > { %v613_v0 = vld [vmem:[%s779_s1] sm:$0xff] (!%p190_p2)   ;;  %v641_v1 = vmov (!%p190_p2), 0   ;;  %v614_v2 = vld [vmem:[%s779_s1 + $0x8] sm:$0xff] (!%p190_p2)   ;;  %s537_s24 = sshll.u32 (!%p190_p2), %s532_s19, 2  ;;  %v615_v3 = vld [vmem:[%s779_s1 + $0x10] sm:$0xff] (!%p190_p2)   ;;  %vm369_vm0 = vcmask (!%p190_p2), 719872  }
   0x6   : > { %193 = sbr.rel (%p190_p2) target bundleno = 287 (0x11f), region = 40  ;;  %380 = vmatprep.subr.bf16.mxu0 (!%p190_p2), %v641_v1  ;;  %576 = vmatprep.subr.bf16.mxu1 (!%p190_p2), %v641_v1  ;;  %p219_p3 = scmp.lt.s32.totalorder (!%p190_p2), %s537_s24, 7  ;;  %v616_v4 = vld [vmem:[%s779_s1 + $0x18] sm:$0xff] (!%p190_p2)   ;;  %v617_v5 = vld [vmem:[%s779_s1 + $0x20] sm:$0xff] (!%p190_p2)   ;;  %v618_v8 = vld [vmem:[%s779_s1 + $0x28] sm:$0xff] (!%p190_p2)   ;;  %vm376_vm1 = vcmask (!%p190_p2), 1043456  }
   0x7   : > { %381 = vmatpush1.bf16.msra.mxu0 (!%p190_p2), %v613_v0  ;;  %590 = vmatpush1.bf16.msra.mxu1 (!%p190_p2), %v613_v0  ;;  %v619_v9 = vld [vmem:[%s779_s1 + $0x30] sm:$0xff] (!%p190_p2)   ;;  %v620_v10 = vld [vmem:[%s779_s1 + $0x38] sm:$0xff] (!%p190_p2)   ;;  %v621_v11 = vld [vmem:[%s779_s1 + $0x40] sm:$0xff] (!%p190_p2)   ;;  %vm471_vm2 = vcmask (!%p190_p2), 191488  }
   0x8   : > { %382 = vmatprep.subr.bf16.mxu0 (!%p190_p2), %v641_v1  ;;  %577 = vmatprep.subr.bf16.mxu1 (!%p190_p2), %v641_v1  ;;  %v622_v12 = vld [vmem:[%s779_s1 + $0x48] sm:$0xff] (!%p190_p2)   ;;  %v623_v13 = vld [vmem:[%s779_s1 + $0x50] sm:$0xff] (!%p190_p2)   ;;  %v624_v14 = vld [vmem:[%s779_s1 + $0x58] sm:$0xff] (!%p190_p2)  }
   0x9   : > { %v625_v15 = vld [vmem:[%s779_s1 + $0x60] sm:$0xff] (!%p190_p2)   ;;  %v626_v16 = vld [vmem:[%s779_s1 + $0x68] ss:$0 sps:$4 sm:$0xff] (!%p190_p2)  }
   0xa   : > { %v378_v17 = vsel (!%p190_p2), %vm376_vm1, %v626_v16, 0  ;;  %v542_v20 = vld [vmem:[%s780_s2] ss:$0 sm:$0xff] (!%p190_p2) }
   0xb   : > { %383 = vmatpush1.bf16.msra.mxu0 (!%p190_p2), %v614_v2  ;;  %591 = vmatpush1.bf16.msra.mxu1 (!%p190_p2), %v614_v2  ;;  %v563_v27 = vld [vmem:[%s781_s3] ss:$0 sm:$0xff] (!%p190_p2) }
   0xc   : > { %384 = vmatprep.subr.bf16.mxu0 (!%p190_p2), %v641_v1  ;;  %578 = vmatprep.subr.bf16.mxu1 (!%p190_p2), %v641_v1  ;;  %v564_v36 = vld [vmem:[%s782_s4] ss:$0 sm:$0xff] (!%p190_p2) }
   0xd   : > { %s785_s24 = smov (!%p219_p3, %s537_s24), 7 }
   0xe   : > { %s571_s27 = sshll.u32 %s785_s24, 3  ;;  %s541_s11 = sshll.u32 %s785_s24, 2 }
   0xf   : > { %385 = vmatpush1.bf16.msra.mxu0 %v615_v3  ;;  %592 = vmatpush1.bf16.msra.mxu1 %v615_v3  ;;  %s706_s7 = scalar_lea.vmem %s778_s0, %s571_s27  ;;  %s229_s14 = scalar_lea.vmem %s783_s5, %s541_s11 }
  0x10   : > { %386 = vmatprep.subr.bf16.mxu0 %v641_v1  ;;  %579 = vmatprep.subr.bf16.mxu1 %v641_v1  ;;  %v629_v6 = vld [vmem:[%s706_s7 + $0x4] ss:$8 sps:$4 sm:$0xff]   ;;  %v632_v7 = vld [vmem:[%s706_s7 + $0x14] ss:$8 sps:$4 sm:$0xff]   ;;  %v627_v18 = vld [vmem:[%s706_s7] ss:$8 sps:$4 sm:$0xff]  }
  0x11   : > { %561 = vmatprep.mubr.msk.bf16.mxu0 %vm369_vm0, %v629_v6  ;;  %562 = vmatprep.mubr.msk.bf16.mxu1 %vm369_vm0, %v632_v7  ;;  %v630_v19 = vld [vmem:[%s706_s7 + $0x10] ss:$8 sps:$4 sm:$0xff]  }
  0x13   : > { %387 = vmatpush1.bf16.msra.mxu0 %v616_v4  ;;  %593 = vmatpush1.bf16.msra.mxu1 %v616_v4 }
  0x14   : > { %388 = vmatprep.subr.bf16.mxu0 %v641_v1  ;;  %580 = vmatprep.subr.bf16.mxu1 %v641_v1 }
  0x17   : > { %389 = vmatpush1.bf16.msra.mxu0 %v617_v5  ;;  %594 = vmatpush1.bf16.msra.mxu1 %v617_v5 }
  0x18   : > { %390 = vmatprep.subr.bf16.mxu0 %v641_v1  ;;  %581 = vmatprep.subr.bf16.mxu1 %v641_v1 }
  0x1b   : > { %391 = vmatpush1.bf16.msra.mxu0 %v618_v8  ;;  %595 = vmatpush1.bf16.msra.mxu1 %v618_v8 }
  0x1c   : > { %392 = vmatprep.subr.bf16.mxu0 %v641_v1  ;;  %582 = vmatprep.subr.bf16.mxu1 %v641_v1 }
  0x1f   : > { %393 = vmatpush1.bf16.msra.mxu0 %v619_v9  ;;  %596 = vmatpush1.bf16.msra.mxu1 %v619_v9 }
  0x20   : > { %394 = vmatprep.subr.bf16.mxu0 %v641_v1  ;;  %583 = vmatprep.subr.bf16.mxu1 %v641_v1 }
  0x23   : > { %395 = vmatpush1.bf16.msra.mxu0 %v620_v10  ;;  %597 = vmatpush1.bf16.msra.mxu1 %v620_v10 }
  0x24   : > { %396 = vmatprep.subr.bf16.mxu0 %v641_v1  ;;  %584 = vmatprep.subr.bf16.mxu1 %v641_v1 }
  0x27   : > { %397 = vmatpush1.bf16.msra.mxu0 %v621_v11  ;;  %598 = vmatpush1.bf16.msra.mxu1 %v621_v11 }
  0x28   : > { %398 = vmatprep.subr.bf16.mxu0 %v641_v1  ;;  %585 = vmatprep.subr.bf16.mxu1 %v641_v1 }
  0x2b   : > { %399 = vmatpush1.bf16.msra.mxu0 %v622_v12  ;;  %599 = vmatpush1.bf16.msra.mxu1 %v622_v12 }
  0x2c   : > { %400 = vmatprep.subr.bf16.mxu0 %v641_v1  ;;  %586 = vmatprep.subr.bf16.mxu1 %v641_v1 }
  0x2f   : > { %401 = vmatpush1.bf16.msra.mxu0 %v623_v13  ;;  %600 = vmatpush1.bf16.msra.mxu1 %v623_v13 }
  0x30   : > { %402 = vmatprep.subr.bf16.mxu0 %v641_v1  ;;  %587 = vmatprep.subr.bf16.mxu1 %v641_v1 }
  0x33   : > { %403 = vmatpush1.bf16.msra.mxu0 %v624_v14  ;;  %601 = vmatpush1.bf16.msra.mxu1 %v624_v14 }
  0x34   : > { %404 = vmatprep.subr.bf16.mxu0 %v641_v1  ;;  %588 = vmatprep.subr.bf16.mxu1 %v641_v1 }
  0x37   : > { %405 = vmatpush1.bf16.msra.mxu0 %v625_v15  ;;  %602 = vmatpush1.bf16.msra.mxu1 %v625_v15 }
  0x38   : > { %406 = vmatprep.subr.bf16.mxu0 %v641_v1  ;;  %589 = vmatprep.subr.bf16.mxu1 %v641_v1 }
  0x3b   : > { %407 = vmatpush1.bf16.msra.mxu0 %v378_v17  ;;  %603 = vmatpush1.bf16.msra.mxu1 %v378_v17 }
  0x3e   : > { %413 = vmatmul.mubr.bf16.vlgmr.msra.gmra.mrb[0].mxu0 %v627_v18  ;;  %421 = vmatmul.mubr.bf16.vlgmr.msra.gmra.mrb[0].mxu1 %v630_v19 }
 0x111   : > { %v414_v21 = vpop.f32.mrb[0].mxu0  ;;  %v422_v22 = vpop.f32.mrb[0].mxu1 }
 0x112   : > { %v415_v23 = vadd.f32 %v542_v20, %v414_v21  ;;  %v423_v24 = vadd.f32 %v542_v20, %v422_v22  ;;  %v416_v25 = vpop.f32.mrb[1].mxu0  ;;  %v424_v26 = vpop.f32.mrb[1].mxu1 }
 0x113   : > { %v417_v28 = vpop.f32.mrb[2].mxu0  ;;  %v425_v29 = vpop.f32.mrb[2].mxu1 }
 0x114   : > { %v429_v30 = vmax.f32 %v415_v23, 0.0  ;;  %v431_v31 = vmax.f32 %v423_v24, 0.0  ;;  %v418_v32 = vadd.f32 %v542_v20, %v417_v28  ;;  %v426_v33 = vadd.f32 %v542_v20, %v425_v29  ;;  %v419_v34 = vpop.f32.mrb[3].mxu0  ;;  %v427_v35 = vpop.f32.mrb[3].mxu1 }
 0x116   : > { %v440_v37 = vmul.f32 %v563_v27, %v429_v30  ;;  %v442_v38 = vmul.f32 %v563_v27, %v431_v31  ;;  %v430_v39 = vmax.f32 %v418_v32, 0.0  ;;  %v432_v40 = vmax.f32 %v426_v33, 0.0 }
 0x118   : > { %v451_v41 = vadd.f32 %v564_v36, %v440_v37  ;;  %v453_v42 = vadd.f32 %v564_v36, %v442_v38  ;;  %v441_v43 = vmul.f32 %v563_v27, %v430_v39  ;;  %v443_v44 = vmul.f32 %v563_v27, %v432_v40 }
 0x11a   : > { %v572_v45 = vpack.c.bf16 %v451_v41, %v451_v41  ;;  %v452_v46 = vadd.f32 %v564_v36, %v441_v43  ;;  %v454_v47 = vadd.f32 %v564_v36, %v443_v44  ;;  %v574_v48 = vpack.c.bf16 %v453_v42, %v453_v42 }
 0x11c   : > { %472 = vst.msk [vmem:[%s229_s14] sm:$0xf] %vm471_vm2, %v572_v45  ;;  %v573_v49 = vpack.c.bf16 %v452_v46, %v452_v46  ;;  %v575_v50 = vpack.c.bf16 %v454_v47, %v454_v47  ;;  %474 = vst.msk [vmem:[%s229_s14 + $0x8] sm:$0xf] %vm471_vm2, %v574_v48 }
 0x11e   : > { %473 = vst.msk [vmem:[%s229_s14 + $0x4] sm:$0xf] %vm471_vm2, %v573_v49  ;;  %475 = vst.msk [vmem:[%s229_s14 + $0xc] sm:$0xf] %vm471_vm2, %v575_v50 }
 0x11f PF: > { %s15_s18 = sadd.s32 1, %s639_s18  }
 0x120   : > { %p12_p4 = scmp.ge.s32.totalorder %s15_s18, 4  }
 0x122   :  { %14 = sbr.rel (!%p12_p4) target bundleno = 1 (0x1), region = 70 }

// kernel: mul.5
= control target key start
LH: loop header
LB: loop body
LE: loop exit
PB: predicated region body
PF: predicated region fallthrough
CT: control target
= control target key end

     0   :  { %s82_s0 = inlined_call_operand.vmem [shape: f32[32], index: 0, kind: input, shape index: {}]   ;;  %s83_s1 = inlined_call_operand.vmem [shape: f32[32,256], index: 1, kind: output, shape index: {}]  }
   0x1   :  { %v16_v0 = vld [vmem:[%s82_s0] ss:$0 sm:$0xff] }
   0x2   :  { %19 = vbcast.lane.b32.xlu1 %v16_v0, 272  ;;  %6 = vbcast.lane.b32.xlu0 %v16_v0, 256 }
   0x6   :  { %26 = vbcast.lane.b32.xlu1 %v16_v0, 280  ;;  %12 = vbcast.lane.b32.xlu0 %v16_v0, 264 }
  0x74   :  { %v20_v1 = vpop.permute.xlu1 %19  ;;  %v7_v2 = vpop.permute.xlu0 %6 }
  0x75   :  { %39 = vst [vmem:[%s83_s1 + $0x20] sm:$0xff] %v20_v1  ;;  %43 = vst [vmem:[%s83_s1 + $0x28] sm:$0xff] %v20_v1 }
  0x76   :  { %8 = vst [vmem:[%s83_s1] sm:$0xff] %v7_v2  ;;  %41 = vst [vmem:[%s83_s1 + $0x8] sm:$0xff] %v7_v2 }
  0x78   :  { %v27_v3 = vpop.permute.xlu1 %26  ;;  %v13_v4 = vpop.permute.xlu0 %12 }
  0x79   :  { %40 = vst [vmem:[%s83_s1 + $0x30] sm:$0xff] %v27_v3  ;;  %44 = vst [vmem:[%s83_s1 + $0x38] sm:$0xff] %v27_v3 }
  0x7a   :  { %38 = vst [vmem:[%s83_s1 + $0x10] sm:$0xff] %v13_v4  ;;  %42 = vst [vmem:[%s83_s1 + $0x18] sm:$0xff] %v13_v4 }

// kernel: pool_forward.9
= control target key start
LH: loop header
LB: loop body
LE: loop exit
PB: predicated region body
PF: predicated region fallthrough
CT: control target
= control target key end

     0   :  { %vm451_vm0 = vcmask 1044480   ;;  %vm452_vm1 = vcmask 1045504   ;;  %v3320_v1 = vmov 65535   ;;  %vm236_vm2 = vcmask 1043456   ;;  %s4456_s4 = inlined_call_operand.vmem [shape: bf16[24,256], index: 4, kind: input, shape index: {}]   ;;  %s4457_s5 = inlined_call_operand.vmem [shape: bf16[11,256], index: 5, kind: input, shape index: {}]   ;;  %s4458_s0 = inlined_call_operand.vmem [shape: bf16[256,24], index: 0, kind: input, shape index: {}]   ;;  %s4459_s1 = inlined_call_operand.vmem [shape: bf16[8,11], index: 1, kind: input, shape index: {}]   ;;  %s4460_s7 = inlined_call_operand.vmem [shape: bf16[256,256], index: 7, kind: input, shape index: {}]   ;;  %s4461_s9 = inlined_call_operand.vmem [shape: bf16[256,256], index: 9, kind: input, shape index: {}]   ;;  %s4462_s6 = inlined_call_operand.vmem [shape: f32[1,256], index: 6, kind: input, shape index: {}]   ;;  %s4463_s2 = inlined_call_operand.vmem [shape: f32[32,256], index: 2, kind: input, shape index: {}]   ;;  %s4464_s8 = inlined_call_operand.vmem [shape: f32[1,256], index: 8, kind: input, shape index: {}]   ;;  %s4465_s11 = inlined_call_operand.vmem [shape: bf16[256,256], index: 11, kind: input, shape index: {}]   ;;  %s4466_s10 = inlined_call_operand.vmem [shape: f32[1,256], index: 10, kind: input, shape index: {}]   ;;  %s4467_s3 = inlined_call_operand.vmem [shape: f32[32,256], index: 3, kind: input, shape index: {}]   ;;  %s4468_s13 = inlined_call_operand.vmem [shape: bf16[256,256], index: 13, kind: input, shape index: {}]   ;;  %s4469_s15 = inlined_call_operand.vmem [shape: bf16[256,128], index: 15, kind: input, shape index: {}]   ;;  %s4470_s12 = inlined_call_operand.vmem [shape: f32[1,256], index: 12, kind: input, shape index: {}]   ;;  %s4471_s14 = inlined_call_operand.vmem [shape: f32[1,256], index: 14, kind: input, shape index: {}]   ;;  %s4472_s16 = inlined_call_operand.vmem [shape: f32[1,128], index: 16, kind: input, shape index: {}]   ;;  %s4473_s17 = inlined_call_operand.vmem [shape: f32[8,128], index: 17, kind: output, shape index: {}]  }
   0x1   :  { %4476 = sst [smem:[#allocation2_spill]] %s4456_s4  ;;  %v453_v2 = vsel %vm451_vm0, 4294967295, %v3320_v1  ;;  %v3321_v8 = vmov 0   ;;  %vm447_vm3 = vcmask 89088   ;;  %v3092_v14 = vld [vmem:[%s4458_s0] sm:$0xff]   ;;  %vm187_vm4 = vcmask 195584  }
   0x2   :  { %4477 = sst [smem:[#allocation3_spill]] %s4457_s5  ;;  %s4478_s26 = sld [smem:[#allocation2_spill]]  ;;  %v454_v6 = vsel %vm452_vm1, %v453_v2, 0  ;;  %493 = vmatprep.mubr.bf16.mxu1 %v3321_v8  ;;  %275 = vmatprep.mubr.bf16.mxu0 %v3321_v8  ;;  %v436_v15 = vld [vmem:[%s4459_s1] sm:$0xf]  ;;  %v3093_v16 = vld [vmem:[%s4458_s0 + $0x8] sm:$0xff]  }
   0x3   :  { %s4479_s19 = sld [smem:[#allocation3_spill]]  ;;  %v3108_v17 = vld [vmem:[%s4460_s7] ss:$8 sps:$4 sm:$0xff]   ;;  %v3110_v18 = vld [vmem:[%s4460_s7 + $0x4] ss:$8 sps:$4 sm:$0xff]   ;;  %v3094_v20 = vld [vmem:[%s4458_s0 + $0x10] sm:$0xff]  }
   0x4   :  { %v3113_v19 = vld [vmem:[%s4460_s7 + $0x14] ss:$8 sps:$4 sm:$0xff]   ;;  %v3111_v21 = vld [vmem:[%s4460_s7 + $0x10] ss:$8 sps:$4 sm:$0xff]   ;;  %v3116_v22 = vld [vmem:[%s4460_s7 + $0x24] ss:$8 sps:$4 sm:$0xff]  }
   0x5   :  { %v3114_v23 = vld [vmem:[%s4460_s7 + $0x20] ss:$8 sps:$4 sm:$0xff]   ;;  %v3119_v24 = vld [vmem:[%s4460_s7 + $0x34] ss:$8 sps:$4 sm:$0xff]   ;;  %v3117_v26 = vld [vmem:[%s4460_s7 + $0x30] ss:$8 sps:$4 sm:$0xff]  }
   0x6   :  { %v3095_v25 = vld [vmem:[%s4458_s0 + $0x18] sm:$0xff]   ;;  %v3122_v27 = vld [vmem:[%s4460_s7 + $0x44] ss:$8 sps:$4 sm:$0xff]   ;;  %v3120_v28 = vld [vmem:[%s4460_s7 + $0x40] ss:$8 sps:$4 sm:$0xff]   ;;  %vm2204_vm5 = vcmask 1041409  }
   0x7   :  { %v3125_v29 = vld [vmem:[%s4460_s7 + $0x54] ss:$8 sps:$4 sm:$0xff]   ;;  %v3096_v30 = vld [vmem:[%s4458_s0 + $0x20] sm:$0xff]   ;;  %v3123_v31 = vld [vmem:[%s4460_s7 + $0x50] ss:$8 sps:$4 sm:$0xff]   ;;  %vm2206_vm6 = vcmask 1042434  }
   0x8   :  { %v91_v0 = vld [vmem:[%s4478_s26 + $0x10] sm:$0xff]  ;;  %v3084_v3 = vld [vmem:[%s4478_s26 + $0x4] ss:$8 sps:$4 sm:$0xff]   ;;  %v3087_v5 = vld [vmem:[%s4478_s26] ss:$8 sps:$4 sm:$0xff]   ;;  %vm2208_vm7 = vcmask 1043459  }
   0x9   :  { %v2893_v4 = vcombine.high %v91_v0, %v91_v0  ;;  %v2892_v7 = vcombine.low %v91_v0, %v91_v0  ;;  %v3088_v9 = vld [vmem:[%s4479_s19 + $0x4] ss:$8 sps:$4 sm:$0x3f]   ;;  %243 = vmatprep.subr.bf16.mxu0 %v3084_v3  ;;  %v3090_v10 = vld [vmem:[%s4479_s19] ss:$8 sps:$4 sm:$0x3f]   ;;  %v581_v3 = vlaneseq }
   0xa   :  { %244 = vmatpush1.bf16.msra.mxu0 %v3087_v5  ;;  %v459_v11 = vand.u32 %v3088_v9, %v454_v6  ;;  %v456_v13 = vand.u32 %v3090_v10, %v454_v6  ;;  %v3128_v32 = vld [vmem:[%s4460_s7 + $0x64] ss:$8 sps:$4 sm:$0xff]   ;;  %v3126_v33 = vld [vmem:[%s4460_s7 + $0x60] ss:$8 sps:$4 sm:$0xff]   ;;  %v3131_v34 = vld [vmem:[%s4460_s7 + $0x74] ss:$8 sps:$4 sm:$0xff]  }
   0xb   :  { %v238_v12 = vsel %vm236_vm2, %v2892_v7, 0  ;;  %2894 = vmatprep.subr.msk.bf16.mxu0 %vm236_vm2, %v2893_v4  ;;  %v3097_v35 = vld [vmem:[%s4458_s0 + $0x28] sm:$0xff]   ;;  %v3129_v36 = vld [vmem:[%s4460_s7 + $0x70] ss:$8 sps:$4 sm:$0xff]   ;;  %v3137_v39 = vld [vmem:[%s4460_s7 + $0x94] ss:$8 sps:$4 sm:$0xff]  }
   0xc   :  { %461 = vmatprep.subr.bf16.mxu1 %v459_v11  ;;  %v3134_v37 = vld [vmem:[%s4460_s7 + $0x84] ss:$8 sps:$4 sm:$0xff]   ;;  %v3132_v38 = vld [vmem:[%s4460_s7 + $0x80] ss:$8 sps:$4 sm:$0xff]   ;;  %v3098_v40 = vld [vmem:[%s4458_s0 + $0x30] sm:$0xff]   ;;  %v582_v7 = vshrl.u32 %v581_v3, 7 }
   0xd   :  { %462 = vmatpush1.bf16.msra.mxu1 %v456_v13  ;;  %v3135_v41 = vld [vmem:[%s4460_s7 + $0x90] ss:$8 sps:$4 sm:$0xff]   ;;  %v3140_v42 = vld [vmem:[%s4460_s7 + $0xa4] ss:$8 sps:$4 sm:$0xff]   ;;  %v3138_v43 = vld [vmem:[%s4460_s7 + $0xa0] ss:$8 sps:$4 sm:$0xff]  }
   0xe   :  { %246 = vmatpush1.bf16.msra.mxu0 %v238_v12  ;;  %1146 = vmatprep.subr.bf16.mxu1 %v3110_v18  ;;  %v3143_v44 = vld [vmem:[%s4460_s7 + $0xb4] ss:$8 sps:$4 sm:$0xff]   ;;  %v3141_v46 = vld [vmem:[%s4460_s7 + $0xb0] ss:$8 sps:$4 sm:$0xff]   ;;  %v3100_v47 = vld [vmem:[%s4458_s0 + $0x40] sm:$0xff]   ;;  %vm2210_vm8 = vcmask 1044484  }
   0xf   :  { %v3099_v45 = vld [vmem:[%s4458_s0 + $0x38] sm:$0xff]   ;;  %v3101_v48 = vld [vmem:[%s4458_s0 + $0x48] sm:$0xff]   ;;  %v3102_v49 = vld [vmem:[%s4458_s0 + $0x50] sm:$0xff]   ;;  %v3322_v1 = vmov 1966171168   ;;  %vm2212_vm9 = vcmask 1045509  }
  0x10   :  { %2913 = vmatmul.mubr.msk.bf16.vlgmr.msra.gmra.mrb[0].mxu1 %vm447_vm3, %v436_v15  ;;  %v3103_v50 = vld [vmem:[%s4458_s0 + $0x58] sm:$0xff]   ;;  %v3146_v51 = vld [vmem:[%s4460_s7 + $0xc4] ss:$8 sps:$4 sm:$0xff]   ;;  %v3144_v52 = vld [vmem:[%s4460_s7 + $0xc0] ss:$8 sps:$4 sm:$0xff]   ;;  %v579_v2 = vunpack.c.l.s4 %v3322_v1  ;;  %vm2214_vm10 = vcmask 1046534  }
  0x11   :  { %2895 = vmatmul.mubr.msk.bf16.vlgmr.msra.gmra.mrb[0].mxu0 %vm187_vm4, %v3092_v14  ;;  %1147 = vmatpush1.bf16.msra.mxu1 %v3108_v17  ;;  %v3149_v53 = vld [vmem:[%s4460_s7 + $0xd4] ss:$8 sps:$4 sm:$0xff]   ;;  %v3147_v54 = vld [vmem:[%s4460_s7 + $0xd0] ss:$8 sps:$4 sm:$0xff]   ;;  %v3104_v55 = vld [vmem:[%s4458_s0 + $0x60] sm:$0xff]   ;;  %vm2216_vm11 = vcmask 1047559  }
  0x12   :  { %285 = vmatprep.mubr.bf16.mxu0 %v3321_v8  ;;  %1148 = vmatprep.subr.bf16.mxu1 %v3113_v19  ;;  %v3152_v56 = vld [vmem:[%s4460_s7 + $0xe4] ss:$8 sps:$4 sm:$0xff]   ;;  %v3150_v57 = vld [vmem:[%s4460_s7 + $0xe0] ss:$8 sps:$4 sm:$0xff]   ;;  %v3155_v58 = vld [vmem:[%s4460_s7 + $0xf4] ss:$8 sps:$4 sm:$0xff]   ;;  %v580_v6 = vunpack.c.0.s8 %v579_v2 }
  0x13   :  { %v3153_v59 = vld [vmem:[%s4460_s7 + $0xf0] ss:$8 sps:$4 sm:$0xff]   ;;  %v3105_v60 = vld [vmem:[%s4458_s0 + $0x68] sm:$0xff]   ;;  %v3161_v5 = vld [vmem:[%s4461_s9 + $0x14] ss:$8 sps:$4 sm:$0xff]  }
  0x14   :  { %v3106_v61 = vld [vmem:[%s4458_s0 + $0x70] sm:$0xff]   ;;  %v3107_v62 = vld [vmem:[%s4458_s0 + $0x78] sm:$0xff]   ;;  %v3156_v63 = vld [vmem:[%s4461_s9] ss:$8 sps:$4 sm:$0xff]   ;;  %v3622_v9 = vsub.s32 %v580_v6, %v582_v7 }
  0x15   :  { %1149 = vmatpush1.bf16.msra.mxu1 %v3111_v21  ;;  %v3158_v0 = vld [vmem:[%s4461_s9 + $0x4] ss:$8 sps:$4 sm:$0xff]   ;;  %v3159_v4 = vld [vmem:[%s4461_s9 + $0x10] ss:$8 sps:$4 sm:$0xff]   ;;  %v3162_v18 = vld [vmem:[%s4461_s9 + $0x20] ss:$8 sps:$4 sm:$0xff]  }
  0x16   :  { %1150 = vmatprep.subr.bf16.mxu1 %v3116_v22  ;;  %1639 = vmatprep.subr.bf16.mxu0 %v3158_v0  ;;  %v3164_v19 = vld [vmem:[%s4461_s9 + $0x24] ss:$8 sps:$4 sm:$0xff]   ;;  %v770_v22 = vld [vmem:[%s4462_s6] sm:$0x3]  ;;  %v3173_v3 = vld [vmem:[%s4461_s9 + $0x54] ss:$8 sps:$4 sm:$0xff]  }
  0x17   :  { %1640 = vmatpush1.bf16.msra.mxu0 %v3156_v63 }
  0x18   :  { %1641 = vmatprep.subr.bf16.mxu0 %v3161_v5 }
  0x19   :  { %2896 = vmatmul.mubr.msk.bf16.gmra.mrb[4].mxu0 %vm187_vm4, %v3093_v16  ;;  %1151 = vmatpush1.bf16.msra.mxu1 %v3114_v23 }
  0x1a   :  { %295 = vmatprep.mubr.bf16.mxu0 %v3321_v8  ;;  %1152 = vmatprep.subr.bf16.mxu1 %v3119_v24  ;;  %v3637_v24 = vsub.s32 0, %v582_v7 }
  0x1b   :  { %1642 = vmatpush1.bf16.msra.mxu0 %v3159_v4 }
  0x1c   :  { %1643 = vmatprep.subr.bf16.mxu0 %v3164_v19 }
  0x1d   :  { %1153 = vmatpush1.bf16.msra.mxu1 %v3117_v26  ;;  %v3644_v26 = vld [vmem:[%s4463_s2] sm:$0xff] }
  0x1e   :  { %1154 = vmatprep.subr.bf16.mxu1 %v3122_v27  ;;  %v3649_v27 = vld [vmem:[%s4463_s2 + $0x8] sm:$0xff] }
  0x1f   :  { %1644 = vmatpush1.bf16.msra.mxu0 %v3162_v18 }
  0x21   :  { %2897 = vmatmul.mubr.msk.bf16.gmra.mrb[8].mxu0 %vm187_vm4, %v3094_v20  ;;  %1155 = vmatpush1.bf16.msra.mxu1 %v3120_v28 }
  0x22   :  { %305 = vmatprep.mubr.bf16.mxu0 %v3321_v8  ;;  %1156 = vmatprep.subr.bf16.mxu1 %v3125_v29 }
  0x25   :  { %1157 = vmatpush1.bf16.msra.mxu1 %v3123_v31  ;;  %v3664_v31 = vld [vmem:[%s4463_s2 + $0x18] sm:$0xff] }
  0x26   :  { %1158 = vmatprep.subr.bf16.mxu1 %v3128_v32  ;;  %v3667_v32 = vrot.slane %v770_v22, %v3637_v24 }
  0x29   :  { %2898 = vmatmul.mubr.msk.bf16.gmra.mrb[12].mxu0 %vm187_vm4, %v3095_v25  ;;  %1159 = vmatpush1.bf16.msra.mxu1 %v3126_v33  ;;  %v3639_v25 = vsub.s32 1, %v582_v7 }
  0x2a   :  { %315 = vmatprep.mubr.bf16.mxu0 %v3321_v8  ;;  %1160 = vmatprep.subr.bf16.mxu1 %v3131_v34  ;;  %v3675_v34 = vld [vmem:[%s4463_s2 + $0x20] sm:$0xff] }
  0x2b   :  { %v3670_v33 = vrot.slane %v770_v22, %v3639_v25  ;;  %v3176_v22 = vld [vmem:[%s4461_s9 + $0x64] ss:$8 sps:$4 sm:$0xff]  }
  0x2d   :  { %1161 = vmatpush1.bf16.msra.mxu1 %v3129_v36  ;;  %v3167_v36 = vld [vmem:[%s4461_s9 + $0x34] ss:$8 sps:$4 sm:$0xff]  }
  0x2e   :  { %1162 = vmatprep.subr.bf16.mxu1 %v3134_v37  ;;  %1645 = vmatprep.subr.bf16.mxu0 %v3167_v36 }
  0x31   :  { %2899 = vmatmul.mubr.msk.bf16.gmra.mrb[16].mxu0 %vm187_vm4, %v3096_v30  ;;  %1163 = vmatpush1.bf16.msra.mxu1 %v3132_v38  ;;  %v3659_v30 = vld [vmem:[%s4463_s2 + $0x10] sm:$0xff] }
  0x32   :  { %325 = vmatprep.mubr.bf16.mxu0 %v3321_v8  ;;  %1164 = vmatprep.subr.bf16.mxu1 %v3137_v39 }
  0x35   :  { %1165 = vmatpush1.bf16.msra.mxu1 %v3135_v41 }
  0x36   :  { %1166 = vmatprep.subr.bf16.mxu1 %v3140_v42 }
  0x39   :  { %2900 = vmatmul.mubr.msk.bf16.gmra.mrb[20].mxu0 %vm187_vm4, %v3097_v35  ;;  %1167 = vmatpush1.bf16.msra.mxu1 %v3138_v43  ;;  %v3165_v35 = vld [vmem:[%s4461_s9 + $0x30] ss:$8 sps:$4 sm:$0xff]  }
  0x3a   :  { %335 = vmatprep.mubr.bf16.mxu0 %v3321_v8  ;;  %1168 = vmatprep.subr.bf16.mxu1 %v3143_v44 }
  0x3b   :  { %1646 = vmatpush1.bf16.msra.mxu0 %v3165_v35 }
  0x3d   :  { %1169 = vmatpush1.bf16.msra.mxu1 %v3141_v46  ;;  %v3697_v46 = vld [vmem:[%s4463_s2 + $0x28] sm:$0xff] }
  0x3e   :  { %1170 = vmatprep.subr.bf16.mxu1 %v3146_v51 }
  0x41   :  { %2901 = vmatmul.mubr.msk.bf16.gmra.mrb[24].mxu0 %vm187_vm4, %v3098_v40  ;;  %1171 = vmatpush1.bf16.msra.mxu1 %v3144_v52 }
  0x42   :  { %345 = vmatprep.mubr.bf16.mxu0 %v3321_v8  ;;  %1172 = vmatprep.subr.bf16.mxu1 %v3149_v53 }
  0x45   :  { %1173 = vmatpush1.bf16.msra.mxu1 %v3147_v54 }
  0x46   :  { %1174 = vmatprep.subr.bf16.mxu1 %v3152_v56 }
  0x49   :  { %2902 = vmatmul.mubr.msk.bf16.gmra.mrb[28].mxu0 %vm187_vm4, %v3099_v45  ;;  %1175 = vmatpush1.bf16.msra.mxu1 %v3150_v57 }
  0x4a   :  { %355 = vmatprep.mubr.bf16.mxu0 %v3321_v8  ;;  %1176 = vmatprep.subr.bf16.mxu1 %v3155_v58 }
  0x4d   :  { %1177 = vmatpush1.bf16.msra.mxu1 %v3153_v59 }
  0x51   :  { %2903 = vmatmul.mubr.msk.bf16.gmra.mrb[32].mxu0 %vm187_vm4, %v3100_v47  ;;  %v3702_v47 = vld [vmem:[%s4463_s2 + $0x30] sm:$0xff] }
  0x52   :  { %365 = vmatprep.mubr.bf16.mxu0 %v3321_v8 }
  0x59   :  { %2904 = vmatmul.mubr.msk.bf16.gmra.mrb[36].mxu0 %vm187_vm4, %v3101_v48 }
  0x5a   :  { %375 = vmatprep.mubr.bf16.mxu0 %v3321_v8 }
  0x61   :  { %2905 = vmatmul.mubr.msk.bf16.gmra.mrb[40].mxu0 %vm187_vm4, %v3102_v49 }
  0x62   :  { %385 = vmatprep.mubr.bf16.mxu0 %v3321_v8 }
  0x69   :  { %2906 = vmatmul.mubr.msk.bf16.gmra.mrb[44].mxu0 %vm187_vm4, %v3103_v50 }
  0x6a   :  { %395 = vmatprep.mubr.bf16.mxu0 %v3321_v8 }
  0x71   :  { %2907 = vmatmul.mubr.msk.bf16.gmra.mrb[48].mxu0 %vm187_vm4, %v3104_v55  ;;  %v3708_v55 = vld [vmem:[%s4463_s2 + $0x38] sm:$0xff] }
  0x72   :  { %405 = vmatprep.mubr.bf16.mxu0 %v3321_v8 }
  0x79   :  { %2908 = vmatmul.mubr.msk.bf16.gmra.mrb[52].mxu0 %vm187_vm4, %v3105_v60 }
  0x7a   :  { %415 = vmatprep.mubr.bf16.mxu0 %v3321_v8 }
  0x81   :  { %2909 = vmatmul.mubr.msk.bf16.gmra.mrb[56].mxu0 %vm187_vm4, %v3106_v61  ;;  %v3168_v61 = vld [vmem:[%s4461_s9 + $0x40] ss:$8 sps:$4 sm:$0xff]  }
  0x82   :  { %425 = vmatprep.mubr.bf16.mxu0 %v3321_v8 }
  0x89   :  { %2910 = vmatmul.mubr.msk.bf16.gmra.mrb[60].mxu0 %vm187_vm4, %v3107_v62  ;;  %v3170_v62 = vld [vmem:[%s4461_s9 + $0x44] ss:$8 sps:$4 sm:$0xff]  }
  0x8a   :  { %1647 = vmatprep.subr.bf16.mxu0 %v3170_v62  ;;  %v3177_v62 = vld [vmem:[%s4461_s9 + $0x70] ss:$8 sps:$4 sm:$0xff]  }
  0x8b   :  { %1648 = vmatpush1.bf16.msra.mxu0 %v3168_v61 }
  0x8c   :  { %1649 = vmatprep.subr.bf16.mxu0 %v3173_v3 }
  0xe3   :  { %v495_v8 = vpop.f32.mrb[0].mxu1 }
  0xe4   :  { %v497_v10 = vpop.f32.mrb[1].mxu1  ;;  %v277_v11 = vpop.f32.mrb[0].mxu0 }
  0xe5   :  { %v576_v12 = vcombine.low %v495_v8, %v497_v10  ;;  %v577_v13 = vcombine.high %v495_v8, %v497_v10  ;;  %v499_v14 = vpop.f32.mrb[2].mxu1  ;;  %v279_v15 = vpop.f32.mrb[1].mxu0  ;;  %v510_v39 = vadd.f32 %v3644_v26, %v277_v11 }
  0xe6   :  { %v500_v16 = vpop.f32.mrb[3].mxu1  ;;  %v281_v17 = vpop.f32.mrb[2].mxu0  ;;  %v511_v40 = vadd.f32 %v3649_v27, %v279_v15 }
  0xe7   :  { %v584_v20 = vrot.slane %v576_v12, %v3622_v9  ;;  %v3632_v21 = vrot.slane %v577_v13, %v3622_v9  ;;  %v283_v23 = vpop.f32.mrb[3].mxu0  ;;  %v512_v43 = vadd.f32 %v3659_v30, %v281_v17  ;;  %v3171_v16 = vld [vmem:[%s4461_s9 + $0x50] ss:$8 sps:$4 sm:$0xff]  }
  0xe8   :  { %v513_v44 = vadd.f32 %v3664_v31, %v283_v23  ;;  %1650 = vmatpush1.bf16.msra.mxu0 %v3171_v16 }
  0xe9   :  { %v593_v28 = vcombine.high %v3632_v21, %v3632_v21  ;;  %v3654_v29 = vrot.slane %v584_v20, %v3622_v9  ;;  %v592_v37 = vcombine.high %v584_v20, %v584_v20  ;;  %1651 = vmatprep.subr.bf16.mxu0 %v3176_v22 }
  0xeb   :  { %v3684_v38 = vrot.slane %v593_v28, %v3622_v9  ;;  %v629_v41 = vrot.slane %v3654_v29, %v3637_v24  ;;  %v633_v42 = vrot.slane %v3654_v29, %v3639_v25  ;;  %v3711_v56 = vrot.slane %v592_v37, %v3622_v9 }
  0xec   :  { %v287_v45 = vpop.f32.mrb[4].mxu0  ;;  %v622_v22 = vcombine.high %v3654_v29, %v3654_v29  ;;  %v3188_v29 = vld [vmem:[%s4461_s9 + $0xa4] ss:$8 sps:$4 sm:$0xff]  }
  0xed   :  { %v514_v48 = vadd.f32 %v3675_v34, %v287_v45  ;;  %v289_v49 = vpop.f32.mrb[5].mxu0  ;;  %v706_v50 = vadd.f32 %v629_v41, %v510_v39  ;;  %v707_v51 = vadd.f32 %v633_v42, %v511_v40  ;;  %v708_v52 = vadd.f32 %v629_v41, %v512_v43 }
  0xee   :  { %v709_v53 = vadd.f32 %v633_v42, %v513_v44  ;;  %v291_v54 = vpop.f32.mrb[6].mxu0  ;;  %v515_v58 = vadd.f32 %v3697_v46, %v289_v49  ;;  %v637_v19 = vrot.slane %v3711_v56, %v3637_v24 }
  0xef   :  { %v710_v57 = vadd.f32 %v629_v41, %v514_v48  ;;  %v516_v59 = vadd.f32 %v3702_v47, %v291_v54  ;;  %v293_v60 = vpop.f32.mrb[7].mxu0  ;;  %v782_v63 = vadd.f32 %v3667_v32, %v706_v50  ;;  %v783_v0 = vadd.f32 %v3670_v33, %v707_v51  ;;  %v3174_v50 = vld [vmem:[%s4461_s9 + $0x60] ss:$8 sps:$4 sm:$0xff]  }
  0xf0   :  { %v784_v1 = vadd.f32 %v3667_v32, %v708_v52  ;;  %v785_v2 = vadd.f32 %v3670_v33, %v709_v53  ;;  %v711_v5 = vadd.f32 %v633_v42, %v515_v58  ;;  %v517_v7 = vadd.f32 %v3708_v55, %v293_v60  ;;  %v3179_v53 = vld [vmem:[%s4461_s9 + $0x74] ss:$8 sps:$4 sm:$0xff]   ;;  %1652 = vmatpush1.bf16.msra.mxu0 %v3174_v50 }
  0xf1   :  { %v786_v4 = vadd.f32 %v3667_v32, %v710_v57  ;;  %v712_v6 = vadd.f32 %v629_v41, %v516_v59  ;;  %v846_v8 = vmax.f32 %v782_v63, 0.0  ;;  %v847_v10 = vmax.f32 %v783_v0, 0.0  ;;  %1653 = vmatprep.subr.bf16.mxu0 %v3179_v53 }
  0xf2   :  { %v848_v11 = vmax.f32 %v784_v1, 0.0  ;;  %v849_v12 = vmax.f32 %v785_v2, 0.0  ;;  %v787_v13 = vadd.f32 %v3670_v33, %v711_v5  ;;  %v713_v15 = vadd.f32 %v633_v42, %v517_v7  ;;  %v3182_v1 = vld [vmem:[%s4461_s9 + $0x84] ss:$8 sps:$4 sm:$0xff]  }
  0xf3   :  { %v788_v14 = vadd.f32 %v3667_v32, %v712_v6  ;;  %v850_v23 = vmax.f32 %v786_v4, 0.0  ;;  %v641_v41 = vrot.slane %v3711_v56, %v3639_v25 }
  0xf4   :  { %v910_v17 = vpack.c.bf16 %v848_v11, %v846_v8  ;;  %v297_v18 = vpop.f32.mrb[8].mxu0  ;;  %v911_v20 = vpack.c.bf16 %v849_v12, %v847_v10  ;;  %v789_v35 = vadd.f32 %v3670_v33, %v713_v15  ;;  %v851_v39 = vmax.f32 %v787_v13, 0.0  ;;  %1654 = vmatpush1.bf16.msra.mxu0 %v3177_v62  ;;  %v3180_v15 = vld [vmem:[%s4461_s9 + $0x80] ss:$8 sps:$4 sm:$0xff]  }
  0xf5   :  { %v852_v28 = vmax.f32 %v788_v14, 0.0  ;;  %v518_v36 = vadd.f32 %v3644_v26, %v297_v18  ;;  %v299_v37 = vpop.f32.mrb[9].mxu0  ;;  %1655 = vmatprep.subr.bf16.mxu0 %v3182_v1 }
  0xf6   :  { %1178 = vmatprep.mubr.bf16.mxu1 %v911_v20  ;;  %v519_v40 = vadd.f32 %v3649_v27, %v299_v37  ;;  %v301_v42 = vpop.f32.mrb[10].mxu0  ;;  %v853_v43 = vmax.f32 %v789_v35, 0.0  ;;  %v3185_v20 = vld [vmem:[%s4461_s9 + $0x94] ss:$8 sps:$4 sm:$0xff]  }
  0xf7   :  { %v714_v44 = vadd.f32 %v637_v19, %v518_v36  ;;  %1179 = vmatmul.mubr.bf16.vlgmr.msra.gmra.mrb[4].mxu1 %v910_v17  ;;  %v520_v45 = vadd.f32 %v3659_v30, %v301_v42  ;;  %v303_v48 = vpop.f32.mrb[11].mxu0  ;;  %v912_v49 = vpack.c.bf16 %v852_v28, %v850_v23 }
  0xf8   :  { %v715_v51 = vadd.f32 %v641_v41, %v519_v40  ;;  %v521_v52 = vadd.f32 %v3664_v31, %v303_v48  ;;  %v913_v58 = vpack.c.bf16 %v853_v43, %v851_v39  ;;  %1656 = vmatpush1.bf16.msra.mxu0 %v3180_v15  ;;  %v3183_v39 = vld [vmem:[%s4461_s9 + $0x90] ss:$8 sps:$4 sm:$0xff]  }
  0xf9   :  { %v790_v54 = vadd.f32 %v3667_v32, %v714_v44  ;;  %v716_v57 = vadd.f32 %v637_v19, %v520_v45  ;;  %1657 = vmatprep.subr.bf16.mxu0 %v3185_v20  ;;  %v645_v44 = vrot.slane %v622_v22, %v3637_v24 }
  0xfa   :  { %v791_v59 = vadd.f32 %v3670_v33, %v715_v51  ;;  %v717_v60 = vadd.f32 %v641_v41, %v521_v52  ;;  %1188 = vmatprep.mubr.bf16.mxu1 %v913_v58  ;;  %v649_v51 = vrot.slane %v622_v22, %v3639_v25 }
  0xfb   :  { %v792_v61 = vadd.f32 %v3667_v32, %v716_v57  ;;  %v854_v2 = vmax.f32 %v790_v54, 0.0 }
  0xfc   :  { %v793_v63 = vadd.f32 %v3670_v33, %v717_v60  ;;  %v307_v0 = vpop.f32.mrb[12].mxu0  ;;  %v855_v6 = vmax.f32 %v791_v59, 0.0  ;;  %1658 = vmatpush1.bf16.msra.mxu0 %v3183_v39  ;;  %v3186_v59 = vld [vmem:[%s4461_s9 + $0xa0] ss:$8 sps:$4 sm:$0xff]   ;;  %v3197_v39 = vld [vmem:[%s4461_s9 + $0xd4] ss:$8 sps:$4 sm:$0xff]  }
  0xfd   :  { %v856_v3 = vmax.f32 %v792_v61, 0.0  ;;  %v522_v4 = vadd.f32 %v3675_v34, %v307_v0  ;;  %v309_v5 = vpop.f32.mrb[13].mxu0  ;;  %1659 = vmatprep.subr.bf16.mxu0 %v3188_v29 }
  0xfe   :  { %v857_v7 = vmax.f32 %v793_v63, 0.0  ;;  %v523_v8 = vadd.f32 %v3697_v46, %v309_v5  ;;  %v311_v10 = vpop.f32.mrb[14].mxu0  ;;  %v3191_v63 = vld [vmem:[%s4461_s9 + $0xb4] ss:$8 sps:$4 sm:$0xff]   ;;  %v3189_v5 = vld [vmem:[%s4461_s9 + $0xb0] ss:$8 sps:$4 sm:$0xff]  }
  0xff   :  { %v718_v11 = vadd.f32 %v637_v19, %v522_v4  ;;  %1189 = vmatmul.mubr.bf16.gmra.mrb[8].mxu1 %v912_v49  ;;  %v524_v12 = vadd.f32 %v3702_v47, %v311_v10  ;;  %v313_v13 = vpop.f32.mrb[15].mxu0  ;;  %v914_v14 = vpack.c.bf16 %v856_v3, %v854_v2 }
 0x100   :  { %v719_v16 = vadd.f32 %v641_v41, %v523_v8  ;;  %v525_v17 = vadd.f32 %v3708_v55, %v313_v13  ;;  %v915_v18 = vpack.c.bf16 %v857_v7, %v855_v6  ;;  %1660 = vmatpush1.bf16.msra.mxu0 %v3186_v59  ;;  %v3194_v8 = vld [vmem:[%s4461_s9 + $0xc4] ss:$8 sps:$4 sm:$0xff]  }
 0x101   :  { %v794_v23 = vadd.f32 %v3667_v32, %v718_v11  ;;  %v720_v28 = vadd.f32 %v637_v19, %v524_v12  ;;  %1661 = vmatprep.subr.bf16.mxu0 %v3191_v63 }
 0x102   :  { %v795_v35 = vadd.f32 %v3670_v33, %v719_v16  ;;  %v721_v36 = vadd.f32 %v641_v41, %v525_v17  ;;  %1198 = vmatprep.mubr.bf16.mxu1 %v915_v18 }
 0x103   :  { %v796_v37 = vadd.f32 %v3667_v32, %v720_v28  ;;  %v858_v19 = vmax.f32 %v794_v23, 0.0  ;;  %v3192_v28 = vld [vmem:[%s4461_s9 + $0xc0] ss:$8 sps:$4 sm:$0xff]  }
 0x104   :  { %v797_v40 = vadd.f32 %v3670_v33, %v721_v36  ;;  %v317_v42 = vpop.f32.mrb[16].mxu0  ;;  %v859_v48 = vmax.f32 %v795_v35, 0.0  ;;  %1662 = vmatpush1.bf16.msra.mxu0 %v3189_v5 }
 0x105   :  { %v860_v43 = vmax.f32 %v796_v37, 0.0  ;;  %v526_v41 = vadd.f32 %v3644_v26, %v317_v42  ;;  %v319_v45 = vpop.f32.mrb[17].mxu0  ;;  %1663 = vmatprep.subr.bf16.mxu0 %v3194_v8 }
 0x106   :  { %v861_v49 = vmax.f32 %v797_v40, 0.0  ;;  %v527_v50 = vadd.f32 %v3649_v27, %v319_v45  ;;  %v321_v52 = vpop.f32.mrb[18].mxu0  ;;  %v624_v40 = vcombine.high %v3711_v56, %v3711_v56  ;;  %v3195_v45 = vld [vmem:[%s4461_s9 + $0xd0] ss:$8 sps:$4 sm:$0xff]   ;;  %v3200_v56 = vld [vmem:[%s4461_s9 + $0xe4] ss:$8 sps:$4 sm:$0xff]  }
 0x107   :  { %v722_v53 = vadd.f32 %v645_v44, %v526_v41  ;;  %1199 = vmatmul.mubr.bf16.gmra.mrb[12].mxu1 %v914_v14  ;;  %v528_v54 = vadd.f32 %v3659_v30, %v321_v52  ;;  %v323_v57 = vpop.f32.mrb[19].mxu0  ;;  %v916_v58 = vpack.c.bf16 %v860_v43, %v858_v19 }
 0x108   :  { %v723_v60 = vadd.f32 %v649_v51, %v527_v50  ;;  %v529_v61 = vadd.f32 %v3664_v31, %v323_v57  ;;  %v917_v62 = vpack.c.bf16 %v861_v49, %v859_v48  ;;  %1664 = vmatpush1.bf16.msra.mxu0 %v3192_v28  ;;  %v653_v52 = vrot.slane %v624_v40, %v3637_v24 }
 0x109   :  { %v798_v0 = vadd.f32 %v3667_v32, %v722_v53  ;;  %v724_v1 = vadd.f32 %v645_v44, %v528_v54  ;;  %1665 = vmatprep.subr.bf16.mxu0 %v3197_v39  ;;  %v657_v59 = vrot.slane %v624_v40, %v3639_v25 }
 0x10a   :  { %v799_v2 = vadd.f32 %v3670_v33, %v723_v60  ;;  %v725_v3 = vadd.f32 %v649_v51, %v529_v61  ;;  %1208 = vmatprep.mubr.bf16.mxu1 %v917_v62 }
 0x10b   :  { %v800_v4 = vadd.f32 %v3667_v32, %v724_v1  ;;  %v862_v10 = vmax.f32 %v798_v0, 0.0  ;;  %v3198_v1 = vld [vmem:[%s4461_s9 + $0xe0] ss:$8 sps:$4 sm:$0xff]  }
 0x10c   :  { %v801_v6 = vadd.f32 %v3670_v33, %v725_v3  ;;  %v327_v7 = vpop.f32.mrb[20].mxu0  ;;  %v863_v14 = vmax.f32 %v799_v2, 0.0  ;;  %1666 = vmatpush1.bf16.msra.mxu0 %v3195_v45 }
 0x10d   :  { %v864_v11 = vmax.f32 %v800_v4, 0.0  ;;  %v530_v12 = vadd.f32 %v3675_v34, %v327_v7  ;;  %v329_v13 = vpop.f32.mrb[21].mxu0  ;;  %1667 = vmatprep.subr.bf16.mxu0 %v3200_v56 }
 0x10e   :  { %v865_v15 = vmax.f32 %v801_v6, 0.0  ;;  %v531_v16 = vadd.f32 %v3697_v46, %v329_v13  ;;  %v331_v17 = vpop.f32.mrb[22].mxu0 }
 0x10f   :  { %v726_v18 = vadd.f32 %v645_v44, %v530_v12  ;;  %1209 = vmatmul.mubr.bf16.gmra.mrb[16].mxu1 %v916_v58  ;;  %v532_v20 = vadd.f32 %v3702_v47, %v331_v17  ;;  %v333_v22 = vpop.f32.mrb[23].mxu0  ;;  %v918_v23 = vpack.c.bf16 %v864_v11, %v862_v10 }
 0x110   :  { %v727_v35 = vadd.f32 %v649_v51, %v531_v16  ;;  %v533_v36 = vadd.f32 %v3708_v55, %v333_v22  ;;  %v919_v37 = vpack.c.bf16 %v865_v15, %v863_v14  ;;  %1668 = vmatpush1.bf16.msra.mxu0 %v3198_v1 }
 0x111   :  { %v802_v42 = vadd.f32 %v3667_v32, %v726_v18  ;;  %v728_v29 = vadd.f32 %v645_v44, %v532_v20 }
 0x112   :  { %v803_v19 = vadd.f32 %v3670_v33, %v727_v35  ;;  %v729_v43 = vadd.f32 %v649_v51, %v533_v36  ;;  %1218 = vmatprep.mubr.bf16.mxu1 %v919_v37 }
 0x113   :  { %v804_v41 = vadd.f32 %v3667_v32, %v728_v29  ;;  %v866_v44 = vmax.f32 %v802_v42, 0.0  ;;  %v3848_v42 = vrot.slane %v3632_v21, %v3622_v9 }
 0x114   :  { %v805_v48 = vadd.f32 %v3670_v33, %v729_v43  ;;  %v337_v49 = vpop.f32.mrb[24].mxu0  ;;  %v867_v54 = vmax.f32 %v803_v19, 0.0 }
 0x115   :  { %v868_v50 = vmax.f32 %v804_v41, 0.0  ;;  %v534_v51 = vadd.f32 %v3644_v26, %v337_v49  ;;  %v339_v53 = vpop.f32.mrb[25].mxu0  ;;  %v661_v56 = vrot.slane %v3848_v42, %v3637_v24 }
 0x116   :  { %v869_v57 = vmax.f32 %v805_v48, 0.0  ;;  %v535_v58 = vadd.f32 %v3649_v27, %v339_v53  ;;  %v341_v60 = vpop.f32.mrb[26].mxu0 }
 0x117   :  { %v730_v61 = vadd.f32 %v653_v52, %v534_v51  ;;  %1219 = vmatmul.mubr.bf16.gmra.mrb[20].mxu1 %v918_v23  ;;  %v536_v62 = vadd.f32 %v3659_v30, %v341_v60  ;;  %v343_v63 = vpop.f32.mrb[27].mxu0  ;;  %v920_v0 = vpack.c.bf16 %v868_v50, %v866_v44  ;;  %v665_v51 = vrot.slane %v3848_v42, %v3639_v25 }
 0x118   :  { %v731_v2 = vadd.f32 %v657_v59, %v535_v58  ;;  %v537_v3 = vadd.f32 %v3664_v31, %v343_v63  ;;  %v921_v4 = vpack.c.bf16 %v869_v57, %v867_v54 }
 0x119   :  { %v806_v5 = vadd.f32 %v3667_v32, %v730_v61  ;;  %v732_v6 = vadd.f32 %v653_v52, %v536_v62 }
 0x11a   :  { %v807_v7 = vadd.f32 %v3670_v33, %v731_v2  ;;  %v733_v8 = vadd.f32 %v657_v59, %v537_v3  ;;  %1228 = vmatprep.mubr.bf16.mxu1 %v921_v4 }
 0x11b   :  { %v808_v10 = vadd.f32 %v3667_v32, %v732_v6  ;;  %v870_v13 = vmax.f32 %v806_v5, 0.0 }
 0x11c   :  { %v809_v11 = vadd.f32 %v3670_v33, %v733_v8  ;;  %v347_v12 = vpop.f32.mrb[28].mxu0  ;;  %v871_v17 = vmax.f32 %v807_v7, 0.0 }
 0x11d   :  { %v872_v14 = vmax.f32 %v808_v10, 0.0  ;;  %v538_v15 = vadd.f32 %v3675_v34, %v347_v12  ;;  %v349_v16 = vpop.f32.mrb[29].mxu0 }
 0x11e   :  { %v873_v18 = vmax.f32 %v809_v11, 0.0  ;;  %v539_v20 = vadd.f32 %v3697_v46, %v349_v16  ;;  %v351_v22 = vpop.f32.mrb[30].mxu0 }
 0x11f   :  { %v734_v23 = vadd.f32 %v653_v52, %v538_v15  ;;  %1229 = vmatmul.mubr.bf16.gmra.mrb[24].mxu1 %v920_v0  ;;  %v540_v28 = vadd.f32 %v3702_v47, %v351_v22  ;;  %v353_v35 = vpop.f32.mrb[31].mxu0  ;;  %v922_v36 = vpack.c.bf16 %v872_v14, %v870_v13 }
 0x120   :  { %v735_v37 = vadd.f32 %v657_v59, %v539_v20  ;;  %v541_v39 = vadd.f32 %v3708_v55, %v353_v35  ;;  %v923_v40 = vpack.c.bf16 %v873_v18, %v871_v17 }
 0x121   :  { %v810_v29 = vadd.f32 %v3667_v32, %v734_v23  ;;  %v736_v19 = vadd.f32 %v653_v52, %v540_v28 }
 0x122   :  { %v811_v43 = vadd.f32 %v3670_v33, %v735_v37  ;;  %v737_v41 = vadd.f32 %v657_v59, %v541_v39  ;;  %1238 = vmatprep.mubr.bf16.mxu1 %v923_v40 }
 0x123   :  { %v812_v45 = vadd.f32 %v3667_v32, %v736_v19  ;;  %v874_v44 = vmax.f32 %v810_v29, 0.0 }
 0x124   :  { %v813_v48 = vadd.f32 %v3670_v33, %v737_v41  ;;  %v357_v49 = vpop.f32.mrb[32].mxu0  ;;  %v875_v52 = vmax.f32 %v811_v43, 0.0 }
 0x125   :  { %v876_v50 = vmax.f32 %v812_v45, 0.0  ;;  %v542_v9 = vadd.f32 %v3644_v26, %v357_v49  ;;  %v359_v21 = vpop.f32.mrb[33].mxu0  ;;  %v669_v49 = vrot.slane %v3684_v38, %v3637_v24 }
 0x126   :  { %v877_v53 = vmax.f32 %v813_v48, 0.0  ;;  %v543_v54 = vadd.f32 %v3649_v27, %v359_v21  ;;  %v361_v57 = vpop.f32.mrb[34].mxu0  ;;  %v673_v21 = vrot.slane %v3684_v38, %v3639_v25 }
 0x127   :  { %v738_v58 = vadd.f32 %v661_v56, %v542_v9  ;;  %1239 = vmatmul.mubr.bf16.gmra.mrb[28].mxu1 %v922_v36  ;;  %v544_v59 = vadd.f32 %v3659_v30, %v361_v57  ;;  %v363_v60 = vpop.f32.mrb[35].mxu0  ;;  %v924_v61 = vpack.c.bf16 %v876_v50, %v874_v44 }
 0x128   :  { %v739_v62 = vadd.f32 %v665_v51, %v543_v54  ;;  %v545_v63 = vadd.f32 %v3664_v31, %v363_v60  ;;  %v925_v0 = vpack.c.bf16 %v877_v53, %v875_v52 }
 0x129   :  { %v814_v1 = vadd.f32 %v3667_v32, %v738_v58  ;;  %v740_v2 = vadd.f32 %v661_v56, %v544_v59 }
 0x12a   :  { %v815_v3 = vadd.f32 %v3670_v33, %v739_v62  ;;  %v741_v4 = vadd.f32 %v665_v51, %v545_v63  ;;  %1248 = vmatprep.mubr.bf16.mxu1 %v925_v0 }
 0x12b   :  { %v816_v5 = vadd.f32 %v3667_v32, %v740_v2  ;;  %v878_v8 = vmax.f32 %v814_v1, 0.0 }
 0x12c   :  { %v817_v6 = vadd.f32 %v3670_v33, %v741_v4  ;;  %v367_v7 = vpop.f32.mrb[36].mxu0  ;;  %v879_v13 = vmax.f32 %v815_v3, 0.0 }
 0x12d   :  { %v880_v10 = vmax.f32 %v816_v5, 0.0  ;;  %v546_v11 = vadd.f32 %v3675_v34, %v367_v7  ;;  %v369_v12 = vpop.f32.mrb[37].mxu0 }
 0x12e   :  { %v881_v14 = vmax.f32 %v817_v6, 0.0  ;;  %v547_v15 = vadd.f32 %v3697_v46, %v369_v12  ;;  %v371_v16 = vpop.f32.mrb[38].mxu0 }
 0x12f   :  { %v742_v17 = vadd.f32 %v661_v56, %v546_v11  ;;  %1249 = vmatmul.mubr.bf16.gmra.mrb[32].mxu1 %v924_v61  ;;  %v548_v18 = vadd.f32 %v3702_v47, %v371_v16  ;;  %v373_v20 = vpop.f32.mrb[39].mxu0  ;;  %v926_v22 = vpack.c.bf16 %v880_v10, %v878_v8 }
 0x130   :  { %v743_v23 = vadd.f32 %v665_v51, %v547_v15  ;;  %v549_v28 = vadd.f32 %v3708_v55, %v373_v20  ;;  %v927_v35 = vpack.c.bf16 %v881_v14, %v879_v13 }
 0x131   :  { %v818_v36 = vadd.f32 %v3667_v32, %v742_v17  ;;  %v744_v37 = vadd.f32 %v661_v56, %v548_v18 }
 0x132   :  { %v819_v39 = vadd.f32 %v3670_v33, %v743_v23  ;;  %v745_v40 = vadd.f32 %v665_v51, %v549_v28  ;;  %1258 = vmatprep.mubr.bf16.mxu1 %v927_v35 }
 0x133   :  { %v820_v29 = vadd.f32 %v3667_v32, %v744_v37  ;;  %v882_v41 = vmax.f32 %v818_v36, 0.0 }
 0x134   :  { %v821_v19 = vadd.f32 %v3670_v33, %v745_v40  ;;  %v377_v43 = vpop.f32.mrb[40].mxu0  ;;  %v883_v50 = vmax.f32 %v819_v39, 0.0 }
 0x135   :  { %v884_v45 = vmax.f32 %v820_v29, 0.0  ;;  %v550_v48 = vadd.f32 %v3644_v26, %v377_v43  ;;  %v379_v44 = vpop.f32.mrb[41].mxu0 }
 0x136   :  { %v885_v9 = vmax.f32 %v821_v19, 0.0  ;;  %v551_v56 = vadd.f32 %v3649_v27, %v379_v44  ;;  %v381_v51 = vpop.f32.mrb[42].mxu0 }
 0x137   :  { %v746_v52 = vadd.f32 %v669_v49, %v550_v48  ;;  %1259 = vmatmul.mubr.bf16.gmra.mrb[36].mxu1 %v926_v22  ;;  %v552_v53 = vadd.f32 %v3659_v30, %v381_v51  ;;  %v383_v54 = vpop.f32.mrb[43].mxu0  ;;  %v928_v57 = vpack.c.bf16 %v884_v45, %v882_v41  ;;  %v623_v22 = vcombine.high %v3848_v42, %v3848_v42 }
 0x138   :  { %v747_v58 = vadd.f32 %v673_v21, %v551_v56  ;;  %v553_v59 = vadd.f32 %v3664_v31, %v383_v54  ;;  %v929_v60 = vpack.c.bf16 %v885_v9, %v883_v50 }
 0x139   :  { %v822_v61 = vadd.f32 %v3667_v32, %v746_v52  ;;  %v748_v62 = vadd.f32 %v669_v49, %v552_v53  ;;  %v677_v41 = vrot.slane %v623_v22, %v3637_v24  ;;  %v681_v44 = vrot.slane %v623_v22, %v3639_v25  ;;  %v3203_v22 = vld [vmem:[%s4461_s9 + $0xf4] ss:$8 sps:$4 sm:$0xff]  }
 0x13a   :  { %v823_v63 = vadd.f32 %v3670_v33, %v747_v58  ;;  %v749_v0 = vadd.f32 %v673_v21, %v553_v59  ;;  %1268 = vmatprep.mubr.bf16.mxu1 %v929_v60  ;;  %1669 = vmatprep.subr.bf16.mxu0 %v3203_v22 }
 0x13b   :  { %v824_v1 = vadd.f32 %v3667_v32, %v748_v62  ;;  %v886_v4 = vmax.f32 %v822_v61, 0.0 }
 0x13c   :  { %v825_v2 = vadd.f32 %v3670_v33, %v749_v0  ;;  %v387_v3 = vpop.f32.mrb[44].mxu0  ;;  %v887_v8 = vmax.f32 %v823_v63, 0.0 }
 0x13d   :  { %v888_v5 = vmax.f32 %v824_v1, 0.0  ;;  %v554_v6 = vadd.f32 %v3675_v34, %v387_v3  ;;  %v389_v7 = vpop.f32.mrb[45].mxu0 }
 0x13e   :  { %v889_v10 = vmax.f32 %v825_v2, 0.0  ;;  %v555_v11 = vadd.f32 %v3697_v46, %v389_v7  ;;  %v391_v12 = vpop.f32.mrb[46].mxu0 }
 0x13f   :  { %v750_v13 = vadd.f32 %v669_v49, %v554_v6  ;;  %1269 = vmatmul.mubr.bf16.gmra.mrb[40].mxu1 %v928_v57  ;;  %v556_v14 = vadd.f32 %v3702_v47, %v391_v12  ;;  %v393_v15 = vpop.f32.mrb[47].mxu0  ;;  %v930_v16 = vpack.c.bf16 %v888_v5, %v886_v4 }
 0x140   :  { %v751_v17 = vadd.f32 %v673_v21, %v555_v11  ;;  %v557_v18 = vadd.f32 %v3708_v55, %v393_v15  ;;  %v931_v20 = vpack.c.bf16 %v889_v10, %v887_v8 }
 0x141   :  { %v826_v23 = vadd.f32 %v3667_v32, %v750_v13  ;;  %v752_v28 = vadd.f32 %v669_v49, %v556_v14 }
 0x142   :  { %v827_v35 = vadd.f32 %v3670_v33, %v751_v17  ;;  %v753_v36 = vadd.f32 %v673_v21, %v557_v18  ;;  %1278 = vmatprep.mubr.bf16.mxu1 %v931_v20  ;;  %v3201_v20 = vld [vmem:[%s4461_s9 + $0xf0] ss:$8 sps:$4 sm:$0xff]  }
 0x143   :  { %v828_v37 = vadd.f32 %v3667_v32, %v752_v28  ;;  %v890_v29 = vmax.f32 %v826_v23, 0.0  ;;  %1670 = vmatpush1.bf16.msra.mxu0 %v3201_v20 }
 0x144   :  { %v829_v39 = vadd.f32 %v3670_v33, %v753_v36  ;;  %v397_v40 = vpop.f32.mrb[48].mxu0  ;;  %v891_v42 = vmax.f32 %v827_v35, 0.0 }
 0x145   :  { %v892_v19 = vmax.f32 %v828_v37, 0.0  ;;  %v558_v43 = vadd.f32 %v3644_v26, %v397_v40  ;;  %v399_v45 = vpop.f32.mrb[49].mxu0 }
 0x146   :  { %v893_v48 = vmax.f32 %v829_v39, 0.0  ;;  %v559_v49 = vadd.f32 %v3649_v27, %v399_v45  ;;  %v401_v50 = vpop.f32.mrb[50].mxu0 }
 0x147   :  { %v754_v9 = vadd.f32 %v677_v41, %v558_v43  ;;  %1279 = vmatmul.mubr.bf16.gmra.mrb[44].mxu1 %v930_v16  ;;  %v560_v56 = vadd.f32 %v3659_v30, %v401_v50  ;;  %v403_v21 = vpop.f32.mrb[51].mxu0  ;;  %v932_v51 = vpack.c.bf16 %v892_v19, %v890_v29  ;;  %v625_v16 = vcombine.high %v3684_v38, %v3684_v38 }
 0x148   :  { %v755_v52 = vadd.f32 %v681_v44, %v559_v49  ;;  %v561_v53 = vadd.f32 %v3664_v31, %v403_v21  ;;  %v933_v54 = vpack.c.bf16 %v893_v48, %v891_v42 }
 0x149   :  { %v830_v57 = vadd.f32 %v3667_v32, %v754_v9  ;;  %v756_v58 = vadd.f32 %v677_v41, %v560_v56  ;;  %v685_v29 = vrot.slane %v625_v16, %v3637_v24  ;;  %v689_v42 = vrot.slane %v625_v16, %v3639_v25 }
 0x14a   :  { %v831_v59 = vadd.f32 %v3670_v33, %v755_v52  ;;  %v757_v60 = vadd.f32 %v681_v44, %v561_v53  ;;  %1288 = vmatprep.mubr.bf16.mxu1 %v933_v54 }
 0x14b   :  { %v832_v61 = vadd.f32 %v3667_v32, %v756_v58  ;;  %v894_v0 = vmax.f32 %v830_v57, 0.0 }
 0x14c   :  { %v833_v62 = vadd.f32 %v3670_v33, %v757_v60  ;;  %v407_v63 = vpop.f32.mrb[52].mxu0  ;;  %v895_v4 = vmax.f32 %v831_v59, 0.0 }
 0x14d   :  { %v896_v1 = vmax.f32 %v832_v61, 0.0  ;;  %v562_v2 = vadd.f32 %v3675_v34, %v407_v63  ;;  %v409_v3 = vpop.f32.mrb[53].mxu0 }
 0x14e   :  { %v897_v5 = vmax.f32 %v833_v62, 0.0  ;;  %v563_v6 = vadd.f32 %v3697_v46, %v409_v3  ;;  %v411_v7 = vpop.f32.mrb[54].mxu0 }
 0x14f   :  { %v758_v8 = vadd.f32 %v677_v41, %v562_v2  ;;  %1289 = vmatmul.mubr.bf16.gmra.mrb[48].mxu1 %v932_v51  ;;  %v564_v10 = vadd.f32 %v3702_v47, %v411_v7  ;;  %v413_v11 = vpop.f32.mrb[55].mxu0  ;;  %v934_v12 = vpack.c.bf16 %v896_v1, %v894_v0 }
 0x150   :  { %v759_v13 = vadd.f32 %v681_v44, %v563_v6  ;;  %v565_v14 = vadd.f32 %v3708_v55, %v413_v11  ;;  %v935_v15 = vpack.c.bf16 %v897_v5, %v895_v4 }
 0x151   :  { %v834_v17 = vadd.f32 %v3667_v32, %v758_v8  ;;  %v760_v18 = vadd.f32 %v677_v41, %v564_v10 }
 0x152   :  { %v835_v23 = vadd.f32 %v3670_v33, %v759_v13  ;;  %v761_v28 = vadd.f32 %v681_v44, %v565_v14  ;;  %1298 = vmatprep.mubr.bf16.mxu1 %v935_v15 }
 0x153   :  { %v836_v35 = vadd.f32 %v3667_v32, %v760_v18  ;;  %v898_v37 = vmax.f32 %v834_v17, 0.0 }
 0x154   :  { %v837_v38 = vadd.f32 %v3670_v33, %v761_v28  ;;  %v417_v36 = vpop.f32.mrb[56].mxu0  ;;  %v899_v43 = vmax.f32 %v835_v23, 0.0 }
 0x155   :  { %v900_v39 = vmax.f32 %v836_v35, 0.0  ;;  %v566_v40 = vadd.f32 %v3644_v26, %v417_v36  ;;  %v419_v19 = vpop.f32.mrb[57].mxu0 }
 0x156   :  { %v901_v41 = vmax.f32 %v837_v38, 0.0  ;;  %v567_v45 = vadd.f32 %v3649_v27, %v419_v19  ;;  %v421_v48 = vpop.f32.mrb[58].mxu0 }
 0x157   :  { %v762_v49 = vadd.f32 %v685_v29, %v566_v40  ;;  %1299 = vmatmul.mubr.bf16.gmra.mrb[52].mxu1 %v934_v12  ;;  %v568_v44 = vadd.f32 %v3659_v30, %v421_v48  ;;  %v423_v50 = vpop.f32.mrb[59].mxu0  ;;  %v936_v9 = vpack.c.bf16 %v900_v39, %v898_v37 }
 0x158   :  { %v763_v56 = vadd.f32 %v689_v42, %v567_v45  ;;  %v569_v21 = vadd.f32 %v3664_v31, %v423_v50  ;;  %v937_v26 = vpack.c.bf16 %v901_v41, %v899_v43 }
 0x159   :  { %v838_v51 = vadd.f32 %v3667_v32, %v762_v49  ;;  %v764_v52 = vadd.f32 %v685_v29, %v568_v44 }
 0x15a   :  { %v839_v53 = vadd.f32 %v3670_v33, %v763_v56  ;;  %v765_v54 = vadd.f32 %v689_v42, %v569_v21  ;;  %1308 = vmatprep.mubr.bf16.mxu1 %v937_v26 }
 0x15b   :  { %v840_v27 = vadd.f32 %v3667_v32, %v764_v52  ;;  %v902_v59 = vmax.f32 %v838_v51, 0.0 }
 0x15c   :  { %v841_v57 = vadd.f32 %v3670_v33, %v765_v54  ;;  %v427_v58 = vpop.f32.mrb[60].mxu0  ;;  %v903_v62 = vmax.f32 %v839_v53, 0.0 }
 0x15d   :  { %v904_v30 = vmax.f32 %v840_v27, 0.0  ;;  %v570_v60 = vadd.f32 %v3675_v34, %v427_v58  ;;  %v429_v61 = vpop.f32.mrb[61].mxu0 }
 0x15e   :  { %v905_v31 = vmax.f32 %v841_v57, 0.0  ;;  %v571_v63 = vadd.f32 %v3697_v46, %v429_v61  ;;  %v431_v0 = vpop.f32.mrb[62].mxu0 }
 0x15f   :  { %v766_v1 = vadd.f32 %v685_v29, %v570_v60  ;;  %1309 = vmatmul.mubr.bf16.gmra.mrb[56].mxu1 %v936_v9  ;;  %v572_v2 = vadd.f32 %v3702_v47, %v431_v0  ;;  %v433_v3 = vpop.f32.mrb[63].mxu0  ;;  %v938_v4 = vpack.c.bf16 %v904_v30, %v902_v59 }
 0x160   :  { %v767_v5 = vadd.f32 %v689_v42, %v571_v63  ;;  %v573_v6 = vadd.f32 %v3708_v55, %v433_v3  ;;  %v939_v7 = vpack.c.bf16 %v905_v31, %v903_v62  ;;  %v974_v55 = vld [vmem:[%s4464_s8] sm:$0x3] }
 0x161   :  { %v842_v8 = vadd.f32 %v3667_v32, %v766_v1  ;;  %v768_v10 = vadd.f32 %v685_v29, %v572_v2  ;;  %v3944_v18 = vrot.slane %v974_v55, %v3637_v24 }
 0x162   :  { %v843_v34 = vadd.f32 %v3670_v33, %v767_v5  ;;  %v769_v11 = vadd.f32 %v689_v42, %v573_v6  ;;  %1318 = vmatprep.mubr.bf16.mxu1 %v939_v7 }
 0x163   :  { %v844_v46 = vadd.f32 %v3667_v32, %v768_v10  ;;  %v906_v13 = vmax.f32 %v842_v8, 0.0  ;;  %v3947_v32 = vrot.slane %v974_v55, %v3639_v25 }
 0x164   :  { %v845_v12 = vadd.f32 %v3670_v33, %v769_v11  ;;  %v907_v47 = vmax.f32 %v843_v34, 0.0 }
 0x165   :  { %v908_v14 = vmax.f32 %v844_v46, 0.0 }
 0x166   :  { %v909_v15 = vmax.f32 %v845_v12, 0.0 }
 0x167   :  { %1319 = vmatmul.mubr.bf16.gmra.mrb[60].mxu1 %v938_v4  ;;  %v940_v16 = vpack.c.bf16 %v908_v14, %v906_v13 }
 0x168   :  { %v941_v17 = vpack.c.bf16 %v909_v15, %v907_v47 }
 0x16a   :  { %1328 = vmatprep.mubr.bf16.mxu1 %v941_v17 }
 0x16f   :  { %1329 = vmatmul.mubr.bf16.gmra.mrb[64].mxu1 %v940_v16 }
 0x1ca   :  { %v1180_v33 = vpop.f32.mrb[4].mxu1 }
 0x1cb   :  { %v1181_v20 = vadd.f32 %v1180_v33, %v3944_v18  ;;  %v1182_v22 = vpop.f32.mrb[5].mxu1 }
 0x1cc   :  { %v1183_v23 = vadd.f32 %v1182_v22, %v3947_v32  ;;  %v1184_v28 = vpop.f32.mrb[6].mxu1 }
 0x1cd   :  { %v1185_v35 = vadd.f32 %v1184_v28, %v3944_v18  ;;  %v1186_v38 = vpop.f32.mrb[7].mxu1  ;;  %v1339_v37 = vmax.f32 %v1181_v20, 0.0 }
 0x1ce   :  { %v1187_v36 = vadd.f32 %v1186_v38, %v3947_v32  ;;  %v1340_v40 = vmax.f32 %v1183_v23, 0.0 }
 0x1cf   :  { %v1341_v39 = vmax.f32 %v1185_v35, 0.0 }
 0x1d0   :  { %v1342_v29 = vmax.f32 %v1187_v36, 0.0 }
 0x1d1   :  { %v1403_v19 = vpack.c.bf16 %v1341_v39, %v1339_v37 }
 0x1d2   :  { %v1404_v43 = vpack.c.bf16 %v1342_v29, %v1340_v40  ;;  %v1190_v41 = vpop.f32.mrb[8].mxu1 }
 0x1d3   :  { %v1191_v45 = vadd.f32 %v1190_v41, %v3944_v18  ;;  %v1192_v42 = vpop.f32.mrb[9].mxu1 }
 0x1d4   :  { %v1193_v48 = vadd.f32 %v1192_v42, %v3947_v32  ;;  %v1194_v49 = vpop.f32.mrb[10].mxu1  ;;  %1671 = vmatprep.mubr.bf16.mxu0 %v1404_v43 }
 0x1d5   :  { %v1195_v44 = vadd.f32 %v1194_v49, %v3944_v18  ;;  %v1196_v50 = vpop.f32.mrb[11].mxu1  ;;  %1672 = vmatmul.mubr.bf16.vlgmr.msra.gmra.mrb[64].mxu0 %v1403_v19  ;;  %v1343_v56 = vmax.f32 %v1191_v45, 0.0 }
 0x1d6   :  { %v1197_v9 = vadd.f32 %v1196_v50, %v3947_v32  ;;  %v1344_v26 = vmax.f32 %v1193_v48, 0.0 }
 0x1d7   :  { %v1345_v21 = vmax.f32 %v1195_v44, 0.0 }
 0x1d8   :  { %v1346_v51 = vmax.f32 %v1197_v9, 0.0 }
 0x1d9   :  { %v1405_v52 = vpack.c.bf16 %v1345_v21, %v1343_v56 }
 0x1da   :  { %v1406_v53 = vpack.c.bf16 %v1346_v51, %v1344_v26  ;;  %v1200_v54 = vpop.f32.mrb[12].mxu1 }
 0x1db   :  { %v1201_v27 = vadd.f32 %v1200_v54, %v3944_v18  ;;  %v1202_v57 = vpop.f32.mrb[13].mxu1 }
 0x1dc   :  { %v1203_v58 = vadd.f32 %v1202_v57, %v3947_v32  ;;  %v1204_v59 = vpop.f32.mrb[14].mxu1  ;;  %1681 = vmatprep.mubr.bf16.mxu0 %v1406_v53 }
 0x1dd   :  { %v1205_v30 = vadd.f32 %v1204_v59, %v3944_v18  ;;  %v1206_v60 = vpop.f32.mrb[15].mxu1  ;;  %1682 = vmatmul.mubr.bf16.gmra.mrb[68].mxu0 %v1405_v52  ;;  %v1347_v62 = vmax.f32 %v1201_v27, 0.0 }
 0x1de   :  { %v1207_v61 = vadd.f32 %v1206_v60, %v3947_v32  ;;  %v1348_v63 = vmax.f32 %v1203_v58, 0.0 }
 0x1df   :  { %v1349_v31 = vmax.f32 %v1205_v30, 0.0 }
 0x1e0   :  { %v1350_v0 = vmax.f32 %v1207_v61, 0.0 }
 0x1e1   :  { %v1407_v1 = vpack.c.bf16 %v1349_v31, %v1347_v62 }
 0x1e2   :  { %v1408_v2 = vpack.c.bf16 %v1350_v0, %v1348_v63  ;;  %v1210_v3 = vpop.f32.mrb[16].mxu1 }
 0x1e3   :  { %v1211_v4 = vadd.f32 %v1210_v3, %v3944_v18  ;;  %v1212_v5 = vpop.f32.mrb[17].mxu1 }
 0x1e4   :  { %v1213_v6 = vadd.f32 %v1212_v5, %v3947_v32  ;;  %v1214_v7 = vpop.f32.mrb[18].mxu1  ;;  %1691 = vmatprep.mubr.bf16.mxu0 %v1408_v2 }
 0x1e5   :  { %v1215_v8 = vadd.f32 %v1214_v7, %v3944_v18  ;;  %v1216_v10 = vpop.f32.mrb[19].mxu1  ;;  %1692 = vmatmul.mubr.bf16.gmra.mrb[72].mxu0 %v1407_v1  ;;  %v1351_v11 = vmax.f32 %v1211_v4, 0.0 }
 0x1e6   :  { %v1217_v34 = vadd.f32 %v1216_v10, %v3947_v32  ;;  %v1352_v12 = vmax.f32 %v1213_v6, 0.0 }
 0x1e7   :  { %v1353_v46 = vmax.f32 %v1215_v8, 0.0 }
 0x1e8   :  { %v1354_v13 = vmax.f32 %v1217_v34, 0.0 }
 0x1e9   :  { %v1409_v14 = vpack.c.bf16 %v1353_v46, %v1351_v11 }
 0x1ea   :  { %v1410_v47 = vpack.c.bf16 %v1354_v13, %v1352_v12  ;;  %v1220_v15 = vpop.f32.mrb[20].mxu1 }
 0x1eb   :  { %v1221_v16 = vadd.f32 %v1220_v15, %v3944_v18  ;;  %v1222_v17 = vpop.f32.mrb[21].mxu1 }
 0x1ec   :  { %v1223_v55 = vadd.f32 %v1222_v17, %v3947_v32  ;;  %v1224_v33 = vpop.f32.mrb[22].mxu1  ;;  %1701 = vmatprep.mubr.bf16.mxu0 %v1410_v47 }
 0x1ed   :  { %v1225_v20 = vadd.f32 %v1224_v33, %v3944_v18  ;;  %v1226_v22 = vpop.f32.mrb[23].mxu1  ;;  %1702 = vmatmul.mubr.bf16.gmra.mrb[76].mxu0 %v1409_v14  ;;  %v1355_v28 = vmax.f32 %v1221_v16, 0.0 }
 0x1ee   :  { %v1227_v23 = vadd.f32 %v1226_v22, %v3947_v32  ;;  %v1356_v38 = vmax.f32 %v1223_v55, 0.0 }
 0x1ef   :  { %v1357_v35 = vmax.f32 %v1225_v20, 0.0 }
 0x1f0   :  { %v1358_v36 = vmax.f32 %v1227_v23, 0.0 }
 0x1f1   :  { %v1411_v37 = vpack.c.bf16 %v1357_v35, %v1355_v28 }
 0x1f2   :  { %v1412_v39 = vpack.c.bf16 %v1358_v36, %v1356_v38  ;;  %v1230_v40 = vpop.f32.mrb[24].mxu1 }
 0x1f3   :  { %v1231_v29 = vadd.f32 %v1230_v40, %v3944_v18  ;;  %v1232_v19 = vpop.f32.mrb[25].mxu1 }
 0x1f4   :  { %v1233_v43 = vadd.f32 %v1232_v19, %v3947_v32  ;;  %v1234_v41 = vpop.f32.mrb[26].mxu1  ;;  %1711 = vmatprep.mubr.bf16.mxu0 %v1412_v39 }
 0x1f5   :  { %v1235_v45 = vadd.f32 %v1234_v41, %v3944_v18  ;;  %v1236_v42 = vpop.f32.mrb[27].mxu1  ;;  %1712 = vmatmul.mubr.bf16.gmra.mrb[80].mxu0 %v1411_v37  ;;  %v1359_v49 = vmax.f32 %v1231_v29, 0.0 }
 0x1f6   :  { %v1237_v48 = vadd.f32 %v1236_v42, %v3947_v32  ;;  %v1360_v50 = vmax.f32 %v1233_v43, 0.0 }
 0x1f7   :  { %v1361_v44 = vmax.f32 %v1235_v45, 0.0 }
 0x1f8   :  { %v1362_v9 = vmax.f32 %v1237_v48, 0.0 }
 0x1f9   :  { %v1413_v56 = vpack.c.bf16 %v1361_v44, %v1359_v49 }
 0x1fa   :  { %v1414_v21 = vpack.c.bf16 %v1362_v9, %v1360_v50  ;;  %v1240_v26 = vpop.f32.mrb[28].mxu1 }
 0x1fb   :  { %v1241_v51 = vadd.f32 %v1240_v26, %v3944_v18  ;;  %v1242_v52 = vpop.f32.mrb[29].mxu1 }
 0x1fc   :  { %v1243_v53 = vadd.f32 %v1242_v52, %v3947_v32  ;;  %v1244_v54 = vpop.f32.mrb[30].mxu1  ;;  %1721 = vmatprep.mubr.bf16.mxu0 %v1414_v21 }
 0x1fd   :  { %v1245_v27 = vadd.f32 %v1244_v54, %v3944_v18  ;;  %v1246_v57 = vpop.f32.mrb[31].mxu1  ;;  %1722 = vmatmul.mubr.bf16.gmra.mrb[84].mxu0 %v1413_v56  ;;  %v1363_v59 = vmax.f32 %v1241_v51, 0.0 }
 0x1fe   :  { %v1247_v58 = vadd.f32 %v1246_v57, %v3947_v32  ;;  %v1364_v60 = vmax.f32 %v1243_v53, 0.0 }
 0x1ff   :  { %v1365_v30 = vmax.f32 %v1245_v27, 0.0 }
 0x200   :  { %v1366_v61 = vmax.f32 %v1247_v58, 0.0 }
 0x201   :  { %v1415_v62 = vpack.c.bf16 %v1365_v30, %v1363_v59 }
 0x202   :  { %v1416_v31 = vpack.c.bf16 %v1366_v61, %v1364_v60  ;;  %v1250_v63 = vpop.f32.mrb[32].mxu1 }
 0x203   :  { %v1251_v0 = vadd.f32 %v1250_v63, %v3944_v18  ;;  %v1252_v1 = vpop.f32.mrb[33].mxu1 }
 0x204   :  { %v1253_v2 = vadd.f32 %v1252_v1, %v3947_v32  ;;  %v1254_v3 = vpop.f32.mrb[34].mxu1  ;;  %1731 = vmatprep.mubr.bf16.mxu0 %v1416_v31 }
 0x205   :  { %v1255_v4 = vadd.f32 %v1254_v3, %v3944_v18  ;;  %v1256_v5 = vpop.f32.mrb[35].mxu1  ;;  %1732 = vmatmul.mubr.bf16.gmra.mrb[88].mxu0 %v1415_v62  ;;  %v1367_v7 = vmax.f32 %v1251_v0, 0.0 }
 0x206   :  { %v1257_v6 = vadd.f32 %v1256_v5, %v3947_v32  ;;  %v1368_v10 = vmax.f32 %v1253_v2, 0.0 }
 0x207   :  { %v1369_v8 = vmax.f32 %v1255_v4, 0.0 }
 0x208   :  { %v1370_v34 = vmax.f32 %v1257_v6, 0.0 }
 0x209   :  { %v1417_v11 = vpack.c.bf16 %v1369_v8, %v1367_v7 }
 0x20a   :  { %v1418_v46 = vpack.c.bf16 %v1370_v34, %v1368_v10  ;;  %v1260_v12 = vpop.f32.mrb[36].mxu1 }
 0x20b   :  { %v1261_v13 = vadd.f32 %v1260_v12, %v3944_v18  ;;  %v1262_v14 = vpop.f32.mrb[37].mxu1 }
 0x20c   :  { %v1263_v47 = vadd.f32 %v1262_v14, %v3947_v32  ;;  %v1264_v15 = vpop.f32.mrb[38].mxu1  ;;  %1741 = vmatprep.mubr.bf16.mxu0 %v1418_v46 }
 0x20d   :  { %v1265_v16 = vadd.f32 %v1264_v15, %v3944_v18  ;;  %v1266_v17 = vpop.f32.mrb[39].mxu1  ;;  %1742 = vmatmul.mubr.bf16.gmra.mrb[92].mxu0 %v1417_v11  ;;  %v1371_v33 = vmax.f32 %v1261_v13, 0.0 }
 0x20e   :  { %v1267_v55 = vadd.f32 %v1266_v17, %v3947_v32  ;;  %v1372_v22 = vmax.f32 %v1263_v47, 0.0 }
 0x20f   :  { %v1373_v20 = vmax.f32 %v1265_v16, 0.0 }
 0x210   :  { %v1374_v23 = vmax.f32 %v1267_v55, 0.0 }
 0x211   :  { %v1419_v28 = vpack.c.bf16 %v1373_v20, %v1371_v33 }
 0x212   :  { %v1420_v35 = vpack.c.bf16 %v1374_v23, %v1372_v22  ;;  %v1270_v38 = vpop.f32.mrb[40].mxu1 }
 0x213   :  { %v1271_v36 = vadd.f32 %v1270_v38, %v3944_v18  ;;  %v1272_v37 = vpop.f32.mrb[41].mxu1 }
 0x214   :  { %v1273_v39 = vadd.f32 %v1272_v37, %v3947_v32  ;;  %v1274_v40 = vpop.f32.mrb[42].mxu1  ;;  %1751 = vmatprep.mubr.bf16.mxu0 %v1420_v35 }
 0x215   :  { %v1275_v29 = vadd.f32 %v1274_v40, %v3944_v18  ;;  %v1276_v19 = vpop.f32.mrb[43].mxu1  ;;  %1752 = vmatmul.mubr.bf16.gmra.mrb[96].mxu0 %v1419_v28  ;;  %v1375_v41 = vmax.f32 %v1271_v36, 0.0 }
 0x216   :  { %v1277_v43 = vadd.f32 %v1276_v19, %v3947_v32  ;;  %v1376_v42 = vmax.f32 %v1273_v39, 0.0 }
 0x217   :  { %v1377_v45 = vmax.f32 %v1275_v29, 0.0 }
 0x218   :  { %v1378_v48 = vmax.f32 %v1277_v43, 0.0 }
 0x219   :  { %v1421_v49 = vpack.c.bf16 %v1377_v45, %v1375_v41 }
 0x21a   :  { %v1422_v44 = vpack.c.bf16 %v1378_v48, %v1376_v42  ;;  %v1280_v50 = vpop.f32.mrb[44].mxu1 }
 0x21b   :  { %v1281_v9 = vadd.f32 %v1280_v50, %v3944_v18  ;;  %v1282_v56 = vpop.f32.mrb[45].mxu1 }
 0x21c   :  { %v1283_v21 = vadd.f32 %v1282_v56, %v3947_v32  ;;  %v1284_v26 = vpop.f32.mrb[46].mxu1  ;;  %1761 = vmatprep.mubr.bf16.mxu0 %v1422_v44 }
 0x21d   :  { %v1285_v51 = vadd.f32 %v1284_v26, %v3944_v18  ;;  %v1286_v52 = vpop.f32.mrb[47].mxu1  ;;  %1762 = vmatmul.mubr.bf16.gmra.mrb[100].mxu0 %v1421_v49  ;;  %v1379_v54 = vmax.f32 %v1281_v9, 0.0 }
 0x21e   :  { %v1287_v53 = vadd.f32 %v1286_v52, %v3947_v32  ;;  %v1380_v57 = vmax.f32 %v1283_v21, 0.0 }
 0x21f   :  { %v1381_v27 = vmax.f32 %v1285_v51, 0.0 }
 0x220   :  { %v1382_v58 = vmax.f32 %v1287_v53, 0.0 }
 0x221   :  { %v1423_v59 = vpack.c.bf16 %v1381_v27, %v1379_v54 }
 0x222   :  { %v1424_v30 = vpack.c.bf16 %v1382_v58, %v1380_v57  ;;  %v1290_v60 = vpop.f32.mrb[48].mxu1 }
 0x223   :  { %v1291_v61 = vadd.f32 %v1290_v60, %v3944_v18  ;;  %v1292_v62 = vpop.f32.mrb[49].mxu1 }
 0x224   :  { %v1293_v31 = vadd.f32 %v1292_v62, %v3947_v32  ;;  %v1294_v63 = vpop.f32.mrb[50].mxu1  ;;  %1771 = vmatprep.mubr.bf16.mxu0 %v1424_v30 }
 0x225   :  { %v1295_v0 = vadd.f32 %v1294_v63, %v3944_v18  ;;  %v1296_v1 = vpop.f32.mrb[51].mxu1  ;;  %1772 = vmatmul.mubr.bf16.gmra.mrb[104].mxu0 %v1423_v59  ;;  %v1383_v3 = vmax.f32 %v1291_v61, 0.0 }
 0x226   :  { %v1297_v2 = vadd.f32 %v1296_v1, %v3947_v32  ;;  %v1384_v5 = vmax.f32 %v1293_v31, 0.0 }
 0x227   :  { %v1385_v4 = vmax.f32 %v1295_v0, 0.0 }
 0x228   :  { %v1386_v6 = vmax.f32 %v1297_v2, 0.0 }
 0x229   :  { %v1425_v7 = vpack.c.bf16 %v1385_v4, %v1383_v3 }
 0x22a   :  { %v1426_v8 = vpack.c.bf16 %v1386_v6, %v1384_v5  ;;  %v1300_v10 = vpop.f32.mrb[52].mxu1  ;;  %v3204_v5 = vld [vmem:[%s4465_s11] ss:$8 sps:$4 sm:$0xff]   ;;  %v3206_v6 = vld [vmem:[%s4465_s11 + $0x4] ss:$8 sps:$4 sm:$0xff]  }
 0x22b   :  { %v1301_v34 = vadd.f32 %v1300_v10, %v3944_v18  ;;  %v1302_v11 = vpop.f32.mrb[53].mxu1  ;;  %2389 = vmatprep.subr.bf16.mxu1 %v3206_v6  ;;  %v3213_v10 = vld [vmem:[%s4465_s11 + $0x30] ss:$8 sps:$4 sm:$0xff]  }
 0x22c   :  { %v1303_v46 = vadd.f32 %v1302_v11, %v3947_v32  ;;  %v1304_v12 = vpop.f32.mrb[54].mxu1  ;;  %1781 = vmatprep.mubr.bf16.mxu0 %v1426_v8  ;;  %2390 = vmatpush1.bf16.msra.mxu1 %v3204_v5  ;;  %v3210_v8 = vld [vmem:[%s4465_s11 + $0x20] ss:$8 sps:$4 sm:$0xff]   ;;  %v3218_v11 = vld [vmem:[%s4465_s11 + $0x44] ss:$8 sps:$4 sm:$0xff]   ;;  %v4144_v5 = vld [vmem:[%s4467_s3 + $0x30] sm:$0xff] }
 0x22d   :  { %v1305_v13 = vadd.f32 %v1304_v12, %v3944_v18  ;;  %v1306_v14 = vpop.f32.mrb[55].mxu1  ;;  %1782 = vmatmul.mubr.bf16.gmra.mrb[108].mxu0 %v1425_v7  ;;  %v1387_v15 = vmax.f32 %v1301_v34, 0.0  ;;  %v3212_v7 = vld [vmem:[%s4465_s11 + $0x24] ss:$8 sps:$4 sm:$0xff]   ;;  %v3215_v34 = vld [vmem:[%s4465_s11 + $0x34] ss:$8 sps:$4 sm:$0xff]  }
 0x22e   :  { %v1307_v47 = vadd.f32 %v1306_v14, %v3947_v32  ;;  %v1388_v17 = vmax.f32 %v1303_v46, 0.0  ;;  %v3216_v46 = vld [vmem:[%s4465_s11 + $0x40] ss:$8 sps:$4 sm:$0xff]   ;;  %v3219_v12 = vld [vmem:[%s4465_s11 + $0x50] ss:$8 sps:$4 sm:$0xff]  }
 0x22f   :  { %v1389_v16 = vmax.f32 %v1305_v13, 0.0  ;;  %v3221_v13 = vld [vmem:[%s4465_s11 + $0x54] ss:$8 sps:$4 sm:$0xff]   ;;  %v3224_v14 = vld [vmem:[%s4465_s11 + $0x64] ss:$8 sps:$4 sm:$0xff]  }
 0x230   :  { %v1390_v55 = vmax.f32 %v1307_v47, 0.0  ;;  %v3222_v47 = vld [vmem:[%s4465_s11 + $0x60] ss:$8 sps:$4 sm:$0xff]  }
 0x231   :  { %v1427_v33 = vpack.c.bf16 %v1389_v16, %v1387_v15  ;;  %v3225_v15 = vld [vmem:[%s4465_s11 + $0x70] ss:$8 sps:$4 sm:$0xff]   ;;  %v3227_v16 = vld [vmem:[%s4465_s11 + $0x74] ss:$8 sps:$4 sm:$0xff]  }
 0x232   :  { %v1428_v20 = vpack.c.bf16 %v1390_v55, %v1388_v17  ;;  %v1310_v22 = vpop.f32.mrb[56].mxu1  ;;  %v3230_v17 = vld [vmem:[%s4465_s11 + $0x84] ss:$8 sps:$4 sm:$0xff]   ;;  %v3228_v55 = vld [vmem:[%s4465_s11 + $0x80] ss:$8 sps:$4 sm:$0xff]  }
 0x233   :  { %v1311_v23 = vadd.f32 %v1310_v22, %v3944_v18  ;;  %v1312_v28 = vpop.f32.mrb[57].mxu1  ;;  %v3236_v22 = vld [vmem:[%s4465_s11 + $0xa4] ss:$8 sps:$4 sm:$0xff]  }
 0x234   :  { %v1313_v35 = vadd.f32 %v1312_v28, %v3947_v32  ;;  %v1314_v38 = vpop.f32.mrb[58].mxu1  ;;  %1791 = vmatprep.mubr.bf16.mxu0 %v1428_v20  ;;  %v3233_v20 = vld [vmem:[%s4465_s11 + $0x94] ss:$8 sps:$4 sm:$0xff]   ;;  %v1467_v28 = vld [vmem:[%s4466_s10] sm:$0x3] }
 0x235   :  { %v1315_v36 = vadd.f32 %v1314_v38, %v3944_v18  ;;  %v1316_v37 = vpop.f32.mrb[59].mxu1  ;;  %1792 = vmatmul.mubr.bf16.gmra.mrb[112].mxu0 %v1427_v33  ;;  %v1391_v40 = vmax.f32 %v1311_v23, 0.0  ;;  %v3231_v33 = vld [vmem:[%s4465_s11 + $0x90] ss:$8 sps:$4 sm:$0xff]   ;;  %v3234_v23 = vld [vmem:[%s4465_s11 + $0xa0] ss:$8 sps:$4 sm:$0xff]   ;;  %v4086_v38 = vrot.slane %v1467_v28, %v3639_v25 }
 0x236   :  { %v1317_v39 = vadd.f32 %v1316_v37, %v3947_v32  ;;  %v1392_v19 = vmax.f32 %v1313_v35, 0.0  ;;  %v4083_v35 = vrot.slane %v1467_v28, %v3637_v24 }
 0x237   :  { %v1393_v29 = vmax.f32 %v1315_v36, 0.0 }
 0x238   :  { %v1394_v43 = vmax.f32 %v1317_v39, 0.0 }
 0x239   :  { %v1429_v41 = vpack.c.bf16 %v1393_v29, %v1391_v40  ;;  %v3237_v40 = vld [vmem:[%s4465_s11 + $0xb0] ss:$8 sps:$4 sm:$0xff]   ;;  %v3239_v29 = vld [vmem:[%s4465_s11 + $0xb4] ss:$8 sps:$4 sm:$0xff]  }
 0x23a   :  { %v1430_v45 = vpack.c.bf16 %v1394_v43, %v1392_v19  ;;  %v1320_v42 = vpop.f32.mrb[60].mxu1 }
 0x23b   :  { %v1321_v48 = vadd.f32 %v1320_v42, %v3944_v18  ;;  %v1322_v49 = vpop.f32.mrb[61].mxu1 }
 0x23c   :  { %v1323_v44 = vadd.f32 %v1322_v49, %v3947_v32  ;;  %v1324_v50 = vpop.f32.mrb[62].mxu1  ;;  %1801 = vmatprep.mubr.bf16.mxu0 %v1430_v45  ;;  %v4103_v49 = vld [vmem:[%s4467_s3] sm:$0xff] }
 0x23d   :  { %v1325_v9 = vadd.f32 %v1324_v50, %v3944_v18  ;;  %v1326_v56 = vpop.f32.mrb[63].mxu1  ;;  %1802 = vmatmul.mubr.bf16.gmra.mrb[116].mxu0 %v1429_v41  ;;  %v1395_v26 = vmax.f32 %v1321_v48, 0.0  ;;  %v3242_v41 = vld [vmem:[%s4465_s11 + $0xc4] ss:$8 sps:$4 sm:$0xff]   ;;  %v4108_v50 = vld [vmem:[%s4467_s3 + $0x10] sm:$0xff] }
 0x23e   :  { %v1327_v21 = vadd.f32 %v1326_v56, %v3947_v32  ;;  %v1396_v52 = vmax.f32 %v1323_v44, 0.0  ;;  %v3240_v56 = vld [vmem:[%s4465_s11 + $0xc0] ss:$8 sps:$4 sm:$0xff]  }
 0x23f   :  { %v1397_v51 = vmax.f32 %v1325_v9, 0.0 }
 0x240   :  { %v1398_v53 = vmax.f32 %v1327_v21, 0.0  ;;  %v4117_v21 = vld [vmem:[%s4467_s3 + $0x8] sm:$0xff] }
 0x241   :  { %v1431_v54 = vpack.c.bf16 %v1397_v51, %v1395_v26  ;;  %v4122_v51 = vld [vmem:[%s4467_s3 + $0x18] sm:$0xff] }
 0x242   :  { %v1432_v27 = vpack.c.bf16 %v1398_v53, %v1396_v52  ;;  %v1330_v57 = vpop.f32.mrb[64].mxu1 }
 0x243   :  { %v1331_v58 = vadd.f32 %v1330_v57, %v3944_v18  ;;  %v1332_v59 = vpop.f32.mrb[65].mxu1 }
 0x244   :  { %v1333_v30 = vadd.f32 %v1332_v59, %v3947_v32  ;;  %v1334_v60 = vpop.f32.mrb[66].mxu1  ;;  %1811 = vmatprep.mubr.bf16.mxu0 %v1432_v27 }
 0x245   :  { %v1335_v61 = vadd.f32 %v1334_v60, %v3944_v18  ;;  %v1336_v62 = vpop.f32.mrb[67].mxu1  ;;  %1812 = vmatmul.mubr.bf16.gmra.mrb[120].mxu0 %v1431_v54  ;;  %v1399_v63 = vmax.f32 %v1331_v58, 0.0  ;;  %v3207_v18 = vld [vmem:[%s4465_s11 + $0x10] ss:$8 sps:$4 sm:$0xff]  }
 0x246   :  { %v1337_v31 = vadd.f32 %v1336_v62, %v3947_v32  ;;  %v1400_v1 = vmax.f32 %v1333_v30, 0.0  ;;  %v3209_v32 = vld [vmem:[%s4465_s11 + $0x14] ss:$8 sps:$4 sm:$0xff]   ;;  %v4132_v62 = vld [vmem:[%s4467_s3 + $0x20] sm:$0xff] }
 0x247   :  { %v1401_v0 = vmax.f32 %v1335_v61, 0.0  ;;  %2391 = vmatprep.subr.bf16.mxu1 %v3209_v32 }
 0x248   :  { %v1402_v2 = vmax.f32 %v1337_v31, 0.0  ;;  %2392 = vmatpush1.bf16.msra.mxu1 %v3207_v18 }
 0x249   :  { %v1433_v3 = vpack.c.bf16 %v1401_v0, %v1399_v63  ;;  %2393 = vmatprep.subr.bf16.mxu1 %v3212_v7  ;;  %v4151_v7 = vld [vmem:[%s4467_s3 + $0x38] sm:$0xff] }
 0x24a   :  { %v1434_v4 = vpack.c.bf16 %v1402_v2, %v1400_v1  ;;  %v4138_v1 = vld [vmem:[%s4467_s3 + $0x28] sm:$0xff] }
 0x24c   :  { %1821 = vmatprep.mubr.bf16.mxu0 %v1434_v4  ;;  %2394 = vmatpush1.bf16.msra.mxu1 %v3210_v8 }
 0x24d   :  { %1822 = vmatmul.mubr.bf16.gmra.mrb[124].mxu0 %v1433_v3  ;;  %2395 = vmatprep.subr.bf16.mxu1 %v3215_v34 }
 0x250   :  { %2396 = vmatpush1.bf16.msra.mxu1 %v3213_v10 }
 0x251   :  { %2397 = vmatprep.subr.bf16.mxu1 %v3218_v11 }
 0x254   :  { %2398 = vmatpush1.bf16.msra.mxu1 %v3216_v46 }
 0x255   :  { %2399 = vmatprep.subr.bf16.mxu1 %v3221_v13 }
 0x258   :  { %2400 = vmatpush1.bf16.msra.mxu1 %v3219_v12 }
 0x259   :  { %2401 = vmatprep.subr.bf16.mxu1 %v3224_v14 }
 0x25c   :  { %2402 = vmatpush1.bf16.msra.mxu1 %v3222_v47 }
 0x25d   :  { %2403 = vmatprep.subr.bf16.mxu1 %v3227_v16  ;;  %v3243_v16 = vld [vmem:[%s4465_s11 + $0xd0] ss:$8 sps:$4 sm:$0xff]  }
 0x260   :  { %2404 = vmatpush1.bf16.msra.mxu1 %v3225_v15 }
 0x261   :  { %2405 = vmatprep.subr.bf16.mxu1 %v3230_v17  ;;  %v3245_v17 = vld [vmem:[%s4465_s11 + $0xd4] ss:$8 sps:$4 sm:$0xff]  }
 0x264   :  { %2406 = vmatpush1.bf16.msra.mxu1 %v3228_v55 }
 0x265   :  { %2407 = vmatprep.subr.bf16.mxu1 %v3233_v20 }
 0x268   :  { %2408 = vmatpush1.bf16.msra.mxu1 %v3231_v33 }
 0x269   :  { %2409 = vmatprep.subr.bf16.mxu1 %v3236_v22  ;;  %v3248_v22 = vld [vmem:[%s4465_s11 + $0xe4] ss:$8 sps:$4 sm:$0xff]  }
 0x26c   :  { %2410 = vmatpush1.bf16.msra.mxu1 %v3234_v23 }
 0x26d   :  { %2411 = vmatprep.subr.bf16.mxu1 %v3239_v29 }
 0x270   :  { %2412 = vmatpush1.bf16.msra.mxu1 %v3237_v40  ;;  %v3246_v40 = vld [vmem:[%s4465_s11 + $0xe0] ss:$8 sps:$4 sm:$0xff]  }
 0x271   :  { %2413 = vmatprep.subr.bf16.mxu1 %v3242_v41 }
 0x274   :  { %2414 = vmatpush1.bf16.msra.mxu1 %v3240_v56 }
 0x275   :  { %2415 = vmatprep.subr.bf16.mxu1 %v3245_v17 }
 0x278   :  { %2416 = vmatpush1.bf16.msra.mxu1 %v3243_v16 }
 0x279   :  { %2417 = vmatprep.subr.bf16.mxu1 %v3248_v22 }
 0x27c   :  { %2418 = vmatpush1.bf16.msra.mxu1 %v3246_v40 }
 0x2a8   :  { %v1673_v36 = vpop.f32.mrb[64].mxu0 }
 0x2a9   :  { %v1674_v37 = vadd.f32 %v1673_v36, %v4083_v35  ;;  %v1675_v39 = vpop.f32.mrb[65].mxu0 }
 0x2aa   :  { %v1676_v19 = vadd.f32 %v1675_v39, %v4086_v38  ;;  %v1677_v43 = vpop.f32.mrb[66].mxu0 }
 0x2ab   :  { %v1832_v45 = vmax.f32 %v1674_v37, 0.0  ;;  %v1678_v42 = vadd.f32 %v1677_v43, %v4083_v35  ;;  %v1679_v48 = vpop.f32.mrb[67].mxu0  ;;  %v3251_v43 = vld [vmem:[%s4465_s11 + $0xf4] ss:$8 sps:$4 sm:$0xff]  }
 0x2ac   :  { %v1833_v44 = vmax.f32 %v1676_v19, 0.0  ;;  %v1680_v9 = vadd.f32 %v1679_v48, %v4086_v38  ;;  %2419 = vmatprep.subr.bf16.mxu1 %v3251_v43 }
 0x2ad   :  { %v1834_v26 = vmax.f32 %v1678_v42, 0.0  ;;  %v1904_v53 = vmul.f32 %v4103_v49, %v1832_v45 }
 0x2ae   :  { %v1835_v52 = vmax.f32 %v1680_v9, 0.0  ;;  %v1905_v27 = vmul.f32 %v4117_v21, %v1833_v44 }
 0x2af   :  { %v1906_v54 = vmul.f32 %v4108_v50, %v1834_v26  ;;  %v3249_v26 = vld [vmem:[%s4465_s11 + $0xf0] ss:$8 sps:$4 sm:$0xff]  }
 0x2b0   :  { %v1907_v57 = vmul.f32 %v4122_v51, %v1835_v52  ;;  %v1683_v58 = vpop.f32.mrb[68].mxu0  ;;  %2420 = vmatpush1.bf16.msra.mxu1 %v3249_v26 }
 0x2b1   :  { %v1968_v59 = vadd.f32 %v1906_v54, %v1904_v53  ;;  %v1684_v30 = vadd.f32 %v1683_v58, %v4083_v35  ;;  %v1685_v60 = vpop.f32.mrb[69].mxu0 }
 0x2b2   :  { %v1977_v61 = vadd.f32 %v1907_v57, %v1905_v27  ;;  %v1686_v31 = vadd.f32 %v1685_v60, %v4086_v38  ;;  %v1687_v63 = vpop.f32.mrb[70].mxu0  ;;  %v3254_v60 = vld [vmem:[%s4468_s13 + $0x4] ss:$8 sps:$4 sm:$0xff]  }
 0x2b3   :  { %v1836_v0 = vmax.f32 %v1684_v30, 0.0  ;;  %v1688_v2 = vadd.f32 %v1687_v63, %v4083_v35  ;;  %v1689_v3 = vpop.f32.mrb[71].mxu0  ;;  %2638 = vmatprep.subr.bf16.mxu1 %v3254_v60 }
 0x2b4   :  { %v1837_v4 = vmax.f32 %v1686_v31, 0.0  ;;  %v1690_v6 = vadd.f32 %v1689_v3, %v4086_v38 }
 0x2b5   :  { %v1908_v18 = vmul.f32 %v4132_v62, %v1836_v0  ;;  %v1838_v32 = vmax.f32 %v1688_v2, 0.0 }
 0x2b6   :  { %v1909_v8 = vmul.f32 %v4138_v1, %v1837_v4  ;;  %v1839_v10 = vmax.f32 %v1690_v6, 0.0 }
 0x2b7   :  { %v1969_v34 = vadd.f32 %v1968_v59, %v1908_v18  ;;  %v1910_v11 = vmul.f32 %v4144_v5, %v1838_v32 }
 0x2b8   :  { %v1978_v46 = vadd.f32 %v1977_v61, %v1909_v8  ;;  %v1911_v12 = vmul.f32 %v4151_v7, %v1839_v10  ;;  %v1693_v13 = vpop.f32.mrb[72].mxu0 }
 0x2b9   :  { %v1970_v14 = vadd.f32 %v1969_v34, %v1910_v11  ;;  %v1694_v47 = vadd.f32 %v1693_v13, %v4083_v35  ;;  %v1695_v15 = vpop.f32.mrb[73].mxu0 }
 0x2ba   :  { %v1979_v55 = vadd.f32 %v1978_v46, %v1911_v12  ;;  %v1696_v33 = vadd.f32 %v1695_v15, %v4086_v38  ;;  %v1697_v20 = vpop.f32.mrb[74].mxu0 }
 0x2bb   :  { %v1840_v23 = vmax.f32 %v1694_v47, 0.0  ;;  %v1698_v28 = vadd.f32 %v1697_v20, %v4083_v35  ;;  %v1699_v36 = vpop.f32.mrb[75].mxu0  ;;  %v1971_v29 = vrot.slane %v1970_v14, 4 }
 0x2bc   :  { %v1841_v37 = vmax.f32 %v1696_v33, 0.0  ;;  %v1700_v39 = vadd.f32 %v1699_v36, %v4086_v38  ;;  %v1980_v41 = vrot.slane %v1979_v55, 4 }
 0x2bd   :  { %v1842_v19 = vmax.f32 %v1698_v28, 0.0  ;;  %v1912_v42 = vmul.f32 %v4103_v49, %v1840_v23  ;;  %v1972_v52 = vadd.f32 %v1971_v29, %v1970_v14 }
 0x2be   :  { %v1843_v45 = vmax.f32 %v1700_v39, 0.0  ;;  %v1913_v44 = vmul.f32 %v4117_v21, %v1841_v37  ;;  %v1981_v57 = vadd.f32 %v1980_v41, %v1979_v55 }
 0x2bf   :  { %v1914_v48 = vmul.f32 %v4108_v50, %v1842_v19  ;;  %v1973_v3 = vrot.slane %v1972_v52, 2 }
 0x2c0   :  { %v1915_v9 = vmul.f32 %v4122_v51, %v1843_v45  ;;  %v1703_v56 = vpop.f32.mrb[76].mxu0  ;;  %v1982_v18 = vrot.slane %v1981_v57, 2 }
 0x2c1   :  { %v1986_v53 = vadd.f32 %v1914_v48, %v1912_v42  ;;  %v1704_v54 = vadd.f32 %v1703_v56, %v4083_v35  ;;  %v1705_v27 = vpop.f32.mrb[77].mxu0  ;;  %v1974_v13 = vadd.f32 %v1973_v3, %v1972_v52 }
 0x2c2   :  { %v1995_v58 = vadd.f32 %v1915_v9, %v1913_v44  ;;  %v1706_v59 = vadd.f32 %v1705_v27, %v4086_v38  ;;  %v1707_v30 = vpop.f32.mrb[78].mxu0  ;;  %v1983_v16 = vadd.f32 %v1982_v18, %v1981_v57 }
 0x2c3   :  { %v1844_v61 = vmax.f32 %v1704_v54, 0.0  ;;  %v1708_v31 = vadd.f32 %v1707_v30, %v4083_v35  ;;  %v1709_v63 = vpop.f32.mrb[79].mxu0  ;;  %v1975_v40 = vrot.slane %v1974_v13, 1 }
 0x2c4   :  { %v1845_v0 = vmax.f32 %v1706_v59, 0.0  ;;  %v1710_v2 = vadd.f32 %v1709_v63, %v4086_v38  ;;  %v1984_v43 = vrot.slane %v1983_v16, 1 }
 0x2c5   :  { %v1916_v4 = vmul.f32 %v4132_v62, %v1844_v61  ;;  %v1846_v6 = vmax.f32 %v1708_v31, 0.0 }
 0x2c6   :  { %v1917_v32 = vmul.f32 %v4138_v1, %v1845_v0  ;;  %v1847_v8 = vmax.f32 %v1710_v2, 0.0  ;;  %v1985_v59 = vadd.f32 %v1984_v43, %v1983_v16 }
 0x2c7   :  { %v1987_v10 = vadd.f32 %v1986_v53, %v1916_v4  ;;  %v1918_v34 = vmul.f32 %v4144_v5, %v1846_v6  ;;  %v1976_v53 = vadd.f32 %v1975_v40, %v1974_v13 }
 0x2c8   :  { %v1996_v11 = vadd.f32 %v1995_v58, %v1917_v32  ;;  %v1919_v46 = vmul.f32 %v4151_v7, %v1847_v8  ;;  %v1713_v12 = vpop.f32.mrb[80].mxu0 }
 0x2c9   :  { %v1988_v14 = vadd.f32 %v1987_v10, %v1918_v34  ;;  %v1714_v47 = vadd.f32 %v1713_v12, %v4083_v35  ;;  %v1715_v15 = vpop.f32.mrb[81].mxu0  ;;  %v2112_v32 = vpack.c.bf16 %v1976_v53, %v1976_v53 }
 0x2ca   :  { %v1997_v17 = vadd.f32 %v1996_v11, %v1919_v46  ;;  %v1716_v55 = vadd.f32 %v1715_v15, %v4086_v38  ;;  %v1717_v33 = vpop.f32.mrb[82].mxu0  ;;  %v2113_v11 = vpack.c.bf16 %v1985_v59, %v1985_v59 }
 0x2cb   :  { %v1989_v20 = vrot.slane %v1988_v14, 4  ;;  %v1848_v22 = vmax.f32 %v1714_v47, 0.0  ;;  %v1718_v23 = vadd.f32 %v1717_v33, %v4083_v35  ;;  %v1719_v28 = vpop.f32.mrb[83].mxu0 }
 0x2cc   :  { %v1998_v36 = vrot.slane %v1997_v17, 4  ;;  %v1849_v37 = vmax.f32 %v1716_v55, 0.0  ;;  %v1720_v39 = vadd.f32 %v1719_v28, %v4086_v38 }
 0x2cd   :  { %v1990_v29 = vadd.f32 %v1989_v20, %v1988_v14  ;;  %v1850_v19 = vmax.f32 %v1718_v23, 0.0  ;;  %v1920_v48 = vmul.f32 %v4103_v49, %v1848_v22  ;;  %v2188_v20 = vunpack.c.l.b16 %v2112_v32 }
 0x2ce   :  { %v1999_v41 = vadd.f32 %v1998_v36, %v1997_v17  ;;  %v1851_v45 = vmax.f32 %v1720_v39, 0.0  ;;  %v1921_v56 = vmul.f32 %v4117_v21, %v1849_v37  ;;  %v2189_v37 = vunpack.c.l.b16 %v2113_v11 }
 0x2cf   :  { %v1991_v42 = vrot.slane %v1990_v29, 2  ;;  %v1922_v44 = vmul.f32 %v4108_v50, %v1850_v19 }
 0x2d0   :  { %v2000_v9 = vrot.slane %v1999_v41, 2  ;;  %v1923_v26 = vmul.f32 %v4122_v51, %v1851_v45  ;;  %v1723_v52 = vpop.f32.mrb[84].mxu0 }
 0x2d1   :  { %v1992_v54 = vadd.f32 %v1991_v42, %v1990_v29  ;;  %v2004_v27 = vadd.f32 %v1922_v44, %v1920_v48  ;;  %v1724_v57 = vadd.f32 %v1723_v52, %v4083_v35  ;;  %v1725_v58 = vpop.f32.mrb[85].mxu0 }
 0x2d2   :  { %v2001_v30 = vadd.f32 %v2000_v9, %v1999_v41  ;;  %v2013_v60 = vadd.f32 %v1923_v26, %v1921_v56  ;;  %v1726_v61 = vadd.f32 %v1725_v58, %v4086_v38  ;;  %v1727_v31 = vpop.f32.mrb[86].mxu0 }
 0x2d3   :  { %v1993_v63 = vrot.slane %v1992_v54, 1  ;;  %v1852_v0 = vmax.f32 %v1724_v57, 0.0  ;;  %v1728_v2 = vadd.f32 %v1727_v31, %v4083_v35  ;;  %v1729_v3 = vpop.f32.mrb[87].mxu0 }
 0x2d4   :  { %v2002_v4 = vrot.slane %v2001_v30, 1  ;;  %v1853_v6 = vmax.f32 %v1726_v61, 0.0  ;;  %v1730_v18 = vadd.f32 %v1729_v3, %v4086_v38 }
 0x2d5   :  { %v1994_v8 = vadd.f32 %v1993_v63, %v1992_v54  ;;  %v1924_v10 = vmul.f32 %v4132_v62, %v1852_v0  ;;  %v1854_v34 = vmax.f32 %v1728_v2, 0.0 }
 0x2d6   :  { %v2003_v46 = vadd.f32 %v2002_v4, %v2001_v30  ;;  %v1925_v12 = vmul.f32 %v4138_v1, %v1853_v6  ;;  %v1855_v13 = vmax.f32 %v1730_v18, 0.0 }
 0x2d7   :  { %v2114_v14 = vpack.c.bf16 %v1994_v8, %v1994_v8  ;;  %v2005_v47 = vadd.f32 %v2004_v27, %v1924_v10  ;;  %v1926_v15 = vmul.f32 %v4144_v5, %v1854_v34 }
 0x2d8   :  { %v2115_v16 = vpack.c.bf16 %v2003_v46, %v2003_v46  ;;  %v2014_v17 = vadd.f32 %v2013_v60, %v1925_v12  ;;  %v1927_v55 = vmul.f32 %v4151_v7, %v1855_v13  ;;  %v1733_v33 = vpop.f32.mrb[88].mxu0 }
 0x2d9   :  { %v2190_v22 = vunpack.c.l.b16 %v2114_v14  ;;  %v2006_v23 = vadd.f32 %v2005_v47, %v1926_v15  ;;  %v1734_v28 = vadd.f32 %v1733_v33, %v4083_v35  ;;  %v1735_v36 = vpop.f32.mrb[89].mxu0 }
 0x2da   :  { %v2191_v39 = vunpack.c.l.b16 %v2115_v16  ;;  %v2015_v40 = vadd.f32 %v2014_v17, %v1927_v55  ;;  %v1736_v29 = vadd.f32 %v1735_v36, %v4086_v38  ;;  %v1737_v19 = vpop.f32.mrb[90].mxu0 }
 0x2db   :  { %v2205_v43 = vsel %vm2204_vm5, %v2190_v22, %v2188_v20  ;;  %v2007_v41 = vrot.slane %v2006_v23, 4  ;;  %v1856_v45 = vmax.f32 %v1734_v28, 0.0  ;;  %v1738_v42 = vadd.f32 %v1737_v19, %v4083_v35  ;;  %v1739_v48 = vpop.f32.mrb[91].mxu0 }
 0x2dc   :  { %v2218_v44 = vsel %vm2204_vm5, %v2191_v39, %v2189_v37  ;;  %v2016_v9 = vrot.slane %v2015_v40, 4  ;;  %v1857_v56 = vmax.f32 %v1736_v29, 0.0  ;;  %v1740_v26 = vadd.f32 %v1739_v48, %v4086_v38 }
 0x2dd   :  { %v2008_v52 = vadd.f32 %v2007_v41, %v2006_v23  ;;  %v1858_v53 = vmax.f32 %v1738_v42, 0.0  ;;  %v1928_v58 = vmul.f32 %v4103_v49, %v1856_v45 }
 0x2de   :  { %v2017_v54 = vadd.f32 %v2016_v9, %v2015_v40  ;;  %v1859_v27 = vmax.f32 %v1740_v26, 0.0  ;;  %v1929_v60 = vmul.f32 %v4117_v21, %v1857_v56 }
 0x2df   :  { %v2009_v57 = vrot.slane %v2008_v52, 2  ;;  %v1930_v59 = vmul.f32 %v4108_v50, %v1858_v53 }
 0x2e0   :  { %v2018_v30 = vrot.slane %v2017_v54, 2  ;;  %v1931_v61 = vmul.f32 %v4122_v51, %v1859_v27  ;;  %v1743_v31 = vpop.f32.mrb[92].mxu0 }
 0x2e1   :  { %v2010_v63 = vadd.f32 %v2009_v57, %v2008_v52  ;;  %v2022_v0 = vadd.f32 %v1930_v59, %v1928_v58  ;;  %v1744_v2 = vadd.f32 %v1743_v31, %v4083_v35  ;;  %v1745_v3 = vpop.f32.mrb[93].mxu0 }
 0x2e2   :  { %v2019_v4 = vadd.f32 %v2018_v30, %v2017_v54  ;;  %v2031_v6 = vadd.f32 %v1931_v61, %v1929_v60  ;;  %v1746_v18 = vadd.f32 %v1745_v3, %v4086_v38  ;;  %v1747_v32 = vpop.f32.mrb[94].mxu0 }
 0x2e3   :  { %v2011_v8 = vrot.slane %v2010_v63, 1  ;;  %v1860_v10 = vmax.f32 %v1744_v2, 0.0  ;;  %v1748_v34 = vadd.f32 %v1747_v32, %v4083_v35  ;;  %v1749_v11 = vpop.f32.mrb[95].mxu0 }
 0x2e4   :  { %v2020_v46 = vrot.slane %v2019_v4, 1  ;;  %v1861_v12 = vmax.f32 %v1746_v18, 0.0  ;;  %v1750_v13 = vadd.f32 %v1749_v11, %v4086_v38 }
 0x2e5   :  { %v2012_v14 = vadd.f32 %v2011_v8, %v2010_v63  ;;  %v1932_v47 = vmul.f32 %v4132_v62, %v1860_v10  ;;  %v1862_v15 = vmax.f32 %v1748_v34, 0.0 }
 0x2e6   :  { %v2021_v16 = vadd.f32 %v2020_v46, %v2019_v4  ;;  %v1933_v17 = vmul.f32 %v4138_v1, %v1861_v12  ;;  %v1863_v55 = vmax.f32 %v1750_v13, 0.0 }
 0x2e7   :  { %v2116_v33 = vpack.c.bf16 %v2012_v14, %v2012_v14  ;;  %v2023_v20 = vadd.f32 %v2022_v0, %v1932_v47  ;;  %v1934_v22 = vmul.f32 %v4144_v5, %v1862_v15 }
 0x2e8   :  { %v2117_v23 = vpack.c.bf16 %v2021_v16, %v2021_v16  ;;  %v2032_v28 = vadd.f32 %v2031_v6, %v1933_v17  ;;  %v1935_v36 = vmul.f32 %v4151_v7, %v1863_v55  ;;  %v1753_v37 = vpop.f32.mrb[96].mxu0 }
 0x2e9   :  { %v2192_v39 = vunpack.c.l.b16 %v2116_v33  ;;  %v2024_v40 = vadd.f32 %v2023_v20, %v1934_v22  ;;  %v1754_v29 = vadd.f32 %v1753_v37, %v4083_v35  ;;  %v1755_v19 = vpop.f32.mrb[97].mxu0 }
 0x2ea   :  { %v2193_v41 = vunpack.c.l.b16 %v2117_v23  ;;  %v2033_v45 = vadd.f32 %v2032_v28, %v1935_v36  ;;  %v1756_v42 = vadd.f32 %v1755_v19, %v4086_v38  ;;  %v1757_v48 = vpop.f32.mrb[98].mxu0 }
 0x2eb   :  { %v2207_v9 = vsel %vm2206_vm6, %v2192_v39, %v2205_v43  ;;  %v2025_v56 = vrot.slane %v2024_v40, 4  ;;  %v1864_v26 = vmax.f32 %v1754_v29, 0.0  ;;  %v1758_v52 = vadd.f32 %v1757_v48, %v4083_v35  ;;  %v1759_v53 = vpop.f32.mrb[99].mxu0 }
 0x2ec   :  { %v2034_v54 = vrot.slane %v2033_v45, 4  ;;  %v1865_v27 = vmax.f32 %v1756_v42, 0.0  ;;  %v1760_v57 = vadd.f32 %v1759_v53, %v4086_v38  ;;  %v2219_v58 = vsel %vm2206_vm6, %v2193_v41, %v2218_v44 }
 0x2ed   :  { %v2026_v59 = vadd.f32 %v2025_v56, %v2024_v40  ;;  %v1866_v30 = vmax.f32 %v1758_v52, 0.0  ;;  %v1936_v63 = vmul.f32 %v4103_v49, %v1864_v26 }
 0x2ee   :  { %v2035_v60 = vadd.f32 %v2034_v54, %v2033_v45  ;;  %v1867_v61 = vmax.f32 %v1760_v57, 0.0  ;;  %v1937_v2 = vmul.f32 %v4117_v21, %v1865_v27 }
 0x2ef   :  { %v2027_v31 = vrot.slane %v2026_v59, 2  ;;  %v1938_v43 = vmul.f32 %v4108_v50, %v1866_v30 }
 0x2f0   :  { %v2036_v0 = vrot.slane %v2035_v60, 2  ;;  %v1939_v3 = vmul.f32 %v4122_v51, %v1867_v61  ;;  %v1763_v4 = vpop.f32.mrb[100].mxu0 }
 0x2f1   :  { %v2028_v6 = vadd.f32 %v2027_v31, %v2026_v59  ;;  %v2040_v18 = vadd.f32 %v1938_v43, %v1936_v63  ;;  %v1764_v32 = vadd.f32 %v1763_v4, %v4083_v35  ;;  %v1765_v44 = vpop.f32.mrb[101].mxu0 }
 0x2f2   :  { %v2037_v8 = vadd.f32 %v2036_v0, %v2035_v60  ;;  %v2049_v10 = vadd.f32 %v1939_v3, %v1937_v2  ;;  %v1766_v34 = vadd.f32 %v1765_v44, %v4086_v38  ;;  %v1767_v11 = vpop.f32.mrb[102].mxu0 }
 0x2f3   :  { %v2029_v46 = vrot.slane %v2028_v6, 1  ;;  %v1868_v12 = vmax.f32 %v1764_v32, 0.0  ;;  %v1768_v13 = vadd.f32 %v1767_v11, %v4083_v35  ;;  %v1769_v14 = vpop.f32.mrb[103].mxu0 }
 0x2f4   :  { %v2038_v47 = vrot.slane %v2037_v8, 1  ;;  %v1869_v15 = vmax.f32 %v1766_v34, 0.0  ;;  %v1770_v16 = vadd.f32 %v1769_v14, %v4086_v38 }
 0x2f5   :  { %v2030_v17 = vadd.f32 %v2029_v46, %v2028_v6  ;;  %v1940_v55 = vmul.f32 %v4132_v62, %v1868_v12  ;;  %v1870_v33 = vmax.f32 %v1768_v13, 0.0 }
 0x2f6   :  { %v2039_v20 = vadd.f32 %v2038_v47, %v2037_v8  ;;  %v1941_v22 = vmul.f32 %v4138_v1, %v1869_v15  ;;  %v1871_v23 = vmax.f32 %v1770_v16, 0.0 }
 0x2f7   :  { %v2118_v28 = vpack.c.bf16 %v2030_v17, %v2030_v17  ;;  %v2041_v36 = vadd.f32 %v2040_v18, %v1940_v55  ;;  %v1942_v37 = vmul.f32 %v4144_v5, %v1870_v33 }
 0x2f8   :  { %v2119_v39 = vpack.c.bf16 %v2039_v20, %v2039_v20  ;;  %v2050_v40 = vadd.f32 %v2049_v10, %v1941_v22  ;;  %v1943_v29 = vmul.f32 %v4151_v7, %v1871_v23  ;;  %v1773_v19 = vpop.f32.mrb[104].mxu0 }
 0x2f9   :  { %v2194_v41 = vunpack.c.l.b16 %v2118_v28  ;;  %v2042_v45 = vadd.f32 %v2041_v36, %v1942_v37  ;;  %v1774_v42 = vadd.f32 %v1773_v19, %v4083_v35  ;;  %v1775_v48 = vpop.f32.mrb[105].mxu0 }
 0x2fa   :  { %v2195_v56 = vunpack.c.l.b16 %v2119_v39  ;;  %v2051_v26 = vadd.f32 %v2050_v40, %v1943_v29  ;;  %v1776_v52 = vadd.f32 %v1775_v48, %v4086_v38  ;;  %v1777_v53 = vpop.f32.mrb[106].mxu0 }
 0x2fb   :  { %v2043_v54 = vrot.slane %v2042_v45, 4  ;;  %v1872_v27 = vmax.f32 %v1774_v42, 0.0  ;;  %v1778_v57 = vadd.f32 %v1777_v53, %v4083_v35  ;;  %v1779_v59 = vpop.f32.mrb[107].mxu0  ;;  %v2209_v30 = vsel %vm2208_vm7, %v2194_v41, %v2207_v9 }
 0x2fc   :  { %v2052_v60 = vrot.slane %v2051_v26, 4  ;;  %v1873_v61 = vmax.f32 %v1776_v52, 0.0  ;;  %v1780_v31 = vadd.f32 %v1779_v59, %v4086_v38  ;;  %v2220_v63 = vsel %vm2208_vm7, %v2195_v56, %v2219_v58 }
 0x2fd   :  { %v2044_v43 = vadd.f32 %v2043_v54, %v2042_v45  ;;  %v1874_v0 = vmax.f32 %v1778_v57, 0.0  ;;  %v1944_v6 = vmul.f32 %v4103_v49, %v1872_v27 }
 0x2fe   :  { %v2053_v2 = vadd.f32 %v2052_v60, %v2051_v26  ;;  %v1875_v3 = vmax.f32 %v1780_v31, 0.0  ;;  %v1945_v44 = vmul.f32 %v4117_v21, %v1873_v61 }
 0x2ff   :  { %v2045_v4 = vrot.slane %v2044_v43, 2  ;;  %v1946_v18 = vmul.f32 %v4108_v50, %v1874_v0 }
 0x300   :  { %v2054_v32 = vrot.slane %v2053_v2, 2  ;;  %v1947_v9 = vmul.f32 %v4122_v51, %v1875_v3  ;;  %v1783_v8 = vpop.f32.mrb[108].mxu0 }
 0x301   :  { %v2046_v10 = vadd.f32 %v2045_v4, %v2044_v43  ;;  %v2058_v34 = vadd.f32 %v1946_v18, %v1944_v6  ;;  %v1784_v11 = vadd.f32 %v1783_v8, %v4083_v35  ;;  %v1785_v58 = vpop.f32.mrb[109].mxu0 }
 0x302   :  { %v2055_v46 = vadd.f32 %v2054_v32, %v2053_v2  ;;  %v2067_v12 = vadd.f32 %v1947_v9, %v1945_v44  ;;  %v1786_v13 = vadd.f32 %v1785_v58, %v4086_v38  ;;  %v1787_v14 = vpop.f32.mrb[110].mxu0 }
 0x303   :  { %v2047_v47 = vrot.slane %v2046_v10, 1  ;;  %v1876_v15 = vmax.f32 %v1784_v11, 0.0  ;;  %v1788_v16 = vadd.f32 %v1787_v14, %v4083_v35  ;;  %v1789_v17 = vpop.f32.mrb[111].mxu0 }
 0x304   :  { %v2056_v55 = vrot.slane %v2055_v46, 1  ;;  %v1877_v33 = vmax.f32 %v1786_v13, 0.0  ;;  %v1790_v20 = vadd.f32 %v1789_v17, %v4086_v38 }
 0x305   :  { %v2048_v22 = vadd.f32 %v2047_v47, %v2046_v10  ;;  %v1948_v23 = vmul.f32 %v4132_v62, %v1876_v15  ;;  %v1878_v28 = vmax.f32 %v1788_v16, 0.0 }
 0x306   :  { %v2057_v36 = vadd.f32 %v2056_v55, %v2055_v46  ;;  %v1949_v37 = vmul.f32 %v4138_v1, %v1877_v33  ;;  %v1879_v39 = vmax.f32 %v1790_v20, 0.0 }
 0x307   :  { %v2120_v40 = vpack.c.bf16 %v2048_v22, %v2048_v22  ;;  %v2059_v29 = vadd.f32 %v2058_v34, %v1948_v23  ;;  %v1950_v19 = vmul.f32 %v4144_v5, %v1878_v28 }
 0x308   :  { %v2121_v41 = vpack.c.bf16 %v2057_v36, %v2057_v36  ;;  %v2068_v45 = vadd.f32 %v2067_v12, %v1949_v37  ;;  %v1951_v42 = vmul.f32 %v4151_v7, %v1879_v39  ;;  %v1793_v48 = vpop.f32.mrb[112].mxu0 }
 0x309   :  { %v2196_v56 = vunpack.c.l.b16 %v2120_v40  ;;  %v2060_v26 = vadd.f32 %v2059_v29, %v1950_v19  ;;  %v1794_v52 = vadd.f32 %v1793_v48, %v4083_v35  ;;  %v1795_v53 = vpop.f32.mrb[113].mxu0 }
 0x30a   :  { %v2197_v54 = vunpack.c.l.b16 %v2121_v41  ;;  %v2069_v27 = vadd.f32 %v2068_v45, %v1951_v42  ;;  %v1796_v57 = vadd.f32 %v1795_v53, %v4086_v38  ;;  %v1797_v59 = vpop.f32.mrb[114].mxu0 }
 0x30b   :  { %v2061_v60 = vrot.slane %v2060_v26, 4  ;;  %v1880_v61 = vmax.f32 %v1794_v52, 0.0  ;;  %v1798_v31 = vadd.f32 %v1797_v59, %v4083_v35  ;;  %v1799_v43 = vpop.f32.mrb[115].mxu0  ;;  %v2211_v0 = vsel %vm2210_vm8, %v2196_v56, %v2209_v30 }
 0x30c   :  { %v2070_v2 = vrot.slane %v2069_v27, 4  ;;  %v1881_v3 = vmax.f32 %v1796_v57, 0.0  ;;  %v1800_v4 = vadd.f32 %v1799_v43, %v4086_v38  ;;  %v2221_v6 = vsel %vm2210_vm8, %v2197_v54, %v2220_v63 }
 0x30d   :  { %v2062_v18 = vadd.f32 %v2061_v60, %v2060_v26  ;;  %v1882_v32 = vmax.f32 %v1798_v31, 0.0  ;;  %v1952_v10 = vmul.f32 %v4103_v49, %v1880_v61 }
 0x30e   :  { %v2071_v44 = vadd.f32 %v2070_v2, %v2069_v27  ;;  %v1883_v9 = vmax.f32 %v1800_v4, 0.0  ;;  %v1953_v58 = vmul.f32 %v4117_v21, %v1881_v3 }
 0x30f   :  { %v2063_v8 = vrot.slane %v2062_v18, 2  ;;  %v1954_v34 = vmul.f32 %v4108_v50, %v1882_v32 }
 0x310   :  { %v2072_v11 = vrot.slane %v2071_v44, 2  ;;  %v1955_v30 = vmul.f32 %v4122_v51, %v1883_v9  ;;  %v1803_v46 = vpop.f32.mrb[116].mxu0 }
 0x311   :  { %v2064_v12 = vadd.f32 %v2063_v8, %v2062_v18  ;;  %v2076_v13 = vadd.f32 %v1954_v34, %v1952_v10  ;;  %v1804_v14 = vadd.f32 %v1803_v46, %v4083_v35  ;;  %v1805_v63 = vpop.f32.mrb[117].mxu0 }
 0x312   :  { %v2073_v47 = vadd.f32 %v2072_v11, %v2071_v44  ;;  %v2085_v15 = vadd.f32 %v1955_v30, %v1953_v58  ;;  %v1806_v16 = vadd.f32 %v1805_v63, %v4086_v38  ;;  %v1807_v17 = vpop.f32.mrb[118].mxu0 }
 0x313   :  { %v2065_v55 = vrot.slane %v2064_v12, 1  ;;  %v1884_v33 = vmax.f32 %v1804_v14, 0.0  ;;  %v1808_v20 = vadd.f32 %v1807_v17, %v4083_v35  ;;  %v1809_v22 = vpop.f32.mrb[119].mxu0 }
 0x314   :  { %v2074_v23 = vrot.slane %v2073_v47, 1  ;;  %v1885_v28 = vmax.f32 %v1806_v16, 0.0  ;;  %v1810_v36 = vadd.f32 %v1809_v22, %v4086_v38 }
 0x315   :  { %v2066_v37 = vadd.f32 %v2065_v55, %v2064_v12  ;;  %v1956_v39 = vmul.f32 %v4132_v62, %v1884_v33  ;;  %v1886_v40 = vmax.f32 %v1808_v20, 0.0 }
 0x316   :  { %v2075_v29 = vadd.f32 %v2074_v23, %v2073_v47  ;;  %v1957_v19 = vmul.f32 %v4138_v1, %v1885_v28  ;;  %v1887_v41 = vmax.f32 %v1810_v36, 0.0 }
 0x317   :  { %v2122_v45 = vpack.c.bf16 %v2066_v37, %v2066_v37  ;;  %v2077_v42 = vadd.f32 %v2076_v13, %v1956_v39  ;;  %v1958_v48 = vmul.f32 %v4144_v5, %v1886_v40 }
 0x318   :  { %v2123_v56 = vpack.c.bf16 %v2075_v29, %v2075_v29  ;;  %v2086_v26 = vadd.f32 %v2085_v15, %v1957_v19  ;;  %v1959_v52 = vmul.f32 %v4151_v7, %v1887_v41  ;;  %v1813_v53 = vpop.f32.mrb[120].mxu0 }
 0x319   :  { %v2198_v54 = vunpack.c.l.b16 %v2122_v45  ;;  %v2078_v27 = vadd.f32 %v2077_v42, %v1958_v48  ;;  %v1814_v57 = vadd.f32 %v1813_v53, %v4083_v35  ;;  %v1815_v59 = vpop.f32.mrb[121].mxu0 }
 0x31a   :  { %v2199_v60 = vunpack.c.l.b16 %v2123_v56  ;;  %v2087_v61 = vadd.f32 %v2086_v26, %v1959_v52  ;;  %v1816_v31 = vadd.f32 %v1815_v59, %v4086_v38  ;;  %v1817_v43 = vpop.f32.mrb[122].mxu0 }
 0x31b   :  { %v2079_v2 = vrot.slane %v2078_v27, 4  ;;  %v1888_v3 = vmax.f32 %v1814_v57, 0.0  ;;  %v1818_v4 = vadd.f32 %v1817_v43, %v4083_v35  ;;  %v1819_v18 = vpop.f32.mrb[123].mxu0  ;;  %v2213_v32 = vsel %vm2212_vm9, %v2198_v54, %v2211_v0 }
 0x31c   :  { %v2088_v44 = vrot.slane %v2087_v61, 4  ;;  %v1889_v9 = vmax.f32 %v1816_v31, 0.0  ;;  %v1820_v8 = vadd.f32 %v1819_v18, %v4086_v38  ;;  %v2222_v10 = vsel %vm2212_vm9, %v2199_v60, %v2221_v6 }
 0x31d   :  { %v2080_v34 = vadd.f32 %v2079_v2, %v2078_v27  ;;  %v1890_v11 = vmax.f32 %v1818_v4, 0.0  ;;  %v1960_v12 = vmul.f32 %v4103_v49, %v1888_v3 }
 0x31e   :  { %v2089_v58 = vadd.f32 %v2088_v44, %v2087_v61  ;;  %v1891_v30 = vmax.f32 %v1820_v8, 0.0  ;;  %v1961_v63 = vmul.f32 %v4117_v21, %v1889_v9 }
 0x31f   :  { %v2081_v46 = vrot.slane %v2080_v34, 2  ;;  %v1962_v13 = vmul.f32 %v4108_v50, %v1890_v11 }
 0x320   :  { %v2090_v14 = vrot.slane %v2089_v58, 2  ;;  %v1963_v0 = vmul.f32 %v4122_v51, %v1891_v30  ;;  %v1823_v47 = vpop.f32.mrb[124].mxu0  ;;  %v3257_v30 = vld [vmem:[%s4468_s13 + $0x14] ss:$8 sps:$4 sm:$0xff]  }
 0x321   :  { %v2082_v15 = vadd.f32 %v2081_v46, %v2080_v34  ;;  %v2094_v16 = vadd.f32 %v1962_v13, %v1960_v12  ;;  %v1824_v17 = vadd.f32 %v1823_v47, %v4083_v35  ;;  %v1825_v6 = vpop.f32.mrb[125].mxu0  ;;  %v3255_v46 = vld [vmem:[%s4468_s13 + $0x10] ss:$8 sps:$4 sm:$0xff]   ;;  %v3260_v12 = vld [vmem:[%s4468_s13 + $0x24] ss:$8 sps:$4 sm:$0xff]  }
 0x322   :  { %v2091_v55 = vadd.f32 %v2090_v14, %v2089_v58  ;;  %v2103_v33 = vadd.f32 %v1963_v0, %v1961_v63  ;;  %v1826_v20 = vadd.f32 %v1825_v6, %v4086_v38  ;;  %v1827_v22 = vpop.f32.mrb[126].mxu0  ;;  %v3258_v13 = vld [vmem:[%s4468_s13 + $0x20] ss:$8 sps:$4 sm:$0xff]   ;;  %v3263_v14 = vld [vmem:[%s4468_s13 + $0x34] ss:$8 sps:$4 sm:$0xff]  }
 0x323   :  { %v2083_v23 = vrot.slane %v2082_v15, 1  ;;  %v1892_v49 = vmax.f32 %v1824_v17, 0.0  ;;  %v1828_v50 = vadd.f32 %v1827_v22, %v4083_v35  ;;  %v1829_v28 = vpop.f32.mrb[127].mxu0  ;;  %v3261_v63 = vld [vmem:[%s4468_s13 + $0x30] ss:$8 sps:$4 sm:$0xff]  }
 0x324   :  { %v2092_v36 = vrot.slane %v2091_v55, 1  ;;  %v1893_v21 = vmax.f32 %v1826_v20, 0.0  ;;  %v1830_v51 = vadd.f32 %v1829_v28, %v4086_v38  ;;  %v3266_v0 = vld [vmem:[%s4468_s13 + $0x44] ss:$8 sps:$4 sm:$0xff]   ;;  %v3264_v47 = vld [vmem:[%s4468_s13 + $0x40] ss:$8 sps:$4 sm:$0xff]  }
 0x325   :  { %v2084_v37 = vadd.f32 %v2083_v23, %v2082_v15  ;;  %v1964_v39 = vmul.f32 %v4132_v62, %v1892_v49  ;;  %v1894_v40 = vmax.f32 %v1828_v50, 0.0  ;;  %v3269_v15 = vld [vmem:[%s4468_s13 + $0x54] ss:$8 sps:$4 sm:$0xff]   ;;  %v3272_v17 = vld [vmem:[%s4468_s13 + $0x64] ss:$8 sps:$4 sm:$0xff]  }
 0x326   :  { %v2093_v29 = vadd.f32 %v2092_v36, %v2091_v55  ;;  %v1965_v19 = vmul.f32 %v4138_v1, %v1893_v21  ;;  %v1895_v41 = vmax.f32 %v1830_v51, 0.0  ;;  %v3270_v6 = vld [vmem:[%s4468_s13 + $0x60] ss:$8 sps:$4 sm:$0xff]   ;;  %v3275_v55 = vld [vmem:[%s4468_s13 + $0x74] ss:$8 sps:$4 sm:$0xff]  }
 0x327   :  { %v2124_v45 = vpack.c.bf16 %v2084_v37, %v2084_v37  ;;  %v2095_v42 = vadd.f32 %v2094_v16, %v1964_v39  ;;  %v1966_v48 = vmul.f32 %v4144_v5, %v1894_v40  ;;  %v3267_v16 = vld [vmem:[%s4468_s13 + $0x50] ss:$8 sps:$4 sm:$0xff]   ;;  %v3278_v20 = vld [vmem:[%s4468_s13 + $0x84] ss:$8 sps:$4 sm:$0xff]   ;;  %v3276_v22 = vld [vmem:[%s4468_s13 + $0x80] ss:$8 sps:$4 sm:$0xff]  }
 0x328   :  { %v2104_v56 = vadd.f32 %v2103_v33, %v1965_v19  ;;  %v1967_v35 = vmul.f32 %v4151_v7, %v1895_v41  ;;  %v2125_v26 = vpack.c.bf16 %v2093_v29, %v2093_v29  ;;  %v3273_v33 = vld [vmem:[%s4468_s13 + $0x70] ss:$8 sps:$4 sm:$0xff]   ;;  %v3281_v23 = vld [vmem:[%s4468_s13 + $0x94] ss:$8 sps:$4 sm:$0xff]   ;;  %v3284_v50 = vld [vmem:[%s4468_s13 + $0xa4] ss:$8 sps:$4 sm:$0xff]  }
 0x329   :  { %v2200_v52 = vunpack.c.l.b16 %v2124_v45  ;;  %v2096_v53 = vadd.f32 %v2095_v42, %v1966_v48  ;;  %v3279_v49 = vld [vmem:[%s4468_s13 + $0x90] ss:$8 sps:$4 sm:$0xff]   ;;  %v3282_v28 = vld [vmem:[%s4468_s13 + $0xa0] ss:$8 sps:$4 sm:$0xff]   ;;  %v3287_v36 = vld [vmem:[%s4468_s13 + $0xb4] ss:$8 sps:$4 sm:$0xff]  }
 0x32a   :  { %v2105_v38 = vadd.f32 %v2104_v56, %v1967_v35  ;;  %v2201_v54 = vunpack.c.l.b16 %v2125_v26  ;;  %v3285_v21 = vld [vmem:[%s4468_s13 + $0xb0] ss:$8 sps:$4 sm:$0xff]   ;;  %v3290_v51 = vld [vmem:[%s4468_s13 + $0xc4] ss:$8 sps:$4 sm:$0xff]   ;;  %v3288_v37 = vld [vmem:[%s4468_s13 + $0xc0] ss:$8 sps:$4 sm:$0xff]  }
 0x32b   :  { %v2097_v27 = vrot.slane %v2096_v53, 4  ;;  %v2215_v62 = vsel %vm2214_vm10, %v2200_v52, %v2213_v32  ;;  %v3293_v39 = vld [vmem:[%s4468_s13 + $0xd4] ss:$8 sps:$4 sm:$0xff]   ;;  %v3291_v40 = vld [vmem:[%s4468_s13 + $0xd0] ss:$8 sps:$4 sm:$0xff]   ;;  %v3300_v42 = vld [vmem:[%s4469_s15 + $0x40] sm:$0xff]  }
 0x32c   :  { %v2106_v57 = vrot.slane %v2105_v38, 4  ;;  %v2223_v59 = vsel %vm2214_vm10, %v2201_v54, %v2222_v10  ;;  %v3252_v10 = vld [vmem:[%s4468_s13] ss:$8 sps:$4 sm:$0xff]   ;;  %v3296_v19 = vld [vmem:[%s4468_s13 + $0xe4] ss:$8 sps:$4 sm:$0xff]   ;;  %3059 = vmatprep.subr.bf16.mxu0 %v3300_v42  ;;  %v3304_v26 = vld [vmem:[%s4469_s15 + $0x50] sm:$0xff]  }
 0x32d   :  { %v2098_v60 = vadd.f32 %v2097_v27, %v2096_v53  ;;  %v3294_v29 = vld [vmem:[%s4468_s13 + $0xe0] ss:$8 sps:$4 sm:$0xff]   ;;  %v3299_v41 = vld [vmem:[%s4468_s13 + $0xf4] ss:$8 sps:$4 sm:$0xff]   ;;  %v3297_v45 = vld [vmem:[%s4468_s13 + $0xf0] ss:$8 sps:$4 sm:$0xff]  }
 0x32e   :  { %v2107_v1 = vadd.f32 %v2106_v57, %v2105_v38  ;;  %v3301_v48 = vld [vmem:[%s4469_s15] sm:$0xff]   ;;  %v3302_v56 = vld [vmem:[%s4469_s15 + $0x48] sm:$0xff]   ;;  %v3305_v52 = vld [vmem:[%s4469_s15 + $0x10] sm:$0xff]  }
 0x32f   :  { %v2099_v61 = vrot.slane %v2098_v60, 2  ;;  %3060 = vmatpush3.bf16.msra.mxu0 %v3301_v48  ;;  %v3303_v35 = vld [vmem:[%s4469_s15 + $0x8] sm:$0xff]   ;;  %v3306_v53 = vld [vmem:[%s4469_s15 + $0x58] sm:$0xff]   ;;  %v3308_v54 = vld [vmem:[%s4469_s15 + $0x60] sm:$0xff]  }
 0x330   :  { %v2108_v31 = vrot.slane %v2107_v1, 2  ;;  %3061 = vmatprep.subr.bf16.mxu0 %v3302_v56  ;;  %v3307_v38 = vld [vmem:[%s4469_s15 + $0x18] sm:$0xff]   ;;  %v3309_v27 = vld [vmem:[%s4469_s15 + $0x20] sm:$0xff]   ;;  %v3311_v57 = vld [vmem:[%s4469_s15 + $0x28] sm:$0xff]  }
 0x331   :  { %v2100_v43 = vadd.f32 %v2099_v61, %v2098_v60  ;;  %v3313_v60 = vld [vmem:[%s4469_s15 + $0x30] sm:$0xff]   ;;  %v3315_v61 = vld [vmem:[%s4469_s15 + $0x38] sm:$0xff]  }
 0x332   :  { %v2109_v2 = vadd.f32 %v2108_v31, %v2107_v1  ;;  %v3314_v1 = vld [vmem:[%s4469_s15 + $0x78] sm:$0xff]   ;;  %v2160_v31 = vld [vmem:[%s4470_s12] sm:$0x3] }
 0x333   :  { %v2101_v5 = vrot.slane %v2100_v43, 1  ;;  %3062 = vmatpush3.bf16.msra.mxu0 %v3303_v35 }
 0x334   :  { %v2110_v3 = vrot.slane %v2109_v2, 1  ;;  %3063 = vmatprep.subr.bf16.mxu0 %v3304_v26 }
 0x335   :  { %v2102_v4 = vadd.f32 %v2101_v5, %v2100_v43  ;;  %v2165_v43 = vrot.slane %v2160_v31, %v3637_v24 }
 0x336   :  { %v2111_v7 = vadd.f32 %v2110_v3, %v2109_v2  ;;  %v2169_v2 = vrot.slane %v2160_v31, %v3639_v25 }
 0x337   :  { %v2126_v18 = vpack.c.bf16 %v2102_v4, %v2102_v4  ;;  %3064 = vmatpush3.bf16.msra.mxu0 %v3305_v52 }
 0x338   :  { %v2127_v44 = vpack.c.bf16 %v2111_v7, %v2111_v7  ;;  %3065 = vmatprep.subr.bf16.mxu0 %v3306_v53 }
 0x339   :  { %v2202_v9 = vunpack.c.l.b16 %v2126_v18 }
 0x33a   :  { %v2203_v8 = vunpack.c.l.b16 %v2127_v44 }
 0x33b   :  { %v2217_v34 = vsel %vm2216_vm11, %v2202_v9, %v2215_v62  ;;  %3066 = vmatpush3.bf16.msra.mxu0 %v3307_v38  ;;  %v3310_v62 = vld [vmem:[%s4469_s15 + $0x68] sm:$0xff]  }
 0x33c   :  { %v2224_v11 = vsel %vm2216_vm11, %v2203_v8, %v2223_v59  ;;  %v2225_v58 = vpack.c.b16 %v2217_v34, %v2217_v34  ;;  %3067 = vmatprep.subr.bf16.mxu0 %v3308_v54  ;;  %v3312_v59 = vld [vmem:[%s4469_s15 + $0x70] sm:$0xff]  }
 0x33d   :  { %v2226_v32 = vpack.c.b16 %v2224_v11, %v2224_v11 }
 0x33f   :  { %2421 = vmatprep.mubr.bf16.mxu1 %v2226_v32  ;;  %3068 = vmatpush3.bf16.msra.mxu0 %v3309_v27  ;;  %v2466_v32 = vld [vmem:[%s4471_s14] sm:$0x3] }
 0x340   :  { %2422 = vmatmul.mubr.bf16.vlgmr.msra.gmra.mrb[68].mxu1 %v2225_v58  ;;  %3069 = vmatprep.subr.bf16.mxu0 %v3310_v62  ;;  %v2475_v58 = vrot.slane %v2466_v32, %v3639_v25 }
 0x341   :  { %2639 = vmatpush1.bf16.msra.mxu1 %v3252_v10  ;;  %v2471_v10 = vrot.slane %v2466_v32, %v3637_v24 }
 0x342   :  { %2640 = vmatprep.subr.bf16.mxu1 %v3257_v30 }
 0x343   :  { %3070 = vmatpush3.bf16.msra.mxu0 %v3311_v57 }
 0x344   :  { %3071 = vmatprep.subr.bf16.mxu0 %v3312_v59 }
 0x345   :  { %2641 = vmatpush1.bf16.msra.mxu1 %v3255_v46 }
 0x346   :  { %2642 = vmatprep.subr.bf16.mxu1 %v3260_v12 }
 0x347   :  { %3072 = vmatpush3.bf16.msra.mxu0 %v3313_v60 }
 0x348   :  { %3073 = vmatprep.subr.bf16.mxu0 %v3314_v1 }
 0x349   :  { %2643 = vmatpush1.bf16.msra.mxu1 %v3258_v13 }
 0x34a   :  { %2644 = vmatprep.subr.bf16.mxu1 %v3263_v14 }
 0x34b   :  { %3074 = vmatpush3.bf16.msra.mxu0 %v3315_v61 }
 0x34d   :  { %2645 = vmatpush1.bf16.msra.mxu1 %v3261_v63 }
 0x34e   :  { %2646 = vmatprep.subr.bf16.mxu1 %v3266_v0 }
 0x351   :  { %2647 = vmatpush1.bf16.msra.mxu1 %v3264_v47 }
 0x352   :  { %2648 = vmatprep.subr.bf16.mxu1 %v3269_v15 }
 0x355   :  { %2649 = vmatpush1.bf16.msra.mxu1 %v3267_v16 }
 0x356   :  { %2650 = vmatprep.subr.bf16.mxu1 %v3272_v17 }
 0x359   :  { %2651 = vmatpush1.bf16.msra.mxu1 %v3270_v6  ;;  %v3042_v6 = vld [vmem:[%s4472_s16] ss:$0 sm:$0xff] }
 0x35a   :  { %2652 = vmatprep.subr.bf16.mxu1 %v3275_v55 }
 0x35d   :  { %2653 = vmatpush1.bf16.msra.mxu1 %v3273_v33 }
 0x35e   :  { %2654 = vmatprep.subr.bf16.mxu1 %v3278_v20 }
 0x361   :  { %2655 = vmatpush1.bf16.msra.mxu1 %v3276_v22 }
 0x362   :  { %2656 = vmatprep.subr.bf16.mxu1 %v3281_v23 }
 0x365   :  { %2657 = vmatpush1.bf16.msra.mxu1 %v3279_v49 }
 0x366   :  { %2658 = vmatprep.subr.bf16.mxu1 %v3284_v50 }
 0x369   :  { %2659 = vmatpush1.bf16.msra.mxu1 %v3282_v28 }
 0x36a   :  { %2660 = vmatprep.subr.bf16.mxu1 %v3287_v36 }
 0x36d   :  { %2661 = vmatpush1.bf16.msra.mxu1 %v3285_v21 }
 0x36e   :  { %2662 = vmatprep.subr.bf16.mxu1 %v3290_v51 }
 0x371   :  { %2663 = vmatpush1.bf16.msra.mxu1 %v3288_v37 }
 0x372   :  { %2664 = vmatprep.subr.bf16.mxu1 %v3293_v39 }
 0x375   :  { %2665 = vmatpush1.bf16.msra.mxu1 %v3291_v40 }
 0x376   :  { %2666 = vmatprep.subr.bf16.mxu1 %v3296_v19 }
 0x379   :  { %2667 = vmatpush1.bf16.msra.mxu1 %v3294_v29 }
 0x37a   :  { %2668 = vmatprep.subr.bf16.mxu1 %v3299_v41 }
 0x37d   :  { %2669 = vmatpush1.bf16.msra.mxu1 %v3297_v45 }
 0x413   :  { %v2423_v5 = vpop.f32.mrb[68].mxu1 }
 0x414   :  { %v2424_v3 = vadd.f32 %v2423_v5, %v2165_v43  ;;  %v2425_v4 = vpop.f32.mrb[69].mxu1 }
 0x415   :  { %v2426_v7 = vadd.f32 %v2425_v4, %v2169_v2  ;;  %v2427_v18 = vpop.f32.mrb[70].mxu1 }
 0x416   :  { %v2430_v44 = vmax.f32 %v2424_v3, 0.0  ;;  %v2428_v9 = vpop.f32.mrb[71].mxu1 }
 0x417   :  { %v2431_v8 = vmax.f32 %v2426_v7, 0.0 }
 0x418   :  { %v2432_v11 = vpack.c.bf16 %v2430_v44, %v2430_v44 }
 0x419   :  { %v2433_v34 = vpack.c.bf16 %v2431_v8, %v2431_v8 }
 0x41b   :  { %2670 = vmatprep.mubr.bf16.mxu1 %v2433_v34 }
 0x41c   :  { %2671 = vmatmul.mubr.bf16.vlgmr.msra.gmra.mrb[72].mxu1 %v2432_v11 }
 0x4ef   :  { %v2672_v30 = vpop.f32.mrb[72].mxu1 }
 0x4f0   :  { %v2673_v46 = vadd.f32 %v2672_v30, %v2471_v10  ;;  %v2674_v12 = vpop.f32.mrb[73].mxu1 }
 0x4f1   :  { %v2675_v13 = vadd.f32 %v2674_v12, %v2475_v58  ;;  %v2676_v14 = vpop.f32.mrb[74].mxu1 }
 0x4f2   :  { %v2679_v63 = vmax.f32 %v2673_v46, 0.0  ;;  %v2677_v0 = vpop.f32.mrb[75].mxu1 }
 0x4f3   :  { %v2680_v47 = vmax.f32 %v2675_v13, 0.0 }
 0x4f4   :  { %v2681_v16 = vpack.c.bf16 %v2679_v63, %v2679_v63 }
 0x4f5   :  { %v2682_v15 = vpack.c.bf16 %v2680_v47, %v2680_v47 }
 0x4f7   :  { %2850 = vmatprep.mubr.bf16.mxu0 %v2682_v15 }
 0x4f8   :  { %2851 = vmatmul.mubr.bf16.vlgmr.msra.gmra.mrb[128].mxu0 %v2681_v16 }
 0x5cb   :  { %v3075_v17 = vpop.f32.mrb[128].mxu0 }
 0x5cc   :  { %v3076_v24 = vpop.f32.mrb[129].mxu0 }
 0x5cd   :  { %v3077_v55 = vadd.f32 %v3076_v24, %v3075_v17  ;;  %v3078_v25 = vpop.f32.mrb[130].mxu0 }
 0x5ce   :  { %v3079_v33 = vpop.f32.mrb[131].mxu0 }
 0x5cf   :  { %v2853_v20 = vadd.f32 %v3077_v55, %v3042_v6 }
 0x5d1   :  { %2858 = vmax.xlane.f32.xlu0 %v2853_v20 }
 0x65e   :  { %v2859_v22 = vpop.xlane.xlu0 %2858 }
 0x65f   :  { %v2860_v23 = vsub.f32 %v2853_v20, %v2859_v22 }
 0x661   :  { %v2861_v49 = vmul.f32 1.442695, %v2860_v23 }
 0x663   :  { %3316 = vpow2.f32 %v2861_v49 }
 0x66d   :  { %v3317_v50 = vpop.eup %3316 }
 0x66e   :  { %2863 = vadd.xlane.f32.xlu0 %v3317_v50 }
 0x6fb   :  { %v2864_v28 = vpop.xlane.xlu0 %2863 }
 0x6fc   :  { %3318 = vlog2.f32 %v2864_v28 }
 0x706   :  { %v3319_v36 = vpop.eup %3318 }
 0x707   :  { %v2866_v21 = vmul.f32 0.6931472, %v3319_v36 }
 0x709   :  { %v2867_v51 = vadd.f32 %v2866_v21, %v2859_v22 }
 0x70b   :  { %v2868_v37 = vsub.f32 %v2853_v20, %v2867_v51 }
 0x70d   :  { %2869 = vst [vmem:[%s4473_s17] sm:$0xff] %v2868_v37 }

</bundles_post_ra>
